<compile_context>
chip_gen: v6e
topology: v6e:2x2x1
jax: 0.10.0
libtpu: 0.0.40
codegen_flags: <defaults>
</compile_context>

<pallas_src>
import functools

import jax
import jax.numpy as jnp
from jax.experimental import pallas as pl
from jax.experimental.pallas import tpu as pltpu


def _fused_regprox_kernel(*refs, H, W, channels):
    """Fused Conv3x3(+PReLU) stack for one image.

    refs layout:
      refs[0]               : x_ref      (1, H, W, C0)          VMEM
      refs[1 : 1+L]         : w_refs[i]  (9*Cin_i, Cout_i)      VMEM
      refs[1+L]             : alpha_ref  (max(L-1, 1),)         SMEM
      refs[2+L]             : o_ref      (1, H, W*C_last)       VMEM
      refs[3+L : 3+2L]      : pad_refs[i] (H+2, W+2, Cin_i)     VMEM scratch
    """
    n_layers = len(channels) - 1
    x_ref = refs[0]
    w_refs = refs[1:1 + n_layers]
    alpha_ref = refs[1 + n_layers]
    o_ref = refs[2 + n_layers]
    pad_refs = refs[3 + n_layers:]

    first_step = pl.program_id(0) == 0

    cur = x_ref[0]  # (H, W, C0) activation; stays on-chip for all layers.

    for li in range(n_layers):
        cin = channels[li]
        cout = channels[li + 1]
        pad = pad_refs[li]

        # Zero the halo scratch only once per kernel launch; the borders stay
        # zero across grid iterations, the interior is rewritten every step.
        @pl.when(first_step)
        def _(pad=pad):
            pad[...] = jnp.zeros_like(pad)

        pad[1:H + 1, 1:W + 1, :] = cur

        # im2col: the 9 (dy, dx)-shifted windows stacked along the channel
        # (lane) axis -> a single MXU matmul with K = 9*cin.
        patch = jnp.concatenate(
            [pad[dy:dy + H, dx:dx + W, :]
             for dy in range(3) for dx in range(3)],
            axis=-1)                                   # (H, W, 9*cin)
        patch = patch.reshape(H * W, 9 * cin)
        acc = jnp.dot(patch, w_refs[li][...],
                      preferred_element_type=jnp.float32)   # (H*W, cout)

        if li < n_layers - 1:
            a = alpha_ref[li]                          # scalar PReLU slope (SMEM)
            cur = jnp.where(acc >= 0, acc, a * acc).reshape(H, W, cout)
        else:
            # Final layer (no PReLU): flat (H, W*Cout) store.
            o_ref[0] = acc.reshape(H, W * cout).astype(o_ref.dtype)


def reg_proximal_forward(x_nchw, weights_oihw, alphas):
    """RegProximal.forward.

    x_nchw      : (N, C0, H, W)  f32, PyTorch layout.
    weights_oihw: list of (Cout_i, Cin_i, 3, 3) PyTorch Conv2d weights.
    alphas      : list of (1,) PReLU scalars, length = n_layers - 1.
    Returns (N, C_last, H, W).
    """
    n_layers = len(weights_oihw)
    channels = [weights_oihw[0].shape[1]] + [w.shape[0] for w in weights_oihw]
    N, C0, H, W = x_nchw.shape
    assert C0 == channels[0]
    Cout = channels[-1]

    # Layout conversion once at the boundary (a full LPD pipeline would keep
    # NHWC end-to-end and skip these).
    x_nhwc = jnp.transpose(x_nchw, (0, 2, 3, 1)).astype(jnp.float32)

    # PyTorch OIHW -> HWIO -> (9*Cin, Cout): (dy, dx, cin) flattened on the
    # contraction axis, matching the in-kernel im2col channel ordering.
    ws = []
    for w in weights_oihw:
        co, ci = w.shape[0], w.shape[1]
        w_hwio = jnp.transpose(w, (2, 3, 1, 0)).astype(jnp.float32)   # (3,3,ci,co)
        ws.append(w_hwio.reshape(9 * ci, co))

    if n_layers > 1:
        alphas_arr = jnp.concatenate(
            [jnp.asarray(a, jnp.float32).reshape(-1) for a in alphas])
    else:
        alphas_arr = jnp.zeros((1,), jnp.float32)                     # unused

    # Advisory cost estimate for the XLA scheduler.
    flops = 2 * N * H * W * sum(
        9 * channels[i] * channels[i + 1] for i in range(n_layers))
    bytes_accessed = 4 * (x_nhwc.size + sum(w.size for w in ws)
                          + alphas_arr.size + N * H * W * Cout)
    cost = pl.CostEstimate(flops=flops, transcendentals=0,
                           bytes_accessed=bytes_accessed)

    kernel = functools.partial(_fused_regprox_kernel,
                               H=H, W=W, channels=tuple(channels))

    out_flat = pl.pallas_call(
        kernel,
        out_shape=jax.ShapeDtypeStruct((N, H, W * Cout), jnp.float32),
        grid=(N,),
        in_specs=(
            [pl.BlockSpec((1, H, W, channels[0]), lambda n: (n, 0, 0, 0))]
            + [pl.BlockSpec(w.shape, lambda n: (0, 0)) for w in ws]
            + [pl.BlockSpec(memory_space=pltpu.MemorySpace.SMEM)]
        ),
        out_specs=pl.BlockSpec((1, H, W * Cout), lambda n: (n, 0, 0)),
        scratch_shapes=[pltpu.VMEM((H + 2, W + 2, channels[i]), jnp.float32)
                        for i in range(n_layers)],
        compiler_params=pltpu.CompilerParams(
            dimension_semantics=("parallel",)),
        cost_estimate=cost,
    )(x_nhwc, *ws, alphas_arr)

    out = out_flat.reshape(N, H, W, Cout)
    # NHWC -> NCHW (a free reshape when Cout == 1).
    return jnp.transpose(out, (0, 3, 1, 2))


def _reference_forward(x_nchw, weights_oihw, alphas):
    """Pure-JAX reference (lax conv) for correctness checking."""
    x = jnp.transpose(x_nchw, (0, 2, 3, 1)).astype(jnp.float32)
    n_layers = len(weights_oihw)
    for i in range(n_layers):
        w_hwio = jnp.transpose(weights_oihw[i], (2, 3, 1, 0)).astype(jnp.float32)
        x = jax.lax.conv_general_dilated(
            x, w_hwio, window_strides=(1, 1), padding="SAME",
            dimension_numbers=("NHWC", "HWIO", "NHWC"))
        if i < n_layers - 1:
            a = jnp.asarray(alphas[i], jnp.float32).reshape(-1)[0]
            x = jnp.where(x >= 0, x, a * x)
    return jnp.transpose(x, (0, 3, 1, 2))


if __name__ == "__main__":
    # Module config: layers=3, channels=[2, 32, 32, 1] (typical LPD RegProximal)
    layers = 3
    channels = [2, 32, 32, 1]
    N, H, W = 2, 16, 16

    key = jax.random.PRNGKey(0)
    kx, *kw = jax.random.split(key, 1 + layers)

    # Input in PyTorch NCHW convention.
    x = jax.random.normal(kx, (N, channels[0], H, W), dtype=jnp.float32)

    # Weights in PyTorch OIHW convention (Cout, Cin, 3, 3).
    weights = [
        0.1 * jax.random.normal(kw[i], (channels[i + 1], channels[i], 3, 3),
                                dtype=jnp.float32)
        for i in range(layers)
    ]
    # PReLU default init: single scalar alpha = 0.25, one per PReLU layer
    # (there are layers-1 of them; no PReLU after the final conv).
    alphas = [jnp.full((1,), 0.25, jnp.float32) for _ in range(layers - 1)]

    out = jax.block_until_ready(reg_proximal_forward(x, weights, alphas))
    ref = jax.block_until_ready(_reference_forward(x, weights, alphas))

    assert out.shape == (N, channels[-1], H, W), out.shape
    assert jnp.allclose(out, ref, atol=1e-4, rtol=1e-4), \
        float(jnp.max(jnp.abs(out - ref)))

    print("KERNEL_OK")
</pallas_src>

<mosaic_0001>
module attributes {stable_mosaic.version = 11 : i64} {
  func.func @_fused_regprox_kernel(%arg0: i32, %arg1: memref<1x16x16x2xf32, #tpu.memory_space<vmem>>, %arg2: memref<18x32xf32, #tpu.memory_space<vmem>>, %arg3: memref<288x32xf32, #tpu.memory_space<vmem>>, %arg4: memref<288x1xf32, #tpu.memory_space<vmem>>, %arg5: memref<2xf32, #tpu.memory_space<smem>>, %arg6: memref<1x16x16xf32, #tpu.memory_space<vmem>>, %arg7: memref<18x18x2xf32, #tpu.memory_space<vmem>>, %arg8: memref<18x18x32xf32, #tpu.memory_space<vmem>>, %arg9: memref<18x18x32xf32, #tpu.memory_space<vmem>>) attributes {dimension_semantics = [#tpu.dimension_semantics<parallel>], iteration_bounds = array<i64: 2>, scalar_prefetch = 0 : i64, scratch_operands = 3 : i64, tpu.core_type = #tpu.core_type<tc>, window_params = [{transform_indices = @transform_0, window_bounds = array<i64: 1, 16, 16, 2>}, {pipeline_mode = #tpu.pipeline_mode<synchronous>, transform_indices = @transform_1, window_bounds = array<i64: 18, 32>}, {pipeline_mode = #tpu.pipeline_mode<synchronous>, transform_indices = @transform_2, window_bounds = array<i64: 288, 32>}, {pipeline_mode = #tpu.pipeline_mode<synchronous>, transform_indices = @transform_3, window_bounds = array<i64: 288, 1>}, {transform_indices = @transform_4, window_bounds = array<i64: 2>}, {transform_indices = @transform_5, window_bounds = array<i64: 1, 16, 16>}]} {
    %c0_i32 = arith.constant 0 : i32
    %0 = arith.cmpi eq, %arg0, %c0_i32 : i32
    %c0 = arith.constant 0 : index
    %c0_0 = arith.constant 0 : index
    %c0_1 = arith.constant 0 : index
    %c0_2 = arith.constant 0 : index
    %1 = vector.load %arg1[%c0, %c0_0, %c0_1, %c0_2] : memref<1x16x16x2xf32, #tpu.memory_space<vmem>>, vector<1x16x16x2xf32>
    %2 = vector.shape_cast %1 : vector<1x16x16x2xf32> to vector<16x16x2xf32>
    %3 = arith.extui %0 : i1 to i32
    %c0_i32_3 = arith.constant 0 : i32
    %4 = arith.cmpi ne, %3, %c0_i32_3 : i32
    scf.if %4 {
      %cst_109 = arith.constant 0.000000e+00 : f32
      %69 = vector.broadcast %cst_109 : f32 to vector<18x18x2xf32>
      %c0_110 = arith.constant 0 : index
      %c0_111 = arith.constant 0 : index
      %c0_112 = arith.constant 0 : index
      %70 = vector.load %arg7[%c0_110, %c0_111, %c0_112] : memref<18x18x2xf32, #tpu.memory_space<vmem>>, vector<18x18x2xf32>
      tpu.vector_store %arg7[%c0_110, %c0_111, %c0_112], %69 {strides = array<i32>} : memref<18x18x2xf32, #tpu.memory_space<vmem>>, vector<18x18x2xf32>,
    } else {
    }
    %c1 = arith.constant 1 : index
    %c1_4 = arith.constant 1 : index
    %c0_5 = arith.constant 0 : index
    %5 = vector.load %arg7[%c1, %c1_4, %c0_5] : memref<18x18x2xf32, #tpu.memory_space<vmem>>, vector<16x16x2xf32>
    tpu.vector_store %arg7[%c1, %c1_4, %c0_5], %2 {strides = array<i32>} : memref<18x18x2xf32, #tpu.memory_space<vmem>>, vector<16x16x2xf32>,
    %c0_6 = arith.constant 0 : index
    %c0_7 = arith.constant 0 : index
    %c0_8 = arith.constant 0 : index
    %6 = vector.load %arg7[%c0_6, %c0_7, %c0_8] : memref<18x18x2xf32, #tpu.memory_space<vmem>>, vector<16x16x2xf32>
    %c0_9 = arith.constant 0 : index
    %c1_10 = arith.constant 1 : index
    %c0_11 = arith.constant 0 : index
    %7 = vector.load %arg7[%c0_9, %c1_10, %c0_11] : memref<18x18x2xf32, #tpu.memory_space<vmem>>, vector<16x16x2xf32>
    %c0_12 = arith.constant 0 : index
    %c2 = arith.constant 2 : index
    %c0_13 = arith.constant 0 : index
    %8 = vector.load %arg7[%c0_12, %c2, %c0_13] : memref<18x18x2xf32, #tpu.memory_space<vmem>>, vector<16x16x2xf32>
    %c1_14 = arith.constant 1 : index
    %c0_15 = arith.constant 0 : index
    %c0_16 = arith.constant 0 : index
    %9 = vector.load %arg7[%c1_14, %c0_15, %c0_16] : memref<18x18x2xf32, #tpu.memory_space<vmem>>, vector<16x16x2xf32>
    %c1_17 = arith.constant 1 : index
    %c1_18 = arith.constant 1 : index
    %c0_19 = arith.constant 0 : index
    %10 = vector.load %arg7[%c1_17, %c1_18, %c0_19] : memref<18x18x2xf32, #tpu.memory_space<vmem>>, vector<16x16x2xf32>
    %c1_20 = arith.constant 1 : index
    %c2_21 = arith.constant 2 : index
    %c0_22 = arith.constant 0 : index
    %11 = vector.load %arg7[%c1_20, %c2_21, %c0_22] : memref<18x18x2xf32, #tpu.memory_space<vmem>>, vector<16x16x2xf32>
    %c2_23 = arith.constant 2 : index
    %c0_24 = arith.constant 0 : index
    %c0_25 = arith.constant 0 : index
    %12 = vector.load %arg7[%c2_23, %c0_24, %c0_25] : memref<18x18x2xf32, #tpu.memory_space<vmem>>, vector<16x16x2xf32>
    %c2_26 = arith.constant 2 : index
    %c1_27 = arith.constant 1 : index
    %c0_28 = arith.constant 0 : index
    %13 = vector.load %arg7[%c2_26, %c1_27, %c0_28] : memref<18x18x2xf32, #tpu.memory_space<vmem>>, vector<16x16x2xf32>
    %c2_29 = arith.constant 2 : index
    %c2_30 = arith.constant 2 : index
    %c0_31 = arith.constant 0 : index
    %14 = vector.load %arg7[%c2_29, %c2_30, %c0_31] : memref<18x18x2xf32, #tpu.memory_space<vmem>>, vector<16x16x2xf32>
    %15 = tpu.concatenate %6, %7, %8, %9, %10, %11, %12, %13, %14 in 2 : vector<16x16x2xf32>, vector<16x16x2xf32>, vector<16x16x2xf32>, vector<16x16x2xf32>, vector<16x16x2xf32>, vector<16x16x2xf32>, vector<16x16x2xf32>, vector<16x16x2xf32>, vector<16x16x2xf32> -> vector<16x16x18xf32>
    %16 = vector.shape_cast %15 : vector<16x16x18xf32> to vector<256x18xf32>
    %c0_32 = arith.constant 0 : index
    %c0_33 = arith.constant 0 : index
    %17 = vector.load %arg2[%c0_32, %c0_33] : memref<18x32xf32, #tpu.memory_space<vmem>>, vector<18x32xf32>
    %cst = arith.constant dense<0.000000e+00> : vector<256x32xf32>
    %18 = tpu.matmul %16, %17, %cst {dimension_numbers = #tpu.dot_dimension_numbers<[1], [0], [0], [1], [0, 0, 1, 1], [], []>} : vector<256x18xf32>, vector<18x32xf32>, vector<256x32xf32> -> vector<256x32xf32>
    %c0_34 = arith.constant 0 : index
    %19 = memref.load %arg5[%c0_34] : memref<2xf32, #tpu.memory_space<smem>>
    %cst_35 = arith.constant 0.000000e+00 : f32
    %20 = vector.broadcast %cst_35 : f32 to vector<256x32xf32>
    %21 = arith.cmpf oge, %18, %20 : vector<256x32xf32>
    %22 = vector.broadcast %19 : f32 to vector<256x32xf32>
    %23 = arith.mulf %22, %18 : vector<256x32xf32>
    %24 = arith.select %21, %18, %23 : vector<256x32xi1>, vector<256x32xf32>
    %25 = vector.shape_cast %24 : vector<256x32xf32> to vector<16x16x32xf32>
    %26 = arith.extui %0 : i1 to i32
    %c0_i32_36 = arith.constant 0 : i32
    %27 = arith.cmpi ne, %26, %c0_i32_36 : i32
    scf.if %27 {
      %cst_109 = arith.constant 0.000000e+00 : f32
      %69 = vector.broadcast %cst_109 : f32 to vector<18x18x32xf32>
      %c0_110 = arith.constant 0 : index
      %c0_111 = arith.constant 0 : index
      %c0_112 = arith.constant 0 : index
      %70 = vector.load %arg8[%c0_110, %c0_111, %c0_112] : memref<18x18x32xf32, #tpu.memory_space<vmem>>, vector<18x18x32xf32>
      tpu.vector_store %arg8[%c0_110, %c0_111, %c0_112], %69 {strides = array<i32>} : memref<18x18x32xf32, #tpu.memory_space<vmem>>, vector<18x18x32xf32>,
    } else {
    }
    %c1_37 = arith.constant 1 : index
    %c1_38 = arith.constant 1 : index
    %c0_39 = arith.constant 0 : index
    %28 = vector.load %arg8[%c1_37, %c1_38, %c0_39] : memref<18x18x32xf32, #tpu.memory_space<vmem>>, vector<16x16x32xf32>
    tpu.vector_store %arg8[%c1_37, %c1_38, %c0_39], %25 {strides = array<i32>} : memref<18x18x32xf32, #tpu.memory_space<vmem>>, vector<16x16x32xf32>,
    %c0_40 = arith.constant 0 : index
    %c0_41 = arith.constant 0 : index
    %c0_42 = arith.constant 0 : index
    %29 = vector.load %arg8[%c0_40, %c0_41, %c0_42] : memref<18x18x32xf32, #tpu.memory_space<vmem>>, vector<16x16x32xf32>
    %c0_43 = arith.constant 0 : index
    %c1_44 = arith.constant 1 : index
    %c0_45 = arith.constant 0 : index
    %30 = vector.load %arg8[%c0_43, %c1_44, %c0_45] : memref<18x18x32xf32, #tpu.memory_space<vmem>>, vector<16x16x32xf32>
    %c0_46 = arith.constant 0 : index
    %c2_47 = arith.constant 2 : index
    %c0_48 = arith.constant 0 : index
    %31 = vector.load %arg8[%c0_46, %c2_47, %c0_48] : memref<18x18x32xf32, #tpu.memory_space<vmem>>, vector<16x16x32xf32>
    %c1_49 = arith.constant 1 : index
    %c0_50 = arith.constant 0 : index
    %c0_51 = arith.constant 0 : index
    %32 = vector.load %arg8[%c1_49, %c0_50, %c0_51] : memref<18x18x32xf32, #tpu.memory_space<vmem>>, vector<16x16x32xf32>
    %c1_52 = arith.constant 1 : index
    %c1_53 = arith.constant 1 : index
    %c0_54 = arith.constant 0 : index
    %33 = vector.load %arg8[%c1_52, %c1_53, %c0_54] : memref<18x18x32xf32, #tpu.memory_space<vmem>>, vector<16x16x32xf32>
    %c1_55 = arith.constant 1 : index
    %c2_56 = arith.constant 2 : index
    %c0_57 = arith.constant 0 : index
    %34 = vector.load %arg8[%c1_55, %c2_56, %c0_57] : memref<18x18x32xf32, #tpu.memory_space<vmem>>, vector<16x16x32xf32>
    %c2_58 = arith.constant 2 : index
    %c0_59 = arith.constant 0 : index
    %c0_60 = arith.constant 0 : index
    %35 = vector.load %arg8[%c2_58, %c0_59, %c0_60] : memref<18x18x32xf32, #tpu.memory_space<vmem>>, vector<16x16x32xf32>
    %c2_61 = arith.constant 2 : index
    %c1_62 = arith.constant 1 : index
    %c0_63 = arith.constant 0 : index
    %36 = vector.load %arg8[%c2_61, %c1_62, %c0_63] : memref<18x18x32xf32, #tpu.memory_space<vmem>>, vector<16x16x32xf32>
    %c2_64 = arith.constant 2 : index
    %c2_65 = arith.constant 2 : index
    %c0_66 = arith.constant 0 : index
    %37 = vector.load %arg8[%c2_64, %c2_65, %c0_66] : memref<18x18x32xf32, #tpu.memory_space<vmem>>, vector<16x16x32xf32>
    %38 = tpu.concatenate %29, %30, %31, %32, %33, %34, %35, %36, %37 in 2 : vector<16x16x32xf32>, vector<16x16x32xf32>, vector<16x16x32xf32>, vector<16x16x32xf32>, vector<16x16x32xf32>, vector<16x16x32xf32>, vector<16x16x32xf32>, vector<16x16x32xf32>, vector<16x16x32xf32> -> vector<16x16x288xf32>
    %39 = vector.shape_cast %38 : vector<16x16x288xf32> to vector<256x288xf32>
    %c0_67 = arith.constant 0 : index
    %c0_68 = arith.constant 0 : index
    %40 = vector.load %arg3[%c0_67, %c0_68] : memref<288x32xf32, #tpu.memory_space<vmem>>, vector<288x32xf32>
    %cst_69 = arith.constant dense<0.000000e+00> : vector<256x32xf32>
    %41 = tpu.matmul %39, %40, %cst_69 {dimension_numbers = #tpu.dot_dimension_numbers<[1], [0], [0], [1], [0, 0, 1, 1], [], []>} : vector<256x288xf32>, vector<288x32xf32>, vector<256x32xf32> -> vector<256x32xf32>
    %c1_70 = arith.constant 1 : index
    %42 = memref.load %arg5[%c1_70] : memref<2xf32, #tpu.memory_space<smem>>
    %cst_71 = arith.constant 0.000000e+00 : f32
    %43 = vector.broadcast %cst_71 : f32 to vector<256x32xf32>
    %44 = arith.cmpf oge, %41, %43 : vector<256x32xf32>
    %45 = vector.broadcast %42 : f32 to vector<256x32xf32>
    %46 = arith.mulf %45, %41 : vector<256x32xf32>
    %47 = arith.select %44, %41, %46 : vector<256x32xi1>, vector<256x32xf32>
    %48 = vector.shape_cast %47 : vector<256x32xf32> to vector<16x16x32xf32>
    %49 = arith.extui %0 : i1 to i32
    %c0_i32_72 = arith.constant 0 : i32
    %50 = arith.cmpi ne, %49, %c0_i32_72 : i32
    scf.if %50 {
      %cst_109 = arith.constant 0.000000e+00 : f32
      %69 = vector.broadcast %cst_109 : f32 to vector<18x18x32xf32>
      %c0_110 = arith.constant 0 : index
      %c0_111 = arith.constant 0 : index
      %c0_112 = arith.constant 0 : index
      %70 = vector.load %arg9[%c0_110, %c0_111, %c0_112] : memref<18x18x32xf32, #tpu.memory_space<vmem>>, vector<18x18x32xf32>
      tpu.vector_store %arg9[%c0_110, %c0_111, %c0_112], %69 {strides = array<i32>} : memref<18x18x32xf32, #tpu.memory_space<vmem>>, vector<18x18x32xf32>,
    } else {
    }
    %c1_73 = arith.constant 1 : index
    %c1_74 = arith.constant 1 : index
    %c0_75 = arith.constant 0 : index
    %51 = vector.load %arg9[%c1_73, %c1_74, %c0_75] : memref<18x18x32xf32, #tpu.memory_space<vmem>>, vector<16x16x32xf32>
    tpu.vector_store %arg9[%c1_73, %c1_74, %c0_75], %48 {strides = array<i32>} : memref<18x18x32xf32, #tpu.memory_space<vmem>>, vector<16x16x32xf32>,
    %c0_76 = arith.constant 0 : index
    %c0_77 = arith.constant 0 : index
    %c0_78 = arith.constant 0 : index
    %52 = vector.load %arg9[%c0_76, %c0_77, %c0_78] : memref<18x18x32xf32, #tpu.memory_space<vmem>>, vector<16x16x32xf32>
    %c0_79 = arith.constant 0 : index
    %c1_80 = arith.constant 1 : index
    %c0_81 = arith.constant 0 : index
    %53 = vector.load %arg9[%c0_79, %c1_80, %c0_81] : memref<18x18x32xf32, #tpu.memory_space<vmem>>, vector<16x16x32xf32>
    %c0_82 = arith.constant 0 : index
    %c2_83 = arith.constant 2 : index
    %c0_84 = arith.constant 0 : index
    %54 = vector.load %arg9[%c0_82, %c2_83, %c0_84] : memref<18x18x32xf32, #tpu.memory_space<vmem>>, vector<16x16x32xf32>
    %c1_85 = arith.constant 1 : index
    %c0_86 = arith.constant 0 : index
    %c0_87 = arith.constant 0 : index
    %55 = vector.load %arg9[%c1_85, %c0_86, %c0_87] : memref<18x18x32xf32, #tpu.memory_space<vmem>>, vector<16x16x32xf32>
    %c1_88 = arith.constant 1 : index
    %c1_89 = arith.constant 1 : index
    %c0_90 = arith.constant 0 : index
    %56 = vector.load %arg9[%c1_88, %c1_89, %c0_90] : memref<18x18x32xf32, #tpu.memory_space<vmem>>, vector<16x16x32xf32>
    %c1_91 = arith.constant 1 : index
    %c2_92 = arith.constant 2 : index
    %c0_93 = arith.constant 0 : index
    %57 = vector.load %arg9[%c1_91, %c2_92, %c0_93] : memref<18x18x32xf32, #tpu.memory_space<vmem>>, vector<16x16x32xf32>
    %c2_94 = arith.constant 2 : index
    %c0_95 = arith.constant 0 : index
    %c0_96 = arith.constant 0 : index
    %58 = vector.load %arg9[%c2_94, %c0_95, %c0_96] : memref<18x18x32xf32, #tpu.memory_space<vmem>>, vector<16x16x32xf32>
    %c2_97 = arith.constant 2 : index
    %c1_98 = arith.constant 1 : index
    %c0_99 = arith.constant 0 : index
    %59 = vector.load %arg9[%c2_97, %c1_98, %c0_99] : memref<18x18x32xf32, #tpu.memory_space<vmem>>, vector<16x16x32xf32>
    %c2_100 = arith.constant 2 : index
    %c2_101 = arith.constant 2 : index
    %c0_102 = arith.constant 0 : index
    %60 = vector.load %arg9[%c2_100, %c2_101, %c0_102] : memref<18x18x32xf32, #tpu.memory_space<vmem>>, vector<16x16x32xf32>
    %61 = tpu.concatenate %52, %53, %54, %55, %56, %57, %58, %59, %60 in 2 : vector<16x16x32xf32>, vector<16x16x32xf32>, vector<16x16x32xf32>, vector<16x16x32xf32>, vector<16x16x32xf32>, vector<16x16x32xf32>, vector<16x16x32xf32>, vector<16x16x32xf32>, vector<16x16x32xf32> -> vector<16x16x288xf32>
    %62 = vector.shape_cast %61 : vector<16x16x288xf32> to vector<256x288xf32>
    %c0_103 = arith.constant 0 : index
    %c0_104 = arith.constant 0 : index
    %63 = vector.load %arg4[%c0_103, %c0_104] : memref<288x1xf32, #tpu.memory_space<vmem>>, vector<288x1xf32>
    %cst_105 = arith.constant dense<0.000000e+00> : vector<256x1xf32>
    %64 = tpu.matmul %62, %63, %cst_105 {dimension_numbers = #tpu.dot_dimension_numbers<[1], [0], [0], [1], [0, 0, 1, 1], [], []>} : vector<256x288xf32>, vector<288x1xf32>, vector<256x1xf32> -> vector<256x1xf32>
    %65 = vector.shape_cast %64 : vector<256x1xf32> to vector<16x16xf32>
    %c0_106 = arith.constant 0 : index
    %c0_107 = arith.constant 0 : index
    %c0_108 = arith.constant 0 : index
    %66 = vector.load %arg6[%c0_106, %c0_107, %c0_108] : memref<1x16x16xf32, #tpu.memory_space<vmem>>, vector<1x16x16xf32>
    %67 = vector.shape_cast %66 : vector<1x16x16xf32> to vector<16x16xf32>
    %68 = vector.shape_cast %65 : vector<16x16xf32> to vector<1x16x16xf32>
    tpu.vector_store %arg6[%c0_106, %c0_107, %c0_108], %68 {strides = array<i32>} : memref<1x16x16xf32, #tpu.memory_space<vmem>>, vector<1x16x16xf32>,
    return
  }
  func.func @transform_0(%arg0: i32) -> (i32, i32, i32, i32) {
    %c0_i32 = arith.constant 0 : i32
    %c0_i32_0 = arith.constant 0 : i32
    %c0_i32_1 = arith.constant 0 : i32
    %c0_i32_2 = arith.constant 0 : i32
    return %arg0, %c0_i32, %c0_i32_0, %c0_i32_1 : i32, i32, i32, i32
  }
  func.func @transform_1(%arg0: i32) -> (i32, i32) {
    %c0_i32 = arith.constant 0 : i32
    %c0_i32_0 = arith.constant 0 : i32
    %c0_i32_1 = arith.constant 0 : i32
    return %c0_i32, %c0_i32_0 : i32, i32
  }
  func.func @transform_2(%arg0: i32) -> (i32, i32) {
    %c0_i32 = arith.constant 0 : i32
    %c0_i32_0 = arith.constant 0 : i32
    %c0_i32_1 = arith.constant 0 : i32
    return %c0_i32, %c0_i32_0 : i32, i32
  }
  func.func @transform_3(%arg0: i32) -> (i32, i32) {
    %c0_i32 = arith.constant 0 : i32
    %c0_i32_0 = arith.constant 0 : i32
    %c0_i32_1 = arith.constant 0 : i32
    return %c0_i32, %c0_i32_0 : i32, i32
  }
  func.func @transform_4(%arg0: i32) -> i32 {
    %c0_i32 = arith.constant 0 : i32
    %c0_i32_0 = arith.constant 0 : i32
    return %c0_i32 : i32
  }
  func.func @transform_5(%arg0: i32) -> (i32, i32, i32) {
    %c0_i32 = arith.constant 0 : i32
    %c0_i32_0 = arith.constant 0 : i32
    %c0_i32_1 = arith.constant 0 : i32
    return %arg0, %c0_i32, %c0_i32_0 : i32, i32, i32
  }
}

</mosaic_0001>

<bundles_post_ra>
// kernel: tpu_custom_call.1
= control target key start
LH: loop header
LB: loop body
LE: loop exit
PB: predicated region body
PF: predicated region fallthrough
CT: control target
= control target key end

     0   :  { %10 = vsyncpa [#allocation7], 0  ;;  %s11733_s0 = inlined_call_operand.vmem [shape: f32[2,16,16,2], index: 0, kind: input, shape index: {}]   ;;  %s11734_s1 = inlined_call_operand.vmem [shape: f32[18,32], index: 1, kind: input, shape index: {}]   ;;  %s11735_s2 = inlined_call_operand.vmem [shape: f32[288,32], index: 2, kind: input, shape index: {}]   ;;  %s11736_s3 = inlined_call_operand.vmem [shape: f32[288,1], index: 3, kind: input, shape index: {}]   ;;  %s11737_s4 = inlined_call_operand.vmem [shape: f32[2], index: 4, kind: input, shape index: {}]   ;;  %s11738_s5 = inlined_call_operand.hbm [shape: f32[2,16,16], index: 5, kind: output, shape index: {}]  }
   0x1   :  { %11 = vsyncpa [#allocation6], 0 }
   0x2   :  { %13 = vsyncpa [#allocation6 + $0x1], 0  ;;  %s8267_s18 = smov 0   ;;  %s8269_s19 = smov 0  }
   0x3   :  { %s8271_s20 = smov 0   ;;  %s8273_s21 = smov 0  }
   0x4 LB: > { %s8288_s22 = sadd.s32 4294967295, %s8216_s21   ;;  %s6701_s23 = sadd.s32 4294967294, %s8216_s21   ;;  %s8216_s21 = sphi %s8273_s21, %s11894_s21   ;;  %s8212_s20 = sphi %s8271_s20, %s11893_s20   ;;  %s8208_s19 = sphi %s8269_s19, %s11892_s19   ;;  %s8204_s18 = sphi %s8267_s18, %s11891_s18  }
   0x5   : > { %s8292_s24 = sadd.s32 1, %s8216_s21   ;;  %s136_s25 = sadd.s32 1, %s8212_s20 }
   0x6   : > { %s133_s26 = ssub.s32 %s8216_s21, %s8292_s24  ;;  %p146_p0 = scmp.ne.s32.totalorder %s8212_s20, %s8208_s19 }
   0x7   : > { %p134_p1 = scmp.eq.s32.totalorder %s133_s26, 0  ;;  %p147_p2 = scmp.eq.s32.totalorder %s8288_s22, 1 }
   0x8   : > { %p152_p3 = scmp.ne.s32.totalorder %s8208_s19, %s8204_s18  ;;  %p153_p4 = scmp.eq.s32.totalorder %s6701_s23, 1 }
   0x9   : > { %s8303_s27 = scalar_select %p134_p1, %s8212_s20, %s136_s25  }
   0xa   : > { %p8305_p5 = por %p147_p2, %p146_p0  ;;  %p8309_p6 = por %p153_p4, %p152_p3 }
   0xb   : > { %p6702_p7 = scmp.ge.s32.totalorder %s8216_s21, 1  ;;  %p160_p8 = scmp.lt.s32.totalorder %s8216_s21, 3 }
   0xc   : > { %p7105_p10 = scmp.eq.s32.totalorder %s8288_s22, 0  ;;  %s182_s8 = sshll.u32 %s11737_s4, 4  ;;  %s183_s8 = int_to_ptr.vmem [resolvable:$true] %s182_s8 }
   0xd   : > { %p8317_p11 = pnand %p6702_p7, %p160_p8  ;;  %s8137_s9 = scalar_lea.vmem %s183_s8, 16 }
   0xe   : > { %p8138_p0 = scmp.ne.s32.totalorder %s183_s8, %s8137_s9  ;;  %p8145_p4 = scmp.lt.s32.totalorder %s183_s8, %s183_s8 }
   0xf   : > { %p7097_p12 = pneg %p8317_p11  ;;  %p8146_p7 = scmp.lt.s32.totalorder %s8137_s9, %s8137_s9 }
  0x11   : > { %p7098_p13 = pnand %p7105_p10, %p7097_p12  ;;  %p8147_p8 = por %p8146_p7, %p8145_p4 }
  0x13   : > { %p8139_p1 = pneg %p7098_p13 }
  0x15   : > { %p8140_p2 = pnand %p8139_p1, %p8138_p0 }
  0x17   : > { %p8141_p3 = pneg %p8140_p2 }
  0x19   : > { %p8148_p9 = pnand %p8147_p8, %p8141_p3 }
  0x1b   : > { %8151 = shalt.err (!%p8148_p9)
}
  0x1c   : > { %s8218_s10 = smov [#allocation5]   ;;  %203 = sbr.rel (%p8317_p11) target bundleno = 2141 (0x85d), region = 40 }
  0x1d   : > { %7100 = dma.vmem_to_smem (!%p7098_p13), %s183_s8, 16, %s8218_s10, [#allocation7]  }
  0x21   : > { %8195 = dma.done.wait (%p7105_p10), [#allocation7], 16  }
  0x22   : > { %8197 = vsyncadd (%p7105_p10), [#allocation7], 4294967280 }
  0x23   : > { %209 = sfence }
  0x24   : > { %s229_s11 = sand.u32 1, %s8208_s19   ;;  %p232_p12 = scmp.lt.s32.totalorder %s8288_s22, 1 }
  0x25   : > { %s8338_s12 = sshll.u32 %s229_s11, 4  ;;  %p11746_p9 = scmp.ne.s32.totalorder %s8288_s22, 0 }
  0x26   : > { %s233_s13 = scalar_select %p232_p12, %s8288_s22, 1 }
  0x27   : > { %s8443_s23 = scalar_lea.vmem [#allocation8], %s8338_s12 }
  0x28   : > { %s6816_s14 = sshll.u32 %s233_s13, 8 }
  0x29   : > { %s8344_s17 = scalar_lea.vmem %s11733_s0, %s6816_s14 }
  0x2a   : > { %v8347_v0 = vld [vmem:[%s8344_s17] sm:$0xff]  ;;  %v8350_v1 = vld [vmem:[%s8344_s17 + $0x8] sm:$0xff]  ;;  %v8353_v2 = vld [vmem:[%s8344_s17 + $0x10] sm:$0xff] }
  0x2b   : > { %v8356_v3 = vld [vmem:[%s8344_s17 + $0x18] sm:$0xff]  ;;  %v8359_v4 = vld [vmem:[%s8344_s17 + $0x20] sm:$0xff]  ;;  %v8362_v5 = vld [vmem:[%s8344_s17 + $0x28] sm:$0xff] }
  0x2c   : > { %v8365_v6 = vld [vmem:[%s8344_s17 + $0x30] sm:$0xff]  ;;  %v8368_v7 = vld [vmem:[%s8344_s17 + $0x38] sm:$0xff]  ;;  %v8371_v8 = vld [vmem:[%s8344_s17 + $0x40] sm:$0xff] }
  0x2d   : > { %v8374_v9 = vld [vmem:[%s8344_s17 + $0x48] sm:$0xff]  ;;  %v8377_v10 = vld [vmem:[%s8344_s17 + $0x50] sm:$0xff]  ;;  %v8380_v11 = vld [vmem:[%s8344_s17 + $0x58] sm:$0xff] }
  0x2e   : > { %v8383_v12 = vld [vmem:[%s8344_s17 + $0x60] sm:$0xff]  ;;  %v8386_v13 = vld [vmem:[%s8344_s17 + $0x68] sm:$0xff]  ;;  %v8389_v14 = vld [vmem:[%s8344_s17 + $0x70] sm:$0xff] }
  0x2f   : > { %v8392_v15 = vld [vmem:[%s8344_s17 + $0x78] sm:$0xff]  ;;  %v8395_v16 = vld [vmem:[%s8344_s17 + $0x80] sm:$0xff]  ;;  %v8398_v17 = vld [vmem:[%s8344_s17 + $0x88] sm:$0xff] }
  0x30   : > { %v8401_v18 = vld [vmem:[%s8344_s17 + $0x90] sm:$0xff]  ;;  %v8404_v19 = vld [vmem:[%s8344_s17 + $0x98] sm:$0xff]  ;;  %v8407_v20 = vld [vmem:[%s8344_s17 + $0xa0] sm:$0xff]  ;;  %272 = sbr.rel (%p11746_p9) target bundleno = 81 (0x51), region = 48 }
  0x31   : > { %v8410_v21 = vld [vmem:[%s8344_s17 + $0xa8] sm:$0xff]  ;;  %v8413_v22 = vld [vmem:[%s8344_s17 + $0xb0] sm:$0xff]  ;;  %v8416_v23 = vld [vmem:[%s8344_s17 + $0xb8] sm:$0xff] }
  0x32   : > { %v8419_v24 = vld [vmem:[%s8344_s17 + $0xc0] sm:$0xff]  ;;  %v8422_v25 = vld [vmem:[%s8344_s17 + $0xc8] sm:$0xff]  ;;  %v8425_v26 = vld [vmem:[%s8344_s17 + $0xd0] sm:$0xff] }
  0x33   : > { %v8428_v27 = vld [vmem:[%s8344_s17 + $0xd8] sm:$0xff]  ;;  %v8431_v28 = vld [vmem:[%s8344_s17 + $0xe0] sm:$0xff]  ;;  %v8434_v29 = vld [vmem:[%s8344_s17 + $0xe8] sm:$0xff] }
  0x34   : > { %v8437_v30 = vld [vmem:[%s8344_s17 + $0xf0] sm:$0xff]  ;;  %v8440_v31 = vld [vmem:[%s8344_s17 + $0xf8] sm:$0xff] }
  0x35   : > { %vm273_vm0 = vcmask 15360   ;;  %vm276_vm1 = vcmask 9216   ;;  %v8219_v32 = vmov 0.0  }
  0x36   : > { %274 = vst.msk [vmem:[#allocation2] sm:$0xff] %vm273_vm0, %v8219_v32  ;;  %275 = vst.msk [vmem:[#allocation2 + $0x8] sm:$0xff] %vm273_vm0, %v8219_v32 }
  0x37   : > { %278 = vst.msk [vmem:[#allocation2 + $0x18] sm:$0xff] %vm273_vm0, %v8219_v32  ;;  %279 = vst.msk [vmem:[#allocation2 + $0x20] sm:$0xff] %vm273_vm0, %v8219_v32 }
  0x38   : > { %281 = vst.msk [vmem:[#allocation2 + $0x30] sm:$0xff] %vm273_vm0, %v8219_v32  ;;  %282 = vst.msk [vmem:[#allocation2 + $0x38] sm:$0xff] %vm273_vm0, %v8219_v32 }
  0x39   : > { %284 = vst.msk [vmem:[#allocation2 + $0x48] sm:$0xff] %vm273_vm0, %v8219_v32  ;;  %285 = vst.msk [vmem:[#allocation2 + $0x50] sm:$0xff] %vm273_vm0, %v8219_v32 }
  0x3a   : > { %287 = vst.msk [vmem:[#allocation2 + $0x60] sm:$0xff] %vm273_vm0, %v8219_v32  ;;  %288 = vst.msk [vmem:[#allocation2 + $0x68] sm:$0xff] %vm273_vm0, %v8219_v32 }
  0x3b   : > { %290 = vst.msk [vmem:[#allocation2 + $0x78] sm:$0xff] %vm273_vm0, %v8219_v32  ;;  %291 = vst.msk [vmem:[#allocation2 + $0x80] sm:$0xff] %vm273_vm0, %v8219_v32 }
  0x3c   : > { %293 = vst.msk [vmem:[#allocation2 + $0x90] sm:$0xff] %vm273_vm0, %v8219_v32  ;;  %294 = vst.msk [vmem:[#allocation2 + $0x98] sm:$0xff] %vm273_vm0, %v8219_v32 }
  0x3d   : > { %296 = vst.msk [vmem:[#allocation2 + $0xa8] sm:$0xff] %vm273_vm0, %v8219_v32  ;;  %297 = vst.msk [vmem:[#allocation2 + $0xb0] sm:$0xff] %vm273_vm0, %v8219_v32 }
  0x3e   : > { %299 = vst.msk [vmem:[#allocation2 + $0xc0] sm:$0xff] %vm273_vm0, %v8219_v32  ;;  %300 = vst.msk [vmem:[#allocation2 + $0xc8] sm:$0xff] %vm273_vm0, %v8219_v32 }
  0x3f   : > { %302 = vst.msk [vmem:[#allocation2 + $0xd8] sm:$0xff] %vm273_vm0, %v8219_v32  ;;  %303 = vst.msk [vmem:[#allocation2 + $0xe0] sm:$0xff] %vm273_vm0, %v8219_v32 }
  0x40   : > { %305 = vst.msk [vmem:[#allocation2 + $0xf0] sm:$0xff] %vm273_vm0, %v8219_v32  ;;  %306 = vst.msk [vmem:[#allocation2 + $0xf8] sm:$0xff] %vm273_vm0, %v8219_v32 }
  0x41   : > { %308 = vst.msk [vmem:[#allocation2 + $0x108] sm:$0xff] %vm273_vm0, %v8219_v32  ;;  %309 = vst.msk [vmem:[#allocation2 + $0x110] sm:$0xff] %vm273_vm0, %v8219_v32 }
  0x42   : > { %311 = vst.msk [vmem:[#allocation2 + $0x120] sm:$0xff] %vm273_vm0, %v8219_v32  ;;  %312 = vst.msk [vmem:[#allocation2 + $0x128] sm:$0xff] %vm273_vm0, %v8219_v32 }
  0x43   : > { %314 = vst.msk [vmem:[#allocation2 + $0x138] sm:$0xff] %vm273_vm0, %v8219_v32  ;;  %315 = vst.msk [vmem:[#allocation2 + $0x140] sm:$0xff] %vm273_vm0, %v8219_v32 }
  0x44   : > { %317 = vst.msk [vmem:[#allocation2 + $0x150] sm:$0xff] %vm273_vm0, %v8219_v32  ;;  %318 = vst.msk [vmem:[#allocation2 + $0x158] sm:$0xff] %vm273_vm0, %v8219_v32 }
  0x45   : > { %320 = vst.msk [vmem:[#allocation2 + $0x168] sm:$0xff] %vm273_vm0, %v8219_v32  ;;  %321 = vst.msk [vmem:[#allocation2 + $0x170] sm:$0xff] %vm273_vm0, %v8219_v32 }
  0x46   : > { %323 = vst.msk [vmem:[#allocation2 + $0x180] sm:$0xff] %vm273_vm0, %v8219_v32  ;;  %324 = vst.msk [vmem:[#allocation2 + $0x188] sm:$0xff] %vm273_vm0, %v8219_v32 }
  0x47   : > { %326 = vst.msk [vmem:[#allocation2 + $0x198] sm:$0xff] %vm273_vm0, %v8219_v32  ;;  %327 = vst.msk [vmem:[#allocation2 + $0x1a0] sm:$0xff] %vm273_vm0, %v8219_v32 }
  0x48   : > { %277 = vst.msk [vmem:[#allocation2 + $0x10] sm:$0x3] %vm276_vm1, %v8219_v32  ;;  %280 = vst.msk [vmem:[#allocation2 + $0x28] sm:$0x3] %vm276_vm1, %v8219_v32 }
  0x49   : > { %283 = vst.msk [vmem:[#allocation2 + $0x40] sm:$0x3] %vm276_vm1, %v8219_v32  ;;  %286 = vst.msk [vmem:[#allocation2 + $0x58] sm:$0x3] %vm276_vm1, %v8219_v32 }
  0x4a   : > { %289 = vst.msk [vmem:[#allocation2 + $0x70] sm:$0x3] %vm276_vm1, %v8219_v32  ;;  %292 = vst.msk [vmem:[#allocation2 + $0x88] sm:$0x3] %vm276_vm1, %v8219_v32 }
  0x4b   : > { %295 = vst.msk [vmem:[#allocation2 + $0xa0] sm:$0x3] %vm276_vm1, %v8219_v32  ;;  %298 = vst.msk [vmem:[#allocation2 + $0xb8] sm:$0x3] %vm276_vm1, %v8219_v32 }
  0x4c   : > { %301 = vst.msk [vmem:[#allocation2 + $0xd0] sm:$0x3] %vm276_vm1, %v8219_v32  ;;  %304 = vst.msk [vmem:[#allocation2 + $0xe8] sm:$0x3] %vm276_vm1, %v8219_v32 }
  0x4d   : > { %307 = vst.msk [vmem:[#allocation2 + $0x100] sm:$0x3] %vm276_vm1, %v8219_v32  ;;  %310 = vst.msk [vmem:[#allocation2 + $0x118] sm:$0x3] %vm276_vm1, %v8219_v32 }
  0x4e   : > { %313 = vst.msk [vmem:[#allocation2 + $0x130] sm:$0x3] %vm276_vm1, %v8219_v32  ;;  %316 = vst.msk [vmem:[#allocation2 + $0x148] sm:$0x3] %vm276_vm1, %v8219_v32 }
  0x4f   : > { %319 = vst.msk [vmem:[#allocation2 + $0x160] sm:$0x3] %vm276_vm1, %v8219_v32  ;;  %322 = vst.msk [vmem:[#allocation2 + $0x178] sm:$0x3] %vm276_vm1, %v8219_v32 }
  0x50   : > { %325 = vst.msk [vmem:[#allocation2 + $0x190] sm:$0x3] %vm276_vm1, %v8219_v32  ;;  %328 = vst.msk [vmem:[#allocation2 + $0x1a8] sm:$0x3] %vm276_vm1, %v8219_v32 }
  0x51 PF: > { %v395_v33 = vld [vmem:[#allocation2 + $0x1] sm:$0xff]  ;;  %vm330_vm2 = vcmask 15360   ;;  %s8220_s25 = smov 2   ;;  %v396_v34 = vld [vmem:[#allocation2 + $0x9] sm:$0xff]  ;;  %s8221_s26 = smov 4   ;;  %vm2039_vm3 = vcmask 1041408  }
  0x52   : > { %684 = vrot.lane.b32.xlu0 %v395_v33, %s8220_s25  ;;  %333 = vst.msk [vmem:[#allocation2 + $0x31] sm:$0xff] %vm330_vm2, %v8353_v2  ;;  %331 = vst.msk [vmem:[#allocation2 + $0x19] sm:$0xff] %vm330_vm2, %v8347_v0  ;;  %v427_v63 = vld [vmem:[#allocation2 + $0x2] sm:$0xff]  ;;  %s8222_s30 = smov 6   ;;  %s8223_s6 = smov 8   ;;  %vm1708_vm4 = vcmask 31744  }
  0x53   : > { %332 = vst.msk [vmem:[#allocation2 + $0x21] sm:$0xff] %vm330_vm2, %v8350_v1  ;;  %334 = vst.msk [vmem:[#allocation2 + $0x39] sm:$0xff] %vm330_vm2, %v8356_v3  ;;  %s8224_s7 = smov 10   ;;  %s8225_s10 = smov 12   ;;  %vm1741_vm5 = vcmask 48128   ;;  %vm1774_vm6 = vcmask 64512  }
  0x54   : > { %335 = vst.msk [vmem:[#allocation2 + $0x49] sm:$0xff] %vm330_vm2, %v8359_v4  ;;  %336 = vst.msk [vmem:[#allocation2 + $0x51] sm:$0xff] %vm330_vm2, %v8362_v5  ;;  %v428_v4 = vld [vmem:[#allocation2 + $0xa] sm:$0xff]  ;;  %s8226_s16 = smov 14   ;;  %s8227_s17 = smov 16   ;;  %vm1807_vm7 = vcmask 80896  }
  0x55   : > { %337 = vst.msk [vmem:[#allocation2 + $0x61] sm:$0xff] %vm330_vm2, %v8365_v6  ;;  %338 = vst.msk [vmem:[#allocation2 + $0x69] sm:$0xff] %vm330_vm2, %v8368_v7  ;;  %vm1840_vm8 = vcmask 97280   ;;  %vm1873_vm9 = vcmask 113664   ;;  %vm1906_vm10 = vcmask 130048   ;;  %vm1942_vm11 = vcmask 146432  }
  0x56   : > { %339 = vst.msk [vmem:[#allocation2 + $0x79] sm:$0xff] %vm330_vm2, %v8371_v8  ;;  %340 = vst.msk [vmem:[#allocation2 + $0x81] sm:$0xff] %vm330_vm2, %v8374_v9  ;;  %686 = vrot.lane.b32.xlu0 %v396_v34, %s8220_s25  ;;  %p11889_p10 = scmp.ne.s32.totalorder %s8288_s22, 0 }
  0x57   : > { %341 = vst.msk [vmem:[#allocation2 + $0x91] sm:$0xff] %vm330_vm2, %v8377_v10  ;;  %342 = vst.msk [vmem:[#allocation2 + $0x99] sm:$0xff] %vm330_vm2, %v8380_v11 }
  0x58   : > { %343 = vst.msk [vmem:[#allocation2 + $0xa9] sm:$0xff] %vm330_vm2, %v8383_v12  ;;  %344 = vst.msk [vmem:[#allocation2 + $0xb1] sm:$0xff] %vm330_vm2, %v8386_v13 }
  0x59   : > { %345 = vst.msk [vmem:[#allocation2 + $0xc1] sm:$0xff] %vm330_vm2, %v8389_v14  ;;  %346 = vst.msk [vmem:[#allocation2 + $0xc9] sm:$0xff] %vm330_vm2, %v8392_v15  ;;  %v8567_v35 = vld [vmem:[#allocation2 + $0x31] sm:$0xff]  ;;  %v8569_v36 = vld [vmem:[#allocation2 + $0x19] sm:$0xff] }
  0x5a   : > { %347 = vst.msk [vmem:[#allocation2 + $0xd9] sm:$0xff] %vm330_vm2, %v8395_v16  ;;  %348 = vst.msk [vmem:[#allocation2 + $0xe1] sm:$0xff] %vm330_vm2, %v8398_v17  ;;  %692 = vrot.lane.b32.xlu0 %v8567_v35, %s8220_s25  ;;  %688 = vrot.lane.b32.xlu1 %v8569_v36, %s8220_s25  ;;  %v8577_v38 = vld [vmem:[#allocation2 + $0x21] sm:$0xff]  ;;  %v8585_v40 = vld [vmem:[#allocation2 + $0x39] sm:$0xff] }
  0x5b   : > { %349 = vst.msk [vmem:[#allocation2 + $0xf1] sm:$0xff] %vm330_vm2, %v8401_v18  ;;  %350 = vst.msk [vmem:[#allocation2 + $0xf9] sm:$0xff] %vm330_vm2, %v8404_v19  ;;  %v8575_v37 = vld [vmem:[#allocation2 + $0x49] sm:$0xff]  ;;  %v8593_v42 = vld [vmem:[#allocation2 + $0x51] sm:$0xff] }
  0x5c   : > { %351 = vst.msk [vmem:[#allocation2 + $0x109] sm:$0xff] %vm330_vm2, %v8407_v20  ;;  %352 = vst.msk [vmem:[#allocation2 + $0x111] sm:$0xff] %vm330_vm2, %v8410_v21  ;;  %v8583_v39 = vld [vmem:[#allocation2 + $0x61] sm:$0xff]  ;;  %v8601_v44 = vld [vmem:[#allocation2 + $0x69] sm:$0xff] }
  0x5d   : > { %353 = vst.msk [vmem:[#allocation2 + $0x121] sm:$0xff] %vm330_vm2, %v8413_v22  ;;  %354 = vst.msk [vmem:[#allocation2 + $0x129] sm:$0xff] %vm330_vm2, %v8416_v23  ;;  %v8591_v41 = vld [vmem:[#allocation2 + $0x79] sm:$0xff]  ;;  %v8609_v46 = vld [vmem:[#allocation2 + $0x81] sm:$0xff] }
  0x5e   : > { %355 = vst.msk [vmem:[#allocation2 + $0x139] sm:$0xff] %vm330_vm2, %v8419_v24  ;;  %356 = vst.msk [vmem:[#allocation2 + $0x141] sm:$0xff] %vm330_vm2, %v8422_v25  ;;  %696 = vrot.lane.b32.xlu0 %v8575_v37, %s8220_s25  ;;  %690 = vrot.lane.b32.xlu1 %v8577_v38, %s8220_s25  ;;  %v8599_v43 = vld [vmem:[#allocation2 + $0x91] sm:$0xff]  ;;  %v8615_v48 = vld [vmem:[#allocation2 + $0x99] sm:$0xff] }
  0x5f   : > { %357 = vst.msk [vmem:[#allocation2 + $0x151] sm:$0xff] %vm330_vm2, %v8425_v26  ;;  %358 = vst.msk [vmem:[#allocation2 + $0x159] sm:$0xff] %vm330_vm2, %v8428_v27  ;;  %v8607_v45 = vld [vmem:[#allocation2 + $0xa9] sm:$0xff]  ;;  %v8620_v50 = vld [vmem:[#allocation2 + $0xb1] sm:$0xff] }
  0x60   : > { %359 = vst.msk [vmem:[#allocation2 + $0x169] sm:$0xff] %vm330_vm2, %v8431_v28  ;;  %360 = vst.msk [vmem:[#allocation2 + $0x171] sm:$0xff] %vm330_vm2, %v8434_v29  ;;  %v411_v47 = vld [vmem:[#allocation2 + $0xc1] sm:$0xff]  ;;  %v412_v52 = vld [vmem:[#allocation2 + $0xc9] sm:$0xff] }
  0x61   : > { %361 = vst.msk [vmem:[#allocation2 + $0x181] sm:$0xff] %vm330_vm2, %v8437_v30  ;;  %362 = vst.msk [vmem:[#allocation2 + $0x189] sm:$0xff] %vm330_vm2, %v8440_v31  ;;  %v413_v49 = vld [vmem:[#allocation2 + $0xd9] sm:$0xff]  ;;  %v414_v54 = vld [vmem:[#allocation2 + $0xe1] sm:$0xff] }
  0x62   : > { %700 = vrot.lane.b32.xlu0 %v8583_v39, %s8220_s25  ;;  %694 = vrot.lane.b32.xlu1 %v8585_v40, %s8220_s25  ;;  %v415_v51 = vld [vmem:[#allocation2 + $0xf1] sm:$0xff]  ;;  %v416_v56 = vld [vmem:[#allocation2 + $0xf9] sm:$0xff]  ;;  %v8651_v6 = vld [vmem:[#allocation2 + $0x22] sm:$0xff] }
  0x63   : > { %v417_v53 = vld [vmem:[#allocation2 + $0x109] sm:$0xff]  ;;  %v418_v58 = vld [vmem:[#allocation2 + $0x111] sm:$0xff]  ;;  %v8639_v1 = vld [vmem:[#allocation2 + $0x1a] sm:$0xff] }
  0x64   : > { %v419_v55 = vld [vmem:[#allocation2 + $0x121] sm:$0xff]  ;;  %v420_v60 = vld [vmem:[#allocation2 + $0x129] sm:$0xff]  ;;  %v8644_v3 = vld [vmem:[#allocation2 + $0x32] sm:$0xff] }
  0x65   : > { %v421_v57 = vld [vmem:[#allocation2 + $0x139] sm:$0xff]  ;;  %v422_v62 = vld [vmem:[#allocation2 + $0x141] sm:$0xff]  ;;  %v8649_v5 = vld [vmem:[#allocation2 + $0x4a] sm:$0xff] }
  0x66   : > { %704 = vrot.lane.b32.xlu0 %v8591_v41, %s8220_s25  ;;  %698 = vrot.lane.b32.xlu1 %v8593_v42, %s8220_s25  ;;  %v423_v59 = vld [vmem:[#allocation2 + $0x151] sm:$0xff]  ;;  %v424_v0 = vld [vmem:[#allocation2 + $0x159] sm:$0xff]  ;;  %v8657_v7 = vld [vmem:[#allocation2 + $0x62] sm:$0xff] }
  0x67   : > { %v425_v61 = vld [vmem:[#allocation2 + $0x169] sm:$0xff]  ;;  %v426_v2 = vld [vmem:[#allocation2 + $0x171] sm:$0xff]  ;;  %v8659_v8 = vld [vmem:[#allocation2 + $0x3a] sm:$0xff] }
  0x68   : > { %v8665_v9 = vld [vmem:[#allocation2 + $0x7a] sm:$0xff]  ;;  %v8667_v10 = vld [vmem:[#allocation2 + $0x52] sm:$0xff]  ;;  %v8675_v12 = vld [vmem:[#allocation2 + $0x6a] sm:$0xff] }
  0x69   : > { %v8673_v11 = vld [vmem:[#allocation2 + $0x92] sm:$0xff]  ;;  %v8681_v13 = vld [vmem:[#allocation2 + $0xaa] sm:$0xff]  ;;  %v8683_v14 = vld [vmem:[#allocation2 + $0x82] sm:$0xff] }
  0x6a   : > { %708 = vrot.lane.b32.xlu0 %v8599_v43, %s8220_s25  ;;  %702 = vrot.lane.b32.xlu1 %v8601_v44, %s8220_s25  ;;  %v443_v15 = vld [vmem:[#allocation2 + $0xc2] sm:$0xff]  ;;  %v8689_v16 = vld [vmem:[#allocation2 + $0x9a] sm:$0xff]  ;;  %v8694_v18 = vld [vmem:[#allocation2 + $0xb2] sm:$0xff] }
  0x6b   : > { %v445_v17 = vld [vmem:[#allocation2 + $0xda] sm:$0xff]  ;;  %v447_v19 = vld [vmem:[#allocation2 + $0xf2] sm:$0xff]  ;;  %v8699_v20 = vld [vmem:[#allocation2 + $0xca] sm:$0xff] }
  0x6c   : > { %v449_v21 = vld [vmem:[#allocation2 + $0x10a] sm:$0xff]  ;;  %v446_v22 = vld [vmem:[#allocation2 + $0xe2] sm:$0xff]  ;;  %v448_v24 = vld [vmem:[#allocation2 + $0xfa] sm:$0xff] }
  0x6d   : > { %v451_v23 = vld [vmem:[#allocation2 + $0x122] sm:$0xff]  ;;  %v453_v25 = vld [vmem:[#allocation2 + $0x13a] sm:$0xff]  ;;  %v450_v26 = vld [vmem:[#allocation2 + $0x112] sm:$0xff] }
  0x6e   : > { %712 = vrot.lane.b32.xlu0 %v8607_v45, %s8220_s25  ;;  %706 = vrot.lane.b32.xlu1 %v8609_v46, %s8220_s25  ;;  %v455_v28 = vld [vmem:[#allocation2 + $0x152] sm:$0xff]  ;;  %v452_v29 = vld [vmem:[#allocation2 + $0x12a] sm:$0xff]  ;;  %v454_v32 = vld [vmem:[#allocation2 + $0x142] sm:$0xff] }
  0x6f   : > { %v457_v31 = vld [vmem:[#allocation2 + $0x16a] sm:$0xff] }
  0x72   : > { %716 = vrot.lane.b32.xlu0 %v411_v47, %s8220_s25  ;;  %710 = vrot.lane.b32.xlu1 %v8615_v48, %s8220_s25  ;;  %v456_v47 = vld [vmem:[#allocation2 + $0x15a] sm:$0xff] }
  0x76   : > { %720 = vrot.lane.b32.xlu0 %v413_v49, %s8220_s25  ;;  %714 = vrot.lane.b32.xlu1 %v8620_v50, %s8220_s25 }
  0x7a   : > { %724 = vrot.lane.b32.xlu0 %v415_v51, %s8220_s25  ;;  %718 = vrot.lane.b32.xlu1 %v412_v52, %s8220_s25  ;;  %v8726_v52 = vld [vmem:[#allocation2 + $0x18] sm:$0xff] }
  0x7e   : > { %728 = vrot.lane.b32.xlu0 %v417_v53, %s8220_s25  ;;  %722 = vrot.lane.b32.xlu1 %v414_v54, %s8220_s25  ;;  %v458_v53 = vld [vmem:[#allocation2 + $0x172] sm:$0xff] }
  0x82   : > { %732 = vrot.lane.b32.xlu0 %v419_v55, %s8220_s25  ;;  %726 = vrot.lane.b32.xlu1 %v416_v56, %s8220_s25  ;;  %v8735_v56 = vld [vmem:[#allocation2 + $0x30] sm:$0xff] }
  0x86   : > { %736 = vrot.lane.b32.xlu0 %v421_v57, %s8220_s25  ;;  %730 = vrot.lane.b32.xlu1 %v418_v58, %s8220_s25 }
  0x8a   : > { %740 = vrot.lane.b32.xlu0 %v423_v59, %s8220_s25  ;;  %734 = vrot.lane.b32.xlu1 %v420_v60, %s8220_s25  ;;  %v8744_v59 = vld [vmem:[#allocation2 + $0x48] sm:$0xff]  ;;  %v8746_v60 = vld [vmem:[#allocation2 + $0x20] sm:$0xff] }
  0x8e   : > { %744 = vrot.lane.b32.xlu0 %v425_v61, %s8220_s25  ;;  %738 = vrot.lane.b32.xlu1 %v422_v62, %s8220_s25 }
  0x92   : > { %812 = vrot.lane.b32.xlu0 %v427_v63, %s8221_s26  ;;  %742 = vrot.lane.b32.xlu1 %v424_v0, %s8220_s25  ;;  %v8756_v63 = vld [vmem:[#allocation2 + $0x60] sm:$0xff]  ;;  %v8758_v0 = vld [vmem:[#allocation2 + $0x38] sm:$0xff] }
  0x96   : > { %816 = vrot.lane.b32.xlu0 %v8639_v1, %s8221_s26  ;;  %746 = vrot.lane.b32.xlu1 %v426_v2, %s8220_s25  ;;  %s2268_s25 = sld [smem:[#allocation5]] }
  0x9a   : > { %820 = vrot.lane.b32.xlu0 %v8644_v3, %s8221_s26  ;;  %814 = vrot.lane.b32.xlu1 %v428_v4, %s8221_s26 }
  0x9e   : > { %824 = vrot.lane.b32.xlu0 %v8649_v5, %s8221_s26  ;;  %818 = vrot.lane.b32.xlu1 %v8651_v6, %s8221_s26 }
  0xa2   : > { %828 = vrot.lane.b32.xlu0 %v8657_v7, %s8221_s26  ;;  %822 = vrot.lane.b32.xlu1 %v8659_v8, %s8221_s26 }
  0xa6   : > { %832 = vrot.lane.b32.xlu0 %v8665_v9, %s8221_s26  ;;  %826 = vrot.lane.b32.xlu1 %v8667_v10, %s8221_s26 }
  0xaa   : > { %836 = vrot.lane.b32.xlu0 %v8673_v11, %s8221_s26  ;;  %830 = vrot.lane.b32.xlu1 %v8675_v12, %s8221_s26 }
  0xae   : > { %840 = vrot.lane.b32.xlu0 %v8681_v13, %s8221_s26  ;;  %834 = vrot.lane.b32.xlu1 %v8683_v14, %s8221_s26 }
  0xb2   : > { %844 = vrot.lane.b32.xlu0 %v443_v15, %s8221_s26  ;;  %838 = vrot.lane.b32.xlu1 %v8689_v16, %s8221_s26  ;;  %v8768_v15 = vld [vmem:[#allocation2 + $0x78] sm:$0xff] }
  0xb6   : > { %848 = vrot.lane.b32.xlu0 %v445_v17, %s8221_s26  ;;  %842 = vrot.lane.b32.xlu1 %v8694_v18, %s8221_s26  ;;  %v8770_v17 = vld [vmem:[#allocation2 + $0x50] sm:$0xff] }
  0xba   : > { %852 = vrot.lane.b32.xlu0 %v447_v19, %s8221_s26  ;;  %846 = vrot.lane.b32.xlu1 %v8699_v20, %s8221_s26 }
  0xbe   : > { %856 = vrot.lane.b32.xlu0 %v449_v21, %s8221_s26  ;;  %850 = vrot.lane.b32.xlu1 %v446_v22, %s8221_s26  ;;  %v8780_v22 = vld [vmem:[#allocation2 + $0x90] sm:$0xff] }
  0xc2   : > { %860 = vrot.lane.b32.xlu0 %v451_v23, %s8221_s26  ;;  %854 = vrot.lane.b32.xlu1 %v448_v24, %s8221_s26  ;;  %v8782_v23 = vld [vmem:[#allocation2 + $0x68] sm:$0xff] }
  0xc4   : > { %v8708_v27 = vpop.permute.xlu0 %684 }
  0xc6   : > { %864 = vrot.lane.b32.xlu0 %v453_v25, %s8221_s26  ;;  %858 = vrot.lane.b32.xlu1 %v450_v26, %s8221_s26  ;;  %v8792_v26 = vld [vmem:[#allocation2 + $0xa8] sm:$0xff] }
  0xc8   : > { %v8712_v30 = vpop.permute.xlu0 %686 }
  0xca   : > { %868 = vrot.lane.b32.xlu0 %v455_v28, %s8221_s26  ;;  %862 = vrot.lane.b32.xlu1 %v452_v29, %s8221_s26  ;;  %v8794_v28 = vld [vmem:[#allocation2 + $0x80] sm:$0xff] }
  0xcc   : > { %v8716_v33 = vpop.permute.xlu0 %692  ;;  %v8718_v34 = vpop.permute.xlu1 %688 }
  0xce   : > { %872 = vrot.lane.b32.xlu0 %v457_v31, %s8221_s26  ;;  %866 = vrot.lane.b32.xlu1 %v454_v32, %s8221_s26  ;;  %v8804_v32 = vld [vmem:[#allocation2 + $0xc0] sm:$0xff] }
  0xd0   : > { %v8722_v49 = vpop.permute.xlu0 %696  ;;  %v8724_v51 = vpop.permute.xlu1 %690 }
  0xd1   : > { %11747 = vst [vmem:[#allocation11_spill] sm:$0xff] %v8722_v49  ;;  %v8870_v49 = vld [vmem:[#allocation2 + $0x128] sm:$0xff] }
  0xd2   : > { %940 = vrot.lane.b32.xlu0 %v8726_v52, %s8222_s30  ;;  %870 = vrot.lane.b32.xlu1 %v456_v47, %s8221_s26  ;;  %v8806_v47 = vld [vmem:[#allocation2 + $0x98] sm:$0xff]  ;;  %11776 = vst [vmem:[#allocation40_spill] sm:$0xff] %v8870_v49 }
  0xd4   : > { %v8731_v54 = vpop.permute.xlu0 %700  ;;  %v8733_v55 = vpop.permute.xlu1 %694 }
  0xd5   : > { %11748 = vst [vmem:[#allocation12_spill] sm:$0xff] %v8731_v54  ;;  %11749 = vst [vmem:[#allocation13_spill] sm:$0xff] %v8733_v55  ;;  %v389_v54 = vld [vmem:[#allocation2 + $0x138] sm:$0xff] }
  0xd6   : > { %944 = vrot.lane.b32.xlu0 %v8735_v56, %s8222_s30  ;;  %874 = vrot.lane.b32.xlu1 %v458_v53, %s8221_s26  ;;  %v392_v55 = vld [vmem:[#allocation2 + $0x158] sm:$0xff] }
  0xd8   : > { %v8740_v57 = vpop.permute.xlu0 %704  ;;  %v8742_v58 = vpop.permute.xlu1 %698 }
  0xd9   : > { %11750 = vst [vmem:[#allocation14_spill] sm:$0xff] %v8740_v57  ;;  %11751 = vst [vmem:[#allocation15_spill] sm:$0xff] %v8742_v58  ;;  %v387_v57 = vld [vmem:[#allocation2 + $0x120] sm:$0xff]  ;;  %v8861_v58 = vld [vmem:[#allocation2 + $0x110] sm:$0xff] }
  0xda   : > { %948 = vrot.lane.b32.xlu0 %v8744_v59, %s8222_s30  ;;  %942 = vrot.lane.b32.xlu1 %v8746_v60, %s8222_s30  ;;  %11774 = vst [vmem:[#allocation38_spill] sm:$0xff] %v8861_v58 }
  0xdc   : > { %v8752_v61 = vpop.permute.xlu0 %708  ;;  %v8754_v62 = vpop.permute.xlu1 %702 }
  0xdd   : > { %11752 = vst [vmem:[#allocation16_spill] sm:$0xff] %v8752_v61  ;;  %11753 = vst [vmem:[#allocation17_spill] sm:$0xff] %v8754_v62  ;;  %v8840_v61 = vld [vmem:[#allocation2 + $0x108] sm:$0xff]  ;;  %v8852_v62 = vld [vmem:[#allocation2 + $0xf8] sm:$0xff] }
  0xde   : > { %952 = vrot.lane.b32.xlu0 %v8756_v63, %s8222_s30  ;;  %946 = vrot.lane.b32.xlu1 %v8758_v0, %s8222_s30  ;;  %11768 = vst [vmem:[#allocation32_spill] sm:$0xff] %v8840_v61  ;;  %11771 = vst [vmem:[#allocation35_spill] sm:$0xff] %v8852_v62 }
  0xe0   : > { %v8764_v2 = vpop.permute.xlu0 %712  ;;  %v8766_v4 = vpop.permute.xlu1 %706 }
  0xe1   : > { %11754 = vst [vmem:[#allocation18_spill] sm:$0xff] %v8764_v2  ;;  %11755 = vst [vmem:[#allocation19_spill] sm:$0xff] %v8766_v4  ;;  %v8828_v2 = vld [vmem:[#allocation2 + $0xf0] sm:$0xff]  ;;  %v8842_v4 = vld [vmem:[#allocation2 + $0xe0] sm:$0xff] }
  0xe2   : > { %956 = vrot.lane.b32.xlu0 %v8768_v15, %s8222_s30  ;;  %950 = vrot.lane.b32.xlu1 %v8770_v17, %s8222_s30 }
  0xe4   : > { %v8776_v19 = vpop.permute.xlu0 %716  ;;  %v8778_v21 = vpop.permute.xlu1 %710 }
  0xe5   : > { %11756 = vst [vmem:[#allocation20_spill] sm:$0xff] %v8776_v19  ;;  %11757 = vst [vmem:[#allocation21_spill] sm:$0xff] %v8778_v21  ;;  %v8816_v19 = vld [vmem:[#allocation2 + $0xd8] sm:$0xff]  ;;  %v8830_v21 = vld [vmem:[#allocation2 + $0xc8] sm:$0xff] }
  0xe6   : > { %960 = vrot.lane.b32.xlu0 %v8780_v22, %s8222_s30  ;;  %954 = vrot.lane.b32.xlu1 %v8782_v23, %s8222_s30 }
  0xe8   : > { %v8788_v24 = vpop.permute.xlu0 %720  ;;  %v8790_v25 = vpop.permute.xlu1 %714 }
  0xe9   : > { %11758 = vst [vmem:[#allocation22_spill] sm:$0xff] %v8788_v24  ;;  %11759 = vst [vmem:[#allocation23_spill] sm:$0xff] %v8790_v25  ;;  %v8818_v25 = vld [vmem:[#allocation2 + $0xb0] sm:$0xff] }
  0xea   : > { %964 = vrot.lane.b32.xlu0 %v8792_v26, %s8222_s30  ;;  %958 = vrot.lane.b32.xlu1 %v8794_v28, %s8222_s30 }
  0xec   : > { %v8800_v29 = vpop.permute.xlu0 %724  ;;  %v8802_v31 = vpop.permute.xlu1 %718 }
  0xed   : > { %11760 = vst [vmem:[#allocation24_spill] sm:$0xff] %v8800_v29  ;;  %11761 = vst [vmem:[#allocation25_spill] sm:$0xff] %v8802_v31 }
  0xee   : > { %968 = vrot.lane.b32.xlu0 %v8804_v32, %s8222_s30  ;;  %962 = vrot.lane.b32.xlu1 %v8806_v47, %s8222_s30 }
  0xf0   : > { %v8812_v53 = vpop.permute.xlu0 %728  ;;  %v8814_v24 = vpop.permute.xlu1 %722 }
  0xf1   : > { %11762 = vst [vmem:[#allocation26_spill] sm:$0xff] %v8812_v53  ;;  %11763 = vst [vmem:[#allocation27_spill] sm:$0xff] %v8814_v24 }
  0xf2   : > { %972 = vrot.lane.b32.xlu0 %v8816_v19, %s8222_s30  ;;  %966 = vrot.lane.b32.xlu1 %v8818_v25, %s8222_s30 }
  0xf4   : > { %v8824_v29 = vpop.permute.xlu0 %732  ;;  %v8826_v31 = vpop.permute.xlu1 %726 }
  0xf5   : > { %11764 = vst [vmem:[#allocation28_spill] sm:$0xff] %v8824_v29  ;;  %11765 = vst [vmem:[#allocation29_spill] sm:$0xff] %v8826_v31 }
  0xf6   : > { %976 = vrot.lane.b32.xlu0 %v8828_v2, %s8222_s30  ;;  %970 = vrot.lane.b32.xlu1 %v8830_v21, %s8222_s30 }
  0xf8   : > { %v8836_v53 = vpop.permute.xlu0 %736  ;;  %v8838_v24 = vpop.permute.xlu1 %730 }
  0xf9   : > { %11766 = vst [vmem:[#allocation30_spill] sm:$0xff] %v8836_v53  ;;  %11767 = vst [vmem:[#allocation31_spill] sm:$0xff] %v8838_v24 }
  0xfa   : > { %980 = vrot.lane.b32.xlu0 %v8840_v61, %s8222_s30  ;;  %974 = vrot.lane.b32.xlu1 %v8842_v4, %s8222_s30  ;;  %v390_v61 = vld [vmem:[#allocation2 + $0x140] sm:$0xff] }
  0xfc   : > { %v8848_v29 = vpop.permute.xlu0 %740  ;;  %v8850_v31 = vpop.permute.xlu1 %734 }
  0xfd   : > { %11769 = vst [vmem:[#allocation33_spill] sm:$0xff] %v8848_v29  ;;  %11770 = vst [vmem:[#allocation34_spill] sm:$0xff] %v8850_v31 }
  0xfe   : > { %984 = vrot.lane.b32.xlu0 %v387_v57, %s8222_s30  ;;  %978 = vrot.lane.b32.xlu1 %v8852_v62, %s8222_s30  ;;  %v391_v57 = vld [vmem:[#allocation2 + $0x150] sm:$0xff] }
 0x100   : > { %v8857_v53 = vpop.permute.xlu0 %744  ;;  %v8859_v24 = vpop.permute.xlu1 %738 }
 0x101   : > { %11772 = vst [vmem:[#allocation36_spill] sm:$0xff] %v8857_v53  ;;  %11773 = vst [vmem:[#allocation37_spill] sm:$0xff] %v8859_v24 }
 0x102   : > { %988 = vrot.lane.b32.xlu0 %v389_v54, %s8222_s30  ;;  %982 = vrot.lane.b32.xlu1 %v8861_v58, %s8222_s30  ;;  %v393_v54 = vld [vmem:[#allocation2 + $0x168] sm:$0xff]  ;;  %v489_v58 = vld [vmem:[#allocation2 + $0x180] sm:$0xff] }
 0x104   : > { %v8866_v29 = vpop.permute.xlu0 %812  ;;  %v8868_v31 = vpop.permute.xlu1 %742 }
 0x105   : > { %11775 = vst [vmem:[#allocation39_spill] sm:$0xff] %v8868_v31 }
 0x106   : > { %992 = vrot.lane.b32.xlu0 %v391_v57, %s8222_s30  ;;  %986 = vrot.lane.b32.xlu1 %v8870_v49, %s8222_s30 }
 0x108   : > { %v8875_v53 = vpop.permute.xlu0 %816  ;;  %v8877_v24 = vpop.permute.xlu1 %746 }
 0x109   : > { %11777 = vst [vmem:[#allocation41_spill] sm:$0xff] %v8877_v24  ;;  %v394_v24 = vld [vmem:[#allocation2 + $0x170] sm:$0xff] }
 0x10a   : > { %996 = vrot.lane.b32.xlu0 %v393_v54, %s8222_s30  ;;  %990 = vrot.lane.b32.xlu1 %v390_v61, %s8222_s30  ;;  %v490_v61 = vld [vmem:[#allocation2 + $0x188] sm:$0xff] }
 0x10c   : > { %v8881_v31 = vpop.permute.xlu0 %820  ;;  %v8883_v62 = vpop.permute.xlu1 %814 }
 0x10d   : > { %11778 = vst [vmem:[#allocation42_spill] sm:$0xff] %v8881_v31 }
 0x10e   : > { %1000 = vrot.lane.b32.xlu0 %v489_v58, %s8222_s30  ;;  %994 = vrot.lane.b32.xlu1 %v392_v55, %s8222_s30 }
 0x110   : > { %v8887_v57 = vpop.permute.xlu0 %824  ;;  %v8889_v49 = vpop.permute.xlu1 %818 }
 0x112   : > { %1068 = vrot.lane.b32.xlu0 %v8569_v36, %s8223_s6  ;;  %998 = vrot.lane.b32.xlu1 %v394_v24, %s8222_s30  ;;  %v1941_v36 = vld [vmem:[%s11734_s1 + $0x10] sm:$0x3] }
 0x113   : > { %6925 = vmatprep.subr.msk.mxu0 %vm2039_vm3, %v1941_v36 }
 0x114   : > { %v8894_v54 = vpop.permute.xlu0 %828  ;;  %v8896_v31 = vpop.permute.xlu1 %822  ;;  %6926 = vmatpush3.msk.msra.mxu0 %vm2039_vm3, %v1941_v36 }
 0x116   : > { %1196 = vrot.lane.b32.xlu0 %v8639_v1, %s8224_s7  ;;  %1002 = vrot.lane.b32.xlu1 %v490_v61, %s8222_s30  ;;  %v1940_v1 = vld [vmem:[%s11734_s1 + $0x8] sm:$0xff] }
 0x117   : > { %6927 = vmatprep.subr.mxu0 %v1940_v1 }
 0x118   : > { %v8901_v55 = vpop.permute.xlu0 %832  ;;  %v8903_v58 = vpop.permute.xlu1 %826  ;;  %6928 = vmatpush3.msra.mxu0 %v1940_v1 }
 0x119   : > { %11779 = vst [vmem:[#allocation43_spill] sm:$0xff] %v8901_v55  ;;  %v1939_v55 = vld [vmem:[%s11734_s1] sm:$0xff] }
 0x11a   : > { %1324 = vrot.lane.b32.xlu0 %v8735_v56, %s8225_s10  ;;  %1070 = vrot.lane.b32.xlu1 %v8577_v38, %s8223_s6 }
 0x11b   : > { %6929 = vmatprep.subr.mxu0 %v1939_v55 }
 0x11c   : > { %v8915_v24 = vpop.permute.xlu0 %836  ;;  %v8917_v61 = vpop.permute.xlu1 %830  ;;  %6930 = vmatpush3.msra.mxu0 %v1939_v55 }
 0x11d   : > { %11780 = vst [vmem:[#allocation44_spill] sm:$0xff] %v8915_v24 }
 0x11e   : > { %1452 = vrot.lane.b32.xlu0 %v8567_v35, %s8226_s16  ;;  %1198 = vrot.lane.b32.xlu1 %v8651_v6, %s8224_s7 }
 0x120   : > { %v8926_v38 = vpop.permute.xlu0 %840  ;;  %v8928_v36 = vpop.permute.xlu1 %834 }
 0x121   : > { %11781 = vst [vmem:[#allocation45_spill] sm:$0xff] %v8926_v38 }
 0x122   : > { %1454 = vrot.lane.b32.xlu0 %v8585_v40, %s8226_s16  ;;  %1326 = vrot.lane.b32.xlu1 %v8758_v0, %s8225_s10 }
 0x124   : > { %v8934_v1 = vpop.permute.xlu0 %844  ;;  %v8936_v24 = vpop.permute.xlu1 %838 }
 0x125   : > { %11782 = vst [vmem:[#allocation46_spill] sm:$0xff] %v8934_v1 }
 0x126   : > { %1074 = vrot.lane.b32.xlu0 %v8585_v40, %s8223_s6  ;;  %1072 = vrot.lane.b32.xlu1 %v8567_v35, %s8223_s6 }
 0x128   : > { %v8942_v6 = vpop.permute.xlu0 %848  ;;  %v8944_v38 = vpop.permute.xlu1 %842 }
 0x129   : > { %11783 = vst [vmem:[#allocation47_spill] sm:$0xff] %v8942_v6  ;;  %11784 = vst [vmem:[#allocation48_spill] sm:$0xff] %v8944_v38 }
 0x12a   : > { %1582 = vrot.lane.b32.xlu0 %v8659_v8, %s8227_s17  ;;  %1580 = vrot.lane.b32.xlu1 %v8644_v3, %s8227_s17 }
 0x12c   : > { %v8950_v55 = vpop.permute.xlu0 %852  ;;  %v8952_v1 = vpop.permute.xlu1 %846 }
 0x12d   : > { %11785 = vst [vmem:[#allocation49_spill] sm:$0xff] %v8950_v55  ;;  %11786 = vst [vmem:[#allocation50_spill] sm:$0xff] %v8952_v1 }
 0x12e   : > { %1328 = vrot.lane.b32.xlu0 %v8744_v59, %s8225_s10  ;;  %1200 = vrot.lane.b32.xlu1 %v8644_v3, %s8224_s7 }
 0x130   : > { %v8958_v35 = vpop.permute.xlu0 %856  ;;  %v8960_v40 = vpop.permute.xlu1 %850 }
 0x131   : > { %11787 = vst [vmem:[#allocation51_spill] sm:$0xff] %v8958_v35  ;;  %11788 = vst [vmem:[#allocation52_spill] sm:$0xff] %v8960_v40 }
 0x132   : > { %1456 = vrot.lane.b32.xlu0 %v8575_v37, %s8226_s16  ;;  %1202 = vrot.lane.b32.xlu1 %v8659_v8, %s8224_s7 }
 0x134   : > { %v8966_v6 = vpop.permute.xlu0 %860  ;;  %v8968_v55 = vpop.permute.xlu1 %854 }
 0x135   : > { %11789 = vst [vmem:[#allocation53_spill] sm:$0xff] %v8966_v6  ;;  %11790 = vst [vmem:[#allocation54_spill] sm:$0xff] %v8968_v55 }
 0x136   : > { %1458 = vrot.lane.b32.xlu0 %v8593_v42, %s8226_s16  ;;  %1330 = vrot.lane.b32.xlu1 %v8770_v17, %s8225_s10 }
 0x138   : > { %v8974_v3 = vpop.permute.xlu0 %864  ;;  %v8976_v35 = vpop.permute.xlu1 %858 }
 0x139   : > { %11791 = vst [vmem:[#allocation55_spill] sm:$0xff] %v8974_v3  ;;  %11792 = vst [vmem:[#allocation56_spill] sm:$0xff] %v8976_v35 }
 0x13a   : > { %1078 = vrot.lane.b32.xlu0 %v8593_v42, %s8223_s6  ;;  %1076 = vrot.lane.b32.xlu1 %v8575_v37, %s8223_s6 }
 0x13c   : > { %v8982_v8 = vpop.permute.xlu0 %868  ;;  %v8984_v6 = vpop.permute.xlu1 %862 }
 0x13d   : > { %11793 = vst [vmem:[#allocation57_spill] sm:$0xff] %v8982_v8  ;;  %11794 = vst [vmem:[#allocation58_spill] sm:$0xff] %v8984_v6 }
 0x13e   : > { %1586 = vrot.lane.b32.xlu0 %v8667_v10, %s8227_s17  ;;  %1584 = vrot.lane.b32.xlu1 %v8649_v5, %s8227_s17 }
 0x140   : > { %v8990_v55 = vpop.permute.xlu0 %872  ;;  %v8992_v3 = vpop.permute.xlu1 %866 }
 0x141   : > { %11795 = vst [vmem:[#allocation59_spill] sm:$0xff] %v8990_v55  ;;  %11796 = vst [vmem:[#allocation60_spill] sm:$0xff] %v8992_v3 }
 0x142   : > { %1332 = vrot.lane.b32.xlu0 %v8756_v63, %s8225_s10  ;;  %1204 = vrot.lane.b32.xlu1 %v8649_v5, %s8224_s7 }
 0x144   : > { %v8998_v37 = vpop.permute.xlu0 %940  ;;  %v9000_v42 = vpop.permute.xlu1 %870 }
 0x145   : > { %11797 = vst [vmem:[#allocation61_spill] sm:$0xff] %v9000_v42 }
 0x146   : > { %1460 = vrot.lane.b32.xlu0 %v8583_v39, %s8226_s16  ;;  %1206 = vrot.lane.b32.xlu1 %v8667_v10, %s8224_s7 }
 0x148   : > { %v9006_v8 = vpop.permute.xlu0 %944  ;;  %v9008_v55 = vpop.permute.xlu1 %874 }
 0x149   : > { %11798 = vst [vmem:[#allocation62_spill] sm:$0xff] %v9008_v55 }
 0x14a   : > { %1462 = vrot.lane.b32.xlu0 %v8601_v44, %s8226_s16  ;;  %1334 = vrot.lane.b32.xlu1 %v8782_v23, %s8225_s10 }
 0x14c   : > { %v9014_v5 = vpop.permute.xlu0 %948  ;;  %v9016_v3 = vpop.permute.xlu1 %942 }
 0x14e   : > { %1082 = vrot.lane.b32.xlu0 %v8601_v44, %s8223_s6  ;;  %1080 = vrot.lane.b32.xlu1 %v8583_v39, %s8223_s6 }
 0x150   : > { %v9022_v10 = vpop.permute.xlu0 %952  ;;  %v9024_v42 = vpop.permute.xlu1 %946 }
 0x152   : > { %1590 = vrot.lane.b32.xlu0 %v8675_v12, %s8227_s17  ;;  %1588 = vrot.lane.b32.xlu1 %v8657_v7, %s8227_s17 }
 0x154   : > { %v9030_v55 = vpop.permute.xlu0 %956  ;;  %v9032_v6 = vpop.permute.xlu1 %950 }
 0x156   : > { %1336 = vrot.lane.b32.xlu0 %v8768_v15, %s8225_s10  ;;  %1208 = vrot.lane.b32.xlu1 %v8657_v7, %s8224_s7 }
 0x158   : > { %v9038_v39 = vpop.permute.xlu0 %960  ;;  %v9040_v44 = vpop.permute.xlu1 %954 }
 0x15a   : > { %1464 = vrot.lane.b32.xlu0 %v8591_v41, %s8226_s16  ;;  %1210 = vrot.lane.b32.xlu1 %v8675_v12, %s8224_s7 }
 0x15c   : > { %v9046_v35 = vpop.permute.xlu0 %964  ;;  %v9048_v40 = vpop.permute.xlu1 %958 }
 0x15d   : > { %11799 = vst [vmem:[#allocation63_spill] sm:$0xff] %v9046_v35 }
 0x15e   : > { %1466 = vrot.lane.b32.xlu0 %v8609_v46, %s8226_s16  ;;  %1338 = vrot.lane.b32.xlu1 %v8794_v28, %s8225_s10 }
 0x160   : > { %v9054_v7 = vpop.permute.xlu0 %968  ;;  %v9056_v1 = vpop.permute.xlu1 %962 }
 0x161   : > { %11800 = vst [vmem:[#allocation64_spill] sm:$0xff] %v9054_v7 }
 0x162   : > { %1086 = vrot.lane.b32.xlu0 %v8609_v46, %s8223_s6  ;;  %1084 = vrot.lane.b32.xlu1 %v8591_v41, %s8223_s6 }
 0x164   : > { %v9062_v12 = vpop.permute.xlu0 %972  ;;  %v9064_v38 = vpop.permute.xlu1 %966 }
 0x165   : > { %11801 = vst [vmem:[#allocation65_spill] sm:$0xff] %v9062_v12 }
 0x166   : > { %1594 = vrot.lane.b32.xlu0 %v8683_v14, %s8227_s17  ;;  %1592 = vrot.lane.b32.xlu1 %v8665_v9, %s8227_s17 }
 0x168   : > { %v9070_v35 = vpop.permute.xlu0 %976  ;;  %v9072_v7 = vpop.permute.xlu1 %970 }
 0x169   : > { %11802 = vst [vmem:[#allocation66_spill] sm:$0xff] %v9070_v35  ;;  %11803 = vst [vmem:[#allocation67_spill] sm:$0xff] %v9072_v7 }
 0x16a   : > { %1340 = vrot.lane.b32.xlu0 %v8780_v22, %s8225_s10  ;;  %1212 = vrot.lane.b32.xlu1 %v8665_v9, %s8224_s7 }
 0x16c   : > { %v9078_v41 = vpop.permute.xlu0 %980  ;;  %v9080_v46 = vpop.permute.xlu1 %974 }
 0x16d   : > { %11804 = vst [vmem:[#allocation68_spill] sm:$0xff] %v9078_v41  ;;  %11805 = vst [vmem:[#allocation69_spill] sm:$0xff] %v9080_v46 }
 0x16e   : > { %1468 = vrot.lane.b32.xlu0 %v8599_v43, %s8226_s16  ;;  %1214 = vrot.lane.b32.xlu1 %v8683_v14, %s8224_s7 }
 0x170   : > { %v9086_v12 = vpop.permute.xlu0 %984  ;;  %v9088_v35 = vpop.permute.xlu1 %978 }
 0x171   : > { %11806 = vst [vmem:[#allocation70_spill] sm:$0xff] %v9086_v12  ;;  %11807 = vst [vmem:[#allocation71_spill] sm:$0xff] %v9088_v35 }
 0x172   : > { %1470 = vrot.lane.b32.xlu0 %v8615_v48, %s8226_s16  ;;  %1342 = vrot.lane.b32.xlu1 %v8806_v47, %s8225_s10 }
 0x174   : > { %v9094_v9 = vpop.permute.xlu0 %988  ;;  %v9096_v41 = vpop.permute.xlu1 %982 }
 0x175   : > { %11808 = vst [vmem:[#allocation72_spill] sm:$0xff] %v9094_v9  ;;  %11809 = vst [vmem:[#allocation73_spill] sm:$0xff] %v9096_v41 }
 0x176   : > { %1090 = vrot.lane.b32.xlu0 %v8615_v48, %s8223_s6  ;;  %1088 = vrot.lane.b32.xlu1 %v8599_v43, %s8223_s6 }
 0x178   : > { %v9102_v14 = vpop.permute.xlu0 %992  ;;  %v9104_v12 = vpop.permute.xlu1 %986 }
 0x179   : > { %11810 = vst [vmem:[#allocation74_spill] sm:$0xff] %v9102_v14  ;;  %11811 = vst [vmem:[#allocation75_spill] sm:$0xff] %v9104_v12 }
 0x17a   : > { %1598 = vrot.lane.b32.xlu0 %v8689_v16, %s8227_s17  ;;  %1596 = vrot.lane.b32.xlu1 %v8673_v11, %s8227_s17 }
 0x17c   : > { %v9110_v35 = vpop.permute.xlu0 %996  ;;  %v9112_v9 = vpop.permute.xlu1 %990 }
 0x17d   : > { %11812 = vst [vmem:[#allocation76_spill] sm:$0xff] %v9110_v35  ;;  %11813 = vst [vmem:[#allocation77_spill] sm:$0xff] %v9112_v9 }
 0x17e   : > { %1344 = vrot.lane.b32.xlu0 %v8792_v26, %s8225_s10  ;;  %1216 = vrot.lane.b32.xlu1 %v8673_v11, %s8224_s7  ;;  %v504_v11 = vld [vmem:[#allocation2 + $0xb1] sm:$0xff]  ;;  %v503_v26 = vld [vmem:[#allocation2 + $0xa9] sm:$0xff] }
 0x180   : > { %v9118_v43 = vpop.permute.xlu0 %1000  ;;  %v9120_v48 = vpop.permute.xlu1 %994 }
 0x181   : > { %11814 = vst [vmem:[#allocation78_spill] sm:$0xff] %v9118_v43  ;;  %11815 = vst [vmem:[#allocation79_spill] sm:$0xff] %v9120_v48  ;;  %v364_v48 = vld [vmem:[#allocation2 + $0x8] sm:$0xff] }
 0x182   : > { %1472 = vrot.lane.b32.xlu0 %v8607_v45, %s8226_s16  ;;  %1218 = vrot.lane.b32.xlu1 %v8689_v16, %s8224_s7 }
 0x184   : > { %v1069_v14 = vpop.permute.xlu0 %1068  ;;  %v9126_v35 = vpop.permute.xlu1 %998 }
 0x185   : > { %11816 = vst [vmem:[#allocation80_spill] sm:$0xff] %v9126_v35 }
 0x186   : > { %1474 = vrot.lane.b32.xlu0 %v8620_v50, %s8226_s16  ;;  %1346 = vrot.lane.b32.xlu1 %v8818_v25, %s8225_s10 }
 0x188   : > { %v1197_v43 = vpop.permute.xlu0 %1196  ;;  %v9132_v9 = vpop.permute.xlu1 %1002 }
 0x189   : > { %11817 = vst [vmem:[#allocation81_spill] sm:$0xff] %v9132_v9  ;;  %v600_v9 = vld [vmem:[#allocation2 + $0xc1] sm:$0xff] }
 0x18a   : > { %1094 = vrot.lane.b32.xlu0 %v504_v11, %s8223_s6  ;;  %1092 = vrot.lane.b32.xlu1 %v503_v26, %s8223_s6  ;;  %v363_v11 = vld [vmem:[#allocation2] sm:$0xff]  ;;  %v1677_v26 = vsel %vm330_vm2, %v364_v48, %v8712_v30 }
 0x18b   : > { %v1710_v46 = vsel %vm1708_vm4, %v1677_v26, %v8883_v62  ;;  %v1676_v7 = vsel %vm330_vm2, %v363_v11, %v8708_v27  ;;  %v601_v62 = vld [vmem:[#allocation2 + $0xc9] sm:$0xff] }
 0x18c   : > { %v1325_v45 = vpop.permute.xlu0 %1324  ;;  %v1071_v16 = vpop.permute.xlu1 %1070 }
 0x18e   : > { %1602 = vrot.lane.b32.xlu0 %v8694_v18, %s8227_s17  ;;  %1600 = vrot.lane.b32.xlu1 %v8681_v13, %s8227_s17 }
 0x190   : > { %v1453_v50 = vpop.permute.xlu0 %1452  ;;  %v1199_v35 = vpop.permute.xlu1 %1198 }
 0x192   : > { %1348 = vrot.lane.b32.xlu0 %v8804_v32, %s8225_s10  ;;  %1220 = vrot.lane.b32.xlu1 %v8681_v13, %s8224_s7  ;;  %v1743_v32 = vsel %vm1741_vm5, %v1710_v46, %v9016_v3  ;;  %v1709_v13 = vsel %vm1708_vm4, %v1676_v7, %v8866_v29 }
 0x193   : > { %v1776_v30 = vsel %vm1774_vm6, %v1743_v32, %v1071_v16  ;;  %v1742_v48 = vsel %vm1741_vm5, %v1709_v13, %v8998_v37  ;;  %v538_v32 = vld [vmem:[#allocation2 + $0xca] sm:$0xff]  ;;  %v1678_v13 = vsel %vm330_vm2, %v8726_v52, %v8718_v34  ;;  %v603_v52 = vld [vmem:[#allocation2 + $0xe1] sm:$0xff] }
 0x194   : > { %v1455_v12 = vpop.permute.xlu0 %1454  ;;  %v1327_v41 = vpop.permute.xlu1 %1326  ;;  %v1809_v27 = vsel %vm1807_vm7, %v1776_v30, %v1199_v35  ;;  %v1775_v11 = vsel %vm1774_vm6, %v1742_v48, %v1069_v14  ;;  %v1679_v30 = vsel %vm330_vm2, %v8746_v60, %v8724_v51  ;;  %v1711_v48 = vsel %vm1708_vm4, %v1678_v13, %v8875_v53  ;;  %v11819_v13 = vld [vmem:[#allocation42_spill] sm:$0xff] }
 0x195   : > { %v1808_v26 = vsel %vm1807_vm7, %v1775_v11, %v1197_v43 }
 0x196   : > { %1476 = vrot.lane.b32.xlu0 %v600_v9, %s8226_s16  ;;  %1222 = vrot.lane.b32.xlu1 %v8694_v18, %s8224_s7  ;;  %v1842_v18 = vsel %vm1840_vm8, %v1809_v27, %v1327_v41  ;;  %v1841_v29 = vsel %vm1840_vm8, %v1808_v26, %v1325_v45  ;;  %v1744_v27 = vsel %vm1741_vm5, %v1711_v48, %v9006_v8 }
 0x197   : > { %v1874_v37 = vsel %vm1873_vm9, %v1841_v29, %v1453_v50  ;;  %v1875_v7 = vsel %vm1873_vm9, %v1842_v18, %v1455_v12 }
 0x198   : > { %v1075_v3 = vpop.permute.xlu0 %1074  ;;  %v1073_v46 = vpop.permute.xlu1 %1072 }
 0x199   : > { %v1777_v51 = vsel %vm1774_vm6, %v1744_v27, %v1073_v46 }
 0x19a   : > { %1478 = vrot.lane.b32.xlu0 %v601_v62, %s8226_s16  ;;  %1350 = vrot.lane.b32.xlu1 %v8830_v21, %s8225_s10  ;;  %v632_v21 = vld [vmem:[#allocation2 + $0xc2] sm:$0xff] }
 0x19c   : > { %v1583_v35 = vpop.permute.xlu0 %1582  ;;  %v1581_v16 = vpop.permute.xlu1 %1580 }
 0x19d   : > { %v1908_v14 = vsel %vm1906_vm10, %v1875_v7, %v1583_v35  ;;  %v1907_v41 = vsel %vm1906_vm10, %v1874_v37, %v1581_v16  ;;  %v635_v7 = vld [vmem:[#allocation2 + $0xe2] sm:$0xff] }
 0x19e   : > { %1098 = vrot.lane.b32.xlu0 %v601_v62, %s8223_s6  ;;  %1096 = vrot.lane.b32.xlu1 %v600_v9, %s8223_s6  ;;  %v602_v9 = vld [vmem:[#allocation2 + $0xd9] sm:$0xff] }
 0x19f   : > { %6931 = vmatprep.mubr.msk.f32.mxu0 %vm1942_vm11, %v1907_v41 }
 0x1a0   : > { %6932 = vmatmul.mubr.msk.f32.vlgmr.msra.gmra.mxu0 %vm1942_vm11, %v1908_v14  ;;  %v1329_v43 = vpop.permute.xlu0 %1328  ;;  %v1201_v45 = vpop.permute.xlu1 %1200 }
 0x1a1   : > { %v1810_v60 = vsel %vm1807_vm7, %v1777_v51, %v1201_v45  ;;  %v1680_v45 = vsel %vm330_vm2, %v8735_v56, %v8716_v33 }
 0x1a2   : > { %1606 = vrot.lane.b32.xlu0 %v8699_v20, %s8227_s17  ;;  %1604 = vrot.lane.b32.xlu1 %v632_v21, %s8227_s17 }
 0x1a4   : > { %v1457_v12 = vpop.permute.xlu0 %1456  ;;  %v1203_v50 = vpop.permute.xlu1 %1202 }
 0x1a6   : > { %1352 = vrot.lane.b32.xlu0 %v8816_v19, %s8225_s10  ;;  %1224 = vrot.lane.b32.xlu1 %v632_v21, %s8224_s7  ;;  %v1712_v19 = vsel %vm1708_vm4, %v1679_v30, %v8889_v49  ;;  %v1713_v30 = vsel %vm1708_vm4, %v1680_v45, %v11819_v13 }
 0x1a7   : > { %v1745_v11 = vsel %vm1741_vm5, %v1712_v19, %v9024_v42  ;;  %v1843_v42 = vsel %vm1840_vm8, %v1810_v60, %v1329_v43  ;;  %v604_v43 = vld [vmem:[#allocation2 + $0xf1] sm:$0xff] }
 0x1a8   : > { %v1459_v20 = vpop.permute.xlu0 %1458  ;;  %v1331_v62 = vpop.permute.xlu1 %1330  ;;  %v1778_v34 = vsel %vm1774_vm6, %v1745_v11, %v1075_v3  ;;  %v1876_v3 = vsel %vm1873_vm9, %v1843_v42, %v1457_v12  ;;  %v11818_v12 = vld [vmem:[#allocation13_spill] sm:$0xff] }
 0x1a9   : > { %v1811_v53 = vsel %vm1807_vm7, %v1778_v34, %v1203_v50  ;;  %v1681_v50 = vsel %vm330_vm2, %v8758_v0, %v11818_v12  ;;  %v605_v0 = vld [vmem:[#allocation2 + $0xf9] sm:$0xff] }
 0x1aa   : > { %1480 = vrot.lane.b32.xlu0 %v602_v9, %s8226_s16  ;;  %1226 = vrot.lane.b32.xlu1 %v538_v32, %s8224_s7  ;;  %v1844_v8 = vsel %vm1840_vm8, %v1811_v53, %v1331_v62 }
 0x1ab   : > { %v1877_v46 = vsel %vm1873_vm9, %v1844_v8, %v1459_v20  ;;  %v1714_v20 = vsel %vm1708_vm4, %v1681_v50, %v8896_v31  ;;  %v636_v8 = vld [vmem:[#allocation2 + $0xf2] sm:$0xff] }
 0x1ac   : > { %v1079_v49 = vpop.permute.xlu0 %1078  ;;  %v1077_v18 = vpop.permute.xlu1 %1076  ;;  %v1747_v62 = vsel %vm1741_vm5, %v1714_v20, %v9032_v6  ;;  %v11820_v6 = vld [vmem:[#allocation35_spill] sm:$0xff] }
 0x1ad   : > { %v1780_v33 = vsel %vm1774_vm6, %v1747_v62, %v1079_v49  ;;  %v607_v50 = vld [vmem:[#allocation2 + $0x111] sm:$0xff] }
 0x1ae   : > { %1482 = vrot.lane.b32.xlu0 %v603_v52, %s8226_s16  ;;  %1354 = vrot.lane.b32.xlu1 %v8842_v4, %s8225_s10  ;;  %v634_v4 = vld [vmem:[#allocation2 + $0xda] sm:$0xff] }
 0x1b0   : > { %v1587_v26 = vpop.permute.xlu0 %1586  ;;  %v1585_v29 = vpop.permute.xlu1 %1584 }
 0x1b1   : > { %v1910_v37 = vsel %vm1906_vm10, %v1877_v46, %v1587_v26  ;;  %v1909_v35 = vsel %vm1906_vm10, %v1876_v3, %v1585_v29  ;;  %v11821_v29 = vld [vmem:[#allocation32_spill] sm:$0xff] }
 0x1b2   : > { %1102 = vrot.lane.b32.xlu0 %v603_v52, %s8223_s6  ;;  %1100 = vrot.lane.b32.xlu1 %v602_v9, %s8223_s6 }
 0x1b3   : > { %6934 = vmatprep.mubr.msk.f32.mxu0 %vm1942_vm11, %v1909_v35  ;;  %v11822_v35 = vld [vmem:[#allocation11_spill] sm:$0xff] }
 0x1b4   : > { %6935 = vmatmul.mubr.msk.f32.gmra.mxu0 %vm1942_vm11, %v1910_v37  ;;  %v1333_v16 = vpop.permute.xlu0 %1332  ;;  %v1205_v14 = vpop.permute.xlu1 %1204  ;;  %v606_v37 = vld [vmem:[#allocation2 + $0x109] sm:$0xff] }
 0x1b6   : > { %1610 = vrot.lane.b32.xlu0 %v635_v7, %s8227_s17  ;;  %1608 = vrot.lane.b32.xlu1 %v634_v4, %s8227_s17 }
 0x1b8   : > { %v1461_v41 = vpop.permute.xlu0 %1460  ;;  %v1207_v21 = vpop.permute.xlu1 %1206 }
 0x1b9   : > { %v1813_v19 = vsel %vm1807_vm7, %v1780_v33, %v1207_v21 }
 0x1ba   : > { %1356 = vrot.lane.b32.xlu0 %v8828_v2, %s8225_s10  ;;  %1228 = vrot.lane.b32.xlu1 %v634_v4, %s8224_s7  ;;  %v1746_v2 = vsel %vm1741_vm5, %v1713_v30, %v9014_v5  ;;  %v11823_v4 = vld [vmem:[#allocation15_spill] sm:$0xff] }
 0x1bb   : > { %v1779_v56 = vsel %vm1774_vm6, %v1746_v2, %v1077_v18  ;;  %v637_v18 = vld [vmem:[#allocation2 + $0xfa] sm:$0xff] }
 0x1bc   : > { %v1463_v9 = vpop.permute.xlu0 %1462  ;;  %v1335_v32 = vpop.permute.xlu1 %1334  ;;  %v1812_v48 = vsel %vm1807_vm7, %v1779_v56, %v1205_v14 }
 0x1bd   : > { %v1846_v5 = vsel %vm1840_vm8, %v1813_v19, %v1335_v32  ;;  %v1845_v11 = vsel %vm1840_vm8, %v1812_v48, %v1333_v16  ;;  %v1683_v16 = vsel %vm330_vm2, %v8770_v17, %v11823_v4  ;;  %v638_v48 = vld [vmem:[#allocation2 + $0x10a] sm:$0xff] }
 0x1be   : > { %1484 = vrot.lane.b32.xlu0 %v604_v43, %s8226_s16  ;;  %1230 = vrot.lane.b32.xlu1 %v635_v7, %s8224_s7  ;;  %v1878_v34 = vsel %vm1873_vm9, %v1845_v11, %v1461_v41  ;;  %v1879_v52 = vsel %vm1873_vm9, %v1846_v5, %v1463_v9  ;;  %v1682_v7 = vsel %vm330_vm2, %v8744_v59, %v11822_v35  ;;  %v608_v11 = vld [vmem:[#allocation2 + $0x121] sm:$0xff] }
 0x1bf   : > { %v1715_v21 = vsel %vm1708_vm4, %v1682_v7, %v8887_v57 }
 0x1c0   : > { %v1083_v31 = vpop.permute.xlu0 %1082  ;;  %v1081_v27 = vpop.permute.xlu1 %1080  ;;  %v1748_v45 = vsel %vm1741_vm5, %v1715_v21, %v9022_v10  ;;  %v641_v21 = vld [vmem:[#allocation2 + $0x12a] sm:$0xff] }
 0x1c1   : > { %v1781_v17 = vsel %vm1774_vm6, %v1748_v45, %v1081_v27  ;;  %v576_v27 = vld [vmem:[#allocation2 + $0x120] sm:$0xff] }
 0x1c2   : > { %1486 = vrot.lane.b32.xlu0 %v605_v0, %s8226_s16  ;;  %1358 = vrot.lane.b32.xlu1 %v11820_v6, %s8225_s10 }
 0x1c4   : > { %v1591_v51 = vpop.permute.xlu0 %1590  ;;  %v1589_v60 = vpop.permute.xlu1 %1588 }
 0x1c5   : > { %v1912_v53 = vsel %vm1906_vm10, %v1879_v52, %v1591_v51  ;;  %v1911_v49 = vsel %vm1906_vm10, %v1878_v34, %v1589_v60  ;;  %v11825_v34 = vld [vmem:[#allocation12_spill] sm:$0xff]  ;;  %v11826_v52 = vld [vmem:[#allocation17_spill] sm:$0xff] }
 0x1c6   : > { %1106 = vrot.lane.b32.xlu0 %v605_v0, %s8223_s6  ;;  %1104 = vrot.lane.b32.xlu1 %v604_v43, %s8223_s6  ;;  %v1716_v43 = vsel %vm1708_vm4, %v1683_v16, %v8903_v58  ;;  %v639_v0 = vld [vmem:[#allocation2 + $0x112] sm:$0xff]  ;;  %v1684_v51 = vsel %vm330_vm2, %v8756_v63, %v11825_v34  ;;  %v1685_v60 = vsel %vm330_vm2, %v8782_v23, %v11826_v52  ;;  %v643_v52 = vld [vmem:[#allocation2 + $0x142] sm:$0xff] }
 0x1c7   : > { %6937 = vmatprep.mubr.msk.f32.mxu0 %vm1942_vm11, %v1911_v49  ;;  %v1749_v12 = vsel %vm1741_vm5, %v1716_v43, %v9040_v44  ;;  %v11824_v44 = vld [vmem:[#allocation38_spill] sm:$0xff] }
 0x1c8   : > { %6938 = vmatmul.mubr.msk.f32.gmra.mxu0 %vm1942_vm11, %v1912_v53  ;;  %v1337_v42 = vpop.permute.xlu0 %1336  ;;  %v1209_v3 = vpop.permute.xlu1 %1208  ;;  %v1782_v59 = vsel %vm1774_vm6, %v1749_v12, %v1083_v31  ;;  %v640_v43 = vld [vmem:[#allocation2 + $0x122] sm:$0xff] }
 0x1c9   : > { %v1814_v57 = vsel %vm1807_vm7, %v1781_v17, %v1209_v3 }
 0x1ca   : > { %1614 = vrot.lane.b32.xlu0 %v637_v18, %s8227_s17  ;;  %1612 = vrot.lane.b32.xlu1 %v636_v8, %s8227_s17  ;;  %v1847_v13 = vsel %vm1840_vm8, %v1814_v57, %v1337_v42  ;;  %v610_v57 = vld [vmem:[#allocation2 + $0x139] sm:$0xff] }
 0x1cc   : > { %v1465_v26 = vpop.permute.xlu0 %1464  ;;  %v1211_v46 = vpop.permute.xlu1 %1210 }
 0x1cd   : > { %v1815_v9 = vsel %vm1807_vm7, %v1782_v59, %v1211_v46  ;;  %v1880_v30 = vsel %vm1873_vm9, %v1847_v13, %v1465_v26  ;;  %v609_v26 = vld [vmem:[#allocation2 + $0x129] sm:$0xff]  ;;  %v578_v59 = vld [vmem:[#allocation2 + $0x138] sm:$0xff] }
 0x1ce   : > { %1360 = vrot.lane.b32.xlu0 %v11821_v29, %s8225_s10  ;;  %1232 = vrot.lane.b32.xlu1 %v636_v8, %s8224_s7  ;;  %v1718_v8 = vsel %vm1708_vm4, %v1685_v60, %v8917_v61  ;;  %v642_v60 = vld [vmem:[#allocation2 + $0x13a] sm:$0xff] }
 0x1cf   : > { %v1751_v3 = vsel %vm1741_vm5, %v1718_v8, %v9048_v40  ;;  %v11827_v40 = vld [vmem:[#allocation40_spill] sm:$0xff] }
 0x1d0   : > { %v1467_v14 = vpop.permute.xlu0 %1466  ;;  %v1339_v41 = vpop.permute.xlu1 %1338 }
 0x1d1   : > { %v1848_v10 = vsel %vm1840_vm8, %v1815_v9, %v1339_v41  ;;  %v11828_v9 = vld [vmem:[#allocation14_spill] sm:$0xff] }
 0x1d2   : > { %1488 = vrot.lane.b32.xlu0 %v606_v37, %s8226_s16  ;;  %1234 = vrot.lane.b32.xlu1 %v637_v18, %s8224_s7  ;;  %v1881_v2 = vsel %vm1873_vm9, %v1848_v10, %v1467_v14  ;;  %v1717_v18 = vsel %vm1708_vm4, %v1684_v51, %v8894_v54 }
 0x1d3   : > { %v1750_v42 = vsel %vm1741_vm5, %v1717_v18, %v9030_v55  ;;  %v580_v18 = vld [vmem:[#allocation2 + $0x150] sm:$0xff] }
 0x1d4   : > { %v1087_v58 = vpop.permute.xlu0 %1086  ;;  %v1085_v32 = vpop.permute.xlu1 %1084 }
 0x1d5   : > { %v1784_v63 = vsel %vm1774_vm6, %v1751_v3, %v1087_v58  ;;  %v1783_v23 = vsel %vm1774_vm6, %v1750_v42, %v1085_v32  ;;  %v1686_v58 = vsel %vm330_vm2, %v8768_v15, %v11828_v9  ;;  %v11829_v32 = vld [vmem:[#allocation19_spill] sm:$0xff]  ;;  %v645_v9 = vld [vmem:[#allocation2 + $0x15a] sm:$0xff] }
 0x1d6   : > { %1490 = vrot.lane.b32.xlu0 %v607_v50, %s8226_s16  ;;  %1362 = vrot.lane.b32.xlu1 %v11824_v44, %s8225_s10  ;;  %v1687_v10 = vsel %vm330_vm2, %v8794_v28, %v11829_v32  ;;  %v612_v3 = vld [vmem:[#allocation2 + $0x151] sm:$0xff] }
 0x1d8   : > { %v1595_v20 = vpop.permute.xlu0 %1594  ;;  %v1593_v62 = vpop.permute.xlu1 %1592 }
 0x1d9   : > { %v1914_v33 = vsel %vm1906_vm10, %v1881_v2, %v1595_v20  ;;  %v1913_v56 = vsel %vm1906_vm10, %v1880_v30, %v1593_v62  ;;  %v11830_v30 = vld [vmem:[#allocation43_spill] sm:$0xff]  ;;  %v1720_v2 = vsel %vm1708_vm4, %v1687_v10, %v8928_v36 }
 0x1da   : > { %1110 = vrot.lane.b32.xlu0 %v607_v50, %s8223_s6  ;;  %1108 = vrot.lane.b32.xlu1 %v606_v37, %s8223_s6  ;;  %v1719_v20 = vsel %vm1708_vm4, %v1686_v58, %v11830_v30  ;;  %v644_v58 = vld [vmem:[#allocation2 + $0x152] sm:$0xff] }
 0x1db   : > { %6940 = vmatprep.mubr.msk.f32.mxu0 %vm1942_vm11, %v1913_v56  ;;  %v1752_v62 = vsel %vm1741_vm5, %v1719_v20, %v9038_v39  ;;  %v611_v56 = vld [vmem:[#allocation2 + $0x141] sm:$0xff]  ;;  %v614_v20 = vld [vmem:[#allocation2 + $0x169] sm:$0xff] }
 0x1dc   : > { %6941 = vmatmul.mubr.msk.f32.gmra.mxu0 %vm1942_vm11, %v1914_v33  ;;  %v1341_v19 = vpop.permute.xlu0 %1340  ;;  %v1213_v31 = vpop.permute.xlu1 %1212  ;;  %v1753_v33 = vsel %vm1741_vm5, %v1720_v2, %v9056_v1  ;;  %v7158_v2 = vld [vmem:[#allocation2 + $0xa8] sm:$0xff] }
 0x1dd   : > { %v1816_v54 = vsel %vm1807_vm7, %v1783_v23, %v1213_v31 }
 0x1de   : > { %1618 = vrot.lane.b32.xlu0 %v639_v0, %s8227_s17  ;;  %1616 = vrot.lane.b32.xlu1 %v638_v48, %s8227_s17  ;;  %v1849_v37 = vsel %vm1840_vm8, %v1816_v54, %v1341_v19 }
 0x1e0   : > { %v1469_v5 = vpop.permute.xlu0 %1468  ;;  %v1215_v6 = vpop.permute.xlu1 %1214 }
 0x1e1   : > { %v1817_v46 = vsel %vm1807_vm7, %v1784_v63, %v1215_v6  ;;  %v1882_v35 = vsel %vm1873_vm9, %v1849_v37, %v1469_v5  ;;  %v11831_v63 = vld [vmem:[#allocation16_spill] sm:$0xff]  ;;  %v11834_v37 = vld [vmem:[#allocation63_spill] sm:$0xff] }
 0x1e2   : > { %1364 = vrot.lane.b32.xlu0 %v576_v27, %s8225_s10  ;;  %1236 = vrot.lane.b32.xlu1 %v638_v48, %s8224_s7  ;;  %v1688_v23 = vsel %vm330_vm2, %v8780_v22, %v11831_v63 }
 0x1e4   : > { %v1471_v53 = vpop.permute.xlu0 %1470  ;;  %v1343_v49 = vpop.permute.xlu1 %1342 }
 0x1e5   : > { %v1850_v55 = vsel %vm1840_vm8, %v1817_v46, %v1343_v49 }
 0x1e6   : > { %1492 = vrot.lane.b32.xlu0 %v608_v11, %s8226_s16  ;;  %1238 = vrot.lane.b32.xlu1 %v639_v0, %s8224_s7  ;;  %v1883_v4 = vsel %vm1873_vm9, %v1850_v55, %v1471_v53  ;;  %v579_v0 = vld [vmem:[#allocation2 + $0x140] sm:$0xff] }
 0x1e8   : > { %v1091_v61 = vpop.permute.xlu0 %1090  ;;  %v1089_v29 = vpop.permute.xlu1 %1088 }
 0x1e9   : > { %v1786_v15 = vsel %vm1774_vm6, %v1753_v33, %v1091_v61  ;;  %v1785_v28 = vsel %vm1774_vm6, %v1752_v62, %v1089_v29  ;;  %v11833_v29 = vld [vmem:[#allocation44_spill] sm:$0xff]  ;;  %v11835_v62 = vld [vmem:[#allocation18_spill] sm:$0xff] }
 0x1ea   : > { %1494 = vrot.lane.b32.xlu0 %v609_v26, %s8226_s16  ;;  %1366 = vrot.lane.b32.xlu1 %v11827_v40, %s8225_s10  ;;  %v1721_v55 = vsel %vm1708_vm4, %v1688_v23, %v11833_v29  ;;  %v1690_v33 = vsel %vm330_vm2, %v7158_v2, %v11835_v62 }
 0x1ec   : > { %v1599_v7 = vpop.permute.xlu0 %1598  ;;  %v1597_v16 = vpop.permute.xlu1 %1596 }
 0x1ed   : > { %v1916_v14 = vsel %vm1906_vm10, %v1883_v4, %v1599_v7  ;;  %v1915_v41 = vsel %vm1906_vm10, %v1882_v35, %v1597_v16  ;;  %v1754_v35 = vsel %vm1741_vm5, %v1721_v55, %v11834_v37  ;;  %v613_v4 = vld [vmem:[#allocation2 + $0x159] sm:$0xff] }
 0x1ee   : > { %1114 = vrot.lane.b32.xlu0 %v609_v26, %s8223_s6  ;;  %1112 = vrot.lane.b32.xlu1 %v608_v11, %s8223_s6  ;;  %v11832_v26 = vld [vmem:[#allocation21_spill] sm:$0xff]  ;;  %v581_v16 = vld [vmem:[#allocation2 + $0x158] sm:$0xff] }
 0x1ef   : > { %6943 = vmatprep.mubr.msk.f32.mxu0 %vm1942_vm11, %v1915_v41  ;;  %v1689_v54 = vsel %vm330_vm2, %v8806_v47, %v11832_v26  ;;  %v584_v55 = vld [vmem:[#allocation2 + $0x180] sm:$0xff] }
 0x1f0   : > { %6944 = vmatmul.mubr.msk.f32.gmra.mxu0 %vm1942_vm11, %v1916_v14  ;;  %v1345_v45 = vpop.permute.xlu0 %1344  ;;  %v1217_v12 = vpop.permute.xlu1 %1216  ;;  %v1722_v40 = vsel %vm1708_vm4, %v1689_v54, %v8936_v24  ;;  %v647_v54 = vld [vmem:[#allocation2 + $0x172] sm:$0xff] }
 0x1f1   : > { %v1818_v48 = vsel %vm1807_vm7, %v1785_v28, %v1217_v12  ;;  %v1755_v7 = vsel %vm1741_vm5, %v1722_v40, %v9064_v38 }
 0x1f2   : > { %1622 = vrot.lane.b32.xlu0 %v641_v21, %s8227_s17  ;;  %1620 = vrot.lane.b32.xlu1 %v640_v43, %s8227_s17  ;;  %v1851_v1 = vsel %vm1840_vm8, %v1818_v48, %v1345_v45  ;;  %v11837_v48 = vld [vmem:[#allocation45_spill] sm:$0xff] }
 0x1f4   : > { %v1473_v17 = vpop.permute.xlu0 %1472  ;;  %v1219_v50 = vpop.permute.xlu1 %1218 }
 0x1f5   : > { %v1819_v36 = vsel %vm1807_vm7, %v1786_v15, %v1219_v50  ;;  %v1884_v27 = vsel %vm1873_vm9, %v1851_v1, %v1473_v17  ;;  %v11836_v15 = vld [vmem:[#allocation23_spill] sm:$0xff] }
 0x1f6   : > { %1368 = vrot.lane.b32.xlu0 %v578_v59, %s8225_s10  ;;  %1240 = vrot.lane.b32.xlu1 %v640_v43, %s8224_s7  ;;  %v1691_v28 = vsel %vm330_vm2, %v8818_v25, %v11836_v15 }
 0x1f8   : > { %v1475_v44 = vpop.permute.xlu0 %1474  ;;  %v1347_v13 = vpop.permute.xlu1 %1346 }
 0x1f9   : > { %v1852_v39 = vsel %vm1840_vm8, %v1819_v36, %v1347_v13  ;;  %v1723_v36 = vsel %vm1708_vm4, %v1690_v33, %v11837_v48  ;;  %v649_v48 = vld [vmem:[#allocation2 + $0x18a] sm:$0xff] }
 0x1fa   : > { %1496 = vrot.lane.b32.xlu0 %v610_v57, %s8226_s16  ;;  %1242 = vrot.lane.b32.xlu1 %v641_v21, %s8224_s7  ;;  %v1885_v6 = vsel %vm1873_vm9, %v1852_v39, %v1475_v44  ;;  %v582_v44 = vld [vmem:[#allocation2 + $0x168] sm:$0xff]  ;;  %v11839_v39 = vld [vmem:[#allocation64_spill] sm:$0xff] }
 0x1fb   : > { %v1756_v1 = vsel %vm1741_vm5, %v1723_v36, %v11839_v39  ;;  %v648_v36 = vld [vmem:[#allocation2 + $0x182] sm:$0xff]  ;;  %v586_v39 = vld [vmem:[#allocation2 + $0x198] sm:$0xff] }
 0x1fc   : > { %v1095_v19 = vpop.permute.xlu0 %1094  ;;  %v1093_v31 = vpop.permute.xlu1 %1092 }
 0x1fd   : > { %v1788_v22 = vsel %vm1774_vm6, %v1755_v7, %v1095_v19  ;;  %v1787_v47 = vsel %vm1774_vm6, %v1754_v35, %v1093_v31  ;;  %v11838_v19 = vld [vmem:[#allocation48_spill] sm:$0xff]  ;;  %v616_v35 = vld [vmem:[#allocation2 + $0x181] sm:$0xff] }
 0x1fe   : > { %1498 = vrot.lane.b32.xlu0 %v611_v56, %s8226_s16  ;;  %1370 = vrot.lane.b32.xlu1 %v579_v0, %s8225_s10  ;;  %v1724_v31 = vsel %vm1708_vm4, %v1691_v28, %v11838_v19  ;;  %v7159_v7 = vld [vmem:[#allocation2 + $0xc0] sm:$0xff] }
 0x200   : > { %v1603_v5 = vpop.permute.xlu0 %1602  ;;  %v1601_v11 = vpop.permute.xlu1 %1600 }
 0x201   : > { %v1918_v34 = vsel %vm1906_vm10, %v1885_v6, %v1603_v5  ;;  %v1917_v51 = vsel %vm1906_vm10, %v1884_v27, %v1601_v11  ;;  %v11840_v27 = vld [vmem:[#allocation67_spill] sm:$0xff] }
 0x202   : > { %1118 = vrot.lane.b32.xlu0 %v611_v56, %s8223_s6  ;;  %1116 = vrot.lane.b32.xlu1 %v610_v57, %s8223_s6  ;;  %v1757_v5 = vsel %vm1741_vm5, %v1724_v31, %v11840_v27  ;;  %v615_v11 = vld [vmem:[#allocation2 + $0x171] sm:$0xff] }
 0x203   : > { %6946 = vmatprep.mubr.msk.f32.mxu0 %vm1942_vm11, %v1917_v51 }
 0x204   : > { %6947 = vmatmul.mubr.msk.f32.gmra.mxu0 %vm1942_vm11, %v1918_v34  ;;  %v1349_v53 = vpop.permute.xlu0 %1348  ;;  %v1221_v49 = vpop.permute.xlu1 %1220  ;;  %v583_v34 = vld [vmem:[#allocation2 + $0x170] sm:$0xff] }
 0x205   : > { %v1820_v14 = vsel %vm1807_vm7, %v1787_v47, %v1221_v49 }
 0x206   : > { %1626 = vrot.lane.b32.xlu0 %v643_v52, %s8227_s17  ;;  %1624 = vrot.lane.b32.xlu1 %v642_v60, %s8227_s17  ;;  %v1853_v38 = vsel %vm1840_vm8, %v1820_v14, %v1349_v53 }
 0x208   : > { %v1477_v8 = vpop.permute.xlu0 %1476  ;;  %v1223_v42 = vpop.permute.xlu1 %1222 }
 0x209   : > { %v1821_v24 = vsel %vm1807_vm7, %v1788_v22, %v1223_v42  ;;  %v1886_v45 = vsel %vm1873_vm9, %v1853_v38, %v1477_v8  ;;  %v11841_v22 = vld [vmem:[#allocation20_spill] sm:$0xff]  ;;  %v11844_v38 = vld [vmem:[#allocation50_spill] sm:$0xff] }
 0x20a   : > { %1372 = vrot.lane.b32.xlu0 %v580_v18, %s8225_s10  ;;  %1244 = vrot.lane.b32.xlu1 %v642_v60, %s8224_s7  ;;  %v1692_v47 = vsel %vm330_vm2, %v7159_v7, %v11841_v22 }
 0x20c   : > { %v1479_v46 = vpop.permute.xlu0 %1478  ;;  %v1351_v61 = vpop.permute.xlu1 %1350 }
 0x20d   : > { %v1854_v43 = vsel %vm1840_vm8, %v1821_v24, %v1351_v61 }
 0x20e   : > { %1500 = vrot.lane.b32.xlu0 %v612_v3, %s8226_s16  ;;  %1246 = vrot.lane.b32.xlu1 %v643_v52, %s8224_s7  ;;  %v1887_v59 = vsel %vm1873_vm9, %v1854_v43, %v1479_v46  ;;  %v646_v46 = vld [vmem:[#allocation2 + $0x16a] sm:$0xff] }
 0x210   : > { %v1099_v41 = vpop.permute.xlu0 %1098  ;;  %v1097_v21 = vpop.permute.xlu1 %1096 }
 0x211   : > { %v1790_v25 = vsel %vm1774_vm6, %v1757_v5, %v1099_v41  ;;  %v1789_v6 = vsel %vm1774_vm6, %v1756_v1, %v1097_v21  ;;  %v11843_v21 = vld [vmem:[#allocation46_spill] sm:$0xff]  ;;  %v618_v5 = vld [vmem:[#allocation2 + $0x199] sm:$0xff] }
 0x212   : > { %1502 = vrot.lane.b32.xlu0 %v613_v4, %s8226_s16  ;;  %1374 = vrot.lane.b32.xlu1 %v581_v16, %s8225_s10  ;;  %v11842_v16 = vld [vmem:[#allocation25_spill] sm:$0xff]  ;;  %v1725_v43 = vsel %vm1708_vm4, %v1692_v47, %v11843_v21 }
 0x213   : > { %v619_v47 = vld [vmem:[#allocation2 + $0x1a1] sm:$0xff] }
 0x214   : > { %v1607_v12 = vpop.permute.xlu0 %1606  ;;  %v1605_v17 = vpop.permute.xlu1 %1604 }
 0x215   : > { %v1920_v50 = vsel %vm1906_vm10, %v1887_v59, %v1607_v12  ;;  %v1919_v57 = vsel %vm1906_vm10, %v1886_v45, %v1605_v17  ;;  %v11845_v12 = vld [vmem:[#allocation65_spill] sm:$0xff] }
 0x216   : > { %1122 = vrot.lane.b32.xlu0 %v613_v4, %s8223_s6  ;;  %1120 = vrot.lane.b32.xlu1 %v612_v3, %s8223_s6  ;;  %v7160_v4 = vld [vmem:[#allocation2 + $0xc8] sm:$0xff]  ;;  %v1758_v59 = vsel %vm1741_vm5, %v1725_v43, %v11845_v12  ;;  %v11846_v17 = vld [vmem:[#allocation69_spill] sm:$0xff] }
 0x217   : > { %6949 = vmatprep.mubr.msk.f32.mxu0 %vm1942_vm11, %v1919_v57  ;;  %v1693_v14 = vsel %vm330_vm2, %v7160_v4, %v11842_v16  ;;  %v651_v43 = vld [vmem:[#allocation2 + $0x1a2] sm:$0xff] }
 0x218   : > { %6950 = vmatmul.mubr.msk.f32.gmra.mxu0 %vm1942_vm11, %v1920_v50  ;;  %v1353_v32 = vpop.permute.xlu0 %1352  ;;  %v1225_v10 = vpop.permute.xlu1 %1224  ;;  %v1726_v45 = vsel %vm1708_vm4, %v1693_v14, %v11844_v38 }
 0x219   : > { %v1822_v51 = vsel %vm1807_vm7, %v1789_v6, %v1225_v10  ;;  %v1759_v50 = vsel %vm1741_vm5, %v1726_v45, %v11846_v17  ;;  %v11847_v6 = vld [vmem:[#allocation22_spill] sm:$0xff]  ;;  %v7163_v17 = vld [vmem:[#allocation2 + $0xf8] sm:$0xff] }
 0x21a   : > { %1630 = vrot.lane.b32.xlu0 %v645_v9, %s8227_s17  ;;  %1628 = vrot.lane.b32.xlu1 %v644_v58, %s8227_s17  ;;  %v1855_v18 = vsel %vm1840_vm8, %v1822_v51, %v1353_v32  ;;  %v585_v32 = vld [vmem:[#allocation2 + $0x188] sm:$0xff]  ;;  %v11848_v51 = vld [vmem:[#allocation27_spill] sm:$0xff] }
 0x21c   : > { %v1481_v13 = vpop.permute.xlu0 %1480  ;;  %v1227_v30 = vpop.permute.xlu1 %1226 }
 0x21d   : > { %v1823_v52 = vsel %vm1807_vm7, %v1790_v25, %v1227_v30  ;;  %v1888_v8 = vsel %vm1873_vm9, %v1855_v18, %v1481_v13  ;;  %v7161_v25 = vld [vmem:[#allocation2 + $0xd8] sm:$0xff] }
 0x21e   : > { %1376 = vrot.lane.b32.xlu0 %v582_v44, %s8225_s10  ;;  %1248 = vrot.lane.b32.xlu1 %v644_v58, %s8224_s7  ;;  %v617_v58 = vld [vmem:[#allocation2 + $0x189] sm:$0xff] }
 0x220   : > { %v1483_v56 = vpop.permute.xlu0 %1482  ;;  %v1355_v0 = vpop.permute.xlu1 %1354 }
 0x221   : > { %v1856_v49 = vsel %vm1840_vm8, %v1823_v52, %v1355_v0 }
 0x222   : > { %1504 = vrot.lane.b32.xlu0 %v614_v20, %s8226_s16  ;;  %1250 = vrot.lane.b32.xlu1 %v645_v9, %s8224_s7  ;;  %v1889_v3 = vsel %vm1873_vm9, %v1856_v49, %v1483_v56  ;;  %v11849_v49 = vld [vmem:[#allocation47_spill] sm:$0xff] }
 0x224   : > { %v1103_v60 = vpop.permute.xlu0 %1102  ;;  %v1101_v53 = vpop.permute.xlu1 %1100 }
 0x225   : > { %v1792_v57 = vsel %vm1774_vm6, %v1759_v50, %v1103_v60  ;;  %v1791_v9 = vsel %vm1774_vm6, %v1758_v59, %v1101_v53  ;;  %v11853_v50 = vld [vmem:[#allocation29_spill] sm:$0xff] }
 0x226   : > { %1506 = vrot.lane.b32.xlu0 %v615_v11, %s8226_s16  ;;  %1378 = vrot.lane.b32.xlu1 %v583_v34, %s8225_s10  ;;  %v7162_v34 = vld [vmem:[#allocation2 + $0xe0] sm:$0xff] }
 0x227   : > { %v1695_v52 = vsel %vm330_vm2, %v7162_v34, %v11848_v51 }
 0x228   : > { %v1611_v42 = vpop.permute.xlu0 %1610  ;;  %v1609_v63 = vpop.permute.xlu1 %1608 }
 0x229   : > { %v1922_v23 = vsel %vm1906_vm10, %v1889_v3, %v1611_v42  ;;  %v1921_v26 = vsel %vm1906_vm10, %v1888_v8, %v1609_v63  ;;  %v11850_v8 = vld [vmem:[#allocation52_spill] sm:$0xff]  ;;  %v11851_v3 = vld [vmem:[#allocation66_spill] sm:$0xff] }
 0x22a   : > { %1126 = vrot.lane.b32.xlu0 %v615_v11, %s8223_s6  ;;  %1124 = vrot.lane.b32.xlu1 %v614_v20, %s8223_s6  ;;  %v1694_v11 = vsel %vm330_vm2, %v7161_v25, %v11847_v6  ;;  %v1728_v42 = vsel %vm1708_vm4, %v1695_v52, %v11850_v8 }
 0x22b   : > { %6952 = vmatprep.mubr.msk.f32.mxu0 %vm1942_vm11, %v1921_v26  ;;  %v1727_v18 = vsel %vm1708_vm4, %v1694_v11, %v11849_v49 }
 0x22c   : > { %6953 = vmatmul.mubr.msk.f32.gmra.mxu0 %vm1942_vm11, %v1922_v23  ;;  %v1357_v61 = vpop.permute.xlu0 %1356  ;;  %v1229_v29 = vpop.permute.xlu1 %1228  ;;  %v1760_v63 = vsel %vm1741_vm5, %v1727_v18, %v11851_v3  ;;  %v11852_v23 = vld [vmem:[#allocation71_spill] sm:$0xff] }
 0x22d   : > { %v1824_v10 = vsel %vm1807_vm7, %v1791_v9, %v1229_v29  ;;  %v1761_v26 = vsel %vm1741_vm5, %v1728_v42, %v11852_v23  ;;  %v587_v29 = vld [vmem:[#allocation2 + $0x1a0] sm:$0xff] }
 0x22e   : > { %1634 = vrot.lane.b32.xlu0 %v647_v54, %s8227_s17  ;;  %1632 = vrot.lane.b32.xlu1 %v646_v46, %s8227_s17  ;;  %v1857_v2 = vsel %vm1840_vm8, %v1824_v10, %v1357_v61  ;;  %v650_v61 = vld [vmem:[#allocation2 + $0x19a] sm:$0xff] }
 0x22f   : > { %v11854_v10 = vld [vmem:[#allocation24_spill] sm:$0xff] }
 0x230   : > { %v1485_v40 = vpop.permute.xlu0 %1484  ;;  %v1231_v37 = vpop.permute.xlu1 %1230 }
 0x231   : > { %v1825_v44 = vsel %vm1807_vm7, %v1792_v57, %v1231_v37  ;;  %v1890_v62 = vsel %vm1873_vm9, %v1857_v2, %v1485_v40  ;;  %v1697_v57 = vsel %vm330_vm2, %v7163_v17, %v11853_v50 }
 0x232   : > { %1380 = vrot.lane.b32.xlu0 %v584_v55, %s8225_s10  ;;  %1252 = vrot.lane.b32.xlu1 %v646_v46, %s8224_s7 }
 0x234   : > { %v1487_v24 = vpop.permute.xlu0 %1486  ;;  %v1359_v41 = vpop.permute.xlu1 %1358 }
 0x235   : > { %v1858_v20 = vsel %vm1840_vm8, %v1825_v44, %v1359_v41 }
 0x236   : > { %1508 = vrot.lane.b32.xlu0 %v616_v35, %s8226_s16  ;;  %1254 = vrot.lane.b32.xlu1 %v647_v54, %s8224_s7  ;;  %v1891_v15 = vsel %vm1873_vm9, %v1858_v20, %v1487_v24  ;;  %v11856_v20 = vld [vmem:[#allocation49_spill] sm:$0xff] }
 0x238   : > { %v1107_v13 = vpop.permute.xlu0 %1106  ;;  %v1105_v30 = vpop.permute.xlu1 %1104 }
 0x239   : > { %v1794_v54 = vsel %vm1774_vm6, %v1761_v26, %v1107_v13  ;;  %v1793_v46 = vsel %vm1774_vm6, %v1760_v63, %v1105_v30  ;;  %v11855_v13 = vld [vmem:[#allocation54_spill] sm:$0xff]  ;;  %v7165_v26 = vld [vmem:[#allocation2 + $0x110] sm:$0xff] }
 0x23a   : > { %1510 = vrot.lane.b32.xlu0 %v617_v58, %s8226_s16  ;;  %1382 = vrot.lane.b32.xlu1 %v585_v32, %s8225_s10  ;;  %v7164_v32 = vld [vmem:[#allocation2 + $0xf0] sm:$0xff]  ;;  %v1730_v30 = vsel %vm1708_vm4, %v1697_v57, %v11855_v13 }
 0x23b   : > { %v1696_v44 = vsel %vm330_vm2, %v7164_v32, %v11854_v10 }
 0x23c   : > { %v1615_v33 = vpop.permute.xlu0 %1614  ;;  %v1613_v28 = vpop.permute.xlu1 %1612  ;;  %v1729_v2 = vsel %vm1708_vm4, %v1696_v44, %v11856_v20 }
 0x23d   : > { %v1924_v56 = vsel %vm1906_vm10, %v1891_v15, %v1615_v33  ;;  %v1923_v0 = vsel %vm1906_vm10, %v1890_v62, %v1613_v28  ;;  %v11857_v62 = vld [vmem:[#allocation73_spill] sm:$0xff]  ;;  %v9513_v15 = vstv %s2268_s25  ;;  %v11858_v28 = vld [vmem:[#allocation68_spill] sm:$0xff] }
 0x23e   : > { %1130 = vrot.lane.b32.xlu0 %v617_v58, %s8223_s6  ;;  %1128 = vrot.lane.b32.xlu1 %v616_v35, %s8223_s6  ;;  %v1763_v33 = vsel %vm1741_vm5, %v1730_v30, %v11857_v62 }
 0x23f   : > { %6955 = vmatprep.mubr.msk.f32.mxu0 %vm1942_vm11, %v1923_v0 }
 0x240   : > { %6956 = vmatmul.mubr.msk.f32.gmra.mxu0 %vm1942_vm11, %v1924_v56  ;;  %v1361_v19 = vpop.permute.xlu0 %1360  ;;  %v1233_v31 = vpop.permute.xlu1 %1232  ;;  %v1762_v56 = vsel %vm1741_vm5, %v1729_v2, %v11858_v28 }
 0x241   : > { %v1826_v55 = vsel %vm1807_vm7, %v1793_v46, %v1233_v31 }
 0x242   : > { %1638 = vrot.lane.b32.xlu0 %v649_v48, %s8227_s17  ;;  %1636 = vrot.lane.b32.xlu1 %v648_v36, %s8227_s17  ;;  %v1859_v22 = vsel %vm1840_vm8, %v1826_v55, %v1361_v19  ;;  %v11860_v55 = vld [vmem:[#allocation26_spill] sm:$0xff] }
 0x244   : > { %v1489_v1 = vpop.permute.xlu0 %1488  ;;  %v1235_v27 = vpop.permute.xlu1 %1234 }
 0x245   : > { %v1827_v40 = vsel %vm1807_vm7, %v1794_v54, %v1235_v27  ;;  %v1892_v4 = vsel %vm1873_vm9, %v1859_v22, %v1489_v1  ;;  %v11859_v54 = vld [vmem:[#allocation31_spill] sm:$0xff] }
 0x246   : > { %1384 = vrot.lane.b32.xlu0 %v586_v39, %s8225_s10  ;;  %1256 = vrot.lane.b32.xlu1 %v648_v36, %s8224_s7  ;;  %v1699_v46 = vsel %vm330_vm2, %v7165_v26, %v11859_v54  ;;  %v11862_v22 = vld [vmem:[#allocation51_spill] sm:$0xff] }
 0x248   : > { %v1491_v60 = vpop.permute.xlu0 %1490  ;;  %v1363_v53 = vpop.permute.xlu1 %1362 }
 0x249   : > { %v1860_v7 = vsel %vm1840_vm8, %v1827_v40, %v1363_v53 }
 0x24a   : > { %1512 = vrot.lane.b32.xlu0 %v618_v5, %s8226_s16  ;;  %1258 = vrot.lane.b32.xlu1 %v649_v48, %s8224_s7  ;;  %v1893_v14 = vsel %vm1873_vm9, %v1860_v7, %v1491_v60 }
 0x24c   : > { %v1111_v37 = vpop.permute.xlu0 %1110  ;;  %v1109_v35 = vpop.permute.xlu1 %1108 }
 0x24d   : > { %v1796_v0 = vsel %vm1774_vm6, %v1763_v33, %v1111_v37  ;;  %v1795_v48 = vsel %vm1774_vm6, %v1762_v56, %v1109_v35  ;;  %v11861_v37 = vld [vmem:[#allocation56_spill] sm:$0xff] }
 0x24e   : > { %1640 = vrot.lane.b32.xlu0 %v650_v61, %s8227_s17  ;;  %1386 = vrot.lane.b32.xlu1 %v587_v29, %s8225_s10  ;;  %v7166_v29 = vld [vmem:[#allocation2 + $0x108] sm:$0xff]  ;;  %v1732_v35 = vsel %vm1708_vm4, %v1699_v46, %v11861_v37 }
 0x24f   : > { %v1698_v40 = vsel %vm330_vm2, %v7166_v29, %v11860_v55 }
 0x250   : > { %v1619_v16 = vpop.permute.xlu0 %1618  ;;  %v1617_v24 = vpop.permute.xlu1 %1616 }
 0x251   : > { %v1926_v41 = vsel %vm1906_vm10, %v1893_v14, %v1619_v16  ;;  %v1925_v21 = vsel %vm1906_vm10, %v1892_v4, %v1617_v24  ;;  %v11863_v4 = vld [vmem:[#allocation75_spill] sm:$0xff]  ;;  %v11864_v14 = vld [vmem:[#allocation70_spill] sm:$0xff] }
 0x252   : > { %1514 = vrot.lane.b32.xlu1 %v619_v47, %s8226_s16  ;;  %6958 = vmatprep.mubr.msk.f32.mxu0 %vm1942_vm11, %v1925_v21  ;;  %v1731_v47 = vsel %vm1708_vm4, %v1698_v40, %v11862_v22  ;;  %v1765_v16 = vsel %vm1741_vm5, %v1732_v35, %v11863_v4 }
 0x253   : > { %6959 = vmatmul.mubr.msk.f32.gmra.mxu0 %vm1942_vm11, %v1926_v41  ;;  %v1764_v24 = vsel %vm1741_vm5, %v1731_v47, %v11864_v14 }
 0x254   : > { %v1365_v38 = vpop.permute.xlu0 %1364  ;;  %v1237_v45 = vpop.permute.xlu1 %1236 }
 0x255   : > { %v1828_v39 = vsel %vm1807_vm7, %v1795_v48, %v1237_v45  ;;  %v7167_v48 = vld [vmem:[#allocation2 + $0x128] sm:$0xff] }
 0x256   : > { %1642 = vrot.lane.b32.xlu1 %v651_v43, %s8227_s17  ;;  %v1861_v34 = vsel %vm1840_vm8, %v1828_v39, %v1365_v38  ;;  %v7168_v39 = vld [vmem:[#allocation2 + $0x120] sm:$0xff] }
 0x258   : > { %v1493_v12 = vpop.permute.xlu0 %1492  ;;  %v1239_v59 = vpop.permute.xlu1 %1238 }
 0x259   : > { %v1829_v36 = vsel %vm1807_vm7, %v1796_v0, %v1239_v59  ;;  %v1894_v60 = vsel %vm1873_vm9, %v1861_v34, %v1493_v12  ;;  %v11868_v34 = vld [vmem:[#allocation53_spill] sm:$0xff] }
 0x25c   : > { %v1495_v9 = vpop.permute.xlu0 %1494  ;;  %v1367_v58 = vpop.permute.xlu1 %1366 }
 0x25d   : > { %v1862_v1 = vsel %vm1840_vm8, %v1829_v36, %v1367_v58  ;;  %v11865_v36 = vld [vmem:[#allocation34_spill] sm:$0xff] }
 0x25e   : > { %v1895_v52 = vsel %vm1873_vm9, %v1862_v1, %v1495_v9  ;;  %v11866_v1 = vld [vmem:[#allocation28_spill] sm:$0xff] }
 0x260   : > { %v6933_v19 = vpop.f32.mrf.mxu0  ;;  %v1115_v31 = vpop.permute.xlu0 %1114 }
 0x261   : > { %vm2270_vm12 = vcmp.ge.f32.partialorder %v6933_v19, 0.0  ;;  %v2303_v27 = vmul.f32 %v6933_v19, %v9513_v15  ;;  %v1113_v5 = vpop.permute.xlu1 %1112  ;;  %v1798_v41 = vsel %vm1774_vm6, %v1765_v16, %v1115_v31 }
 0x262   : > { %v2109_v25 = vpop.f32.mrf.mxu0  ;;  %v1797_v21 = vsel %vm1774_vm6, %v1764_v24, %v1113_v5  ;;  %v11867_v5 = vld [vmem:[#allocation58_spill] sm:$0xff] }
 0x263   : > { %v9523_v6 = vsel %vm2270_vm12, %v6933_v19, %v2303_v27  ;;  %vm2269_vm13 = vcmp.ge.f32.partialorder %v2109_v25, 0.0  ;;  %v2302_v11 = vmul.f32 %v9513_v15, %v2109_v25  ;;  %v1701_v19 = vsel %vm330_vm2, %v7167_v48, %v11865_v36 }
 0x264   : > { %v1623_v51 = vpop.permute.xlu0 %1622  ;;  %v1700_v27 = vsel %vm330_vm2, %v7168_v39, %v11866_v1 }
 0x265   : > { %v9529_v53 = vsel %vm2269_vm13, %v2109_v25, %v2302_v11  ;;  %v1928_v49 = vsel %vm1906_vm10, %v1895_v52, %v1623_v51  ;;  %v1621_v18 = vpop.permute.xlu1 %1620  ;;  %v1734_v25 = vsel %vm1708_vm4, %v1701_v19, %v11867_v5  ;;  %v1733_v51 = vsel %vm1708_vm4, %v1700_v27, %v11868_v34  ;;  %v11869_v52 = vld [vmem:[#allocation77_spill] sm:$0xff] }
 0x266   : > { %v1927_v8 = vsel %vm1906_vm10, %v1894_v60, %v1621_v18  ;;  %v1767_v60 = vsel %vm1741_vm5, %v1734_v25, %v11869_v52 }
 0x267   : > { %6961 = vmatprep.mubr.msk.f32.mxu0 %vm1942_vm11, %v1927_v8 }
 0x268   : > { %6962 = vmatmul.mubr.msk.f32.gmra.mxu0 %vm1942_vm11, %v1928_v49  ;;  %v1369_v42 = vpop.permute.xlu0 %1368  ;;  %v11870_v49 = vld [vmem:[#allocation72_spill] sm:$0xff] }
 0x269   : > { %v1241_v3 = vpop.permute.xlu1 %1240  ;;  %v1766_v18 = vsel %vm1741_vm5, %v1733_v51, %v11870_v49 }
 0x26a   : > { %v1830_v12 = vsel %vm1807_vm7, %v1797_v21, %v1241_v3 }
 0x26b   : > { %v1863_v32 = vsel %vm1840_vm8, %v1830_v12, %v1369_v42 }
 0x26c   : > { %v1497_v63 = vpop.permute.xlu0 %1496 }
 0x26d   : > { %v1243_v23 = vpop.permute.xlu1 %1242  ;;  %v1896_v13 = vsel %vm1873_vm9, %v1863_v32, %v1497_v63 }
 0x26e   : > { %v1831_v43 = vsel %vm1807_vm7, %v1798_v41, %v1243_v23 }
 0x270   : > { %v1499_v61 = vpop.permute.xlu0 %1498 }
 0x271   : > { %v1371_v7 = vpop.permute.xlu1 %1370 }
 0x272   : > { %v1864_v59 = vsel %vm1840_vm8, %v1831_v43, %v1371_v7 }
 0x273   : > { %v1897_v44 = vsel %vm1873_vm9, %v1864_v59, %v1499_v61 }
 0x274   : > { %v6936_v38 = vpop.f32.mrf.mxu0  ;;  %v1119_v45 = vpop.permute.xlu0 %1118 }
 0x275   : > { %vm2272_vm14 = vcmp.ge.f32.partialorder %v6936_v38, 0.0  ;;  %v2305_v17 = vmul.f32 %v6936_v38, %v9513_v15  ;;  %v1117_v50 = vpop.permute.xlu1 %1116  ;;  %v1800_v8 = vsel %vm1774_vm6, %v1767_v60, %v1119_v45  ;;  %v11871_v45 = vld [vmem:[#allocation37_spill] sm:$0xff] }
 0x276   : > { %v2119_v57 = vpop.f32.mrf.mxu0  ;;  %v1799_v42 = vsel %vm1774_vm6, %v1766_v18, %v1117_v50  ;;  %v11872_v50 = vld [vmem:[#allocation30_spill] sm:$0xff] }
 0x277   : > { %v9553_v9 = vsel %vm2272_vm14, %v6936_v38, %v2305_v17  ;;  %vm2271_vm15 = vcmp.ge.f32.partialorder %v2119_v57, 0.0  ;;  %v2304_v58 = vmul.f32 %v9513_v15, %v2119_v57  ;;  %v7169_v38 = vld [vmem:[#allocation2 + $0x140] sm:$0xff]  ;;  %v7170_v17 = vld [vmem:[#allocation2 + $0x138] sm:$0xff] }
 0x278   : > { %v1627_v10 = vpop.permute.xlu0 %1626  ;;  %v1703_v12 = vsel %vm330_vm2, %v7169_v38, %v11871_v45 }
 0x279   : > { %v9559_v30 = vsel %vm2271_vm15, %v2119_v57, %v2304_v58  ;;  %v1930_v20 = vsel %vm1906_vm10, %v1897_v44, %v1627_v10  ;;  %v1625_v2 = vpop.permute.xlu1 %1624  ;;  %v1702_v57 = vsel %vm330_vm2, %v7170_v17, %v11872_v50  ;;  %v11873_v58 = vld [vmem:[#allocation60_spill] sm:$0xff]  ;;  %v11874_v44 = vld [vmem:[#allocation55_spill] sm:$0xff] }
 0x27a   : > { %v1929_v62 = vsel %vm1906_vm10, %v1896_v13, %v1625_v2  ;;  %v1736_v32 = vsel %vm1708_vm4, %v1703_v12, %v11873_v58  ;;  %v1735_v13 = vsel %vm1708_vm4, %v1702_v57, %v11874_v44 }
 0x27b   : > { %6964 = vmatprep.mubr.msk.f32.mxu0 %vm1942_vm11, %v1929_v62  ;;  %v11876_v62 = vld [vmem:[#allocation74_spill] sm:$0xff] }
 0x27c   : > { %6965 = vmatmul.mubr.msk.f32.gmra.mxu0 %vm1942_vm11, %v1930_v20  ;;  %v1373_v33 = vpop.permute.xlu0 %1372  ;;  %v11875_v20 = vld [vmem:[#allocation79_spill] sm:$0xff] }
 0x27d   : > { %v1245_v28 = vpop.permute.xlu1 %1244  ;;  %v1769_v2 = vsel %vm1741_vm5, %v1736_v32, %v11875_v20 }
 0x27e   : > { %v1832_v26 = vsel %vm1807_vm7, %v1799_v42, %v1245_v28 }
 0x27f   : > { %v1865_v37 = vsel %vm1840_vm8, %v1832_v26, %v1373_v33  ;;  %v1768_v33 = vsel %vm1741_vm5, %v1735_v13, %v11876_v62  ;;  %v7171_v26 = vld [vmem:[#allocation2 + $0x158] sm:$0xff] }
 0x280   : > { %v1501_v56 = vpop.permute.xlu0 %1500 }
 0x281   : > { %v1247_v0 = vpop.permute.xlu1 %1246  ;;  %v1898_v22 = vsel %vm1873_vm9, %v1865_v37, %v1501_v56 }
 0x282   : > { %v1833_v3 = vsel %vm1807_vm7, %v1800_v8, %v1247_v0 }
 0x284   : > { %v1503_v31 = vpop.permute.xlu0 %1502 }
 0x285   : > { %v1375_v11 = vpop.permute.xlu1 %1374 }
 0x286   : > { %v1866_v54 = vsel %vm1840_vm8, %v1833_v3, %v1375_v11 }
 0x287   : > { %v1899_v7 = vsel %vm1873_vm9, %v1866_v54, %v1503_v31  ;;  %v11877_v54 = vld [vmem:[#allocation39_spill] sm:$0xff] }
 0x288   : > { %v6939_v63 = vpop.f32.mrf.mxu0  ;;  %v1123_v23 = vpop.permute.xlu0 %1122 }
 0x289   : > { %vm2274_vm0 = vcmp.ge.f32.partialorder %v6939_v63, 0.0  ;;  %v2307_v46 = vmul.f32 %v6939_v63, %v9513_v15  ;;  %v1121_v61 = vpop.permute.xlu1 %1120  ;;  %v1802_v28 = vsel %vm1774_vm6, %v1769_v2, %v1123_v23 }
 0x28a   : > { %v2129_v29 = vpop.f32.mrf.mxu0  ;;  %v1801_v56 = vsel %vm1774_vm6, %v1768_v33, %v1121_v61 }
 0x28b   : > { %v9583_v55 = vsel %vm2274_vm0, %v6939_v63, %v2307_v46  ;;  %vm2273_vm1 = vcmp.ge.f32.partialorder %v2129_v29, 0.0  ;;  %v2306_v40 = vmul.f32 %v9513_v15, %v2129_v29  ;;  %v1705_v46 = vsel %vm330_vm2, %v7171_v26, %v11877_v54  ;;  %v11886_v26 = vld [vmem:[#allocation41_spill] sm:$0xff] }
 0x28c   : > { %v1631_v35 = vpop.permute.xlu0 %1630 }
 0x28d   : > { %v9589_v47 = vsel %vm2273_vm1, %v2129_v29, %v2306_v40  ;;  %v1932_v4 = vsel %vm1906_vm10, %v1899_v7, %v1631_v35  ;;  %v1629_v16 = vpop.permute.xlu1 %1628  ;;  %v7172_v29 = vld [vmem:[#allocation2 + $0x150] sm:$0xff]  ;;  %v11878_v40 = vld [vmem:[#allocation33_spill] sm:$0xff] }
 0x28e   : > { %v1931_v14 = vsel %vm1906_vm10, %v1898_v22, %v1629_v16  ;;  %v1704_v37 = vsel %vm330_vm2, %v7172_v29, %v11878_v40  ;;  %v11879_v35 = vld [vmem:[#allocation61_spill] sm:$0xff] }
 0x28f   : > { %6967 = vmatprep.mubr.msk.f32.mxu0 %vm1942_vm11, %v1931_v14  ;;  %v1738_v7 = vsel %vm1708_vm4, %v1705_v46, %v11879_v35  ;;  %v11881_v14 = vld [vmem:[#allocation80_spill] sm:$0xff]  ;;  %v11887_v46 = vld [vmem:[#allocation62_spill] sm:$0xff]  ;;  %v11888_v40 = vld [vmem:[#allocation81_spill] sm:$0xff] }
 0x290   : > { %6968 = vmatmul.mubr.msk.f32.gmra.mxu0 %vm1942_vm11, %v1932_v4  ;;  %v1377_v24 = vpop.permute.xlu0 %1376  ;;  %v11880_v4 = vld [vmem:[#allocation57_spill] sm:$0xff] }
 0x291   : > { %v1249_v41 = vpop.permute.xlu1 %1248  ;;  %v1737_v16 = vsel %vm1708_vm4, %v1704_v37, %v11880_v4 }
 0x292   : > { %v1834_v19 = vsel %vm1807_vm7, %v1801_v56, %v1249_v41  ;;  %v11882_v41 = vld [vmem:[#allocation76_spill] sm:$0xff] }
 0x293   : > { %v1867_v11 = vsel %vm1840_vm8, %v1834_v19, %v1377_v24  ;;  %v1771_v24 = vsel %vm1741_vm5, %v1738_v7, %v11881_v14 }
 0x294   : > { %v1505_v21 = vpop.permute.xlu0 %1504 }
 0x295   : > { %v1251_v43 = vpop.permute.xlu1 %1250  ;;  %v1900_v52 = vsel %vm1873_vm9, %v1867_v11, %v1505_v21  ;;  %v1770_v21 = vsel %vm1741_vm5, %v1737_v16, %v11882_v41 }
 0x296   : > { %v1835_v0 = vsel %vm1807_vm7, %v1802_v28, %v1251_v43 }
 0x298   : > { %v1507_v59 = vpop.permute.xlu0 %1506 }
 0x299   : > { %v1379_v10 = vpop.permute.xlu1 %1378 }
 0x29a   : > { %v1868_v31 = vsel %vm1840_vm8, %v1835_v0, %v1379_v10 }
 0x29b   : > { %v1901_v51 = vsel %vm1873_vm9, %v1868_v31, %v1507_v59 }
 0x29c   : > { %v6942_v48 = vpop.f32.mrf.mxu0  ;;  %v1127_v36 = vpop.permute.xlu0 %1126 }
 0x29d   : > { %vm2276_vm3 = vcmp.ge.f32.partialorder %v6942_v48, 0.0  ;;  %v2309_v39 = vmul.f32 %v6942_v48, %v9513_v15  ;;  %v1125_v1 = vpop.permute.xlu1 %1124  ;;  %v1804_v43 = vsel %vm1774_vm6, %v1771_v24, %v1127_v36  ;;  %v11883_v36 = vld [vmem:[#allocation36_spill] sm:$0xff] }
 0x29e   : > { %v2139_v27 = vpop.f32.mrf.mxu0  ;;  %v1803_v38 = vsel %vm1774_vm6, %v1770_v21, %v1125_v1 }
 0x29f   : > { %v9613_v5 = vsel %vm2276_vm3, %v6942_v48, %v2309_v39  ;;  %vm2275_vm12 = vcmp.ge.f32.partialorder %v2139_v27, 0.0  ;;  %v2308_v25 = vmul.f32 %v9513_v15, %v2139_v27  ;;  %v7173_v48 = vld [vmem:[#allocation2 + $0x168] sm:$0xff]  ;;  %v11884_v39 = vld [vmem:[#allocation59_spill] sm:$0xff] }
 0x2a0   : > { %v1635_v34 = vpop.permute.xlu0 %1634  ;;  %v1706_v19 = vsel %vm330_vm2, %v7173_v48, %v11883_v36 }
 0x2a1   : > { %v9619_v60 = vsel %vm2275_vm12, %v2139_v27, %v2308_v25  ;;  %v1934_v49 = vsel %vm1906_vm10, %v1901_v51, %v1635_v34  ;;  %v1633_v18 = vpop.permute.xlu1 %1632  ;;  %v1739_v1 = vsel %vm1708_vm4, %v1706_v19, %v11884_v39  ;;  %v11885_v25 = vld [vmem:[#allocation78_spill] sm:$0xff] }
 0x2a2   : > { %v1933_v8 = vsel %vm1906_vm10, %v1900_v52, %v1633_v18  ;;  %v1772_v11 = vsel %vm1741_vm5, %v1739_v1, %v11885_v25 }
 0x2a3   : > { %6970 = vmatprep.mubr.msk.f32.mxu0 %vm1942_vm11, %v1933_v8 }
 0x2a4   : > { %6971 = vmatmul.mubr.msk.f32.gmra.mxu0 %vm1942_vm11, %v1934_v49  ;;  %v1381_v42 = vpop.permute.xlu0 %1380 }
 0x2a5   : > { %v1253_v3 = vpop.permute.xlu1 %1252 }
 0x2a6   : > { %v1836_v17 = vsel %vm1807_vm7, %v1803_v38, %v1253_v3 }
 0x2a7   : > { %v1869_v13 = vsel %vm1840_vm8, %v1836_v17, %v1381_v42 }
 0x2a8   : > { %v1509_v63 = vpop.permute.xlu0 %1508 }
 0x2a9   : > { %v1255_v23 = vpop.permute.xlu1 %1254  ;;  %v1902_v62 = vsel %vm1873_vm9, %v1869_v13, %v1509_v63 }
 0x2aa   : > { %v1837_v45 = vsel %vm1807_vm7, %v1804_v43, %v1255_v23  ;;  %v7174_v23 = vld [vmem:[#allocation2 + $0x170] sm:$0xff] }
 0x2ab   : > { %v1707_v54 = vsel %vm330_vm2, %v7174_v23, %v11886_v26 }
 0x2ac   : > { %v1511_v61 = vpop.permute.xlu0 %1510 }
 0x2ad   : > { %v1383_v22 = vpop.permute.xlu1 %1382 }
 0x2ae   : > { %v1870_v50 = vsel %vm1840_vm8, %v1837_v45, %v1383_v22 }
 0x2af   : > { %v1903_v2 = vsel %vm1873_vm9, %v1870_v50, %v1511_v61  ;;  %v1740_v61 = vsel %vm1708_vm4, %v1707_v54, %v11887_v46 }
 0x2b0   : > { %v6945_v12 = vpop.f32.mrf.mxu0  ;;  %v1131_v59 = vpop.permute.xlu0 %1130  ;;  %v1773_v37 = vsel %vm1741_vm5, %v1740_v61, %v11888_v40 }
 0x2b1   : > { %vm2278_vm13 = vcmp.ge.f32.partialorder %v6945_v12, 0.0  ;;  %v2311_v57 = vmul.f32 %v6945_v12, %v9513_v15  ;;  %v1129_v58 = vpop.permute.xlu1 %1128  ;;  %v1806_v22 = vsel %vm1774_vm6, %v1773_v37, %v1131_v59 }
 0x2b2   : > { %v2149_v32 = vpop.f32.mrf.mxu0  ;;  %v1805_v34 = vsel %vm1774_vm6, %v1772_v11, %v1129_v58 }
 0x2b3   : > { %v9643_v10 = vsel %vm2278_vm13, %v6945_v12, %v2311_v57  ;;  %vm2277_vm14 = vcmp.ge.f32.partialorder %v2149_v32, 0.0  ;;  %v2310_v44 = vmul.f32 %v9513_v15, %v2149_v32 }
 0x2b4   : > { %v1639_v20 = vpop.permute.xlu0 %1638 }
 0x2b5   : > { %v9649_v33 = vsel %vm2277_vm14, %v2149_v32, %v2310_v44  ;;  %v1936_v28 = vsel %vm1906_vm10, %v1903_v2, %v1639_v20  ;;  %v1637_v56 = vpop.permute.xlu1 %1636 }
 0x2b6   : > { %v1935_v0 = vsel %vm1906_vm10, %v1902_v62, %v1637_v56 }
 0x2b7   : > { %6973 = vmatprep.mubr.msk.f32.mxu0 %vm1942_vm11, %v1935_v0 }
 0x2b8   : > { %6974 = vmatmul.mubr.msk.f32.gmra.mxu0 %vm1942_vm11, %v1936_v28  ;;  %v1385_v31 = vpop.permute.xlu0 %1384 }
 0x2b9   : > { %v1257_v27 = vpop.permute.xlu1 %1256 }
 0x2ba   : > { %v1838_v51 = vsel %vm1807_vm7, %v1805_v34, %v1257_v27 }
 0x2bb   : > { %v1871_v18 = vsel %vm1840_vm8, %v1838_v51, %v1385_v31 }
 0x2bc   : > { %v1513_v52 = vpop.permute.xlu0 %1512 }
 0x2bd   : > { %v1259_v49 = vpop.permute.xlu1 %1258  ;;  %v1904_v8 = vsel %vm1873_vm9, %v1871_v18, %v1513_v52 }
 0x2be   : > { %v1839_v16 = vsel %vm1807_vm7, %v1806_v22, %v1259_v49 }
 0x2c0   : > { %v1641_v42 = vpop.permute.xlu0 %1640 }
 0x2c1   : > { %v1937_v3 = vsel %vm1906_vm10, %v1904_v8, %v1641_v42  ;;  %v1387_v63 = vpop.permute.xlu1 %1386 }
 0x2c2   : > { %6976 = vmatprep.mubr.msk.f32.mxu0 %vm1942_vm11, %v1937_v3  ;;  %v1872_v41 = vsel %vm1840_vm8, %v1839_v16, %v1387_v63 }
 0x2c4   : > { %v6948_v29 = vpop.f32.mrf.mxu0 }
 0x2c5   : > { %vm2280_vm15 = vcmp.ge.f32.partialorder %v6948_v29, 0.0  ;;  %v2313_v35 = vmul.f32 %v6948_v29, %v9513_v15  ;;  %v1515_v7 = vpop.permute.xlu1 %1514 }
 0x2c6   : > { %v2159_v4 = vpop.f32.mrf.mxu0  ;;  %v1905_v21 = vsel %vm1873_vm9, %v1872_v41, %v1515_v7 }
 0x2c7   : > { %v9676_v14 = vsel %vm2280_vm15, %v6948_v29, %v2313_v35  ;;  %vm2279_vm0 = vcmp.ge.f32.partialorder %v2159_v4, 0.0  ;;  %v2312_v24 = vmul.f32 %v9513_v15, %v2159_v4 }
 0x2c9   : > { %v9681_v43 = vsel %vm2279_vm0, %v2159_v4, %v2312_v24  ;;  %v1643_v38 = vpop.permute.xlu1 %1642 }
 0x2ca   : > { %v1938_v45 = vsel %vm1906_vm10, %v1905_v21, %v1643_v38 }
 0x2cb   : > { %6977 = vmatmul.mubr.msk.f32.gmra.mxu0 %vm1942_vm11, %v1938_v45 }
 0x2d8   : > { %v6951_v12 = vpop.f32.mrf.mxu0 }
 0x2d9   : > { %vm2282_vm2 = vcmp.ge.f32.partialorder %v6951_v12, 0.0  ;;  %v2315_v59 = vmul.f32 %v6951_v12, %v9513_v15 }
 0x2da   : > { %v2169_v17 = vpop.f32.mrf.mxu0 }
 0x2db   : > { %v9686_v50 = vsel %vm2282_vm2, %v6951_v12, %v2315_v59  ;;  %vm2281_vm4 = vcmp.ge.f32.partialorder %v2169_v17, 0.0  ;;  %v2314_v57 = vmul.f32 %v9513_v15, %v2169_v17 }
 0x2dd   : > { %v9689_v58 = vsel %vm2281_vm4, %v2169_v17, %v2314_v57 }
 0x2ec   : > { %v6954_v32 = vpop.f32.mrf.mxu0 }
 0x2ed   : > { %vm2284_vm5 = vcmp.ge.f32.partialorder %v6954_v32, 0.0  ;;  %v2317_v44 = vmul.f32 %v6954_v32, %v9513_v15 }
 0x2ee   : > { %v2179_v13 = vpop.f32.mrf.mxu0 }
 0x2ef   : > { %v9692_v20 = vsel %vm2284_vm5, %v6954_v32, %v2317_v44  ;;  %vm2283_vm6 = vcmp.ge.f32.partialorder %v2179_v13, 0.0  ;;  %v2316_v2 = vmul.f32 %v9513_v15, %v2179_v13 }
 0x2f1   : > { %v9695_v62 = vsel %vm2283_vm6, %v2179_v13, %v2316_v2 }
 0x300   : > { %v6957_v28 = vpop.f32.mrf.mxu0 }
 0x301   : > { %vm2286_vm7 = vcmp.ge.f32.partialorder %v6957_v28, 0.0  ;;  %v2319_v56 = vmul.f32 %v6957_v28, %v9513_v15 }
 0x302   : > { %v2189_v0 = vpop.f32.mrf.mxu0 }
 0x303   : > { %v9698_v48 = vsel %vm2286_vm7, %v6957_v28, %v2319_v56  ;;  %vm2285_vm8 = vcmp.ge.f32.partialorder %v2189_v0, 0.0  ;;  %v2318_v36 = vmul.f32 %v9513_v15, %v2189_v0 }
 0x305   : > { %v9701_v19 = vsel %vm2285_vm8, %v2189_v0, %v2318_v36 }
 0x313   : > { %v6960_v31 = vpop.f32.mrf.mxu0 }
 0x314   : > { %vm2288_vm9 = vcmp.ge.f32.partialorder %v6960_v31, 0.0  ;;  %v2321_v39 = vmul.f32 %v6960_v31, %v9513_v15 }
 0x315   : > { %v2199_v1 = vpop.f32.mrf.mxu0 }
 0x316   : > { %v9704_v27 = vsel %vm2288_vm9, %v6960_v31, %v2321_v39  ;;  %vm2287_vm11 = vcmp.ge.f32.partialorder %v2199_v1, 0.0  ;;  %v2320_v25 = vmul.f32 %v9513_v15, %v2199_v1 }
 0x318   : > { %v9707_v11 = vsel %vm2287_vm11, %v2199_v1, %v2320_v25 }
 0x328   : > { %v6963_v34 = vpop.f32.mrf.mxu0 }
 0x329   : > { %vm2290_vm1 = vcmp.ge.f32.partialorder %v6963_v34, 0.0  ;;  %v2323_v51 = vmul.f32 %v6963_v34, %v9513_v15 }
 0x32a   : > { %v2209_v52 = vpop.f32.mrf.mxu0 }
 0x32b   : > { %v9710_v49 = vsel %vm2290_vm1, %v6963_v34, %v2323_v51  ;;  %vm2289_vm3 = vcmp.ge.f32.partialorder %v2209_v52, 0.0  ;;  %v2322_v18 = vmul.f32 %v9513_v15, %v2209_v52 }
 0x32d   : > { %v9713_v8 = vsel %vm2289_vm3, %v2209_v52, %v2322_v18 }
 0x33c   : > { %v6966_v42 = vpop.f32.mrf.mxu0 }
 0x33d   : > { %vm2292_vm12 = vcmp.ge.f32.partialorder %v6966_v42, 0.0  ;;  %v2325_v3 = vmul.f32 %v6966_v42, %v9513_v15 }
 0x33e   : > { %v2219_v63 = vpop.f32.mrf.mxu0 }
 0x33f   : > { %v9716_v23 = vsel %vm2292_vm12, %v6966_v42, %v2325_v3  ;;  %vm2291_vm13 = vcmp.ge.f32.partialorder %v2219_v63, 0.0  ;;  %v2324_v26 = vmul.f32 %v9513_v15, %v2219_v63 }
 0x341   : > { %v9719_v54 = vsel %vm2291_vm13, %v2219_v63, %v2324_v26 }
 0x350   : > { %v6969_v46 = vpop.f32.mrf.mxu0 }
 0x351   : > { %vm2294_vm14 = vcmp.ge.f32.partialorder %v6969_v46, 0.0  ;;  %v2327_v61 = vmul.f32 %v6969_v46, %v9513_v15 }
 0x352   : > { %v2229_v29 = vpop.f32.mrf.mxu0 }
 0x353   : > { %v9722_v40 = vsel %vm2294_vm14, %v6969_v46, %v2327_v61  ;;  %vm2293_vm15 = vcmp.ge.f32.partialorder %v2229_v29, 0.0  ;;  %v2326_v37 = vmul.f32 %v9513_v15, %v2229_v29 }
 0x355   : > { %v9725_v35 = vsel %vm2293_vm15, %v2229_v29, %v2326_v37 }
 0x364   : > { %v6972_v7 = vpop.f32.mrf.mxu0 }
 0x365   : > { %vm2296_vm0 = vcmp.ge.f32.partialorder %v6972_v7, 0.0  ;;  %v2329_v22 = vmul.f32 %v6972_v7, %v9513_v15 }
 0x366   : > { %v2239_v4 = vpop.f32.mrf.mxu0 }
 0x367   : > { %v9728_v16 = vsel %vm2296_vm0, %v6972_v7, %v2329_v22  ;;  %vm2295_vm2 = vcmp.ge.f32.partialorder %v2239_v4, 0.0  ;;  %v2328_v24 = vmul.f32 %v9513_v15, %v2239_v4 }
 0x369   : > { %v9731_v41 = vsel %vm2295_vm2, %v2239_v4, %v2328_v24 }
 0x378   : > { %v6975_v21 = vpop.f32.mrf.mxu0 }
 0x379   : > { %vm2298_vm4 = vcmp.ge.f32.partialorder %v6975_v21, 0.0  ;;  %v2331_v38 = vmul.f32 %v6975_v21, %v9513_v15 }
 0x37a   : > { %v2249_v45 = vpop.f32.mrf.mxu0 }
 0x37b   : > { %v9734_v12 = vsel %vm2298_vm4, %v6975_v21, %v2331_v38  ;;  %vm2297_vm5 = vcmp.ge.f32.partialorder %v2249_v45, 0.0  ;;  %v2330_v59 = vmul.f32 %v9513_v15, %v2249_v45 }
 0x37d   : > { %v9737_v17 = vsel %vm2297_vm5, %v2249_v45, %v2330_v59 }
 0x38b   : > { %v6978_v57 = vpop.f32.mrf.mxu0 }
 0x38c   : > { %vm2300_vm6 = vcmp.ge.f32.partialorder %v6978_v57, 0.0  ;;  %v2333_v32 = vmul.f32 %v6978_v57, %v9513_v15  ;;  %2368 = sbr.rel (%p11889_p10) target bundleno = 941 (0x3ad), region = 52 }
 0x38d   : > { %v2259_v44 = vpop.f32.mrf.mxu0 }
 0x38e   : > { %v9740_v13 = vsel %vm2300_vm6, %v6978_v57, %v2333_v32  ;;  %vm2299_vm7 = vcmp.ge.f32.partialorder %v2259_v44, 0.0  ;;  %v2332_v2 = vmul.f32 %v9513_v15, %v2259_v44 }
 0x390   : > { %v9743_v28 = vsel %vm2299_vm7, %v2259_v44, %v2332_v2 }
 0x391   : > { %vm2369_vm8 = vcmask 261120   ;;  %vm2372_vm9 = vcmask 254976   ;;  %v8228_v56 = vmov 0.0  }
 0x392   : > { %2370 = vst.msk [vmem:[#allocation3] sm:$0xff] %vm2369_vm8, %v8228_v56  ;;  %2371 = vst.msk [vmem:[#allocation3 + $0x8] sm:$0xff] %vm2369_vm8, %v8228_v56 }
 0x393   : > { %2374 = vst.msk [vmem:[#allocation3 + $0x18] sm:$0xff] %vm2369_vm8, %v8228_v56  ;;  %2375 = vst.msk [vmem:[#allocation3 + $0x20] sm:$0xff] %vm2369_vm8, %v8228_v56 }
 0x394   : > { %2377 = vst.msk [vmem:[#allocation3 + $0x30] sm:$0xff] %vm2369_vm8, %v8228_v56  ;;  %2378 = vst.msk [vmem:[#allocation3 + $0x38] sm:$0xff] %vm2369_vm8, %v8228_v56 }
 0x395   : > { %2380 = vst.msk [vmem:[#allocation3 + $0x48] sm:$0xff] %vm2369_vm8, %v8228_v56  ;;  %2381 = vst.msk [vmem:[#allocation3 + $0x50] sm:$0xff] %vm2369_vm8, %v8228_v56 }
 0x396   : > { %2383 = vst.msk [vmem:[#allocation3 + $0x60] sm:$0xff] %vm2369_vm8, %v8228_v56  ;;  %2384 = vst.msk [vmem:[#allocation3 + $0x68] sm:$0xff] %vm2369_vm8, %v8228_v56 }
 0x397   : > { %2386 = vst.msk [vmem:[#allocation3 + $0x78] sm:$0xff] %vm2369_vm8, %v8228_v56  ;;  %2387 = vst.msk [vmem:[#allocation3 + $0x80] sm:$0xff] %vm2369_vm8, %v8228_v56 }
 0x398   : > { %2389 = vst.msk [vmem:[#allocation3 + $0x90] sm:$0xff] %vm2369_vm8, %v8228_v56  ;;  %2390 = vst.msk [vmem:[#allocation3 + $0x98] sm:$0xff] %vm2369_vm8, %v8228_v56 }
 0x399   : > { %2392 = vst.msk [vmem:[#allocation3 + $0xa8] sm:$0xff] %vm2369_vm8, %v8228_v56  ;;  %2393 = vst.msk [vmem:[#allocation3 + $0xb0] sm:$0xff] %vm2369_vm8, %v8228_v56 }
 0x39a   : > { %2395 = vst.msk [vmem:[#allocation3 + $0xc0] sm:$0xff] %vm2369_vm8, %v8228_v56  ;;  %2396 = vst.msk [vmem:[#allocation3 + $0xc8] sm:$0xff] %vm2369_vm8, %v8228_v56 }
 0x39b   : > { %2398 = vst.msk [vmem:[#allocation3 + $0xd8] sm:$0xff] %vm2369_vm8, %v8228_v56  ;;  %2399 = vst.msk [vmem:[#allocation3 + $0xe0] sm:$0xff] %vm2369_vm8, %v8228_v56 }
 0x39c   : > { %2401 = vst.msk [vmem:[#allocation3 + $0xf0] sm:$0xff] %vm2369_vm8, %v8228_v56  ;;  %2402 = vst.msk [vmem:[#allocation3 + $0xf8] sm:$0xff] %vm2369_vm8, %v8228_v56 }
 0x39d   : > { %2404 = vst.msk [vmem:[#allocation3 + $0x108] sm:$0xff] %vm2369_vm8, %v8228_v56  ;;  %2405 = vst.msk [vmem:[#allocation3 + $0x110] sm:$0xff] %vm2369_vm8, %v8228_v56 }
 0x39e   : > { %2407 = vst.msk [vmem:[#allocation3 + $0x120] sm:$0xff] %vm2369_vm8, %v8228_v56  ;;  %2408 = vst.msk [vmem:[#allocation3 + $0x128] sm:$0xff] %vm2369_vm8, %v8228_v56 }
 0x39f   : > { %2410 = vst.msk [vmem:[#allocation3 + $0x138] sm:$0xff] %vm2369_vm8, %v8228_v56  ;;  %2411 = vst.msk [vmem:[#allocation3 + $0x140] sm:$0xff] %vm2369_vm8, %v8228_v56 }
 0x3a0   : > { %2413 = vst.msk [vmem:[#allocation3 + $0x150] sm:$0xff] %vm2369_vm8, %v8228_v56  ;;  %2414 = vst.msk [vmem:[#allocation3 + $0x158] sm:$0xff] %vm2369_vm8, %v8228_v56 }
 0x3a1   : > { %2416 = vst.msk [vmem:[#allocation3 + $0x168] sm:$0xff] %vm2369_vm8, %v8228_v56  ;;  %2417 = vst.msk [vmem:[#allocation3 + $0x170] sm:$0xff] %vm2369_vm8, %v8228_v56 }
 0x3a2   : > { %2419 = vst.msk [vmem:[#allocation3 + $0x180] sm:$0xff] %vm2369_vm8, %v8228_v56  ;;  %2420 = vst.msk [vmem:[#allocation3 + $0x188] sm:$0xff] %vm2369_vm8, %v8228_v56 }
 0x3a3   : > { %2422 = vst.msk [vmem:[#allocation3 + $0x198] sm:$0xff] %vm2369_vm8, %v8228_v56  ;;  %2423 = vst.msk [vmem:[#allocation3 + $0x1a0] sm:$0xff] %vm2369_vm8, %v8228_v56 }
 0x3a4   : > { %2373 = vst.msk [vmem:[#allocation3 + $0x10] sm:$0x3] %vm2372_vm9, %v8228_v56  ;;  %2376 = vst.msk [vmem:[#allocation3 + $0x28] sm:$0x3] %vm2372_vm9, %v8228_v56 }
 0x3a5   : > { %2379 = vst.msk [vmem:[#allocation3 + $0x40] sm:$0x3] %vm2372_vm9, %v8228_v56  ;;  %2382 = vst.msk [vmem:[#allocation3 + $0x58] sm:$0x3] %vm2372_vm9, %v8228_v56 }
 0x3a6   : > { %2385 = vst.msk [vmem:[#allocation3 + $0x70] sm:$0x3] %vm2372_vm9, %v8228_v56  ;;  %2388 = vst.msk [vmem:[#allocation3 + $0x88] sm:$0x3] %vm2372_vm9, %v8228_v56 }
 0x3a7   : > { %2391 = vst.msk [vmem:[#allocation3 + $0xa0] sm:$0x3] %vm2372_vm9, %v8228_v56  ;;  %2394 = vst.msk [vmem:[#allocation3 + $0xb8] sm:$0x3] %vm2372_vm9, %v8228_v56 }
 0x3a8   : > { %2397 = vst.msk [vmem:[#allocation3 + $0xd0] sm:$0x3] %vm2372_vm9, %v8228_v56  ;;  %2400 = vst.msk [vmem:[#allocation3 + $0xe8] sm:$0x3] %vm2372_vm9, %v8228_v56 }
 0x3a9   : > { %2403 = vst.msk [vmem:[#allocation3 + $0x100] sm:$0x3] %vm2372_vm9, %v8228_v56  ;;  %2406 = vst.msk [vmem:[#allocation3 + $0x118] sm:$0x3] %vm2372_vm9, %v8228_v56 }
 0x3aa   : > { %2409 = vst.msk [vmem:[#allocation3 + $0x130] sm:$0x3] %vm2372_vm9, %v8228_v56  ;;  %2412 = vst.msk [vmem:[#allocation3 + $0x148] sm:$0x3] %vm2372_vm9, %v8228_v56 }
 0x3ab   : > { %2415 = vst.msk [vmem:[#allocation3 + $0x160] sm:$0x3] %vm2372_vm9, %v8228_v56  ;;  %2418 = vst.msk [vmem:[#allocation3 + $0x178] sm:$0x3] %vm2372_vm9, %v8228_v56 }
 0x3ac   : > { %2421 = vst.msk [vmem:[#allocation3 + $0x190] sm:$0x3] %vm2372_vm9, %v8228_v56  ;;  %2424 = vst.msk [vmem:[#allocation3 + $0x1a8] sm:$0x3] %vm2372_vm9, %v8228_v56 }
 0x3ad PF: > { %vm2426_vm11 = vcmask 261120   ;;  %v3725_v15 = vld [vmem:[%s11735_s2 + $0x78] sm:$0xff]  ;;  %s8230_s16 = smov 32   ;;  %s8231_s17 = smov 96   ;;  %v3718_v52 = vld [vmem:[%s11735_s2 + $0x40] sm:$0xff]  ;;  %v3715_v29 = vld [vmem:[%s11735_s2 + $0x28] sm:$0xff] }
 0x3ae   : > { %2427 = vst.msk [vmem:[#allocation3 + $0x19] sm:$0xff] %vm2426_vm11, %v9529_v53  ;;  %2428 = vst.msk [vmem:[#allocation3 + $0x21] sm:$0xff] %vm2426_vm11, %v9523_v6  ;;  %v8229_v6 = vmov 0.0   ;;  %v3724_v53 = vld [vmem:[%s11735_s2 + $0x70] sm:$0xff]  ;;  %s8232_s8 = smov 64   ;;  %v3713_v4 = vld [vmem:[%s11735_s2 + $0x18] sm:$0xff] }
 0x3af   : > { %2429 = vst.msk [vmem:[#allocation3 + $0x31] sm:$0xff] %vm2426_vm11, %v9559_v30  ;;  %2430 = vst.msk [vmem:[#allocation3 + $0x39] sm:$0xff] %vm2426_vm11, %v9553_v9  ;;  %3842 = vmatprep.subr.mxu1 %v8229_v6  ;;  %v3723_v9 = vld [vmem:[%s11735_s2 + $0x68] sm:$0xff]  ;;  %v2491_v30 = vld [vmem:[#allocation3 + $0x1] sm:$0xff]  ;;  %vm3548_vm1 = vcmask 523264   ;;  %vm3581_vm3 = vcmask 785408  }
 0x3b0   : > { %2431 = vst.msk [vmem:[#allocation3 + $0x49] sm:$0xff] %vm2426_vm11, %v9589_v47  ;;  %2432 = vst.msk [vmem:[#allocation3 + $0x51] sm:$0xff] %vm2426_vm11, %v9583_v55  ;;  %3843 = vmatpush1.msra.mxu1 %v3725_v15  ;;  %v3722_v55 = vld [vmem:[%s11735_s2 + $0x60] sm:$0xff]  ;;  %v2523_v47 = vld [vmem:[#allocation3 + $0x2] sm:$0xff]  ;;  %s6777_s30 = sld [smem:[#allocation5 + $0x1]]  ;;  %p11890_p11 = scmp.ne.s32.totalorder %s8288_s22, 0 }
 0x3b1   : > { %2433 = vst.msk [vmem:[#allocation3 + $0x61] sm:$0xff] %vm2426_vm11, %v9619_v60  ;;  %2434 = vst.msk [vmem:[#allocation3 + $0x69] sm:$0xff] %vm2426_vm11, %v9613_v5  ;;  %3844 = vmatprep.subr.mxu1 %v8229_v6  ;;  %v2492_v5 = vld [vmem:[#allocation3 + $0x9] sm:$0xff]  ;;  %v3744_v45 = vld [vmem:[%s11735_s2 + $0x110] sm:$0xff] }
 0x3b2   : > { %2435 = vst.msk [vmem:[#allocation3 + $0x79] sm:$0xff] %vm2426_vm11, %v9649_v33  ;;  %2436 = vst.msk [vmem:[#allocation3 + $0x81] sm:$0xff] %vm2426_vm11, %v9643_v10  ;;  %3845 = vmatpush1.msra.mxu1 %v3724_v53  ;;  %v3743_v59 = vld [vmem:[%s11735_s2 + $0x108] sm:$0xff]  ;;  %v3742_v2 = vld [vmem:[%s11735_s2 + $0x100] sm:$0xff] }
 0x3b3   : > { %2437 = vst.msk [vmem:[#allocation3 + $0x91] sm:$0xff] %vm2426_vm11, %v9681_v43  ;;  %2438 = vst.msk [vmem:[#allocation3 + $0x99] sm:$0xff] %vm2426_vm11, %v9676_v14  ;;  %3846 = vmatprep.subr.mxu1 %v8229_v6  ;;  %v3711_v32 = vld [vmem:[%s11735_s2 + $0x8] sm:$0xff] }
 0x3b4   : > { %2439 = vst.msk [vmem:[#allocation3 + $0xa9] sm:$0xff] %vm2426_vm11, %v9689_v58  ;;  %2440 = vst.msk [vmem:[#allocation3 + $0xb1] sm:$0xff] %vm2426_vm11, %v9686_v50  ;;  %3847 = vmatpush1.msra.mxu1 %v3723_v9 }
 0x3b5   : > { %2441 = vst.msk [vmem:[#allocation3 + $0xc1] sm:$0xff] %vm2426_vm11, %v9695_v62  ;;  %2442 = vst.msk [vmem:[#allocation3 + $0xc9] sm:$0xff] %vm2426_vm11, %v9692_v20  ;;  %v2619_v60 = vld [vmem:[#allocation3 + $0x1a] sm:$0xff]  ;;  %3848 = vmatprep.subr.mxu1 %v8229_v6  ;;  %v9889_v58 = vld [vmem:[#allocation3 + $0x22] sm:$0xff] }
 0x3b6   : > { %2443 = vst.msk [vmem:[#allocation3 + $0xd9] sm:$0xff] %vm2426_vm11, %v9701_v19  ;;  %2444 = vst.msk [vmem:[#allocation3 + $0xe1] sm:$0xff] %vm2426_vm11, %v9698_v48  ;;  %v9880_v10 = vld [vmem:[#allocation3 + $0x18] sm:$0xff]  ;;  %v7175_v14 = vpack.i.bf16 %v2491_v30, %v2619_v60  ;;  %v9887_v50 = vld [vmem:[#allocation3 + $0x30] sm:$0xff]  ;;  %3849 = vmatpush1.msra.mxu1 %v3722_v55  ;;  %v7190_v0 = vpack.i.bf16 %v2492_v5, %v9889_v58 }
 0x3b7   : > { %2445 = vst.msk [vmem:[#allocation3 + $0xf1] sm:$0xff] %vm2426_vm11, %v9707_v11  ;;  %2446 = vst.msk [vmem:[#allocation3 + $0xf9] sm:$0xff] %vm2426_vm11, %v9704_v27  ;;  %v9882_v33 = vld [vmem:[#allocation3 + $0x31] sm:$0xff]  ;;  %v3721_v20 = vld [vmem:[%s11735_s2 + $0x58] sm:$0xff]  ;;  %3850 = vmatprep.subr.mxu1 %v8229_v6  ;;  %v7180_v62 = vpack.i.bf16 %v2523_v47, %v9887_v50 }
 0x3b8   : > { %2447 = vst.msk [vmem:[#allocation3 + $0x109] sm:$0xff] %vm2426_vm11, %v9713_v8  ;;  %2448 = vst.msk [vmem:[#allocation3 + $0x111] sm:$0xff] %vm2426_vm11, %v9710_v49  ;;  %v7185_v43 = vpack.i.bf16 %v9880_v10, %v9882_v33  ;;  %7176 = vrot.lane.b32.xlu0 %v7175_v14, %s8230_s16  ;;  %v2524_v48 = vld [vmem:[#allocation3 + $0xa] sm:$0xff]  ;;  %v9899_v36 = vld [vmem:[#allocation3 + $0x32] sm:$0xff]  ;;  %3851 = vmatpush1.msra.mxu1 %v3721_v20 }
 0x3b9   : > { %2449 = vst.msk [vmem:[#allocation3 + $0x121] sm:$0xff] %vm2426_vm11, %v9719_v54  ;;  %2450 = vst.msk [vmem:[#allocation3 + $0x129] sm:$0xff] %vm2426_vm11, %v9716_v23  ;;  %v3720_v19 = vld [vmem:[%s11735_s2 + $0x50] sm:$0xff]  ;;  %v2653_v31 = vld [vmem:[#allocation3 + $0x38] sm:$0xff]  ;;  %6987 = vmatprep.mubr.msk.f32.mxu0 %vm2426_vm11, %v9899_v36  ;;  %3852 = vmatprep.subr.mxu1 %v8229_v6 }
 0x3ba   : > { %2451 = vst.msk [vmem:[#allocation3 + $0x139] sm:$0xff] %vm2426_vm11, %v9725_v35  ;;  %2452 = vst.msk [vmem:[#allocation3 + $0x141] sm:$0xff] %vm2426_vm11, %v9722_v40  ;;  %7186 = vrot.lane.b32.xlu1 %v7185_v43, %s8231_s17  ;;  %v9904_v39 = vld [vmem:[#allocation3 + $0x20] sm:$0xff]  ;;  %3853 = vmatpush1.msra.mxu1 %v3720_v19  ;;  %v3719_v27 = vld [vmem:[%s11735_s2 + $0x48] sm:$0xff]  ;;  %v7195_v25 = vpack.i.bf16 %v2524_v48, %v2653_v31 }
 0x3bb   : > { %2453 = vst.msk [vmem:[#allocation3 + $0x151] sm:$0xff] %vm2426_vm11, %v9731_v41  ;;  %2454 = vst.msk [vmem:[#allocation3 + $0x159] sm:$0xff] %vm2426_vm11, %v9728_v16  ;;  %v9906_v1 = vld [vmem:[#allocation3 + $0x39] sm:$0xff]  ;;  %v9920_v51 = vld [vmem:[#allocation3 + $0x48] sm:$0xff]  ;;  %3854 = vmatprep.subr.mxu1 %v8229_v6 }
 0x3bc   : > { %2455 = vst.msk [vmem:[#allocation3 + $0x169] sm:$0xff] %vm2426_vm11, %v9737_v17  ;;  %2456 = vst.msk [vmem:[#allocation3 + $0x171] sm:$0xff] %vm2426_vm11, %v9734_v12  ;;  %7181 = vrot.lane.b32.xlu0 %v7180_v62, %s8232_s8  ;;  %v7200_v11 = vpack.i.bf16 %v9904_v39, %v9906_v1  ;;  %v9918_v34 = vld [vmem:[#allocation3 + $0x19] sm:$0xff]  ;;  %3855 = vmatpush1.msra.mxu1 %v3719_v27  ;;  %v7210_v18 = vpack.i.bf16 %v2619_v60, %v9920_v51  ;;  %v3717_v8 = vld [vmem:[%s11735_s2 + $0x38] sm:$0xff] }
 0x3bd   : > { %2457 = vst.msk [vmem:[#allocation3 + $0x181] sm:$0xff] %vm2426_vm11, %v9743_v28  ;;  %2458 = vst.msk [vmem:[#allocation3 + $0x189] sm:$0xff] %vm2426_vm11, %v9740_v13  ;;  %3856 = vmatprep.subr.mxu1 %v8229_v6  ;;  %v7205_v49 = vpack.i.bf16 %v9918_v34, %v9899_v36  ;;  %v9935_v42 = vld [vmem:[#allocation3 + $0x49] sm:$0xff]  ;;  %v9937_v3 = vld [vmem:[#allocation3 + $0x21] sm:$0xff] }
 0x3be   : > { %7191 = vrot.lane.b32.xlu1 %v7190_v0, %s8230_s16  ;;  %v9939_v63 = vld [vmem:[#allocation3 + $0x3a] sm:$0xff]  ;;  %3857 = vmatpush1.msra.mxu1 %v3718_v52  ;;  %v7215_v26 = vpack.i.bf16 %v9887_v50, %v9935_v42  ;;  %v2655_v46 = vld [vmem:[#allocation3 + $0x50] sm:$0xff]  ;;  %v3745_v41 = vld [vmem:[%s11735_s2 + $0x118] sm:$0xff] }
 0x3bf   : > { %3858 = vmatprep.subr.mxu1 %v8229_v6  ;;  %v3716_v23 = vld [vmem:[%s11735_s2 + $0x30] sm:$0xff]  ;;  %v7220_v54 = vpack.i.bf16 %v9937_v3, %v9939_v63  ;;  %v9951_v61 = vld [vmem:[#allocation3 + $0x51] sm:$0xff]  ;;  %v7225_v40 = vpack.i.bf16 %v9889_v58, %v2655_v46  ;;  %6979 = vmatprep.subr.mxu0 %v3745_v41  ;;  %v10006_v44 = vld [vmem:[#allocation3 + $0x68] sm:$0xff] }
 0x3c0   : > { %7196 = vrot.lane.b32.xlu0 %v7195_v25, %s8232_s8  ;;  %3859 = vmatpush1.msra.mxu1 %v3717_v8  ;;  %v7230_v37 = vpack.i.bf16 %v2653_v31, %v9951_v61  ;;  %v3714_v35 = vld [vmem:[%s11735_s2 + $0x20] sm:$0xff]  ;;  %v9967_v22 = vld [vmem:[#allocation3 + $0x60] sm:$0xff]  ;;  %v7255_v56 = vpack.i.bf16 %v9939_v63, %v10006_v44  ;;  %v10022_v9 = vld [vmem:[#allocation3 + $0x78] sm:$0xff] }
 0x3c1   : > { %3860 = vmatprep.subr.mxu1 %v8229_v6  ;;  %v9965_v7 = vld [vmem:[#allocation3 + $0x4a] sm:$0xff]  ;;  %v7240_v24 = vpack.i.bf16 %v9899_v36, %v9967_v22  ;;  %v9982_v21 = vld [vmem:[#allocation3 + $0x61] sm:$0xff]  ;;  %v9984_v38 = vld [vmem:[#allocation3 + $0x52] sm:$0xff]  ;;  %6980 = vmatpush3.msra.mxu0 %v3745_v41 }
 0x3c2   : > { %7201 = vrot.lane.b32.xlu1 %v7200_v11, %s8231_s17  ;;  %3861 = vmatpush1.msra.mxu1 %v3716_v23  ;;  %v7235_v16 = vpack.i.bf16 %v9882_v33, %v9965_v7  ;;  %v3712_v12 = vld [vmem:[%s11735_s2 + $0x10] sm:$0xff]  ;;  %v7245_v17 = vpack.i.bf16 %v9920_v51, %v9982_v21  ;;  %v7250_v57 = vpack.i.bf16 %v9906_v1, %v9984_v38  ;;  %v10008_v13 = vld [vmem:[#allocation3 + $0x69] sm:$0xff]  ;;  %v3739_v43 = vld [vmem:[%s11735_s2 + $0xe8] sm:$0xff] }
 0x3c3   : > { %3862 = vmatprep.subr.mxu1 %v8229_v6  ;;  %6981 = vmatprep.subr.mxu0 %v3744_v45  ;;  %v3710_v28 = vld [vmem:[%s11735_s2] sm:$0xff]  ;;  %v7260_v15 = vpack.i.bf16 %v2655_v46, %v10008_v13  ;;  %v2625_v53 = vld [vmem:[#allocation3 + $0x62] sm:$0xff]  ;;  %v7270_v47 = vpack.i.bf16 %v9965_v7, %v10022_v9  ;;  %v10039_v60 = vld [vmem:[#allocation3 + $0x79] sm:$0xff] }
 0x3c4   : > { %7206 = vrot.lane.b32.xlu0 %v7205_v49, %s8230_s16  ;;  %3863 = vmatpush1.msra.mxu1 %v3715_v29  ;;  %v3741_v30 = vld [vmem:[%s11735_s2 + $0xf8] sm:$0xff]  ;;  %v7265_v55 = vpack.i.bf16 %v9935_v42, %v2625_v53  ;;  %v3740_v5 = vld [vmem:[%s11735_s2 + $0xf0] sm:$0xff]  ;;  %v7275_v58 = vpack.i.bf16 %v9967_v22, %v10039_v60  ;;  %v3738_v48 = vld [vmem:[%s11735_s2 + $0xe0] sm:$0xff] }
 0x3c5   : > { %3864 = vmatprep.subr.mxu1 %v8229_v6  ;;  %6982 = vmatpush3.msra.mxu0 %v3744_v45  ;;  %v10041_v14 = vld [vmem:[#allocation3 + $0x6a] sm:$0xff]  ;;  %v2659_v62 = vld [vmem:[#allocation3 + $0x80] sm:$0xff]  ;;  %v3735_v23 = vld [vmem:[%s11735_s2 + $0xc8] sm:$0xff] }
 0x3c6   : > { %7211 = vrot.lane.b32.xlu1 %v7210_v18, %s8232_s8  ;;  %3865 = vmatpush1.msra.mxu1 %v3714_v35  ;;  %v7280_v20 = vpack.i.bf16 %v9951_v61, %v10041_v14  ;;  %v10057_v0 = vld [vmem:[#allocation3 + $0x81] sm:$0xff]  ;;  %v7285_v36 = vpack.i.bf16 %v9984_v38, %v2659_v62  ;;  %v10075_v25 = vld [vmem:[#allocation3 + $0x90] sm:$0xff]  ;;  %v2661_v29 = vld [vmem:[#allocation3 + $0x98] sm:$0xff] }
 0x3c7   : > { %3866 = vmatprep.subr.mxu1 %v8229_v6  ;;  %6983 = vmatprep.subr.mxu0 %v3743_v59  ;;  %v7290_v19 = vpack.i.bf16 %v10006_v44, %v10057_v0  ;;  %v2627_v31 = vld [vmem:[#allocation3 + $0x7a] sm:$0xff]  ;;  %v3737_v27 = vld [vmem:[%s11735_s2 + $0xd8] sm:$0xff]  ;;  %v7300_v49 = vpack.i.bf16 %v2625_v53, %v10075_v25  ;;  %v10090_v18 = vld [vmem:[#allocation3 + $0x92] sm:$0xff] }
 0x3c8   : > { %7216 = vrot.lane.b32.xlu0 %v7215_v26, %s8231_s17  ;;  %3867 = vmatpush1.msra.mxu1 %v3713_v4  ;;  %v10078_v11 = vld [vmem:[#allocation3 + $0x82] sm:$0xff]  ;;  %v7295_v52 = vpack.i.bf16 %v9982_v21, %v2627_v31  ;;  %v10092_v8 = vld [vmem:[#allocation3 + $0x91] sm:$0xff]  ;;  %v7325_v41 = vpack.i.bf16 %v10039_v60, %v10090_v18 }
 0x3c9   : > { %3868 = vmatprep.subr.mxu1 %v8229_v6  ;;  %6984 = vmatpush3.msra.mxu0 %v3743_v59  ;;  %v3736_v51 = vld [vmem:[%s11735_s2 + $0xd0] sm:$0xff]  ;;  %v7305_v26 = vpack.i.bf16 %v10022_v9, %v10092_v8  ;;  %v3734_v46 = vld [vmem:[%s11735_s2 + $0xc0] sm:$0xff]  ;;  %v3729_v44 = vld [vmem:[%s11735_s2 + $0x98] sm:$0xff] }
 0x3ca   : > { %7221 = vrot.lane.b32.xlu1 %v7220_v54, %s8230_s16  ;;  %3869 = vmatpush1.msra.mxu1 %v3712_v12  ;;  %v7310_v54 = vpack.i.bf16 %v10008_v13, %v10078_v11  ;;  %v2726_v35 = vld [vmem:[#allocation3 + $0xaa] sm:$0xff]  ;;  %v2727_v4 = vld [vmem:[#allocation3 + $0xb2] sm:$0xff]  ;;  %v2728_v13 = vld [vmem:[#allocation3 + $0xc2] sm:$0xff] }
 0x3cb   : > { %3870 = vmatprep.subr.mxu1 %v8229_v6  ;;  %6985 = vmatprep.subr.mxu0 %v3742_v2  ;;  %v10138_v45 = vld [vmem:[#allocation3 + $0xa9] sm:$0xff]  ;;  %v2664_v9 = vld [vmem:[#allocation3 + $0xc0] sm:$0xff]  ;;  %v2632_v60 = vld [vmem:[#allocation3 + $0xb2] sm:$0xff] }
 0x3cc   : > { %7226 = vrot.lane.b32.xlu0 %v7225_v40, %s8232_s8  ;;  %3871 = vmatpush1.msra.mxu1 %v3711_v32  ;;  %v10114_v40 = vld [vmem:[#allocation3 + $0x99] sm:$0xff]  ;;  %v3730_v12 = vld [vmem:[%s11735_s2 + $0xa0] sm:$0xff]  ;;  %v7335_v59 = vpack.i.bf16 %v10075_v25, %v10138_v45 }
 0x3cd   : > { %3872 = vmatprep.subr.mxu1 %v8229_v6  ;;  %6986 = vmatpush3.msra.mxu0 %v3742_v2  ;;  %v7320_v22 = vpack.i.bf16 %v2659_v62, %v10114_v40  ;;  %v2695_v32 = vld [vmem:[#allocation3 + $0xb1] sm:$0xff]  ;;  %v2697_v62 = vld [vmem:[#allocation3 + $0xc9] sm:$0xff] }
 0x3ce   : > { %7231 = vrot.lane.b32.xlu1 %v7230_v37, %s8231_s17  ;;  %3873 = vmatpush1.msra.mxu1 %v3710_v28  ;;  %v3733_v37 = vld [vmem:[%s11735_s2 + $0xb8] sm:$0xff] }
 0x3cf   : > { %3874 = vmatprep.subr.mxu1 %v8229_v6  ;;  %6988 = vmatmul.mubr.msk.f32.vlgmr.msra.gmra.mxu0 %vm2426_vm11, %v9939_v63  ;;  %v10097_v63 = vld [vmem:[#allocation3 + $0x9a] sm:$0xff]  ;;  %v2729_v2 = vld [vmem:[#allocation3 + $0xca] sm:$0xff] }
 0x3d0   : > { %7236 = vrot.lane.b32.xlu0 %v7235_v16, %s8230_s16  ;;  %3875 = vmatpush2.msra.mxu1 %v3741_v30  ;;  %v2662_v16 = vld [vmem:[#allocation3 + $0xa8] sm:$0xff]  ;;  %v3727_v30 = vld [vmem:[%s11735_s2 + $0x88] sm:$0xff] }
 0x3d1   : > { %6990 = vmatprep.mubr.msk.f32.mxu0 %vm2426_vm11, %v9965_v7  ;;  %3876 = vmatprep.subr.mxu1 %v8229_v6  ;;  %v7315_v7 = vpack.i.bf16 %v10041_v14, %v2661_v29  ;;  %v7330_v21 = vpack.i.bf16 %v2627_v31, %v2662_v16 }
 0x3d2   : > { %7241 = vrot.lane.b32.xlu1 %v7240_v24, %s8232_s8  ;;  %3877 = vmatpush2.msra.mxu1 %v3740_v5  ;;  %v3732_v24 = vld [vmem:[%s11735_s2 + $0xb0] sm:$0xff] }
 0x3d3   : > { %6991 = vmatmul.mubr.msk.f32.gmra.mxu0 %vm2426_vm11, %v9984_v38  ;;  %3878 = vmatprep.subr.mxu1 %v8229_v6  ;;  %v3731_v38 = vld [vmem:[%s11735_s2 + $0xa8] sm:$0xff]  ;;  %v2696_v5 = vld [vmem:[#allocation3 + $0xc1] sm:$0xff] }
 0x3d4   : > { %7246 = vrot.lane.b32.xlu0 %v7245_v17, %s8231_s17  ;;  %6993 = vmatprep.mubr.msk.f32.mxu0 %vm2426_vm11, %v2625_v53  ;;  %v7340_v17 = vpack.i.bf16 %v10057_v0, %v10097_v63  ;;  %v2631_v53 = vld [vmem:[#allocation3 + $0xaa] sm:$0xff]  ;;  %v2730_v0 = vld [vmem:[#allocation3 + $0xda] sm:$0xff] }
 0x3d5   : > { %3879 = vmatpush2.msra.mxu1 %v3739_v43  ;;  %v7365_v43 = vpack.i.bf16 %v2662_v16, %v2696_v5 }
 0x3d6   : > { %7251 = vrot.lane.b32.xlu1 %v7250_v57, %s8230_s16  ;;  %3880 = vmatprep.subr.mxu1 %v8229_v6  ;;  %v2663_v57 = vld [vmem:[#allocation3 + $0xb0] sm:$0xff] }
 0x3d7   : > { %6994 = vmatmul.mubr.msk.f32.gmra.mxu0 %vm2426_vm11, %v10041_v14  ;;  %3881 = vmatpush2.msra.mxu1 %v3738_v48  ;;  %v7345_v28 = vpack.i.bf16 %v10078_v11, %v2663_v57  ;;  %v3726_v14 = vld [vmem:[%s11735_s2 + $0x80] sm:$0xff]  ;;  %v2731_v48 = vld [vmem:[#allocation3 + $0xe2] sm:$0xff] }
 0x3d8   : > { %7256 = vrot.lane.b32.xlu0 %v7255_v56, %s8232_s8  ;;  %6996 = vmatprep.mubr.msk.f32.mxu0 %vm2426_vm11, %v2627_v31  ;;  %v7350_v56 = vpack.i.bf16 %v2661_v29, %v2695_v32  ;;  %v2633_v31 = vld [vmem:[#allocation3 + $0xc2] sm:$0xff]  ;;  %v2635_v29 = vld [vmem:[#allocation3 + $0xda] sm:$0xff] }
 0x3d9   : > { %3882 = vmatprep.subr.mxu1 %v8229_v6  ;;  %v7385_v25 = vpack.i.bf16 %v10138_v45, %v2633_v31 }
 0x3da   : > { %7261 = vrot.lane.b32.xlu1 %v7260_v15, %s8231_s17  ;;  %3883 = vmatpush2.msra.mxu1 %v3737_v27  ;;  %v3728_v15 = vld [vmem:[%s11735_s2 + $0x90] sm:$0xff]  ;;  %v2666_v27 = vld [vmem:[#allocation3 + $0xd8] sm:$0xff] }
 0x3db   : > { %6997 = vmatmul.mubr.msk.f32.gmra.mxu0 %vm2426_vm11, %v10078_v11  ;;  %3884 = vmatprep.subr.mxu1 %v8229_v6  ;;  %v7390_v11 = vpack.i.bf16 %v2631_v53, %v2666_v27 }
 0x3dc   : > { %7266 = vrot.lane.b32.xlu0 %v7265_v55, %s8230_s16  ;;  %6999 = vmatprep.mubr.msk.f32.mxu0 %vm2426_vm11, %v10090_v18  ;;  %v7355_v55 = vpack.i.bf16 %v10092_v8, %v2631_v53  ;;  %v2667_v8 = vld [vmem:[#allocation3 + $0xe0] sm:$0xff] }
 0x3dd   : > { %3885 = vmatpush2.msra.mxu1 %v3736_v51  ;;  %v2698_v51 = vld [vmem:[#allocation3 + $0xd9] sm:$0xff] }
 0x3de   : > { %7271 = vrot.lane.b32.xlu1 %v7270_v47, %s8232_s8  ;;  %3886 = vmatprep.subr.mxu1 %v8229_v6  ;;  %v7360_v47 = vpack.i.bf16 %v10090_v18, %v2664_v9 }
 0x3df   : > { %7000 = vmatmul.mubr.msk.f32.gmra.mxu0 %vm2426_vm11, %v10097_v63  ;;  %3887 = vmatpush2.msra.mxu1 %v3735_v23  ;;  %v2732_v23 = vld [vmem:[#allocation3 + $0xf2] sm:$0xff] }
 0x3e0   : > { %7276 = vrot.lane.b32.xlu0 %v7275_v58, %s8231_s17  ;;  %3888 = vmatprep.subr.mxu1 %v8229_v6  ;;  %v7370_v58 = vpack.i.bf16 %v10114_v40, %v2632_v60  ;;  %v2668_v40 = vld [vmem:[#allocation3 + $0xf0] sm:$0xff] }
 0x3e1   : > { %3889 = vmatpush2.msra.mxu1 %v3734_v46  ;;  %7002 = vmatprep.mubr.msk.f32.mxu0 %vm2426_vm11, %v2726_v35  ;;  %v7420_v35 = vpack.i.bf16 %v2633_v31, %v2668_v40 }
 0x3e2   : > { %7281 = vrot.lane.b32.xlu1 %v7280_v20, %s8230_s16  ;;  %3890 = vmatprep.subr.mxu1 %v8229_v6  ;;  %v2665_v20 = vld [vmem:[#allocation3 + $0xc8] sm:$0xff] }
 0x3e3   : > { %3891 = vmatpush2.msra.mxu1 %v3733_v37  ;;  %7003 = vmatmul.mubr.msk.f32.gmra.mxu0 %vm2426_vm11, %v2727_v4  ;;  %v7415_v37 = vpack.i.bf16 %v2696_v5, %v2635_v29 }
 0x3e4   : > { %7286 = vrot.lane.b32.xlu0 %v7285_v36, %s8232_s8  ;;  %3892 = vmatprep.subr.mxu1 %v8229_v6  ;;  %v7375_v36 = vpack.i.bf16 %v10097_v63, %v2665_v20  ;;  %v2699_v63 = vld [vmem:[#allocation3 + $0xe1] sm:$0xff] }
 0x3e5   : > { %3893 = vmatpush2.msra.mxu1 %v3732_v24  ;;  %7005 = vmatprep.mubr.msk.f32.mxu0 %vm2426_vm11, %v2728_v13  ;;  %v7410_v46 = vpack.i.bf16 %v2665_v20, %v2699_v63  ;;  %v2669_v24 = vld [vmem:[#allocation3 + $0xf8] sm:$0xff]  ;;  %v10222_v13 = vld [vmem:[#allocation3 + $0x109] sm:$0xff] }
 0x3e6   : > { %7291 = vrot.lane.b32.xlu1 %v7290_v19, %s8231_s17  ;;  %3894 = vmatprep.subr.mxu1 %v8229_v6  ;;  %v7380_v19 = vpack.i.bf16 %v2663_v57, %v2697_v62  ;;  %v10212_v57 = vld [vmem:[#allocation3 + $0x122] sm:$0xff] }
 0x3e7   : > { %3895 = vmatpush2.msra.mxu1 %v3731_v38  ;;  %7006 = vmatmul.mubr.msk.f32.gmra.mxu0 %vm2426_vm11, %v2729_v2  ;;  %v10224_v2 = vld [vmem:[#allocation3 + $0xfa] sm:$0xff] }
 0x3e8   : > { %7296 = vrot.lane.b32.xlu0 %v7295_v52, %s8230_s16  ;;  %3896 = vmatprep.subr.mxu1 %v8229_v6  ;;  %v2634_v52 = vld [vmem:[#allocation3 + $0xca] sm:$0xff]  ;;  %v7460_v53 = vpack.i.bf16 %v2699_v63, %v10224_v2 }
 0x3e9   : > { %3897 = vmatpush2.msra.mxu1 %v3730_v12  ;;  %7008 = vmatprep.mubr.msk.f32.mxu0 %vm2426_vm11, %v2730_v0  ;;  %v7400_v18 = vpack.i.bf16 %v2695_v32, %v2634_v52  ;;  %v7435_v38 = vpack.i.bf16 %v2634_v52, %v2669_v24  ;;  %v10205_v12 = vld [vmem:[#allocation3 + $0xf2] sm:$0xff]  ;;  %v10260_v0 = vld [vmem:[#allocation3 + $0x16a] sm:$0xff] }
 0x3ea   : > { %7301 = vrot.lane.b32.xlu1 %v7300_v49, %s8232_s8  ;;  %3898 = vmatprep.subr.mxu1 %v8229_v6  ;;  %v7395_v49 = vpack.i.bf16 %v2664_v9, %v2698_v51  ;;  %v7445_v32 = vpack.i.bf16 %v2698_v51, %v10205_v12  ;;  %v10238_v9 = vld [vmem:[#allocation3 + $0x110] sm:$0xff] }
 0x3eb   : > { %3899 = vmatpush2.msra.mxu1 %v3729_v44  ;;  %7009 = vmatmul.mubr.msk.f32.gmra.mxu0 %vm2426_vm11, %v2731_v48  ;;  %v10264_v48 = vld [vmem:[#allocation3 + $0x121] sm:$0xff] }
 0x3ec   : > { %7306 = vrot.lane.b32.xlu0 %v7305_v26, %s8231_s17  ;;  %3900 = vmatprep.subr.mxu1 %v8229_v6  ;;  %v2733_v26 = vld [vmem:[#allocation3 + $0xfa] sm:$0xff] }
 0x3ed   : > { %3901 = vmatpush2.msra.mxu1 %v3728_v15  ;;  %7011 = vmatprep.mubr.msk.f32.mxu0 %vm2426_vm11, %v2732_v23  ;;  %v7455_v15 = vpack.i.bf16 %v2668_v40, %v10222_v13 }
 0x3ee   : > { %7311 = vrot.lane.b32.xlu1 %v7310_v54, %s8230_s16  ;;  %3902 = vmatprep.subr.mxu1 %v8229_v6  ;;  %v7405_v54 = vpack.i.bf16 %v2632_v60, %v2667_v8 }
 0x3ef   : > { %3903 = vmatpush2.msra.mxu1 %v3727_v30  ;;  %7012 = vmatmul.mubr.msk.f32.gmra.mxu0 %vm2426_vm11, %v2733_v26  ;;  %v10240_v30 = vld [vmem:[#allocation3 + $0x111] sm:$0xff] }
 0x3f0   : > { %7316 = vrot.lane.b32.xlu0 %v7315_v7, %s8232_s8  ;;  %3904 = vmatprep.subr.mxu1 %v8229_v6  ;;  %v10195_v7 = vld [vmem:[#allocation3 + $0xf1] sm:$0xff]  ;;  %v7470_v60 = vpack.i.bf16 %v2669_v24, %v10240_v30 }
 0x3f1   : > { %3905 = vmatpush2.msra.mxu1 %v3726_v14  ;;  %v7425_v4 = vpack.i.bf16 %v2666_v27, %v10195_v7  ;;  %v10254_v14 = vld [vmem:[#allocation3 + $0x10a] sm:$0xff] }
 0x3f2   : > { %7321 = vrot.lane.b32.xlu1 %v7320_v22, %s8231_s17  ;;  %v2636_v22 = vld [vmem:[#allocation3 + $0xe2] sm:$0xff]  ;;  %v7475_v31 = vpack.i.bf16 %v10195_v7, %v10254_v14 }
 0x3f3   : > { %v7430_v16 = vpack.i.bf16 %v2697_v62, %v2636_v22  ;;  %v7465_v5 = vpack.i.bf16 %v2636_v22, %v10238_v9  ;;  %v2460_v22 = vld [vmem:[#allocation3 + $0x8] sm:$0xff] }
 0x3f4   : > { %7326 = vrot.lane.b32.xlu0 %v7325_v41, %s8230_s16  ;;  %v10200_v41 = vld [vmem:[#allocation3 + $0xf9] sm:$0xff] }
 0x3f5   : > { %v7440_v45 = vpack.i.bf16 %v2667_v8, %v10200_v41 }
 0x3f6   : > { %7331 = vrot.lane.b32.xlu1 %v7330_v21, %s8232_s8  ;;  %v2734_v21 = vld [vmem:[#allocation3 + $0x10a] sm:$0xff] }
 0x3f7   : > { %7014 = vmatprep.mubr.msk.f32.mxu0 %vm2426_vm11, %v2734_v21 }
 0x3f8   : > { %7336 = vrot.lane.b32.xlu0 %v7335_v59, %s8231_s17  ;;  %v10207_v59 = vld [vmem:[#allocation3 + $0x108] sm:$0xff] }
 0x3f9   : > { %v7450_v44 = vpack.i.bf16 %v2635_v29, %v10207_v59 }
 0x3fa   : > { %7341 = vrot.lane.b32.xlu1 %v7340_v17, %s8230_s16  ;;  %v10209_v17 = vld [vmem:[#allocation3 + $0x112] sm:$0xff] }
 0x3fb   : > { %7015 = vmatmul.mubr.msk.f32.gmra.mxu0 %vm2426_vm11, %v10209_v17  ;;  %v7490_v7 = vpack.i.bf16 %v10200_v41, %v10209_v17 }
 0x3fc   : > { %7346 = vrot.lane.b32.xlu0 %v7345_v28, %s8232_s8  ;;  %7017 = vmatprep.mubr.msk.f32.mxu0 %vm2426_vm11, %v10212_v57  ;;  %v10226_v28 = vld [vmem:[#allocation3 + $0x12a] sm:$0xff] }
 0x3fe   : > { %7351 = vrot.lane.b32.xlu1 %v7350_v56, %s8231_s17  ;;  %v10228_v56 = vld [vmem:[#allocation3 + $0x13a] sm:$0xff] }
 0x3ff   : > { %7018 = vmatmul.mubr.msk.f32.gmra.mxu0 %vm2426_vm11, %v10226_v28 }
 0x400   : > { %7356 = vrot.lane.b32.xlu0 %v7355_v55, %s8230_s16  ;;  %7020 = vmatprep.mubr.msk.f32.mxu0 %vm2426_vm11, %v10228_v56  ;;  %v10242_v55 = vld [vmem:[#allocation3 + $0x142] sm:$0xff] }
 0x402   : > { %7361 = vrot.lane.b32.xlu1 %v7360_v47, %s8232_s8  ;;  %v10244_v47 = vld [vmem:[#allocation3 + $0x152] sm:$0xff] }
 0x403   : > { %7021 = vmatmul.mubr.msk.f32.gmra.mxu0 %vm2426_vm11, %v10242_v55 }
 0x404   : > { %7366 = vrot.lane.b32.xlu0 %v7365_v43, %s8231_s17  ;;  %7023 = vmatprep.mubr.msk.f32.mxu0 %vm2426_vm11, %v10244_v47  ;;  %v10256_v43 = vld [vmem:[#allocation3 + $0x120] sm:$0xff] }
 0x405   : > { %v7480_v27 = vpack.i.bf16 %v10205_v12, %v10256_v43 }
 0x406   : > { %7371 = vrot.lane.b32.xlu1 %v7370_v58, %s8230_s16  ;;  %v10258_v58 = vld [vmem:[#allocation3 + $0x15a] sm:$0xff] }
 0x407   : > { %7024 = vmatmul.mubr.msk.f32.gmra.mxu0 %vm2426_vm11, %v10258_v58 }
 0x408   : > { %7376 = vrot.lane.b32.xlu0 %v7375_v36, %s8232_s8  ;;  %7026 = vmatprep.mubr.msk.f32.mxu0 %vm2426_vm11, %v10260_v0 }
 0x40a   : > { %7381 = vrot.lane.b32.xlu1 %v7380_v19, %s8231_s17 }
 0x40c   : > { %7386 = vrot.lane.b32.xlu0 %v7385_v25, %s8230_s16  ;;  %v2459_v25 = vld [vmem:[#allocation3] sm:$0xff] }
 0x40e   : > { %7391 = vrot.lane.b32.xlu1 %v7390_v11, %s8232_s8  ;;  %v10274_v11 = vld [vmem:[#allocation3 + $0x172] sm:$0xff] }
 0x40f   : > { %7027 = vmatmul.mubr.msk.f32.gmra.mxu0 %vm2426_vm11, %v10274_v11 }
 0x410   : > { %7396 = vrot.lane.b32.xlu0 %v7395_v49, %s8231_s17  ;;  %v7485_v49 = vpack.i.bf16 %v10207_v59, %v10264_v48 }
 0x412   : > { %7401 = vrot.lane.b32.xlu1 %v7400_v18, %s8230_s16  ;;  %v10278_v18 = vld [vmem:[#allocation3 + $0x182] sm:$0xff] }
 0x413   : > { %7029 = vmatprep.mubr.msk.f32.mxu0 %vm2426_vm11, %v10278_v18 }
 0x414   : > { %7406 = vrot.lane.b32.xlu0 %v7405_v54, %s8232_s8 }
 0x416   : > { %7411 = vrot.lane.b32.xlu1 %v7410_v46, %s8231_s17 }
 0x418   : > { %7416 = vrot.lane.b32.xlu0 %v7415_v37, %s8230_s16 }
 0x41a   : > { %7421 = vrot.lane.b32.xlu1 %v7420_v35, %s8232_s8 }
 0x41c   : > { %7426 = vrot.lane.b32.xlu0 %v7425_v4, %s8231_s17  ;;  %v10293_v4 = vld [vmem:[#allocation3 + $0x128] sm:$0xff] }
 0x41e   : > { %7431 = vrot.lane.b32.xlu1 %v7430_v16, %s8230_s16  ;;  %v10295_v16 = vld [vmem:[#allocation3 + $0x18a] sm:$0xff] }
 0x41f   : > { %7030 = vmatmul.mubr.msk.f32.gmra.mxu0 %vm2426_vm11, %v10295_v16 }
 0x420   : > { %7436 = vrot.lane.b32.xlu0 %v7435_v38, %s8232_s8 }
 0x422   : > { %7441 = vrot.lane.b32.xlu1 %v7440_v45, %s8231_s17  ;;  %v10299_v45 = vld [vmem:[#allocation3 + $0x129] sm:$0xff] }
 0x424   : > { %7446 = vrot.lane.b32.xlu0 %v7445_v32, %s8230_s16 }
 0x426   : > { %7451 = vrot.lane.b32.xlu1 %v7450_v44, %s8232_s8 }
 0x428   : > { %7456 = vrot.lane.b32.xlu0 %v7455_v15, %s8231_s17 }
 0x42a   : > { %7461 = vrot.lane.b32.xlu1 %v7460_v53, %s8230_s16  ;;  %v7177_v20 = vpop.permute.xlu0 %7176  ;;  %v7495_v53 = vpack.i.bf16 %v10224_v2, %v10293_v4 }
 0x42b   : > { %v7179_v36 = vunpack.i.h.bf16 %v7177_v20  ;;  %v7178_v19 = vunpack.i.l.bf16 %v7177_v20  ;;  %v7500_v20 = vpack.i.bf16 %v10238_v9, %v10299_v45  ;;  %v10321_v9 = vld [vmem:[#allocation3 + $0x139] sm:$0xff] }
 0x42c   : > { %v7187_v62 = vpop.permute.xlu1 %7186  ;;  %7466 = vrot.lane.b32.xlu0 %v7465_v5, %s8232_s8 }
 0x42d   : > { %v7189_v8 = vunpack.i.h.bf16 %v7187_v62  ;;  %v7188_v63 = vunpack.i.l.bf16 %v7187_v62  ;;  %v3614_v29 = vsel %vm2426_vm11, %v9918_v34, %v7178_v19  ;;  %v3516_v40 = vsel %vm2426_vm11, %v2459_v25, %v7179_v36 }
 0x42e   : > { %7471 = vrot.lane.b32.xlu1 %v7470_v60, %s8231_s17  ;;  %v7182_v51 = vpop.permute.xlu0 %7181 }
 0x42f   : > { %v7184_v23 = vunpack.i.h.bf16 %v7182_v51  ;;  %v7183_v26 = vunpack.i.l.bf16 %v7182_v51 }
 0x430   : > { %v7192_v52 = vpop.permute.xlu1 %7191  ;;  %7476 = vrot.lane.b32.xlu0 %v7475_v31, %s8230_s16  ;;  %v10316_v31 = vld [vmem:[#allocation3 + $0x138] sm:$0xff] }
 0x431   : > { %v7194_v54 = vunpack.i.h.bf16 %v7192_v52  ;;  %v7193_v46 = vunpack.i.l.bf16 %v7192_v52  ;;  %v3646_v37 = vsel %vm3548_vm1, %v3614_v29, %v7183_v26  ;;  %v3549_v35 = vsel %vm3548_vm1, %v3516_v40, %v7184_v23 }
 0x432   : > { %7481 = vrot.lane.b32.xlu1 %v7480_v27, %s8232_s8  ;;  %v7197_v24 = vpop.permute.xlu0 %7196  ;;  %v3678_v38 = vsel %vm3581_vm3, %v3646_v37, %v7188_v63  ;;  %v3582_v34 = vsel %vm3581_vm3, %v3549_v35, %v7189_v8  ;;  %v7505_v52 = vpack.i.bf16 %v10222_v13, %v10212_v57  ;;  %v7515_v13 = vpack.i.bf16 %v10256_v43, %v10321_v9 }
 0x433   : > { %v7199_v12 = vunpack.i.h.bf16 %v7197_v24  ;;  %v7198_v59 = vunpack.i.l.bf16 %v7197_v24  ;;  %3906 = vmatprep.mubr.f32.mxu1 %v3678_v38  ;;  %v3615_v44 = vsel %vm2426_vm11, %v9937_v3, %v7193_v46  ;;  %v3517_v15 = vsel %vm2426_vm11, %v2460_v22, %v7194_v54  ;;  %v10342_v24 = vld [vmem:[#allocation3 + $0x141] sm:$0xff] }
 0x434   : > { %v7202_v21 = vpop.permute.xlu1 %7201  ;;  %3907 = vmatmul.mubr.f32.vlgmr.msra.gmra.mxu1 %v3582_v34  ;;  %7486 = vrot.lane.b32.xlu0 %v7485_v49, %s8231_s17  ;;  %v7510_v49 = vpack.i.bf16 %v10254_v14, %v10316_v31  ;;  %v7520_v35 = vpack.i.bf16 %v10240_v30, %v10226_v28 }
 0x435   : > { %v7204_v32 = vunpack.i.h.bf16 %v7202_v21  ;;  %v7203_v41 = vunpack.i.l.bf16 %v7202_v21  ;;  %v3647_v5 = vsel %vm3548_vm1, %v3615_v44, %v7198_v59  ;;  %v3550_v60 = vsel %vm3548_vm1, %v3517_v15, %v7199_v12 }
 0x436   : > { %7491 = vrot.lane.b32.xlu1 %v7490_v7, %s8230_s16  ;;  %v7207_v62 = vpop.permute.xlu0 %7206  ;;  %v10340_v7 = vld [vmem:[#allocation3 + $0x140] sm:$0xff]  ;;  %v7530_v15 = vpack.i.bf16 %v10293_v4, %v10342_v24  ;;  %v10363_v4 = vld [vmem:[#allocation3 + $0x151] sm:$0xff] }
 0x437   : > { %v3679_v36 = vsel %vm3581_vm3, %v3647_v5, %v7203_v41  ;;  %v3583_v3 = vsel %vm3581_vm3, %v3550_v60, %v7204_v32  ;;  %v7209_v27 = vunpack.i.h.bf16 %v7207_v62  ;;  %v7208_v25 = vunpack.i.l.bf16 %v7207_v62 }
 0x438   : > { %v7212_v19 = vpop.permute.xlu1 %7211  ;;  %3911 = vmatprep.mubr.f32.mxu1 %v3679_v36  ;;  %7496 = vrot.lane.b32.xlu0 %v7495_v53, %s8232_s8  ;;  %v7525_v30 = vpack.i.bf16 %v10209_v17, %v10340_v7 }
 0x439   : > { %v7214_v2 = vunpack.i.h.bf16 %v7212_v19  ;;  %v7213_v51 = vunpack.i.l.bf16 %v7212_v19  ;;  %3912 = vmatmul.mubr.f32.gmra.mxu1 %v3583_v3  ;;  %v3616_v8 = vsel %vm2426_vm11, %v9882_v33, %v7208_v25  ;;  %v3518_v63 = vsel %vm2426_vm11, %v9880_v10, %v7209_v27 }
 0x43a   : > { %7501 = vrot.lane.b32.xlu1 %v7500_v20, %s8231_s17  ;;  %v7217_v23 = vpop.permute.xlu0 %7216  ;;  %v10358_v20 = vld [vmem:[#allocation3 + $0x150] sm:$0xff]  ;;  %v7535_v19 = vpack.i.bf16 %v10264_v48, %v10228_v56  ;;  %v7545_v48 = vpack.i.bf16 %v10316_v31, %v10363_v4  ;;  %v2464_v31 = vld [vmem:[#allocation3 + $0x38] sm:$0xff] }
 0x43b   : > { %v7219_v54 = vunpack.i.h.bf16 %v7217_v23  ;;  %v7218_v46 = vunpack.i.l.bf16 %v7217_v23  ;;  %v3648_v37 = vsel %vm3548_vm1, %v3616_v8, %v7213_v51  ;;  %v3551_v14 = vsel %vm3548_vm1, %v3518_v63, %v7214_v2 }
 0x43c   : > { %v7222_v26 = vpop.permute.xlu1 %7221  ;;  %7506 = vrot.lane.b32.xlu0 %v7505_v52, %s8230_s16  ;;  %v7540_v3 = vpack.i.bf16 %v10212_v57, %v10358_v20 }
 0x43d   : > { %v7224_v29 = vunpack.i.h.bf16 %v7222_v26  ;;  %v7223_v40 = vunpack.i.l.bf16 %v7222_v26  ;;  %v3680_v33 = vsel %vm3581_vm3, %v3648_v37, %v7218_v46  ;;  %v3584_v10 = vsel %vm3581_vm3, %v3551_v14, %v7219_v54  ;;  %v10382_v54 = vld [vmem:[#allocation3 + $0x158] sm:$0xff] }
 0x43e   : > { %7511 = vrot.lane.b32.xlu1 %v7510_v49, %s8232_s8  ;;  %v7227_v43 = vpop.permute.xlu0 %7226  ;;  %3916 = vmatprep.mubr.f32.mxu1 %v3680_v33  ;;  %v7550_v26 = vpack.i.bf16 %v10299_v45, %v10242_v55  ;;  %v7555_v45 = vpack.i.bf16 %v10226_v28, %v10382_v54  ;;  %v2593_v28 = vld [vmem:[#allocation3 + $0x61] sm:$0xff] }
 0x43f   : > { %v7229_v21 = vunpack.i.h.bf16 %v7227_v43  ;;  %v7228_v38 = vunpack.i.l.bf16 %v7227_v43  ;;  %3917 = vmatmul.mubr.f32.gmra.mxu1 %v3584_v10  ;;  %v3617_v59 = vsel %vm2426_vm11, %v9906_v1, %v7223_v40  ;;  %v3519_v32 = vsel %vm2426_vm11, %v9904_v39, %v7224_v29  ;;  %v10384_v29 = vld [vmem:[#allocation3 + $0x159] sm:$0xff] }
 0x440   : > { %v7232_v22 = vpop.permute.xlu1 %7231  ;;  %7516 = vrot.lane.b32.xlu0 %v7515_v13, %s8231_s17 }
 0x441   : > { %v7234_v34 = vunpack.i.h.bf16 %v7232_v22  ;;  %v7233_v12 = vunpack.i.l.bf16 %v7232_v22  ;;  %v3649_v41 = vsel %vm3548_vm1, %v3617_v59, %v7228_v38  ;;  %v3552_v44 = vsel %vm3548_vm1, %v3519_v32, %v7229_v21  ;;  %v10399_v59 = vld [vmem:[#allocation3 + $0x168] sm:$0xff] }
 0x442   : > { %7521 = vrot.lane.b32.xlu1 %v7520_v35, %s8230_s16  ;;  %v7237_v53 = vpop.permute.xlu0 %7236  ;;  %v7560_v21 = vpack.i.bf16 %v10340_v7, %v10384_v29  ;;  %v7565_v7 = vpack.i.bf16 %v10321_v9, %v10244_v47 }
 0x443   : > { %v3681_v60 = vsel %vm3581_vm3, %v3649_v41, %v7233_v12  ;;  %v3585_v1 = vsel %vm3581_vm3, %v3552_v44, %v7234_v34  ;;  %v7239_v17 = vunpack.i.h.bf16 %v7237_v53  ;;  %v7238_v62 = vunpack.i.l.bf16 %v7237_v53  ;;  %v10404_v53 = vld [vmem:[#allocation3 + $0x169] sm:$0xff] }
 0x444   : > { %v7242_v5 = vpop.permute.xlu1 %7241  ;;  %3921 = vmatprep.mubr.f32.mxu1 %v3681_v60  ;;  %7526 = vrot.lane.b32.xlu0 %v7525_v30, %s8232_s8  ;;  %v2465_v30 = vld [vmem:[#allocation3 + $0x48] sm:$0xff] }
 0x445   : > { %v7244_v39 = vunpack.i.h.bf16 %v7242_v5  ;;  %v7243_v36 = vunpack.i.l.bf16 %v7242_v5  ;;  %3922 = vmatmul.mubr.f32.gmra.mxu1 %v3585_v1  ;;  %v3618_v27 = vsel %vm2426_vm11, %v9935_v42, %v7238_v62  ;;  %v3520_v25 = vsel %vm2426_vm11, %v9887_v50, %v7239_v17 }
 0x446   : > { %7531 = vrot.lane.b32.xlu1 %v7530_v15, %s8231_s17  ;;  %v7247_v2 = vpop.permute.xlu0 %7246  ;;  %v7570_v5 = vpack.i.bf16 %v10228_v56, %v10399_v59 }
 0x447   : > { %v7249_v52 = vunpack.i.h.bf16 %v7247_v2  ;;  %v7248_v49 = vunpack.i.l.bf16 %v7247_v2  ;;  %v3650_v23 = vsel %vm3548_vm1, %v3618_v27, %v7243_v36  ;;  %v3553_v57 = vsel %vm3548_vm1, %v3520_v25, %v7244_v39 }
 0x448   : > { %v7252_v51 = vpop.permute.xlu1 %7251  ;;  %7536 = vrot.lane.b32.xlu0 %v7535_v19, %s8230_s16  ;;  %v7575_v19 = vpack.i.bf16 %v10358_v20, %v10404_v53  ;;  %v2466_v20 = vld [vmem:[#allocation3 + $0x50] sm:$0xff] }
 0x449   : > { %v7254_v8 = vunpack.i.h.bf16 %v7252_v51  ;;  %v7253_v63 = vunpack.i.l.bf16 %v7252_v51  ;;  %v3682_v42 = vsel %vm3581_vm3, %v3650_v23, %v7248_v49  ;;  %v3586_v50 = vsel %vm3581_vm3, %v3553_v57, %v7249_v52  ;;  %v2594_v52 = vld [vmem:[#allocation3 + $0x69] sm:$0xff] }
 0x44a   : > { %7541 = vrot.lane.b32.xlu1 %v7540_v3, %s8232_s8  ;;  %v7257_v46 = vpop.permute.xlu0 %7256  ;;  %3926 = vmatprep.mubr.f32.mxu1 %v3682_v42  ;;  %v7580_v51 = vpack.i.bf16 %v10342_v24, %v10258_v58  ;;  %v10421_v49 = vld [vmem:[#allocation3 + $0x170] sm:$0xff] }
 0x44b   : > { %v7259_v40 = vunpack.i.h.bf16 %v7257_v46  ;;  %v7258_v37 = vunpack.i.l.bf16 %v7257_v46  ;;  %3927 = vmatmul.mubr.f32.gmra.mxu1 %v3586_v50  ;;  %v3619_v10 = vsel %vm2426_vm11, %v9951_v61, %v7253_v63  ;;  %v3521_v35 = vsel %vm2426_vm11, %v2464_v31, %v7254_v8  ;;  %v10423_v63 = vld [vmem:[#allocation3 + $0x171] sm:$0xff] }
 0x44c   : > { %v7262_v13 = vpop.permute.xlu1 %7261  ;;  %7546 = vrot.lane.b32.xlu0 %v7545_v48, %s8231_s17  ;;  %v7585_v24 = vpack.i.bf16 %v10242_v55, %v10421_v49  ;;  %v2595_v55 = vld [vmem:[#allocation3 + $0x79] sm:$0xff] }
 0x44d   : > { %v7264_v14 = vunpack.i.h.bf16 %v7262_v13  ;;  %v7263_v33 = vunpack.i.l.bf16 %v7262_v13  ;;  %v3651_v43 = vsel %vm3548_vm1, %v3619_v10, %v7258_v37  ;;  %v3554_v22 = vsel %vm3548_vm1, %v3521_v35, %v7259_v40  ;;  %v2467_v35 = vld [vmem:[#allocation3 + $0x60] sm:$0xff] }
 0x44e   : > { %7551 = vrot.lane.b32.xlu1 %v7550_v26, %s8230_s16  ;;  %v7267_v38 = vpop.permute.xlu0 %7266  ;;  %v7590_v40 = vpack.i.bf16 %v10382_v54, %v10423_v63  ;;  %v7595_v54 = vpack.i.bf16 %v10363_v4, %v10260_v0 }
 0x44f   : > { %v3683_v12 = vsel %vm3581_vm3, %v3651_v43, %v7263_v33  ;;  %v3587_v61 = vsel %vm3581_vm3, %v3554_v22, %v7264_v14  ;;  %v7269_v32 = vunpack.i.h.bf16 %v7267_v38  ;;  %v7268_v41 = vunpack.i.l.bf16 %v7267_v38 }
 0x450   : > { %v7272_v34 = vpop.permute.xlu1 %7271  ;;  %3931 = vmatprep.mubr.f32.mxu1 %v3683_v12  ;;  %7556 = vrot.lane.b32.xlu0 %v7555_v45, %s8232_s8  ;;  %v10437_v45 = vld [vmem:[#allocation3 + $0x180] sm:$0xff] }
 0x451   : > { %v7274_v44 = vunpack.i.h.bf16 %v7272_v34  ;;  %v7273_v15 = vunpack.i.l.bf16 %v7272_v34  ;;  %3932 = vmatmul.mubr.f32.gmra.mxu1 %v3587_v61  ;;  %v3620_v60 = vsel %vm2426_vm11, %v2593_v28, %v7268_v41  ;;  %v3522_v1 = vsel %vm2426_vm11, %v2465_v30, %v7269_v32  ;;  %v10442_v34 = vld [vmem:[#allocation3 + $0x181] sm:$0xff] }
 0x452   : > { %7561 = vrot.lane.b32.xlu1 %v7560_v21, %s8231_s17  ;;  %v7277_v17 = vpop.permute.xlu0 %7276  ;;  %v7600_v12 = vpack.i.bf16 %v10244_v47, %v10437_v45 }
 0x453   : > { %v7279_v39 = vunpack.i.h.bf16 %v7277_v17  ;;  %v7278_v36 = vunpack.i.l.bf16 %v7277_v17  ;;  %v3652_v27 = vsel %vm3548_vm1, %v3620_v60, %v7273_v15  ;;  %v3555_v25 = vsel %vm3548_vm1, %v3522_v1, %v7274_v44 }
 0x454   : > { %v7282_v62 = vpop.permute.xlu1 %7281  ;;  %7566 = vrot.lane.b32.xlu0 %v7565_v7, %s8230_s16  ;;  %v7605_v15 = vpack.i.bf16 %v10399_v59, %v10442_v34  ;;  %v7610_v17 = vpack.i.bf16 %v10384_v29, %v10274_v11  ;;  %v2468_v59 = vld [vmem:[#allocation3 + $0x68] sm:$0xff] }
 0x455   : > { %v7284_v3 = vunpack.i.h.bf16 %v7282_v62  ;;  %v7283_v9 = vunpack.i.l.bf16 %v7282_v62  ;;  %v3684_v56 = vsel %vm3581_vm3, %v3652_v27, %v7278_v36  ;;  %v3588_v2 = vsel %vm3581_vm3, %v3555_v25, %v7279_v39  ;;  %v2596_v62 = vld [vmem:[#allocation3 + $0x81] sm:$0xff] }
 0x456   : > { %7571 = vrot.lane.b32.xlu1 %v7570_v5, %s8232_s8  ;;  %v7287_v48 = vpop.permute.xlu0 %7286  ;;  %3936 = vmatprep.mubr.f32.mxu1 %v3684_v56  ;;  %v10459_v39 = vld [vmem:[#allocation3 + $0x188] sm:$0xff] }
 0x457   : > { %v7289_v23 = vunpack.i.h.bf16 %v7287_v48  ;;  %v7288_v57 = vunpack.i.l.bf16 %v7287_v48  ;;  %3937 = vmatmul.mubr.f32.gmra.mxu1 %v3588_v2  ;;  %v3621_v26 = vsel %vm2426_vm11, %v2594_v52, %v7283_v9  ;;  %v3523_v31 = vsel %vm2426_vm11, %v2466_v20, %v7284_v3  ;;  %v10461_v3 = vld [vmem:[#allocation3 + $0x189] sm:$0xff]  ;;  %v2746_v2 = vld [vmem:[#allocation3 + $0x19a] sm:$0xff] }
 0x458   : > { %v7292_v8 = vpop.permute.xlu1 %7291  ;;  %7576 = vrot.lane.b32.xlu0 %v7575_v19, %s8231_s17  ;;  %v7615_v29 = vpack.i.bf16 %v10258_v58, %v10459_v39  ;;  %7032 = vmatprep.mubr.msk.f32.mxu0 %vm2426_vm11, %v2746_v2  ;;  %v2747_v20 = vld [vmem:[#allocation3 + $0x1a2] sm:$0xff]  ;;  %v2471_v2 = vld [vmem:[#allocation3 + $0x90] sm:$0xff] }
 0x459   : > { %v7294_v42 = vunpack.i.h.bf16 %v7292_v8  ;;  %v7293_v50 = vunpack.i.l.bf16 %v7292_v8  ;;  %v3653_v46 = vsel %vm3548_vm1, %v3621_v26, %v7288_v57  ;;  %v3556_v13 = vsel %vm3548_vm1, %v3523_v31, %v7289_v23  ;;  %7033 = vmatmul.mubr.msk.f32.gmra.mxu0 %vm2426_vm11, %v2747_v20  ;;  %v2682_v26 = vld [vmem:[#allocation3 + $0x198] sm:$0xff] }
 0x45a   : > { %7581 = vrot.lane.b32.xlu1 %v7580_v51, %s8230_s16  ;;  %v7297_v37 = vpop.permute.xlu0 %7296  ;;  %v7620_v23 = vpack.i.bf16 %v10421_v49, %v10461_v3  ;;  %v2469_v31 = vld [vmem:[#allocation3 + $0x78] sm:$0xff]  ;;  %v7625_v49 = vpack.i.bf16 %v10404_v53, %v10278_v18 }
 0x45b   : > { %v3685_v33 = vsel %vm3581_vm3, %v3653_v46, %v7293_v50  ;;  %v3589_v10 = vsel %vm3581_vm3, %v3556_v13, %v7294_v42  ;;  %v7299_v43 = vunpack.i.h.bf16 %v7297_v37  ;;  %v7298_v22 = vunpack.i.l.bf16 %v7297_v37 }
 0x45c   : > { %v7302_v14 = vpop.permute.xlu1 %7301  ;;  %3941 = vmatprep.mubr.f32.mxu1 %v3685_v33  ;;  %7586 = vrot.lane.b32.xlu0 %v7585_v24, %s8232_s8  ;;  %v2597_v24 = vld [vmem:[#allocation3 + $0x91] sm:$0xff]  ;;  %v7630_v33 = vpack.i.bf16 %v10260_v0, %v2682_v26 }
 0x45d   : > { %v7304_v21 = vunpack.i.h.bf16 %v7302_v14  ;;  %v7303_v38 = vunpack.i.l.bf16 %v7302_v14  ;;  %3942 = vmatmul.mubr.f32.gmra.mxu1 %v3589_v10  ;;  %v3622_v61 = vsel %vm2426_vm11, %v2595_v55, %v7298_v22  ;;  %v3524_v28 = vsel %vm2426_vm11, %v2467_v35, %v7299_v43  ;;  %v2714_v14 = vld [vmem:[#allocation3 + $0x199] sm:$0xff] }
 0x45e   : > { %7591 = vrot.lane.b32.xlu1 %v7590_v40, %s8231_s17  ;;  %v7307_v30 = vpop.permute.xlu0 %7306 }
 0x45f   : > { %v7309_v41 = vunpack.i.h.bf16 %v7307_v30  ;;  %v7308_v44 = vunpack.i.l.bf16 %v7307_v30  ;;  %v3654_v5 = vsel %vm3548_vm1, %v3622_v61, %v7303_v38  ;;  %v3557_v60 = vsel %vm3548_vm1, %v3524_v28, %v7304_v21 }
 0x460   : > { %v7312_v32 = vpop.permute.xlu1 %7311  ;;  %7596 = vrot.lane.b32.xlu0 %v7595_v54, %s8230_s16  ;;  %v7635_v38 = vpack.i.bf16 %v10437_v45, %v2714_v14  ;;  %v7640_v30 = vpack.i.bf16 %v10423_v63, %v10295_v16  ;;  %v2470_v45 = vld [vmem:[#allocation3 + $0x80] sm:$0xff] }
 0x461   : > { %v7314_v7 = vunpack.i.h.bf16 %v7312_v32  ;;  %v7313_v4 = vunpack.i.l.bf16 %v7312_v32  ;;  %v3686_v47 = vsel %vm3581_vm3, %v3654_v5, %v7308_v44  ;;  %v3590_v1 = vsel %vm3581_vm3, %v3557_v60, %v7309_v41  ;;  %v2598_v32 = vld [vmem:[#allocation3 + $0x99] sm:$0xff] }
 0x462   : > { %7601 = vrot.lane.b32.xlu1 %v7600_v12, %s8232_s8  ;;  %v7317_v36 = vpop.permute.xlu0 %7316  ;;  %3946 = vmatprep.mubr.f32.mxu1 %v3686_v47  ;;  %v2683_v41 = vld [vmem:[#allocation3 + $0x1a0] sm:$0xff] }
 0x463   : > { %v7319_v9 = vunpack.i.h.bf16 %v7317_v36  ;;  %v7318_v27 = vunpack.i.l.bf16 %v7317_v36  ;;  %3947 = vmatmul.mubr.f32.gmra.mxu1 %v3590_v1  ;;  %v3623_v51 = vsel %vm2426_vm11, %v2596_v62, %v7313_v4  ;;  %v3525_v52 = vsel %vm2426_vm11, %v2468_v59, %v7314_v7  ;;  %v2715_v7 = vld [vmem:[#allocation3 + $0x1a1] sm:$0xff] }
 0x464   : > { %v7322_v19 = vpop.permute.xlu1 %7321  ;;  %7606 = vrot.lane.b32.xlu0 %v7605_v15, %s8231_s17  ;;  %v7650_v36 = vpack.i.bf16 %v10459_v39, %v2715_v7 }
 0x465   : > { %v7324_v25 = vunpack.i.h.bf16 %v7322_v19  ;;  %v7323_v56 = vunpack.i.l.bf16 %v7322_v19  ;;  %v3655_v48 = vsel %vm3548_vm1, %v3623_v51, %v7318_v27  ;;  %v3558_v8 = vsel %vm3548_vm1, %v3525_v52, %v7319_v9 }
 0x466   : > { %7611 = vrot.lane.b32.xlu1 %v7610_v17, %s8230_s16  ;;  %v7327_v57 = vpop.permute.xlu0 %7326  ;;  %v7645_v17 = vpack.i.bf16 %v10274_v11, %v2683_v41 }
 0x467   : > { %v3687_v58 = vsel %vm3581_vm3, %v3655_v48, %v7323_v56  ;;  %v3591_v50 = vsel %vm3581_vm3, %v3558_v8, %v7324_v25  ;;  %v7329_v46 = vunpack.i.h.bf16 %v7327_v57  ;;  %v7328_v13 = vunpack.i.l.bf16 %v7327_v57  ;;  %v2599_v56 = vld [vmem:[#allocation3 + $0xa9] sm:$0xff] }
 0x468   : > { %v7332_v42 = vpop.permute.xlu1 %7331  ;;  %3951 = vmatprep.mubr.f32.mxu1 %v3687_v58  ;;  %7616 = vrot.lane.b32.xlu0 %v7615_v29, %s8232_s8 }
 0x469   : > { %v7334_v40 = vunpack.i.h.bf16 %v7332_v42  ;;  %v7333_v37 = vunpack.i.l.bf16 %v7332_v42  ;;  %3952 = vmatmul.mubr.f32.gmra.mxu1 %v3591_v50  ;;  %v3624_v10 = vsel %vm2426_vm11, %v2597_v24, %v7328_v13  ;;  %v3526_v55 = vsel %vm2426_vm11, %v2469_v31, %v7329_v46  ;;  %v2600_v46 = vld [vmem:[#allocation3 + $0xb1] sm:$0xff] }
 0x46a   : > { %7621 = vrot.lane.b32.xlu1 %v7620_v23, %s8231_s17  ;;  %v7337_v35 = vpop.permute.xlu0 %7336  ;;  %v2472_v13 = vld [vmem:[#allocation3 + $0x98] sm:$0xff] }
 0x46b   : > { %v7339_v22 = vunpack.i.h.bf16 %v7337_v35  ;;  %v7338_v21 = vunpack.i.l.bf16 %v7337_v35  ;;  %v3656_v18 = vsel %vm3548_vm1, %v3624_v10, %v7333_v37  ;;  %v3559_v61 = vsel %vm3548_vm1, %v3526_v55, %v7334_v40 }
 0x46c   : > { %v7342_v43 = vpop.permute.xlu1 %7341  ;;  %7626 = vrot.lane.b32.xlu0 %v7625_v49, %s8230_s16 }
 0x46d   : > { %v7344_v54 = vunpack.i.h.bf16 %v7342_v43  ;;  %v7343_v12 = vunpack.i.l.bf16 %v7342_v43  ;;  %v3688_v0 = vsel %vm3581_vm3, %v3656_v18, %v7338_v21  ;;  %v3592_v28 = vsel %vm3581_vm3, %v3559_v61, %v7339_v22  ;;  %v2601_v18 = vld [vmem:[#allocation3 + $0xc1] sm:$0xff] }
 0x46e   : > { %7631 = vrot.lane.b32.xlu1 %v7630_v33, %s8232_s8  ;;  %v7347_v44 = vpop.permute.xlu0 %7346  ;;  %3956 = vmatprep.mubr.f32.mxu1 %v3688_v0  ;;  %v2473_v61 = vld [vmem:[#allocation3 + $0xa8] sm:$0xff] }
 0x46f   : > { %v7349_v4 = vunpack.i.h.bf16 %v7347_v44  ;;  %v7348_v5 = vunpack.i.l.bf16 %v7347_v44  ;;  %3957 = vmatmul.mubr.f32.gmra.mxu1 %v3592_v28  ;;  %v3625_v1 = vsel %vm2426_vm11, %v2598_v32, %v7343_v12  ;;  %v3527_v16 = vsel %vm2426_vm11, %v2470_v45, %v7344_v54 }
 0x470   : > { %v7352_v15 = vpop.permute.xlu1 %7351  ;;  %7636 = vrot.lane.b32.xlu0 %v7635_v38, %s8231_s17 }
 0x471   : > { %v7354_v60 = vunpack.i.h.bf16 %v7352_v15  ;;  %v7353_v47 = vunpack.i.l.bf16 %v7352_v15  ;;  %v3657_v62 = vsel %vm3548_vm1, %v3625_v1, %v7348_v5  ;;  %v3560_v59 = vsel %vm3548_vm1, %v3527_v16, %v7349_v4 }
 0x472   : > { %7641 = vrot.lane.b32.xlu1 %v7640_v30, %s8230_s16  ;;  %v7357_v19 = vpop.permute.xlu0 %7356 }
 0x473   : > { %v3689_v27 = vsel %vm3581_vm3, %v3657_v62, %v7353_v47  ;;  %v3593_v25 = vsel %vm3581_vm3, %v3560_v59, %v7354_v60  ;;  %v7359_v51 = vunpack.i.h.bf16 %v7357_v19  ;;  %v7358_v11 = vunpack.i.l.bf16 %v7357_v19  ;;  %v2602_v62 = vld [vmem:[#allocation3 + $0xc9] sm:$0xff] }
 0x474   : > { %v7362_v9 = vpop.permute.xlu1 %7361  ;;  %3961 = vmatprep.mubr.f32.mxu1 %v3689_v27  ;;  %7646 = vrot.lane.b32.xlu0 %v7645_v17, %s8232_s8  ;;  %v2474_v59 = vld [vmem:[#allocation3 + $0xb0] sm:$0xff] }
 0x475   : > { %v7364_v29 = vunpack.i.h.bf16 %v7362_v9  ;;  %v7363_v52 = vunpack.i.l.bf16 %v7362_v9  ;;  %3962 = vmatmul.mubr.f32.gmra.mxu1 %v3593_v25  ;;  %v3626_v39 = vsel %vm2426_vm11, %v2599_v56, %v7358_v11  ;;  %v3528_v20 = vsel %vm2426_vm11, %v2471_v2, %v7359_v51 }
 0x476   : > { %7651 = vrot.lane.b32.xlu1 %v7650_v36, %s8231_s17  ;;  %v7367_v48 = vpop.permute.xlu0 %7366 }
 0x477   : > { %v7369_v23 = vunpack.i.h.bf16 %v7367_v48  ;;  %v7368_v57 = vunpack.i.l.bf16 %v7367_v48  ;;  %v3658_v50 = vsel %vm3548_vm1, %v3626_v39, %v7363_v52  ;;  %v3561_v26 = vsel %vm3548_vm1, %v3528_v20, %v7364_v29 }
 0x478   : > { %v7372_v8 = vpop.permute.xlu1 %7371 }
 0x479   : > { %v7374_v42 = vunpack.i.h.bf16 %v7372_v8  ;;  %v7373_v58 = vunpack.i.l.bf16 %v7372_v8  ;;  %v3690_v24 = vsel %vm3581_vm3, %v3658_v50, %v7368_v57  ;;  %v3594_v31 = vsel %vm3581_vm3, %v3561_v26, %v7369_v23  ;;  %v2603_v8 = vld [vmem:[#allocation3 + $0xd9] sm:$0xff] }
 0x47a   : > { %v7377_v40 = vpop.permute.xlu0 %7376  ;;  %3966 = vmatprep.mubr.f32.mxu1 %v3690_v24  ;;  %v2475_v23 = vld [vmem:[#allocation3 + $0xc0] sm:$0xff] }
 0x47b   : > { %v7379_v49 = vunpack.i.h.bf16 %v7377_v40  ;;  %v7378_v14 = vunpack.i.l.bf16 %v7377_v40  ;;  %3967 = vmatmul.mubr.f32.gmra.mxu1 %v3594_v31  ;;  %v3627_v55 = vsel %vm2426_vm11, %v2600_v46, %v7373_v58  ;;  %v3529_v35 = vsel %vm2426_vm11, %v2472_v13, %v7374_v42 }
 0x47c   : > { %v7382_v37 = vpop.permute.xlu1 %7381 }
 0x47d   : > { %v7384_v33 = vunpack.i.h.bf16 %v7382_v37  ;;  %v7383_v10 = vunpack.i.l.bf16 %v7382_v37  ;;  %v3659_v43 = vsel %vm3548_vm1, %v3627_v55, %v7378_v14  ;;  %v3562_v22 = vsel %vm3548_vm1, %v3529_v35, %v7379_v49  ;;  %v2604_v35 = vld [vmem:[#allocation3 + $0xe1] sm:$0xff] }
 0x47e   : > { %v7387_v21 = vpop.permute.xlu0 %7386 }
 0x47f   : > { %v3691_v54 = vsel %vm3581_vm3, %v3659_v43, %v7383_v10  ;;  %v3595_v12 = vsel %vm3581_vm3, %v3562_v22, %v7384_v33  ;;  %v7389_v0 = vunpack.i.h.bf16 %v7387_v21  ;;  %v7388_v28 = vunpack.i.l.bf16 %v7387_v21  ;;  %v2476_v43 = vld [vmem:[#allocation3 + $0xc8] sm:$0xff] }
 0x480   : > { %v7392_v38 = vpop.permute.xlu1 %7391  ;;  %3971 = vmatprep.mubr.f32.mxu1 %v3691_v54 }
 0x481   : > { %v7394_v30 = vunpack.i.h.bf16 %v7392_v38  ;;  %v7393_v32 = vunpack.i.l.bf16 %v7392_v38  ;;  %3972 = vmatmul.mubr.f32.gmra.mxu1 %v3595_v12  ;;  %v3628_v41 = vsel %vm2426_vm11, %v2601_v18, %v7388_v28  ;;  %v3530_v45 = vsel %vm2426_vm11, %v2473_v61, %v7389_v0 }
 0x482   : > { %v7397_v44 = vpop.permute.xlu0 %7396 }
 0x483   : > { %v7399_v7 = vunpack.i.h.bf16 %v7397_v44  ;;  %v7398_v4 = vunpack.i.l.bf16 %v7397_v44  ;;  %v3660_v47 = vsel %vm3548_vm1, %v3628_v41, %v7393_v32  ;;  %v3563_v1 = vsel %vm3548_vm1, %v3530_v45, %v7394_v30 }
 0x484   : > { %v7402_v15 = vpop.permute.xlu1 %7401 }
 0x485   : > { %v7404_v5 = vunpack.i.h.bf16 %v7402_v15  ;;  %v7403_v60 = vunpack.i.l.bf16 %v7402_v15  ;;  %v3692_v17 = vsel %vm3581_vm3, %v3660_v47, %v7398_v4  ;;  %v3596_v16 = vsel %vm3581_vm3, %v3563_v1, %v7399_v7  ;;  %v2605_v15 = vld [vmem:[#allocation3 + $0xf1] sm:$0xff] }
 0x486   : > { %v7407_v36 = vpop.permute.xlu0 %7406  ;;  %3976 = vmatprep.mubr.f32.mxu1 %v3692_v17  ;;  %v2477_v7 = vld [vmem:[#allocation3 + $0xd8] sm:$0xff] }
 0x487   : > { %v7409_v9 = vunpack.i.h.bf16 %v7407_v36  ;;  %v7408_v27 = vunpack.i.l.bf16 %v7407_v36  ;;  %3977 = vmatmul.mubr.f32.gmra.mxu1 %v3596_v16  ;;  %v3629_v2 = vsel %vm2426_vm11, %v2602_v62, %v7403_v60  ;;  %v3531_v51 = vsel %vm2426_vm11, %v2474_v59, %v7404_v5 }
 0x488   : > { %v7412_v19 = vpop.permute.xlu1 %7411 }
 0x489   : > { %v7414_v25 = vunpack.i.h.bf16 %v7412_v19  ;;  %v7413_v56 = vunpack.i.l.bf16 %v7412_v19  ;;  %v3661_v11 = vsel %vm3548_vm1, %v3629_v2, %v7408_v27  ;;  %v3564_v29 = vsel %vm3548_vm1, %v3531_v51, %v7409_v9  ;;  %v2606_v51 = vld [vmem:[#allocation3 + $0xf9] sm:$0xff] }
 0x48a   : > { %v7417_v52 = vpop.permute.xlu0 %7416 }
 0x48b   : > { %v3693_v20 = vsel %vm3581_vm3, %v3661_v11, %v7413_v56  ;;  %v3597_v48 = vsel %vm3581_vm3, %v3564_v29, %v7414_v25  ;;  %v7419_v57 = vunpack.i.h.bf16 %v7417_v52  ;;  %v7418_v42 = vunpack.i.l.bf16 %v7417_v52  ;;  %v2478_v11 = vld [vmem:[#allocation3 + $0xe0] sm:$0xff] }
 0x48c   : > { %v7422_v39 = vpop.permute.xlu1 %7421  ;;  %3981 = vmatprep.mubr.f32.mxu1 %v3693_v20 }
 0x48d   : > { %v7424_v58 = vunpack.i.h.bf16 %v7422_v39  ;;  %v7423_v50 = vunpack.i.l.bf16 %v7422_v39  ;;  %3982 = vmatmul.mubr.f32.gmra.mxu1 %v3597_v48  ;;  %v3630_v26 = vsel %vm2426_vm11, %v2603_v8, %v7418_v42  ;;  %v3532_v24 = vsel %vm2426_vm11, %v2475_v23, %v7419_v57 }
 0x48e   : > { %v7427_v31 = vpop.permute.xlu0 %7426 }
 0x48f   : > { %v7429_v13 = vunpack.i.h.bf16 %v7427_v31  ;;  %v7428_v40 = vunpack.i.l.bf16 %v7427_v31  ;;  %v3662_v14 = vsel %vm3548_vm1, %v3630_v26, %v7423_v50  ;;  %v3565_v33 = vsel %vm3548_vm1, %v3532_v24, %v7424_v58 }
 0x490   : > { %v7432_v46 = vpop.permute.xlu1 %7431 }
 0x491   : > { %v7434_v37 = vunpack.i.h.bf16 %v7432_v46  ;;  %v7433_v49 = vunpack.i.l.bf16 %v7432_v46  ;;  %v3694_v10 = vsel %vm3581_vm3, %v3662_v14, %v7428_v40  ;;  %v3598_v55 = vsel %vm3581_vm3, %v3565_v33, %v7429_v13  ;;  %v2607_v46 = vld [vmem:[#allocation3 + $0x109] sm:$0xff] }
 0x492   : > { %v7437_v22 = vpop.permute.xlu0 %7436  ;;  %3986 = vmatprep.mubr.f32.mxu1 %v3694_v10  ;;  %v2479_v13 = vld [vmem:[#allocation3 + $0xf0] sm:$0xff] }
 0x493   : > { %v7439_v38 = vunpack.i.h.bf16 %v7437_v22  ;;  %v7438_v54 = vunpack.i.l.bf16 %v7437_v22  ;;  %3987 = vmatmul.mubr.f32.gmra.mxu1 %v3598_v55  ;;  %v3631_v61 = vsel %vm2426_vm11, %v2604_v35, %v7433_v49  ;;  %v3533_v0 = vsel %vm2426_vm11, %v2476_v43, %v7434_v37 }
 0x494   : > { %v7442_v21 = vpop.permute.xlu1 %7441 }
 0x495   : > { %v7444_v12 = vunpack.i.h.bf16 %v7442_v21  ;;  %v7443_v18 = vunpack.i.l.bf16 %v7442_v21  ;;  %v3663_v28 = vsel %vm3548_vm1, %v3631_v61, %v7438_v54  ;;  %v3566_v30 = vsel %vm3548_vm1, %v3533_v0, %v7439_v38  ;;  %v2608_v0 = vld [vmem:[#allocation3 + $0x111] sm:$0xff] }
 0x496   : > { %v7447_v32 = vpop.permute.xlu0 %7446 }
 0x497   : > { %v3695_v45 = vsel %vm3581_vm3, %v3663_v28, %v7443_v18  ;;  %v3599_v44 = vsel %vm3581_vm3, %v3566_v30, %v7444_v12  ;;  %v7449_v4 = vunpack.i.h.bf16 %v7447_v32  ;;  %v7448_v5 = vunpack.i.l.bf16 %v7447_v32  ;;  %v2480_v28 = vld [vmem:[#allocation3 + $0xf8] sm:$0xff] }
 0x498   : > { %v7452_v41 = vpop.permute.xlu1 %7451  ;;  %3991 = vmatprep.mubr.f32.mxu1 %v3695_v45 }
 0x499   : > { %v7454_v60 = vunpack.i.h.bf16 %v7452_v41  ;;  %v7453_v47 = vunpack.i.l.bf16 %v7452_v41  ;;  %3992 = vmatmul.mubr.f32.gmra.mxu1 %v3599_v44  ;;  %v3632_v1 = vsel %vm2426_vm11, %v2605_v15, %v7448_v5  ;;  %v3534_v17 = vsel %vm2426_vm11, %v2477_v7, %v7449_v4 }
 0x49a   : > { %v7457_v16 = vpop.permute.xlu0 %7456 }
 0x49b   : > { %v7459_v59 = vunpack.i.h.bf16 %v7457_v16  ;;  %v7458_v36 = vunpack.i.l.bf16 %v7457_v16  ;;  %v3664_v27 = vsel %vm3548_vm1, %v3632_v1, %v7453_v47  ;;  %v3567_v25 = vsel %vm3548_vm1, %v3534_v17, %v7454_v60  ;;  %v2609_v16 = vld [vmem:[#allocation3 + $0x121] sm:$0xff] }
 0x49c   : > { %v7462_v62 = vpop.permute.xlu1 %7461 }
 0x49d   : > { %v7464_v19 = vunpack.i.h.bf16 %v7462_v62  ;;  %v7463_v9 = vunpack.i.l.bf16 %v7462_v62  ;;  %v3696_v56 = vsel %vm3581_vm3, %v3664_v27, %v7458_v36  ;;  %v3600_v2 = vsel %vm3581_vm3, %v3567_v25, %v7459_v59  ;;  %v2481_v62 = vld [vmem:[#allocation3 + $0x108] sm:$0xff] }
 0x49e   : > { %v7467_v29 = vpop.permute.xlu0 %7466  ;;  %3996 = vmatprep.mubr.f32.mxu1 %v3696_v56 }
 0x49f   : > { %v7469_v39 = vunpack.i.h.bf16 %v7467_v29  ;;  %v7468_v20 = vunpack.i.l.bf16 %v7467_v29  ;;  %3997 = vmatmul.mubr.f32.gmra.mxu1 %v3600_v2  ;;  %v3633_v23 = vsel %vm2426_vm11, %v2606_v51, %v7463_v9  ;;  %v3535_v57 = vsel %vm2426_vm11, %v2478_v11, %v7464_v19 }
 0x4a0   : > { %v7472_v52 = vpop.permute.xlu1 %7471 }
 0x4a1   : > { %v7474_v48 = vunpack.i.h.bf16 %v7472_v52  ;;  %v7473_v8 = vunpack.i.l.bf16 %v7472_v52  ;;  %v3665_v42 = vsel %vm3548_vm1, %v3633_v23, %v7468_v20  ;;  %v3568_v58 = vsel %vm3548_vm1, %v3535_v57, %v7469_v39  ;;  %v2610_v57 = vld [vmem:[#allocation3 + $0x129] sm:$0xff] }
 0x4a2   : > { %v7477_v50 = vpop.permute.xlu0 %7476 }
 0x4a3   : > { %v3697_v24 = vsel %vm3581_vm3, %v3665_v42, %v7473_v8  ;;  %v3601_v31 = vsel %vm3581_vm3, %v3568_v58, %v7474_v48  ;;  %v7479_v40 = vunpack.i.h.bf16 %v7477_v50  ;;  %v7478_v37 = vunpack.i.l.bf16 %v7477_v50  ;;  %v2482_v42 = vld [vmem:[#allocation3 + $0x110] sm:$0xff] }
 0x4a4   : > { %v7482_v26 = vpop.permute.xlu1 %7481  ;;  %4001 = vmatprep.mubr.f32.mxu1 %v3697_v24 }
 0x4a5   : > { %v7484_v49 = vunpack.i.h.bf16 %v7482_v26  ;;  %v7483_v14 = vunpack.i.l.bf16 %v7482_v26  ;;  %4002 = vmatmul.mubr.f32.gmra.mxu1 %v3601_v31  ;;  %v3634_v33 = vsel %vm2426_vm11, %v2607_v46, %v7478_v37  ;;  %v3536_v10 = vsel %vm2426_vm11, %v2479_v13, %v7479_v40 }
 0x4a6   : > { %v7487_v55 = vpop.permute.xlu0 %7486 }
 0x4a7   : > { %v7489_v35 = vunpack.i.h.bf16 %v7487_v55  ;;  %v7488_v43 = vunpack.i.l.bf16 %v7487_v55  ;;  %v3666_v54 = vsel %vm3548_vm1, %v3634_v33, %v7483_v14  ;;  %v3569_v12 = vsel %vm3548_vm1, %v3536_v10, %v7484_v49  ;;  %v2611_v55 = vld [vmem:[#allocation3 + $0x139] sm:$0xff] }
 0x4a8   : > { %v7492_v22 = vpop.permute.xlu1 %7491 }
 0x4a9   : > { %v7494_v21 = vunpack.i.h.bf16 %v7492_v22  ;;  %v7493_v38 = vunpack.i.l.bf16 %v7492_v22  ;;  %v3698_v18 = vsel %vm3581_vm3, %v3666_v54, %v7488_v43  ;;  %v3602_v61 = vsel %vm3581_vm3, %v3569_v12, %v7489_v35  ;;  %v2483_v35 = vld [vmem:[#allocation3 + $0x120] sm:$0xff] }
 0x4aa   : > { %v7497_v30 = vpop.permute.xlu0 %7496  ;;  %4006 = vmatprep.mubr.f32.mxu1 %v3698_v18 }
 0x4ab   : > { %v7499_v32 = vunpack.i.h.bf16 %v7497_v30  ;;  %v7498_v41 = vunpack.i.l.bf16 %v7497_v30  ;;  %4007 = vmatmul.mubr.f32.gmra.mxu1 %v3602_v61  ;;  %v3635_v7 = vsel %vm2426_vm11, %v2608_v0, %v7493_v38  ;;  %v3537_v4 = vsel %vm2426_vm11, %v2480_v28, %v7494_v21 }
 0x4ac   : > { %v7502_v45 = vpop.permute.xlu1 %7501 }
 0x4ad   : > { %v7504_v44 = vunpack.i.h.bf16 %v7502_v45  ;;  %v7503_v15 = vunpack.i.l.bf16 %v7502_v45  ;;  %v3667_v5 = vsel %vm3548_vm1, %v3635_v7, %v7498_v41  ;;  %v3570_v60 = vsel %vm3548_vm1, %v3537_v4, %v7499_v32  ;;  %v2612_v4 = vld [vmem:[#allocation3 + $0x141] sm:$0xff] }
 0x4ae   : > { %v7507_v47 = vpop.permute.xlu0 %7506 }
 0x4af   : > { %v3699_v1 = vsel %vm3581_vm3, %v3667_v5, %v7503_v15  ;;  %v3603_v17 = vsel %vm3581_vm3, %v3570_v60, %v7504_v44  ;;  %v7509_v59 = vunpack.i.h.bf16 %v7507_v47  ;;  %v7508_v36 = vunpack.i.l.bf16 %v7507_v47  ;;  %v2484_v5 = vld [vmem:[#allocation3 + $0x128] sm:$0xff] }
 0x4b0   : > { %v7512_v19 = vpop.permute.xlu1 %7511  ;;  %4011 = vmatprep.mubr.f32.mxu1 %v3699_v1 }
 0x4b1   : > { %v7514_v9 = vunpack.i.h.bf16 %v7512_v19  ;;  %v7513_v27 = vunpack.i.l.bf16 %v7512_v19  ;;  %4012 = vmatmul.mubr.f32.gmra.mxu1 %v3603_v17  ;;  %v3636_v25 = vsel %vm2426_vm11, %v2609_v16, %v7508_v36  ;;  %v3538_v56 = vsel %vm2426_vm11, %v2481_v62, %v7509_v59 }
 0x4b2   : > { %v7517_v2 = vpop.permute.xlu0 %7516 }
 0x4b3   : > { %v7519_v51 = vunpack.i.h.bf16 %v7517_v2  ;;  %v7518_v11 = vunpack.i.l.bf16 %v7517_v2  ;;  %v3668_v20 = vsel %vm3548_vm1, %v3636_v25, %v7513_v27  ;;  %v3571_v48 = vsel %vm3548_vm1, %v3538_v56, %v7514_v9  ;;  %v2613_v2 = vld [vmem:[#allocation3 + $0x151] sm:$0xff] }
 0x4b4   : > { %v7522_v29 = vpop.permute.xlu1 %7521 }
 0x4b5   : > { %v7524_v52 = vunpack.i.h.bf16 %v7522_v29  ;;  %v7523_v39 = vunpack.i.l.bf16 %v7522_v29  ;;  %v3700_v8 = vsel %vm3581_vm3, %v3668_v20, %v7518_v11  ;;  %v3604_v23 = vsel %vm3581_vm3, %v3571_v48, %v7519_v51  ;;  %v2485_v51 = vld [vmem:[#allocation3 + $0x138] sm:$0xff] }
 0x4b6   : > { %v7527_v58 = vpop.permute.xlu0 %7526  ;;  %4016 = vmatprep.mubr.f32.mxu1 %v3700_v8 }
 0x4b7   : > { %v7529_v50 = vunpack.i.h.bf16 %v7527_v58  ;;  %v7528_v26 = vunpack.i.l.bf16 %v7527_v58  ;;  %4017 = vmatmul.mubr.f32.gmra.mxu1 %v3604_v23  ;;  %v3637_v13 = vsel %vm2426_vm11, %v2610_v57, %v7523_v39  ;;  %v3539_v40 = vsel %vm2426_vm11, %v2482_v42, %v7524_v52 }
 0x4b8   : > { %v7532_v24 = vpop.permute.xlu1 %7531 }
 0x4b9   : > { %v7534_v31 = vunpack.i.h.bf16 %v7532_v24  ;;  %v7533_v46 = vunpack.i.l.bf16 %v7532_v24  ;;  %v3669_v37 = vsel %vm3548_vm1, %v3637_v13, %v7528_v26  ;;  %v3572_v49 = vsel %vm3548_vm1, %v3539_v40, %v7529_v50  ;;  %v2614_v40 = vld [vmem:[#allocation3 + $0x159] sm:$0xff] }
 0x4ba   : > { %v7537_v14 = vpop.permute.xlu0 %7536 }
 0x4bb   : > { %v3701_v33 = vsel %vm3581_vm3, %v3669_v37, %v7533_v46  ;;  %v3605_v10 = vsel %vm3581_vm3, %v3572_v49, %v7534_v31  ;;  %v7539_v43 = vunpack.i.h.bf16 %v7537_v14  ;;  %v7538_v22 = vunpack.i.l.bf16 %v7537_v14  ;;  %v2486_v37 = vld [vmem:[#allocation3 + $0x140] sm:$0xff] }
 0x4bc   : > { %v7542_v21 = vpop.permute.xlu1 %7541  ;;  %4021 = vmatprep.mubr.f32.mxu1 %v3701_v33 }
 0x4bd   : > { %v7544_v38 = vunpack.i.h.bf16 %v7542_v21  ;;  %v7543_v54 = vunpack.i.l.bf16 %v7542_v21  ;;  %4022 = vmatmul.mubr.f32.gmra.mxu1 %v3605_v10  ;;  %v3638_v12 = vsel %vm2426_vm11, %v2611_v55, %v7538_v22  ;;  %v3540_v18 = vsel %vm2426_vm11, %v2483_v35, %v7539_v43 }
 0x4be   : > { %v7547_v61 = vpop.permute.xlu0 %7546 }
 0x4bf   : > { %v7549_v0 = vunpack.i.h.bf16 %v7547_v61  ;;  %v7548_v28 = vunpack.i.l.bf16 %v7547_v61  ;;  %v3670_v45 = vsel %vm3548_vm1, %v3638_v12, %v7543_v54  ;;  %v3573_v44 = vsel %vm3548_vm1, %v3540_v18, %v7544_v38  ;;  %v2487_v61 = vld [vmem:[#allocation3 + $0x150] sm:$0xff] }
 0x4c0   : > { %v7552_v30 = vpop.permute.xlu1 %7551 }
 0x4c1   : > { %v7554_v32 = vunpack.i.h.bf16 %v7552_v30  ;;  %v7553_v41 = vunpack.i.l.bf16 %v7552_v30  ;;  %v3702_v15 = vsel %vm3581_vm3, %v3670_v45, %v7548_v28  ;;  %v3606_v7 = vsel %vm3581_vm3, %v3573_v44, %v7549_v0 }
 0x4c2   : > { %v7557_v60 = vpop.permute.xlu0 %7556  ;;  %4026 = vmatprep.mubr.f32.mxu1 %v3702_v15 }
 0x4c3   : > { %v7559_v47 = vunpack.i.h.bf16 %v7557_v60  ;;  %v7558_v1 = vunpack.i.l.bf16 %v7557_v60  ;;  %4027 = vmatmul.mubr.f32.gmra.mxu1 %v3606_v7  ;;  %v3639_v59 = vsel %vm2426_vm11, %v2612_v4, %v7553_v41  ;;  %v3541_v36 = vsel %vm2426_vm11, %v2484_v5, %v7554_v32 }
 0x4c4   : > { %v7562_v17 = vpop.permute.xlu1 %7561 }
 0x4c5   : > { %v7564_v16 = vunpack.i.h.bf16 %v7562_v17  ;;  %v7563_v62 = vunpack.i.l.bf16 %v7562_v17  ;;  %v3671_v19 = vsel %vm3548_vm1, %v3639_v59, %v7558_v1  ;;  %v3574_v9 = vsel %vm3548_vm1, %v3541_v36, %v7559_v47  ;;  %v2488_v59 = vld [vmem:[#allocation3 + $0x158] sm:$0xff] }
 0x4c6   : > { %v7567_v27 = vpop.permute.xlu0 %7566 }
 0x4c7   : > { %v3703_v25 = vsel %vm3581_vm3, %v3671_v19, %v7563_v62  ;;  %v3607_v56 = vsel %vm3581_vm3, %v3574_v9, %v7564_v16  ;;  %v7569_v11 = vunpack.i.h.bf16 %v7567_v27  ;;  %v7568_v29 = vunpack.i.l.bf16 %v7567_v27 }
 0x4c8   : > { %v7572_v52 = vpop.permute.xlu1 %7571  ;;  %4031 = vmatprep.mubr.f32.mxu1 %v3703_v25 }
 0x4c9   : > { %v7574_v39 = vunpack.i.h.bf16 %v7572_v52  ;;  %v7573_v20 = vunpack.i.l.bf16 %v7572_v52  ;;  %4032 = vmatmul.mubr.f32.gmra.mxu1 %v3607_v56  ;;  %v3640_v48 = vsel %vm2426_vm11, %v2613_v2, %v7568_v29  ;;  %v3542_v8 = vsel %vm2426_vm11, %v2485_v51, %v7569_v11 }
 0x4ca   : > { %v7577_v23 = vpop.permute.xlu0 %7576 }
 0x4cb   : > { %v7579_v57 = vunpack.i.h.bf16 %v7577_v23  ;;  %v7578_v42 = vunpack.i.l.bf16 %v7577_v23  ;;  %v3672_v24 = vsel %vm3548_vm1, %v3640_v48, %v7573_v20  ;;  %v3575_v31 = vsel %vm3548_vm1, %v3542_v8, %v7574_v39  ;;  %v2489_v20 = vld [vmem:[#allocation3 + $0x168] sm:$0xff] }
 0x4cc   : > { %v7582_v58 = vpop.permute.xlu1 %7581 }
 0x4cd   : > { %v7584_v50 = vunpack.i.h.bf16 %v7582_v58  ;;  %v7583_v26 = vunpack.i.l.bf16 %v7582_v58  ;;  %v3704_v46 = vsel %vm3581_vm3, %v3672_v24, %v7578_v42  ;;  %v3608_v13 = vsel %vm3581_vm3, %v3575_v31, %v7579_v57 }
 0x4ce   : > { %v7587_v49 = vpop.permute.xlu0 %7586  ;;  %4036 = vmatprep.mubr.f32.mxu1 %v3704_v46 }
 0x4cf   : > { %v7589_v14 = vunpack.i.h.bf16 %v7587_v49  ;;  %v7588_v33 = vunpack.i.l.bf16 %v7587_v49  ;;  %4037 = vmatmul.mubr.f32.gmra.mxu1 %v3608_v13  ;;  %v3641_v43 = vsel %vm2426_vm11, %v2614_v40, %v7583_v26  ;;  %v3543_v22 = vsel %vm2426_vm11, %v2486_v37, %v7584_v50 }
 0x4d0   : > { %v7592_v10 = vpop.permute.xlu1 %7591 }
 0x4d1   : > { %v7594_v55 = vunpack.i.h.bf16 %v7592_v10  ;;  %v7593_v35 = vunpack.i.l.bf16 %v7592_v10  ;;  %v3673_v21 = vsel %vm3548_vm1, %v3641_v43, %v7588_v33  ;;  %v3576_v38 = vsel %vm3548_vm1, %v3543_v22, %v7589_v14  ;;  %v2490_v33 = vld [vmem:[#allocation3 + $0x170] sm:$0xff] }
 0x4d2   : > { %v7597_v54 = vpop.permute.xlu0 %7596 }
 0x4d3   : > { %v3705_v12 = vsel %vm3581_vm3, %v3673_v21, %v7593_v35  ;;  %v3609_v18 = vsel %vm3581_vm3, %v3576_v38, %v7594_v55  ;;  %v7599_v0 = vunpack.i.h.bf16 %v7597_v54  ;;  %v7598_v28 = vunpack.i.l.bf16 %v7597_v54 }
 0x4d4   : > { %v7602_v30 = vpop.permute.xlu1 %7601  ;;  %4041 = vmatprep.mubr.f32.mxu1 %v3705_v12 }
 0x4d5   : > { %v7604_v32 = vunpack.i.h.bf16 %v7602_v30  ;;  %v7603_v41 = vunpack.i.l.bf16 %v7602_v30  ;;  %4042 = vmatmul.mubr.f32.gmra.mxu1 %v3609_v18  ;;  %v3642_v45 = vsel %vm2426_vm11, %v10404_v53, %v7598_v28  ;;  %v3544_v44 = vsel %vm2426_vm11, %v2487_v61, %v7599_v0  ;;  %v6989_v0 = vpop.f32.mrf.mxu0 }
 0x4d6   : > { %v7607_v15 = vpop.permute.xlu0 %7606 }
 0x4d7   : > { %v7609_v7 = vunpack.i.h.bf16 %v7607_v15  ;;  %v7608_v4 = vunpack.i.l.bf16 %v7607_v15  ;;  %v3674_v1 = vsel %vm3548_vm1, %v3642_v45, %v7603_v41  ;;  %v3577_v17 = vsel %vm3548_vm1, %v3544_v44, %v7604_v32  ;;  %v4133_v28 = vpop.f32.mrf.mxu0 }
 0x4d8   : > { %v7612_v5 = vpop.permute.xlu1 %7611  ;;  %v10629_v32 = vstv %s6777_s30 }
 0x4d9   : > { %v7614_v60 = vunpack.i.h.bf16 %v7612_v5  ;;  %v7613_v47 = vunpack.i.l.bf16 %v7612_v5  ;;  %v3706_v16 = vsel %vm3581_vm3, %v3674_v1, %v7608_v4  ;;  %v3610_v62 = vsel %vm3581_vm3, %v3577_v17, %v7609_v7  ;;  %v6992_v4 = vpop.f32.mrf.mxu0 }
 0x4da   : > { %v7617_v36 = vpop.permute.xlu0 %7616  ;;  %4046 = vmatprep.mubr.f32.mxu1 %v3706_v16 }
 0x4db   : > { %v7619_v53 = vunpack.i.h.bf16 %v7617_v36  ;;  %v7618_v19 = vunpack.i.l.bf16 %v7617_v36  ;;  %4047 = vmatmul.mubr.f32.gmra.mxu1 %v3610_v62  ;;  %v3643_v56 = vsel %vm2426_vm11, %v10423_v63, %v7613_v47  ;;  %v3545_v2 = vsel %vm2426_vm11, %v2488_v59, %v7614_v60  ;;  %v4143_v1 = vpop.f32.mrf.mxu0 }
 0x4dc   : > { %v7622_v9 = vpop.permute.xlu1 %7621 }
 0x4dd   : > { %v7624_v27 = vunpack.i.h.bf16 %v7622_v9  ;;  %v7623_v25 = vunpack.i.l.bf16 %v7622_v9  ;;  %v3675_v51 = vsel %vm3548_vm1, %v3643_v56, %v7618_v19  ;;  %v3578_v11 = vsel %vm3548_vm1, %v3545_v2, %v7619_v53  ;;  %v6995_v9 = vpop.f32.mrf.mxu0 }
 0x4de   : > { %v7627_v29 = vpop.permute.xlu0 %7626 }
 0x4df   : > { %v3707_v52 = vsel %vm3581_vm3, %v3675_v51, %v7623_v25  ;;  %v3611_v39 = vsel %vm3581_vm3, %v3578_v11, %v7624_v27  ;;  %v7629_v48 = vunpack.i.h.bf16 %v7627_v29  ;;  %v7628_v8 = vunpack.i.l.bf16 %v7627_v29  ;;  %v4153_v2 = vpop.f32.mrf.mxu0 }
 0x4e0   : > { %v7632_v23 = vpop.permute.xlu1 %7631  ;;  %4051 = vmatprep.mubr.f32.mxu1 %v3707_v52 }
 0x4e1   : > { %v7634_v57 = vunpack.i.h.bf16 %v7632_v23  ;;  %v7633_v42 = vunpack.i.l.bf16 %v7632_v23  ;;  %4052 = vmatmul.mubr.f32.gmra.mxu1 %v3611_v39  ;;  %v3644_v63 = vsel %vm2426_vm11, %v10442_v34, %v7628_v8  ;;  %v3546_v58 = vsel %vm2426_vm11, %v2489_v20, %v7629_v48  ;;  %v6998_v8 = vpop.f32.mrf.mxu0 }
 0x4e2   : > { %v7637_v50 = vpop.permute.xlu0 %7636 }
 0x4e3   : > { %v7639_v26 = vunpack.i.h.bf16 %v7637_v50  ;;  %v7638_v24 = vunpack.i.l.bf16 %v7637_v50  ;;  %v3676_v40 = vsel %vm3548_vm1, %v3644_v63, %v7633_v42  ;;  %v3579_v37 = vsel %vm3548_vm1, %v3546_v58, %v7634_v57  ;;  %v4163_v63 = vpop.f32.mrf.mxu0 }
 0x4e4   : > { %v7642_v31 = vpop.permute.xlu1 %7641 }
 0x4e5   : > { %v7644_v46 = vunpack.i.h.bf16 %v7642_v31  ;;  %v7643_v13 = vunpack.i.l.bf16 %v7642_v31  ;;  %v3708_v49 = vsel %vm3581_vm3, %v3676_v40, %v7638_v24  ;;  %v3612_v14 = vsel %vm3581_vm3, %v3579_v37, %v7639_v26  ;;  %v7001_v40 = vpop.f32.mrf.mxu0 }
 0x4e6   : > { %v7647_v10 = vpop.permute.xlu0 %7646  ;;  %4056 = vmatprep.mubr.f32.mxu1 %v3708_v49 }
 0x4e7   : > { %v7649_v34 = vunpack.i.h.bf16 %v7647_v10  ;;  %v7648_v55 = vunpack.i.l.bf16 %v7647_v10  ;;  %4057 = vmatmul.mubr.f32.gmra.mxu1 %v3612_v14  ;;  %v3645_v21 = vsel %vm2426_vm11, %v10461_v3, %v7643_v13  ;;  %v3547_v38 = vsel %vm2426_vm11, %v2490_v33, %v7644_v46  ;;  %v4173_v33 = vpop.f32.mrf.mxu0 }
 0x4e8   : > { %v7652_v35 = vpop.permute.xlu1 %7651 }
 0x4e9   : > { %v7654_v43 = vunpack.i.h.bf16 %v7652_v35  ;;  %v7653_v22 = vunpack.i.l.bf16 %v7652_v35  ;;  %v3677_v54 = vsel %vm3548_vm1, %v3645_v21, %v7648_v55  ;;  %v3580_v12 = vsel %vm3548_vm1, %v3547_v38, %v7649_v34  ;;  %v7004_v38 = vpop.f32.mrf.mxu0 }
 0x4eb   : > { %v3709_v18 = vsel %vm3581_vm3, %v3677_v54, %v7653_v22  ;;  %v3613_v61 = vsel %vm3581_vm3, %v3580_v12, %v7654_v43 }
 0x4ec   : > { %4061 = vmatprep.mubr.f32.mxu1 %v3709_v18 }
 0x4ed   : > { %4062 = vmatmul.mubr.f32.gmra.mxu1 %v3613_v61  ;;  %v4183_v61 = vpop.f32.mrf.mxu0 }
 0x4f4   : > { %v3908_v30 = vpop.f32.mrf.mxu1 }
 0x4f5   : > { %v4134_v41 = vadd.f32 %v4133_v28, %v3908_v30 }
 0x4f6   : > { %v3910_v3 = vpop.f32.mrf.mxu1 }
 0x4f7   : > { %vm4293_vm12 = vcmp.ge.f32.partialorder %v4134_v41, 0.0  ;;  %v4326_v45 = vmul.f32 %v10629_v32, %v4134_v41 }
 0x4f9   : > { %v3913_v44 = vpop.f32.mrf.mxu1  ;;  %v10632_v15 = vsel %vm4293_vm12, %v4134_v41, %v4326_v45 }
 0x4fa   : > { %v4139_v7 = vadd.f32 %v6989_v0, %v3913_v44 }
 0x4fb   : > { %v3915_v5 = vpop.f32.mrf.mxu1 }
 0x4fc   : > { %vm4294_vm13 = vcmp.ge.f32.partialorder %v4139_v7, 0.0  ;;  %v4327_v60 = vmul.f32 %v10629_v32, %v4139_v7 }
 0x4fe   : > { %v10635_v47 = vsel %vm4294_vm13, %v4139_v7, %v4327_v60  ;;  %v7007_v7 = vpop.f32.mrf.mxu0 }
 0x4ff   : > { %v3918_v17 = vpop.f32.mrf.mxu1 }
 0x500   : > { %v4144_v16 = vadd.f32 %v4143_v1, %v3918_v17  ;;  %v4193_v1 = vpop.f32.mrf.mxu0 }
 0x501   : > { %v3920_v62 = vpop.f32.mrf.mxu1 }
 0x502   : > { %vm4295_vm14 = vcmp.ge.f32.partialorder %v4144_v16, 0.0  ;;  %v4328_v59 = vmul.f32 %v10629_v32, %v4144_v16 }
 0x504   : > { %v10638_v36 = vsel %vm4295_vm14, %v4144_v16, %v4328_v59 }
 0x505   : > { %v3923_v53 = vpop.f32.mrf.mxu1 }
 0x506   : > { %v4149_v19 = vadd.f32 %v6992_v4, %v3923_v53 }
 0x507   : > { %v3925_v27 = vpop.f32.mrf.mxu1 }
 0x508   : > { %vm4296_vm15 = vcmp.ge.f32.partialorder %v4149_v19, 0.0  ;;  %v4329_v25 = vmul.f32 %v10629_v32, %v4149_v19  ;;  %v7010_v27 = vpop.f32.mrf.mxu0 }
 0x50a   : > { %v10641_v56 = vsel %vm4296_vm15, %v4149_v19, %v4329_v25 }
 0x50b   : > { %v3928_v51 = vpop.f32.mrf.mxu1 }
 0x50c   : > { %v4154_v11 = vadd.f32 %v4153_v2, %v3928_v51 }
 0x50d   : > { %v3930_v29 = vpop.f32.mrf.mxu1 }
 0x50e   : > { %vm4297_vm0 = vcmp.ge.f32.partialorder %v4154_v11, 0.0  ;;  %v4330_v52 = vmul.f32 %v10629_v32, %v4154_v11 }
 0x510   : > { %v10644_v39 = vsel %vm4297_vm0, %v4154_v11, %v4330_v52  ;;  %v4203_v11 = vpop.f32.mrf.mxu0 }
 0x511   : > { %v3933_v20 = vpop.f32.mrf.mxu1 }
 0x512   : > { %v4159_v48 = vadd.f32 %v6995_v9, %v3933_v20 }
 0x513   : > { %v3935_v23 = vpop.f32.mrf.mxu1 }
 0x514   : > { %vm4298_vm2 = vcmp.ge.f32.partialorder %v4159_v48, 0.0  ;;  %v4331_v57 = vmul.f32 %v10629_v32, %v4159_v48 }
 0x516   : > { %v10647_v42 = vsel %vm4298_vm2, %v4159_v48, %v4331_v57 }
 0x517   : > { %v3938_v58 = vpop.f32.mrf.mxu1 }
 0x518   : > { %v4164_v50 = vadd.f32 %v4163_v63, %v3938_v58  ;;  %v7013_v63 = vpop.f32.mrf.mxu0 }
 0x519   : > { %v3940_v26 = vpop.f32.mrf.mxu1 }
 0x51a   : > { %vm4299_vm4 = vcmp.ge.f32.partialorder %v4164_v50, 0.0  ;;  %v4332_v24 = vmul.f32 %v10629_v32, %v4164_v50 }
 0x51c   : > { %v10650_v31 = vsel %vm4299_vm4, %v4164_v50, %v4332_v24  ;;  %v4213_v24 = vpop.f32.mrf.mxu0 }
 0x51d   : > { %v3943_v46 = vpop.f32.mrf.mxu1 }
 0x51e   : > { %v4169_v13 = vadd.f32 %v6998_v8, %v3943_v46 }
 0x51f   : > { %v3945_v37 = vpop.f32.mrf.mxu1 }
 0x520   : > { %vm4300_vm5 = vcmp.ge.f32.partialorder %v4169_v13, 0.0  ;;  %v4333_v49 = vmul.f32 %v10629_v32, %v4169_v13 }
 0x522   : > { %v10653_v14 = vsel %vm4300_vm5, %v4169_v13, %v4333_v49 }
 0x523   : > { %v3948_v10 = vpop.f32.mrf.mxu1 }
 0x524   : > { %v4174_v34 = vadd.f32 %v4173_v33, %v3948_v10 }
 0x525   : > { %v3950_v55 = vpop.f32.mrf.mxu1 }
 0x526   : > { %vm4301_vm6 = vcmp.ge.f32.partialorder %v4174_v34, 0.0  ;;  %v4334_v35 = vmul.f32 %v10629_v32, %v4174_v34 }
 0x528   : > { %v10656_v43 = vsel %vm4301_vm6, %v4174_v34, %v4334_v35  ;;  %v7016_v34 = vpop.f32.mrf.mxu0 }
 0x529   : > { %v3953_v22 = vpop.f32.mrf.mxu1 }
 0x52a   : > { %v4179_v21 = vadd.f32 %v7001_v40, %v3953_v22 }
 0x52b   : > { %v3955_v54 = vpop.f32.mrf.mxu1 }
 0x52c   : > { %vm4302_vm7 = vcmp.ge.f32.partialorder %v4179_v21, 0.0  ;;  %v4335_v12 = vmul.f32 %v10629_v32, %v4179_v21 }
 0x52e   : > { %v10659_v18 = vsel %vm4302_vm7, %v4179_v21, %v4335_v12  ;;  %v4223_v21 = vpop.f32.mrf.mxu0 }
 0x52f   : > { %v3958_v0 = vpop.f32.mrf.mxu1 }
 0x530   : > { %v4184_v28 = vadd.f32 %v4183_v61, %v3958_v0 }
 0x531   : > { %v3960_v30 = vpop.f32.mrf.mxu1 }
 0x532   : > { %vm4303_vm8 = vcmp.ge.f32.partialorder %v4184_v28, 0.0  ;;  %v4336_v41 = vmul.f32 %v10629_v32, %v4184_v28 }
 0x534   : > { %v10662_v3 = vsel %vm4303_vm8, %v4184_v28, %v4336_v41  ;;  %v7019_v41 = vpop.f32.mrf.mxu0 }
 0x535   : > { %v3963_v45 = vpop.f32.mrf.mxu1 }
 0x536   : > { %v4189_v44 = vadd.f32 %v7004_v38, %v3963_v45 }
 0x537   : > { %v3965_v4 = vpop.f32.mrf.mxu1 }
 0x538   : > { %vm4304_vm9 = vcmp.ge.f32.partialorder %v4189_v44, 0.0  ;;  %v4337_v5 = vmul.f32 %v10629_v32, %v4189_v44  ;;  %v4233_v4 = vpop.f32.mrf.mxu0 }
 0x53a   : > { %v10665_v60 = vsel %vm4304_vm9, %v4189_v44, %v4337_v5 }
 0x53b   : > { %v3968_v17 = vpop.f32.mrf.mxu1 }
 0x53c   : > { %v4194_v16 = vadd.f32 %v4193_v1, %v3968_v17 }
 0x53d   : > { %v3970_v62 = vpop.f32.mrf.mxu1 }
 0x53e   : > { %vm4305_vm12 = vcmp.ge.f32.partialorder %v4194_v16, 0.0  ;;  %v4338_v59 = vmul.f32 %v10629_v32, %v4194_v16 }
 0x540   : > { %v10668_v53 = vsel %vm4305_vm12, %v4194_v16, %v4338_v59 }
 0x541   : > { %v3973_v19 = vpop.f32.mrf.mxu1 }
 0x542   : > { %v4199_v9 = vadd.f32 %v7007_v7, %v3973_v19 }
 0x543   : > { %v3975_v25 = vpop.f32.mrf.mxu1 }
 0x544   : > { %vm4306_vm13 = vcmp.ge.f32.partialorder %v4199_v9, 0.0  ;;  %v4339_v2 = vmul.f32 %v10629_v32, %v4199_v9 }
 0x546   : > { %v10671_v51 = vsel %vm4306_vm13, %v4199_v9, %v4339_v2  ;;  %v7022_v9 = vpop.f32.mrf.mxu0 }
 0x547   : > { %v3978_v29 = vpop.f32.mrf.mxu1 }
 0x548   : > { %v4204_v52 = vadd.f32 %v4203_v11, %v3978_v29  ;;  %v4243_v11 = vpop.f32.mrf.mxu0 }
 0x549   : > { %v3980_v20 = vpop.f32.mrf.mxu1 }
 0x54a   : > { %vm4307_vm14 = vcmp.ge.f32.partialorder %v4204_v52, 0.0  ;;  %v4340_v48 = vmul.f32 %v10629_v32, %v4204_v52 }
 0x54c   : > { %v10674_v8 = vsel %vm4307_vm14, %v4204_v52, %v4340_v48 }
 0x54d   : > { %v3983_v23 = vpop.f32.mrf.mxu1 }
 0x54e   : > { %v4209_v57 = vadd.f32 %v7010_v27, %v3983_v23 }
 0x54f   : > { %v3985_v58 = vpop.f32.mrf.mxu1 }
 0x550   : > { %vm4308_vm15 = vcmp.ge.f32.partialorder %v4209_v57, 0.0  ;;  %v4341_v50 = vmul.f32 %v10629_v32, %v4209_v57  ;;  %v7025_v58 = vpop.f32.mrf.mxu0 }
 0x552   : > { %v10677_v26 = vsel %vm4308_vm15, %v4209_v57, %v4341_v50 }
 0x553   : > { %v3988_v46 = vpop.f32.mrf.mxu1 }
 0x554   : > { %v4214_v13 = vadd.f32 %v4213_v24, %v3988_v46 }
 0x555   : > { %v3990_v40 = vpop.f32.mrf.mxu1 }
 0x556   : > { %vm4309_vm0 = vcmp.ge.f32.partialorder %v4214_v13, 0.0  ;;  %v4342_v37 = vmul.f32 %v10629_v32, %v4214_v13 }
 0x558   : > { %v10680_v49 = vsel %vm4309_vm0, %v4214_v13, %v4342_v37  ;;  %v4253_v13 = vpop.f32.mrf.mxu0 }
 0x559   : > { %v3993_v33 = vpop.f32.mrf.mxu1 }
 0x55a   : > { %v4219_v10 = vadd.f32 %v7013_v63, %v3993_v33 }
 0x55b   : > { %v3995_v55 = vpop.f32.mrf.mxu1 }
 0x55c   : > { %vm4310_vm2 = vcmp.ge.f32.partialorder %v4219_v10, 0.0  ;;  %v4343_v35 = vmul.f32 %v10629_v32, %v4219_v10 }
 0x55e   : > { %v10683_v22 = vsel %vm4310_vm2, %v4219_v10, %v4343_v35 }
 0x55f   : > { %v3998_v38 = vpop.f32.mrf.mxu1 }
 0x560   : > { %v4224_v54 = vadd.f32 %v4223_v21, %v3998_v38  ;;  %v7028_v21 = vpop.f32.mrf.mxu0 }
 0x561   : > { %v4000_v12 = vpop.f32.mrf.mxu1 }
 0x562   : > { %vm4311_vm4 = vcmp.ge.f32.partialorder %v4224_v54, 0.0  ;;  %v4344_v61 = vmul.f32 %v10629_v32, %v4224_v54 }
 0x564   : > { %v10686_v0 = vsel %vm4311_vm4, %v4224_v54, %v4344_v61  ;;  %v4263_v61 = vpop.f32.mrf.mxu0 }
 0x565   : > { %v4003_v28 = vpop.f32.mrf.mxu1 }
 0x566   : > { %v4229_v30 = vadd.f32 %v7016_v34, %v4003_v28 }
 0x567   : > { %v4005_v45 = vpop.f32.mrf.mxu1 }
 0x568   : > { %vm4312_vm5 = vcmp.ge.f32.partialorder %v4229_v30, 0.0  ;;  %v4345_v44 = vmul.f32 %v10629_v32, %v4229_v30 }
 0x56a   : > { %v10689_v7 = vsel %vm4312_vm5, %v4229_v30, %v4345_v44 }
 0x56b   : > { %v4008_v5 = vpop.f32.mrf.mxu1 }
 0x56c   : > { %v4234_v1 = vadd.f32 %v4233_v4, %v4008_v5 }
 0x56d   : > { %v4010_v17 = vpop.f32.mrf.mxu1 }
 0x56e   : > { %vm4313_vm6 = vcmp.ge.f32.partialorder %v4234_v1, 0.0  ;;  %v4346_v16 = vmul.f32 %v10629_v32, %v4234_v1 }
 0x570   : > { %v10692_v62 = vsel %vm4313_vm6, %v4234_v1, %v4346_v16  ;;  %v7031_v1 = vpop.f32.mrf.mxu0 }
 0x571   : > { %v4013_v59 = vpop.f32.mrf.mxu1 }
 0x572   : > { %v4239_v19 = vadd.f32 %v7019_v41, %v4013_v59 }
 0x573   : > { %v4015_v27 = vpop.f32.mrf.mxu1 }
 0x574   : > { %vm4314_vm7 = vcmp.ge.f32.partialorder %v4239_v19, 0.0  ;;  %v4347_v25 = vmul.f32 %v10629_v32, %v4239_v19 }
 0x576   : > { %v10695_v2 = vsel %vm4314_vm7, %v4239_v19, %v4347_v25  ;;  %v4273_v19 = vpop.f32.mrf.mxu0 }
 0x577   : > { %v4018_v29 = vpop.f32.mrf.mxu1 }
 0x578   : > { %v4244_v52 = vadd.f32 %v4243_v11, %v4018_v29 }
 0x579   : > { %v4020_v20 = vpop.f32.mrf.mxu1 }
 0x57a   : > { %vm4315_vm8 = vcmp.ge.f32.partialorder %v4244_v52, 0.0  ;;  %v4348_v48 = vmul.f32 %v10629_v32, %v4244_v52 }
 0x57c   : > { %v10698_v23 = vsel %vm4315_vm8, %v4244_v52, %v4348_v48  ;;  %v7034_v48 = vpop.f32.mrf.mxu0 }
 0x57d   : > { %v4023_v57 = vpop.f32.mrf.mxu1 }
 0x57e   : > { %v4249_v63 = vadd.f32 %v7022_v9, %v4023_v57 }
 0x57f   : > { %v4025_v50 = vpop.f32.mrf.mxu1 }
 0x580   : > { %vm4316_vm9 = vcmp.ge.f32.partialorder %v4249_v63, 0.0  ;;  %v4349_v24 = vmul.f32 %v10629_v32, %v4249_v63  ;;  %v4283_v50 = vpop.f32.mrf.mxu0 }
 0x582   : > { %v10701_v46 = vsel %vm4316_vm9, %v4249_v63, %v4349_v24 }
 0x583   : > { %v4028_v40 = vpop.f32.mrf.mxu1 }
 0x584   : > { %v4254_v37 = vadd.f32 %v4253_v13, %v4028_v40 }
 0x585   : > { %v4030_v33 = vpop.f32.mrf.mxu1 }
 0x586   : > { %vm4317_vm12 = vcmp.ge.f32.partialorder %v4254_v37, 0.0  ;;  %v4350_v10 = vmul.f32 %v10629_v32, %v4254_v37 }
 0x588   : > { %v10704_v34 = vsel %vm4317_vm12, %v4254_v37, %v4350_v10 }
 0x589   : > { %v4033_v55 = vpop.f32.mrf.mxu1 }
 0x58a   : > { %v4259_v35 = vadd.f32 %v7025_v58, %v4033_v55 }
 0x58b   : > { %v4035_v38 = vpop.f32.mrf.mxu1 }
 0x58c   : > { %vm4318_vm13 = vcmp.ge.f32.partialorder %v4259_v35, 0.0  ;;  %v4351_v54 = vmul.f32 %v10629_v32, %v4259_v35 }
 0x58e   : > { %v10707_v12 = vsel %vm4318_vm13, %v4259_v35, %v4351_v54 }
 0x58f   : > { %v4038_v28 = vpop.f32.mrf.mxu1 }
 0x590   : > { %v4264_v30 = vadd.f32 %v4263_v61, %v4038_v28 }
 0x591   : > { %v4040_v41 = vpop.f32.mrf.mxu1 }
 0x592   : > { %vm4319_vm14 = vcmp.ge.f32.partialorder %v4264_v30, 0.0  ;;  %v4352_v45 = vmul.f32 %v10629_v32, %v4264_v30 }
 0x594   : > { %v10710_v44 = vsel %vm4319_vm14, %v4264_v30, %v4352_v45 }
 0x595   : > { %v4043_v4 = vpop.f32.mrf.mxu1 }
 0x596   : > { %v4269_v5 = vadd.f32 %v7028_v21, %v4043_v4 }
 0x597   : > { %v4045_v17 = vpop.f32.mrf.mxu1 }
 0x598   : > { %vm4320_vm15 = vcmp.ge.f32.partialorder %v4269_v5, 0.0  ;;  %v4353_v16 = vmul.f32 %v10629_v32, %v4269_v5 }
 0x59a   : > { %v10713_v59 = vsel %vm4320_vm15, %v4269_v5, %v4353_v16 }
 0x59b   : > { %v4048_v9 = vpop.f32.mrf.mxu1 }
 0x59c   : > { %v4274_v27 = vadd.f32 %v4273_v19, %v4048_v9 }
 0x59d   : > { %v4050_v25 = vpop.f32.mrf.mxu1 }
 0x59e   : > { %vm4321_vm0 = vcmp.ge.f32.partialorder %v4274_v27, 0.0  ;;  %v4354_v11 = vmul.f32 %v10629_v32, %v4274_v27 }
 0x5a0   : > { %v10716_v29 = vsel %vm4321_vm0, %v4274_v27, %v4354_v11 }
 0x5a1   : > { %v4053_v52 = vpop.f32.mrf.mxu1 }
 0x5a2   : > { %v4279_v20 = vadd.f32 %v7031_v1, %v4053_v52 }
 0x5a3   : > { %v4055_v57 = vpop.f32.mrf.mxu1 }
 0x5a4   : > { %vm4322_vm2 = vcmp.ge.f32.partialorder %v4279_v20, 0.0  ;;  %v4355_v63 = vmul.f32 %v10629_v32, %v4279_v20 }
 0x5a6   : > { %v10719_v58 = vsel %vm4322_vm2, %v4279_v20, %v4355_v63 }
 0x5a7   : > { %v4058_v24 = vpop.f32.mrf.mxu1 }
 0x5a8   : > { %v4284_v13 = vadd.f32 %v4283_v50, %v4058_v24 }
 0x5a9   : > { %v4060_v40 = vpop.f32.mrf.mxu1 }
 0x5aa   : > { %vm4323_vm4 = vcmp.ge.f32.partialorder %v4284_v13, 0.0  ;;  %v4356_v37 = vmul.f32 %v10629_v32, %v4284_v13 }
 0x5ac   : > { %v10722_v33 = vsel %vm4323_vm4, %v4284_v13, %v4356_v37 }
 0x5ad   : > { %v4063_v10 = vpop.f32.mrf.mxu1 }
 0x5ae   : > { %v4289_v55 = vadd.f32 %v7034_v48, %v4063_v10  ;;  %4392 = sbr.rel (%p11890_p11) target bundleno = 1487 (0x5cf), region = 56 }
 0x5af   : > { %v4065_v35 = vpop.f32.mrf.mxu1 }
 0x5b0   : > { %vm4324_vm5 = vcmp.ge.f32.partialorder %v4289_v55, 0.0  ;;  %v4357_v21 = vmul.f32 %v10629_v32, %v4289_v55 }
 0x5b2   : > { %v10725_v38 = vsel %vm4324_vm5, %v4289_v55, %v4357_v21 }
 0x5b3   : > { %vm4395_vm6 = vcmask 254976   ;;  %v8233_v54 = vmov 0.0  }
 0x5b4   : > { %4393 = vst.msk [vmem:[#allocation4] sm:$0xff] %vm2426_vm11, %v8233_v54  ;;  %4394 = vst.msk [vmem:[#allocation4 + $0x8] sm:$0xff] %vm2426_vm11, %v8233_v54 }
 0x5b5   : > { %4397 = vst.msk [vmem:[#allocation4 + $0x18] sm:$0xff] %vm2426_vm11, %v8233_v54  ;;  %4398 = vst.msk [vmem:[#allocation4 + $0x20] sm:$0xff] %vm2426_vm11, %v8233_v54 }
 0x5b6   : > { %4400 = vst.msk [vmem:[#allocation4 + $0x30] sm:$0xff] %vm2426_vm11, %v8233_v54  ;;  %4401 = vst.msk [vmem:[#allocation4 + $0x38] sm:$0xff] %vm2426_vm11, %v8233_v54 }
 0x5b7   : > { %4403 = vst.msk [vmem:[#allocation4 + $0x48] sm:$0xff] %vm2426_vm11, %v8233_v54  ;;  %4404 = vst.msk [vmem:[#allocation4 + $0x50] sm:$0xff] %vm2426_vm11, %v8233_v54 }
 0x5b8   : > { %4406 = vst.msk [vmem:[#allocation4 + $0x60] sm:$0xff] %vm2426_vm11, %v8233_v54  ;;  %4407 = vst.msk [vmem:[#allocation4 + $0x68] sm:$0xff] %vm2426_vm11, %v8233_v54 }
 0x5b9   : > { %4409 = vst.msk [vmem:[#allocation4 + $0x78] sm:$0xff] %vm2426_vm11, %v8233_v54  ;;  %4410 = vst.msk [vmem:[#allocation4 + $0x80] sm:$0xff] %vm2426_vm11, %v8233_v54 }
 0x5ba   : > { %4412 = vst.msk [vmem:[#allocation4 + $0x90] sm:$0xff] %vm2426_vm11, %v8233_v54  ;;  %4413 = vst.msk [vmem:[#allocation4 + $0x98] sm:$0xff] %vm2426_vm11, %v8233_v54 }
 0x5bb   : > { %4415 = vst.msk [vmem:[#allocation4 + $0xa8] sm:$0xff] %vm2426_vm11, %v8233_v54  ;;  %4416 = vst.msk [vmem:[#allocation4 + $0xb0] sm:$0xff] %vm2426_vm11, %v8233_v54 }
 0x5bc   : > { %4418 = vst.msk [vmem:[#allocation4 + $0xc0] sm:$0xff] %vm2426_vm11, %v8233_v54  ;;  %4419 = vst.msk [vmem:[#allocation4 + $0xc8] sm:$0xff] %vm2426_vm11, %v8233_v54 }
 0x5bd   : > { %4421 = vst.msk [vmem:[#allocation4 + $0xd8] sm:$0xff] %vm2426_vm11, %v8233_v54  ;;  %4422 = vst.msk [vmem:[#allocation4 + $0xe0] sm:$0xff] %vm2426_vm11, %v8233_v54 }
 0x5be   : > { %4424 = vst.msk [vmem:[#allocation4 + $0xf0] sm:$0xff] %vm2426_vm11, %v8233_v54  ;;  %4425 = vst.msk [vmem:[#allocation4 + $0xf8] sm:$0xff] %vm2426_vm11, %v8233_v54 }
 0x5bf   : > { %4427 = vst.msk [vmem:[#allocation4 + $0x108] sm:$0xff] %vm2426_vm11, %v8233_v54  ;;  %4428 = vst.msk [vmem:[#allocation4 + $0x110] sm:$0xff] %vm2426_vm11, %v8233_v54 }
 0x5c0   : > { %4430 = vst.msk [vmem:[#allocation4 + $0x120] sm:$0xff] %vm2426_vm11, %v8233_v54  ;;  %4431 = vst.msk [vmem:[#allocation4 + $0x128] sm:$0xff] %vm2426_vm11, %v8233_v54 }
 0x5c1   : > { %4433 = vst.msk [vmem:[#allocation4 + $0x138] sm:$0xff] %vm2426_vm11, %v8233_v54  ;;  %4434 = vst.msk [vmem:[#allocation4 + $0x140] sm:$0xff] %vm2426_vm11, %v8233_v54 }
 0x5c2   : > { %4436 = vst.msk [vmem:[#allocation4 + $0x150] sm:$0xff] %vm2426_vm11, %v8233_v54  ;;  %4437 = vst.msk [vmem:[#allocation4 + $0x158] sm:$0xff] %vm2426_vm11, %v8233_v54 }
 0x5c3   : > { %4439 = vst.msk [vmem:[#allocation4 + $0x168] sm:$0xff] %vm2426_vm11, %v8233_v54  ;;  %4440 = vst.msk [vmem:[#allocation4 + $0x170] sm:$0xff] %vm2426_vm11, %v8233_v54 }
 0x5c4   : > { %4442 = vst.msk [vmem:[#allocation4 + $0x180] sm:$0xff] %vm2426_vm11, %v8233_v54  ;;  %4443 = vst.msk [vmem:[#allocation4 + $0x188] sm:$0xff] %vm2426_vm11, %v8233_v54 }
 0x5c5   : > { %4445 = vst.msk [vmem:[#allocation4 + $0x198] sm:$0xff] %vm2426_vm11, %v8233_v54  ;;  %4446 = vst.msk [vmem:[#allocation4 + $0x1a0] sm:$0xff] %vm2426_vm11, %v8233_v54 }
 0x5c6   : > { %4396 = vst.msk [vmem:[#allocation4 + $0x10] sm:$0x3] %vm4395_vm6, %v8233_v54  ;;  %4399 = vst.msk [vmem:[#allocation4 + $0x28] sm:$0x3] %vm4395_vm6, %v8233_v54 }
 0x5c7   : > { %4402 = vst.msk [vmem:[#allocation4 + $0x40] sm:$0x3] %vm4395_vm6, %v8233_v54  ;;  %4405 = vst.msk [vmem:[#allocation4 + $0x58] sm:$0x3] %vm4395_vm6, %v8233_v54 }
 0x5c8   : > { %4408 = vst.msk [vmem:[#allocation4 + $0x70] sm:$0x3] %vm4395_vm6, %v8233_v54  ;;  %4411 = vst.msk [vmem:[#allocation4 + $0x88] sm:$0x3] %vm4395_vm6, %v8233_v54 }
 0x5c9   : > { %4414 = vst.msk [vmem:[#allocation4 + $0xa0] sm:$0x3] %vm4395_vm6, %v8233_v54  ;;  %4417 = vst.msk [vmem:[#allocation4 + $0xb8] sm:$0x3] %vm4395_vm6, %v8233_v54 }
 0x5ca   : > { %4420 = vst.msk [vmem:[#allocation4 + $0xd0] sm:$0x3] %vm4395_vm6, %v8233_v54  ;;  %4423 = vst.msk [vmem:[#allocation4 + $0xe8] sm:$0x3] %vm4395_vm6, %v8233_v54 }
 0x5cb   : > { %4426 = vst.msk [vmem:[#allocation4 + $0x100] sm:$0x3] %vm4395_vm6, %v8233_v54  ;;  %4429 = vst.msk [vmem:[#allocation4 + $0x118] sm:$0x3] %vm4395_vm6, %v8233_v54 }
 0x5cc   : > { %4432 = vst.msk [vmem:[#allocation4 + $0x130] sm:$0x3] %vm4395_vm6, %v8233_v54  ;;  %4435 = vst.msk [vmem:[#allocation4 + $0x148] sm:$0x3] %vm4395_vm6, %v8233_v54 }
 0x5cd   : > { %4438 = vst.msk [vmem:[#allocation4 + $0x160] sm:$0x3] %vm4395_vm6, %v8233_v54  ;;  %4441 = vst.msk [vmem:[#allocation4 + $0x178] sm:$0x3] %vm4395_vm6, %v8233_v54 }
 0x5ce   : > { %4444 = vst.msk [vmem:[#allocation4 + $0x190] sm:$0x3] %vm4395_vm6, %v8233_v54  ;;  %4447 = vst.msk [vmem:[#allocation4 + $0x1a8] sm:$0x3] %vm4395_vm6, %v8233_v54 }
 0x5cf PF: > { %v4513_v32 = vld [vmem:[#allocation4 + $0x1] sm:$0xff]  ;;  %v4514_v61 = vld [vmem:[#allocation4 + $0x9] sm:$0xff]  ;;  %4451 = vst.msk [vmem:[#allocation4 + $0x31] sm:$0xff] %vm2426_vm11, %v10638_v36  ;;  %4452 = vst.msk [vmem:[#allocation4 + $0x39] sm:$0xff] %vm2426_vm11, %v10641_v56  ;;  %5862 = vmatprep.subr.mxu0 %v8229_v6  ;;  %vm6592_vm7 = vcmask 1043459   ;;  %vm6594_vm8 = vcmask 1044484  }
 0x5d0   : > { %4449 = vst.msk [vmem:[#allocation4 + $0x19] sm:$0xff] %vm2426_vm11, %v10632_v15  ;;  %4450 = vst.msk [vmem:[#allocation4 + $0x21] sm:$0xff] %vm2426_vm11, %v10635_v47  ;;  %v7655_v15 = vpack.i.bf16 %v4514_v61, %v4513_v32  ;;  %v5745_v47 = vld [vmem:[%s11736_s3 + $0x78] sm:$0xff]  ;;  %v5744_v36 = vld [vmem:[%s11736_s3 + $0x70] sm:$0xff]  ;;  %vm6596_vm9 = vcmask 1045509   ;;  %vm6598_vm12 = vcmask 1046534  }
 0x5d1   : > { %4453 = vst.msk [vmem:[#allocation4 + $0x49] sm:$0xff] %vm2426_vm11, %v10644_v39  ;;  %4454 = vst.msk [vmem:[#allocation4 + $0x51] sm:$0xff] %vm2426_vm11, %v10647_v42  ;;  %5863 = vmatpush1.msra.mxu0 %v5745_v47  ;;  %v5743_v56 = vld [vmem:[%s11736_s3 + $0x68] sm:$0xff]  ;;  %v5742_v39 = vld [vmem:[%s11736_s3 + $0x60] sm:$0xff]  ;;  %vm6600_vm13 = vcmask 1047559   ;;  %s8235_s14 = smov [#allocation8]  }
 0x5d2   : > { %4455 = vst.msk [vmem:[#allocation4 + $0x61] sm:$0xff] %vm2426_vm11, %v10650_v31  ;;  %4456 = vst.msk [vmem:[#allocation4 + $0x69] sm:$0xff] %vm2426_vm11, %v10653_v14  ;;  %7656 = vrot.lane.b32.xlu0 %v7655_v15, %s8230_s16  ;;  %5864 = vmatprep.subr.mxu0 %v8229_v6  ;;  %v5741_v42 = vld [vmem:[%s11736_s3 + $0x58] sm:$0xff]  ;;  %v5736_v1 = vld [vmem:[%s11736_s3 + $0x30] sm:$0xff]  ;;  %s8156_s15 = sshll.u32 %s8235_s14, 4  ;;  %s8157_s15 = int_to_ptr.vmem [resolvable:$false] %s8156_s15 }
 0x5d3   : > { %4457 = vst.msk [vmem:[#allocation4 + $0x79] sm:$0xff] %vm2426_vm11, %v10656_v43  ;;  %4458 = vst.msk [vmem:[#allocation4 + $0x81] sm:$0xff] %vm2426_vm11, %v10659_v18  ;;  %5865 = vmatpush1.msra.mxu0 %v5744_v36  ;;  %v5737_v45 = vld [vmem:[%s11736_s3 + $0x38] sm:$0xff]  ;;  %v5735_v11 = vld [vmem:[%s11736_s3 + $0x28] sm:$0xff]  ;;  %s8158_s25 = scalar_lea.vmem %s8157_s15, 512 }
 0x5d4   : > { %4459 = vst.msk [vmem:[#allocation4 + $0x91] sm:$0xff] %vm2426_vm11, %v10662_v3  ;;  %4460 = vst.msk [vmem:[#allocation4 + $0x99] sm:$0xff] %vm2426_vm11, %v10665_v60  ;;  %5866 = vmatprep.subr.mxu0 %v8229_v6  ;;  %v5732_v55 = vld [vmem:[%s11736_s3 + $0x10] sm:$0xff]  ;;  %v5731_v61 = vld [vmem:[%s11736_s3 + $0x8] sm:$0xff] }
 0x5d5   : > { %4461 = vst.msk [vmem:[#allocation4 + $0xa9] sm:$0xff] %vm2426_vm11, %v10668_v53  ;;  %4462 = vst.msk [vmem:[#allocation4 + $0xb1] sm:$0xff] %vm2426_vm11, %v10671_v51  ;;  %5867 = vmatpush1.msra.mxu0 %v5743_v56  ;;  %v5730_v47 = vld [vmem:[%s11736_s3] sm:$0xff] }
 0x5d6   : > { %4463 = vst.msk [vmem:[#allocation4 + $0xc1] sm:$0xff] %vm2426_vm11, %v10674_v8  ;;  %4464 = vst.msk [vmem:[#allocation4 + $0xc9] sm:$0xff] %vm2426_vm11, %v10677_v26  ;;  %v10866_v31 = vld [vmem:[#allocation4 + $0x31] sm:$0xff]  ;;  %v10868_v14 = vld [vmem:[#allocation4 + $0x39] sm:$0xff]  ;;  %5868 = vmatprep.subr.mxu0 %v8229_v6 }
 0x5d7   : > { %4465 = vst.msk [vmem:[#allocation4 + $0xd9] sm:$0xff] %vm2426_vm11, %v10680_v49  ;;  %4466 = vst.msk [vmem:[#allocation4 + $0xe1] sm:$0xff] %vm2426_vm11, %v10683_v22  ;;  %v10870_v43 = vld [vmem:[#allocation4 + $0x19] sm:$0xff]  ;;  %v7665_v18 = vpack.i.bf16 %v10868_v14, %v10866_v31  ;;  %v4516_v3 = vld [vmem:[#allocation4 + $0x21] sm:$0xff]  ;;  %5869 = vmatpush1.msra.mxu0 %v5742_v39 }
 0x5d8   : > { %4467 = vst.msk [vmem:[#allocation4 + $0xf1] sm:$0xff] %vm2426_vm11, %v10686_v0  ;;  %4468 = vst.msk [vmem:[#allocation4 + $0xf9] sm:$0xff] %vm2426_vm11, %v10689_v7  ;;  %v10875_v60 = vld [vmem:[#allocation4 + $0x49] sm:$0xff]  ;;  %v10877_v53 = vld [vmem:[#allocation4 + $0x51] sm:$0xff]  ;;  %v7660_v51 = vpack.i.bf16 %v4516_v3, %v10870_v43  ;;  %5870 = vmatprep.subr.mxu0 %v8229_v6 }
 0x5d9   : > { %4469 = vst.msk [vmem:[#allocation4 + $0x109] sm:$0xff] %vm2426_vm11, %v10692_v62  ;;  %4470 = vst.msk [vmem:[#allocation4 + $0x111] sm:$0xff] %vm2426_vm11, %v10695_v2  ;;  %v10880_v8 = vld [vmem:[#allocation4 + $0x61] sm:$0xff]  ;;  %v10882_v26 = vld [vmem:[#allocation4 + $0x69] sm:$0xff]  ;;  %7666 = vrot.lane.b32.xlu1 %v7665_v18, %s8230_s16  ;;  %v7670_v22 = vpack.i.bf16 %v10877_v53, %v10875_v60  ;;  %5871 = vmatpush1.msra.mxu0 %v5741_v42 }
 0x5da   : > { %4471 = vst.msk [vmem:[#allocation4 + $0x121] sm:$0xff] %vm2426_vm11, %v10698_v23  ;;  %4472 = vst.msk [vmem:[#allocation4 + $0x129] sm:$0xff] %vm2426_vm11, %v10701_v46  ;;  %v5740_v49 = vld [vmem:[%s11736_s3 + $0x50] sm:$0xff]  ;;  %7661 = vrot.lane.b32.xlu0 %v7660_v51, %s8230_s16  ;;  %v7675_v0 = vpack.i.bf16 %v10882_v26, %v10880_v8  ;;  %v10894_v7 = vld [vmem:[#allocation4 + $0x79] sm:$0xff]  ;;  %5872 = vmatprep.subr.mxu0 %v8229_v6 }
 0x5db   : > { %4473 = vst.msk [vmem:[#allocation4 + $0x139] sm:$0xff] %vm2426_vm11, %v10704_v34  ;;  %4474 = vst.msk [vmem:[#allocation4 + $0x141] sm:$0xff] %vm2426_vm11, %v10707_v12  ;;  %v10896_v62 = vld [vmem:[#allocation4 + $0x81] sm:$0xff]  ;;  %v10902_v23 = vld [vmem:[#allocation4 + $0x91] sm:$0xff]  ;;  %5873 = vmatpush1.msra.mxu0 %v5740_v49 }
 0x5dc   : > { %4475 = vst.msk [vmem:[#allocation4 + $0x151] sm:$0xff] %vm2426_vm11, %v10710_v44  ;;  %4476 = vst.msk [vmem:[#allocation4 + $0x159] sm:$0xff] %vm2426_vm11, %v10713_v59  ;;  %v5739_v2 = vld [vmem:[%s11736_s3 + $0x48] sm:$0xff]  ;;  %v10904_v46 = vld [vmem:[#allocation4 + $0x99] sm:$0xff]  ;;  %5874 = vmatprep.subr.mxu0 %v8229_v6  ;;  %v7680_v12 = vpack.i.bf16 %v10896_v62, %v10894_v7 }
 0x5dd   : > { %4477 = vst.msk [vmem:[#allocation4 + $0x169] sm:$0xff] %vm2426_vm11, %v10716_v29  ;;  %4478 = vst.msk [vmem:[#allocation4 + $0x171] sm:$0xff] %vm2426_vm11, %v10719_v58  ;;  %v5738_v34 = vld [vmem:[%s11736_s3 + $0x40] sm:$0xff]  ;;  %7671 = vrot.lane.b32.xlu1 %v7670_v22, %s8230_s16  ;;  %5875 = vmatpush1.msra.mxu0 %v5739_v2  ;;  %v7685_v28 = vpack.i.bf16 %v10904_v46, %v10902_v23  ;;  %v10916_v30 = vld [vmem:[#allocation4 + $0xa9] sm:$0xff] }
 0x5de   : > { %4479 = vst.msk [vmem:[#allocation4 + $0x181] sm:$0xff] %vm2426_vm11, %v10722_v33  ;;  %4480 = vst.msk [vmem:[#allocation4 + $0x189] sm:$0xff] %vm2426_vm11, %v10725_v38  ;;  %7676 = vrot.lane.b32.xlu0 %v7675_v0, %s8230_s16  ;;  %v10918_v41 = vld [vmem:[#allocation4 + $0xb1] sm:$0xff]  ;;  %5876 = vmatprep.subr.mxu0 %v8229_v6  ;;  %v10924_v44 = vld [vmem:[#allocation4 + $0xc1] sm:$0xff] }
 0x5df   : > { %v10926_v4 = vld [vmem:[#allocation4 + $0xc9] sm:$0xff]  ;;  %5877 = vmatpush1.msra.mxu0 %v5738_v34  ;;  %v7690_v5 = vpack.i.bf16 %v10918_v41, %v10916_v30  ;;  %v10938_v16 = vld [vmem:[#allocation4 + $0xd9] sm:$0xff]  ;;  %v10940_v59 = vld [vmem:[#allocation4 + $0xe1] sm:$0xff] }
 0x5e0   : > { %5878 = vmatprep.subr.mxu0 %v8229_v6  ;;  %v7695_v17 = vpack.i.bf16 %v10926_v4, %v10924_v44  ;;  %v10942_v19 = vld [vmem:[#allocation4 + $0x32] sm:$0xff]  ;;  %v7700_v25 = vpack.i.bf16 %v10940_v59, %v10938_v16  ;;  %v10960_v52 = vld [vmem:[#allocation4 + $0x109] sm:$0xff]  ;;  %v5734_v58 = vld [vmem:[%s11736_s3 + $0x20] sm:$0xff] }
 0x5e1   : > { %7681 = vrot.lane.b32.xlu1 %v7680_v12, %s8230_s16  ;;  %5879 = vmatpush1.msra.mxu0 %v5737_v45  ;;  %v10944_v9 = vld [vmem:[#allocation4 + $0xf1] sm:$0xff]  ;;  %v10946_v27 = vld [vmem:[#allocation4 + $0xf9] sm:$0xff]  ;;  %v10964_v48 = vld [vmem:[#allocation4 + $0x121] sm:$0xff] }
 0x5e2   : > { %7686 = vrot.lane.b32.xlu0 %v7685_v28, %s8230_s16  ;;  %5880 = vmatprep.subr.mxu0 %v8229_v6  ;;  %v7705_v29 = vpack.i.bf16 %v10946_v27, %v10944_v9  ;;  %v10962_v20 = vld [vmem:[#allocation4 + $0x111] sm:$0xff]  ;;  %v10966_v57 = vld [vmem:[#allocation4 + $0x129] sm:$0xff]  ;;  %v10978_v24 = vld [vmem:[#allocation4 + $0x139] sm:$0xff] }
 0x5e3   : > { %7043 = vmatprep.mubr.msk.f32.mxu1 %vm2426_vm11, %v10942_v19  ;;  %5881 = vmatpush1.msra.mxu0 %v5736_v1  ;;  %v7710_v63 = vpack.i.bf16 %v10962_v20, %v10960_v52  ;;  %v7715_v50 = vpack.i.bf16 %v10966_v57, %v10964_v48  ;;  %v10980_v13 = vld [vmem:[#allocation4 + $0x141] sm:$0xff]  ;;  %v10982_v40 = vld [vmem:[#allocation4 + $0x151] sm:$0xff]  ;;  %v10984_v37 = vld [vmem:[#allocation4 + $0x159] sm:$0xff] }
 0x5e4   : > { %5882 = vmatprep.subr.mxu0 %v8229_v6  ;;  %v5733_v33 = vld [vmem:[%s11736_s3 + $0x18] sm:$0xff]  ;;  %v7720_v10 = vpack.i.bf16 %v10980_v13, %v10978_v24  ;;  %v7725_v35 = vpack.i.bf16 %v10984_v37, %v10982_v40  ;;  %v11000_v21 = vld [vmem:[#allocation4 + $0x169] sm:$0xff]  ;;  %v11044_v12 = vld [vmem:[#allocation4 + $0x20] sm:$0xff] }
 0x5e5   : > { %7691 = vrot.lane.b32.xlu1 %v7690_v5, %s8230_s16  ;;  %5883 = vmatpush1.msra.mxu0 %v5735_v11  ;;  %v4544_v38 = vld [vmem:[#allocation4 + $0x171] sm:$0xff]  ;;  %v11002_v54 = vld [vmem:[#allocation4 + $0x1a] sm:$0xff]  ;;  %v11004_v32 = vld [vmem:[#allocation4 + $0x22] sm:$0xff]  ;;  %v7755_v1 = vpack.i.bf16 %v11044_v12, %v10868_v14 }
 0x5e6   : > { %7696 = vrot.lane.b32.xlu0 %v7695_v17, %s8230_s16  ;;  %5884 = vmatprep.subr.mxu0 %v8229_v6  ;;  %v7730_v15 = vpack.i.bf16 %v4544_v38, %v11000_v21  ;;  %v7735_v36 = vpack.i.bf16 %v11004_v32, %v11002_v54  ;;  %v4545_v56 = vld [vmem:[#allocation4 + $0x2] sm:$0xff]  ;;  %v11019_v39 = vld [vmem:[#allocation4 + $0x30] sm:$0xff]  ;;  %v11021_v42 = vld [vmem:[#allocation4 + $0x18] sm:$0xff] }
 0x5e7   : > { %5885 = vmatpush1.msra.mxu0 %v5734_v58  ;;  %v5761_v18 = vld [vmem:[%s11736_s3 + $0xf8] sm:$0xff]  ;;  %v7740_v51 = vpack.i.bf16 %v4545_v56, %v11019_v39  ;;  %v5760_v49 = vld [vmem:[%s11736_s3 + $0xf0] sm:$0xff]  ;;  %v7745_v0 = vpack.i.bf16 %v11021_v42, %v10866_v31  ;;  %v5759_v28 = vld [vmem:[%s11736_s3 + $0xe8] sm:$0xff] }
 0x5e8   : > { %5886 = vmatprep.subr.mxu0 %v8229_v6  ;;  %v5765_v3 = vld [vmem:[%s11736_s3 + $0x118] sm:$0xff]  ;;  %v5764_v22 = vld [vmem:[%s11736_s3 + $0x110] sm:$0xff]  ;;  %v5758_v31 = vld [vmem:[%s11736_s3 + $0xe0] sm:$0xff] }
 0x5e9   : > { %7701 = vrot.lane.b32.xlu1 %v7700_v25, %s8230_s16  ;;  %5887 = vmatpush1.msra.mxu0 %v5733_v33  ;;  %v4546_v2 = vld [vmem:[#allocation4 + $0xa] sm:$0xff]  ;;  %v11042_v34 = vld [vmem:[#allocation4 + $0x38] sm:$0xff]  ;;  %v5750_v56 = vld [vmem:[%s11736_s3 + $0xa0] sm:$0xff] }
 0x5ea   : > { %7706 = vrot.lane.b32.xlu0 %v7705_v29, %s8230_s16  ;;  %5888 = vmatprep.subr.mxu0 %v8229_v6  ;;  %v7750_v45 = vpack.i.bf16 %v4546_v2, %v11042_v34  ;;  %v5763_v5 = vld [vmem:[%s11736_s3 + $0x108] sm:$0xff]  ;;  %v11062_v17 = vld [vmem:[#allocation4 + $0x3a] sm:$0xff]  ;;  %v5756_v14 = vld [vmem:[%s11736_s3 + $0xd0] sm:$0xff] }
 0x5eb   : > { %5889 = vmatpush1.msra.mxu0 %v5732_v55  ;;  %7035 = vmatprep.subr.mxu1 %v5765_v3  ;;  %v11064_v25 = vld [vmem:[#allocation4 + $0x48] sm:$0xff]  ;;  %v5757_v11 = vld [vmem:[%s11736_s3 + $0xd8] sm:$0xff]  ;;  %v7760_v29 = vpack.i.bf16 %v11062_v17, %v10942_v19  ;;  %v5754_v55 = vld [vmem:[%s11736_s3 + $0xc0] sm:$0xff] }
 0x5ec   : > { %5890 = vmatprep.subr.mxu0 %v8229_v6  ;;  %7036 = vmatpush3.msra.mxu1 %v5765_v3  ;;  %v7765_v58 = vpack.i.bf16 %v11002_v54, %v11064_v25  ;;  %v5755_v33 = vld [vmem:[%s11736_s3 + $0xc8] sm:$0xff]  ;;  %v11101_v54 = vld [vmem:[#allocation4 + $0x52] sm:$0xff] }
 0x5ed   : > { %7711 = vrot.lane.b32.xlu1 %v7710_v63, %s8230_s16  ;;  %5891 = vmatpush1.msra.mxu0 %v5731_v61  ;;  %v5762_v63 = vld [vmem:[%s11736_s3 + $0x100] sm:$0xff]  ;;  %v11099_v38 = vld [vmem:[#allocation4 + $0x4a] sm:$0xff] }
 0x5ee   : > { %7716 = vrot.lane.b32.xlu0 %v7715_v50, %s8230_s16  ;;  %5892 = vmatprep.subr.mxu0 %v8229_v6  ;;  %v11083_v50 = vld [vmem:[#allocation4 + $0x50] sm:$0xff]  ;;  %v4647_v3 = vld [vmem:[#allocation4 + $0x62] sm:$0xff] }
 0x5ef   : > { %5893 = vmatpush1.msra.mxu0 %v5730_v47  ;;  %7037 = vmatprep.subr.mxu1 %v5764_v22  ;;  %v5752_v61 = vld [vmem:[%s11736_s3 + $0xb0] sm:$0xff]  ;;  %v4678_v47 = vld [vmem:[#allocation4 + $0x60] sm:$0xff] }
 0x5f0   : > { %5894 = vmatprep.subr.mxu0 %v8229_v6  ;;  %7038 = vmatpush3.msra.mxu1 %v5764_v22  ;;  %v7805_v22 = vpack.i.bf16 %v11083_v50, %v10882_v26  ;;  %v4745_v2 = vld [vmem:[#allocation4 + $0x82] sm:$0xff] }
 0x5f1   : > { %7721 = vrot.lane.b32.xlu1 %v7720_v10, %s8230_s16  ;;  %5895 = vmatpush2.msra.mxu0 %v5761_v18  ;;  %v7770_v10 = vpack.i.bf16 %v11019_v39, %v10875_v60  ;;  %v5753_v60 = vld [vmem:[%s11736_s3 + $0xb8] sm:$0xff]  ;;  %v7795_v39 = vpack.i.bf16 %v11064_v25, %v10880_v8  ;;  %v4679_v18 = vld [vmem:[#allocation4 + $0x68] sm:$0xff]  ;;  %v5748_v8 = vld [vmem:[%s11736_s3 + $0x90] sm:$0xff] }
 0x5f2   : > { %7726 = vrot.lane.b32.xlu0 %v7725_v35, %s8230_s16  ;;  %5896 = vmatprep.subr.mxu0 %v8229_v6  ;;  %v7775_v35 = vpack.i.bf16 %v11004_v32, %v11083_v50  ;;  %v7780_v32 = vpack.i.bf16 %v11042_v34, %v10877_v53  ;;  %v7790_v53 = vpack.i.bf16 %v10942_v19, %v4678_v47  ;;  %v5749_v19 = vld [vmem:[%s11736_s3 + $0x98] sm:$0xff]  ;;  %v5746_v26 = vld [vmem:[%s11736_s3 + $0x80] sm:$0xff] }
 0x5f3   : > { %5897 = vmatpush2.msra.mxu0 %v5760_v49  ;;  %7039 = vmatprep.subr.mxu1 %v5763_v5  ;;  %v7800_v49 = vpack.i.bf16 %v11062_v17, %v4679_v18  ;;  %v4680_v34 = vld [vmem:[#allocation4 + $0x78] sm:$0xff] }
 0x5f4   : > { %5898 = vmatprep.subr.mxu0 %v8229_v6  ;;  %7040 = vmatpush3.msra.mxu1 %v5763_v5  ;;  %v4681_v5 = vld [vmem:[#allocation4 + $0x80] sm:$0xff]  ;;  %v4683_v50 = vld [vmem:[#allocation4 + $0x98] sm:$0xff] }
 0x5f5   : > { %7731 = vrot.lane.b32.xlu1 %v7730_v15, %s8230_s16  ;;  %5899 = vmatpush2.msra.mxu0 %v5759_v28  ;;  %v7785_v15 = vpack.i.bf16 %v11101_v54, %v11099_v38  ;;  %v5747_v28 = vld [vmem:[%s11736_s3 + $0x88] sm:$0xff]  ;;  %v4747_v25 = vld [vmem:[#allocation4 + $0x9a] sm:$0xff] }
 0x5f6   : > { %7736 = vrot.lane.b32.xlu0 %v7735_v36, %s8230_s16  ;;  %5900 = vmatprep.subr.mxu0 %v8229_v6  ;;  %v5751_v36 = vld [vmem:[%s11736_s3 + $0xa8] sm:$0xff] }
 0x5f7   : > { %5901 = vmatpush2.msra.mxu0 %v5758_v31  ;;  %7041 = vmatprep.subr.mxu1 %v5762_v63  ;;  %v7815_v31 = vpack.i.bf16 %v11099_v38, %v4680_v34 }
 0x5f8   : > { %5902 = vmatprep.subr.mxu0 %v8229_v6  ;;  %7042 = vmatpush3.msra.mxu1 %v5762_v63  ;;  %v4682_v63 = vld [vmem:[#allocation4 + $0x90] sm:$0xff] }
 0x5f9   : > { %7741 = vrot.lane.b32.xlu1 %v7740_v51, %s8232_s8  ;;  %5903 = vmatpush2.msra.mxu0 %v5757_v11  ;;  %v4648_v51 = vld [vmem:[#allocation4 + $0x6a] sm:$0xff]  ;;  %v7825_v11 = vpack.i.bf16 %v11101_v54, %v4681_v5 }
 0x5fa   : > { %7746 = vrot.lane.b32.xlu0 %v7745_v0, %s8231_s17  ;;  %5904 = vmatprep.subr.mxu0 %v8229_v6  ;;  %v4649_v0 = vld [vmem:[#allocation4 + $0x7a] sm:$0xff] }
 0x5fb   : > { %5905 = vmatpush2.msra.mxu0 %v5756_v14  ;;  %7044 = vmatmul.mubr.msk.f32.vlgmr.msra.gmra.mxu1 %vm2426_vm11, %v11062_v17  ;;  %v4746_v17 = vld [vmem:[#allocation4 + $0x92] sm:$0xff] }
 0x5fc   : > { %5906 = vmatprep.subr.mxu0 %v8229_v6  ;;  %7046 = vmatprep.mubr.msk.f32.mxu1 %vm2426_vm11, %v11099_v38  ;;  %v4652_v38 = vld [vmem:[#allocation4 + $0x9a] sm:$0xff] }
 0x5fd   : > { %7751 = vrot.lane.b32.xlu1 %v7750_v45, %s8232_s8  ;;  %5907 = vmatpush2.msra.mxu0 %v5755_v33  ;;  %v7810_v45 = vpack.i.bf16 %v4648_v51, %v4647_v3  ;;  %v7850_v33 = vpack.i.bf16 %v4648_v51, %v4683_v50 }
 0x5fe   : > { %7756 = vrot.lane.b32.xlu0 %v7755_v1, %s8231_s17  ;;  %5908 = vmatprep.subr.mxu0 %v8229_v6  ;;  %v7820_v1 = vpack.i.bf16 %v4678_v47, %v10894_v7  ;;  %v7840_v7 = vpack.i.bf16 %v4647_v3, %v4682_v63 }
 0x5ff   : > { %5909 = vmatpush2.msra.mxu0 %v5754_v55  ;;  %7047 = vmatmul.mubr.msk.f32.gmra.mxu1 %vm2426_vm11, %v11101_v54  ;;  %v4749_v55 = vld [vmem:[#allocation4 + $0xb2] sm:$0xff]  ;;  %v4684_v54 = vld [vmem:[#allocation4 + $0xa8] sm:$0xff] }
 0x600   : > { %5910 = vmatprep.subr.mxu0 %v8229_v6  ;;  %7049 = vmatprep.mubr.msk.f32.mxu1 %vm2426_vm11, %v4647_v3  ;;  %v7895_v3 = vpack.i.bf16 %v4684_v54, %v10924_v44 }
 0x601   : > { %7761 = vrot.lane.b32.xlu1 %v7760_v29, %s8230_s16  ;;  %5911 = vmatpush2.msra.mxu0 %v5753_v60  ;;  %v4650_v29 = vld [vmem:[#allocation4 + $0x82] sm:$0xff]  ;;  %v7865_v60 = vpack.i.bf16 %v4649_v0, %v4684_v54 }
 0x602   : > { %7766 = vrot.lane.b32.xlu0 %v7765_v58, %s8232_s8  ;;  %5912 = vmatprep.subr.mxu0 %v8229_v6  ;;  %v7835_v14 = vpack.i.bf16 %v4650_v29, %v4649_v0  ;;  %v7845_v58 = vpack.i.bf16 %v4680_v34, %v10902_v23 }
 0x603   : > { %5913 = vmatpush2.msra.mxu0 %v5752_v61  ;;  %7050 = vmatmul.mubr.msk.f32.gmra.mxu1 %vm2426_vm11, %v4648_v51  ;;  %v7870_v61 = vpack.i.bf16 %v4682_v63, %v10916_v30  ;;  %v4687_v51 = vld [vmem:[#allocation4 + $0xc8] sm:$0xff] }
 0x604   : > { %5914 = vmatprep.subr.mxu0 %v8229_v6  ;;  %7052 = vmatprep.mubr.msk.f32.mxu1 %vm2426_vm11, %v4649_v0  ;;  %v4656_v0 = vld [vmem:[#allocation4 + $0xca] sm:$0xff] }
 0x605   : > { %7771 = vrot.lane.b32.xlu1 %v7770_v10, %s8231_s17  ;;  %5915 = vmatpush2.msra.mxu0 %v5751_v36  ;;  %v4748_v10 = vld [vmem:[#allocation4 + $0xaa] sm:$0xff] }
 0x606   : > { %7776 = vrot.lane.b32.xlu0 %v7775_v35, %s8232_s8  ;;  %5916 = vmatprep.subr.mxu0 %v8229_v6  ;;  %v4651_v35 = vld [vmem:[#allocation4 + $0x92] sm:$0xff]  ;;  %v4653_v36 = vld [vmem:[#allocation4 + $0xaa] sm:$0xff] }
 0x607   : > { %5917 = vmatpush2.msra.mxu0 %v5750_v56  ;;  %7053 = vmatmul.mubr.msk.f32.gmra.mxu1 %vm2426_vm11, %v4745_v2  ;;  %v7860_v23 = vpack.i.bf16 %v4652_v38, %v4651_v35  ;;  %v7880_v56 = vpack.i.bf16 %v4683_v50, %v10918_v41  ;;  %v4688_v2 = vld [vmem:[#allocation4 + $0xd8] sm:$0xff] }
 0x608   : > { %5918 = vmatprep.subr.mxu0 %v8229_v6  ;;  %7055 = vmatprep.mubr.msk.f32.mxu1 %vm2426_vm11, %v4746_v17  ;;  %v7915_v34 = vpack.i.bf16 %v4653_v36, %v4688_v2  ;;  %v7930_v17 = vpack.i.bf16 %v4687_v51, %v10940_v59  ;;  %v4659_v50 = vld [vmem:[#allocation4 + $0xf2] sm:$0xff] }
 0x609   : > { %7781 = vrot.lane.b32.xlu1 %v7780_v32, %s8231_s17  ;;  %5919 = vmatpush2.msra.mxu0 %v5749_v19  ;;  %v4685_v32 = vld [vmem:[#allocation4 + $0xb0] sm:$0xff]  ;;  %v7900_v19 = vpack.i.bf16 %v4652_v38, %v4687_v51  ;;  %v4695_v51 = vld [vmem:[#allocation4 + $0x128] sm:$0xff] }
 0x60a   : > { %7786 = vrot.lane.b32.xlu0 %v7785_v15, %s8230_s16  ;;  %5920 = vmatprep.subr.mxu0 %v8229_v6  ;;  %v4750_v15 = vld [vmem:[#allocation4 + $0xc2] sm:$0xff]  ;;  %v7875_v47 = vpack.i.bf16 %v4650_v29, %v4685_v32  ;;  %v7905_v41 = vpack.i.bf16 %v4685_v32, %v10926_v4  ;;  %v4755_v4 = vld [vmem:[#allocation4 + $0xfa] sm:$0xff]  ;;  %v4759_v32 = vld [vmem:[#allocation4 + $0x12a] sm:$0xff] }
 0x60b   : > { %5921 = vmatpush2.msra.mxu0 %v5748_v8  ;;  %7056 = vmatmul.mubr.msk.f32.gmra.mxu1 %vm2426_vm11, %v4747_v25  ;;  %v4753_v8 = vld [vmem:[#allocation4 + $0xe2] sm:$0xff] }
 0x60c   : > { %5922 = vmatprep.subr.mxu0 %v8229_v6  ;;  %7058 = vmatprep.mubr.msk.f32.mxu1 %vm2426_vm11, %v4748_v10 }
 0x60d   : > { %7791 = vrot.lane.b32.xlu1 %v7790_v53, %s8232_s8  ;;  %5923 = vmatpush2.msra.mxu0 %v5747_v28  ;;  %v4654_v53 = vld [vmem:[#allocation4 + $0xb2] sm:$0xff]  ;;  %v4689_v28 = vld [vmem:[#allocation4 + $0xe0] sm:$0xff] }
 0x60e   : > { %7796 = vrot.lane.b32.xlu0 %v7795_v39, %s8231_s17  ;;  %5924 = vmatprep.subr.mxu0 %v8229_v6  ;;  %v7830_v6 = vpack.i.bf16 %v4679_v18, %v10896_v62  ;;  %v7855_v62 = vpack.i.bf16 %v4681_v5, %v10904_v46  ;;  %v4751_v46 = vld [vmem:[#allocation4 + $0xca] sm:$0xff]  ;;  %v7885_v39 = vpack.i.bf16 %v4654_v53, %v4653_v36  ;;  %v4686_v18 = vld [vmem:[#allocation4 + $0xc0] sm:$0xff] }
 0x60f   : > { %5925 = vmatpush2.msra.mxu0 %v5746_v26  ;;  %7059 = vmatmul.mubr.msk.f32.gmra.mxu1 %vm2426_vm11, %v4749_v55  ;;  %v7890_v30 = vpack.i.bf16 %v4651_v35, %v4686_v18  ;;  %v4754_v26 = vld [vmem:[#allocation4 + $0xf2] sm:$0xff]  ;;  %v4657_v5 = vld [vmem:[#allocation4 + $0xda] sm:$0xff]  ;;  %v7955_v59 = vpack.i.bf16 %v4689_v28, %v10946_v27  ;;  %v4692_v55 = vld [vmem:[#allocation4 + $0x108] sm:$0xff] }
 0x610   : > { %7061 = vmatprep.mubr.msk.f32.mxu1 %vm2426_vm11, %v4750_v15  ;;  %v7965_v35 = vpack.i.bf16 %v4657_v5, %v4692_v55  ;;  %v4693_v27 = vld [vmem:[#allocation4 + $0x110] sm:$0xff] }
 0x611   : > { %7801 = vrot.lane.b32.xlu1 %v7800_v49, %s8232_s8  ;;  %v4752_v49 = vld [vmem:[#allocation4 + $0xda] sm:$0xff] }
 0x612   : > { %7806 = vrot.lane.b32.xlu0 %v7805_v22, %s8231_s17  ;;  %v4655_v22 = vld [vmem:[#allocation4 + $0xc2] sm:$0xff] }
 0x613   : > { %7062 = vmatmul.mubr.msk.f32.gmra.mxu1 %vm2426_vm11, %v4751_v46  ;;  %v7910_v44 = vpack.i.bf16 %v4656_v0, %v4655_v22  ;;  %v4661_v46 = vld [vmem:[#allocation4 + $0x10a] sm:$0xff] }
 0x614   : > { %7064 = vmatprep.mubr.msk.f32.mxu1 %vm2426_vm11, %v4752_v49 }
 0x615   : > { %7811 = vrot.lane.b32.xlu1 %v7810_v45, %s8230_s16  ;;  %v7920_v45 = vpack.i.bf16 %v4686_v18, %v10938_v16 }
 0x616   : > { %7816 = vrot.lane.b32.xlu0 %v7815_v31, %s8232_s8  ;;  %v7925_v31 = vpack.i.bf16 %v4654_v53, %v4689_v28 }
 0x617   : > { %7065 = vmatmul.mubr.msk.f32.gmra.mxu1 %vm2426_vm11, %v4753_v8  ;;  %v4760_v8 = vld [vmem:[#allocation4 + $0x13a] sm:$0xff] }
 0x618   : > { %7067 = vmatprep.mubr.msk.f32.mxu1 %vm2426_vm11, %v4754_v26  ;;  %v11277_v26 = vld [vmem:[#allocation4 + $0x15a] sm:$0xff] }
 0x619   : > { %7821 = vrot.lane.b32.xlu1 %v7820_v1, %s8231_s17  ;;  %v4658_v1 = vld [vmem:[#allocation4 + $0xe2] sm:$0xff] }
 0x61a   : > { %7826 = vrot.lane.b32.xlu0 %v7825_v11, %s8232_s8  ;;  %v7935_v25 = vpack.i.bf16 %v4658_v1, %v4657_v5  ;;  %v4690_v11 = vld [vmem:[#allocation4 + $0xf0] sm:$0xff] }
 0x61b   : > { %7068 = vmatmul.mubr.msk.f32.gmra.mxu1 %vm2426_vm11, %v4755_v4  ;;  %v7940_v16 = vpack.i.bf16 %v4655_v22, %v4690_v11  ;;  %v8005_v22 = vpack.i.bf16 %v4693_v27, %v10966_v57  ;;  %v11283_v5 = vld [vmem:[#allocation4 + $0x16a] sm:$0xff] }
 0x61d   : > { %7831 = vrot.lane.b32.xlu1 %v7830_v6, %s8231_s17  ;;  %v7945_v6 = vpack.i.bf16 %v4688_v2, %v10944_v9  ;;  %v11258_v2 = vld [vmem:[#allocation4 + $0x12a] sm:$0xff] }
 0x61e   : > { %7836 = vrot.lane.b32.xlu0 %v7835_v14, %s8230_s16  ;;  %v4691_v14 = vld [vmem:[#allocation4 + $0xf8] sm:$0xff] }
 0x61f   : > { %v7950_v63 = vpack.i.bf16 %v4656_v0, %v4691_v14  ;;  %v7980_v53 = vpack.i.bf16 %v4691_v14, %v10962_v20  ;;  %v11256_v0 = vld [vmem:[#allocation4 + $0x122] sm:$0xff] }
 0x620   : > { %v8010_v57 = vpack.i.bf16 %v11258_v2, %v11256_v0  ;;  %v11301_v14 = vld [vmem:[#allocation4 + $0x142] sm:$0xff] }
 0x621   : > { %7841 = vrot.lane.b32.xlu1 %v7840_v7, %s8232_s8  ;;  %v4756_v7 = vld [vmem:[#allocation4 + $0x10a] sm:$0xff] }
 0x622   : > { %7846 = vrot.lane.b32.xlu0 %v7845_v58, %s8231_s17  ;;  %v4757_v58 = vld [vmem:[#allocation4 + $0x112] sm:$0xff]  ;;  %7070 = vmatprep.mubr.msk.f32.mxu1 %vm2426_vm11, %v4756_v7 }
 0x623   : > { %7071 = vmatmul.mubr.msk.f32.gmra.mxu1 %vm2426_vm11, %v4757_v58 }
 0x625   : > { %7851 = vrot.lane.b32.xlu1 %v7850_v33, %s8232_s8  ;;  %v4660_v33 = vld [vmem:[#allocation4 + $0xfa] sm:$0xff] }
 0x626   : > { %7856 = vrot.lane.b32.xlu0 %v7855_v62, %s8231_s17  ;;  %v7960_v62 = vpack.i.bf16 %v4660_v33, %v4659_v50  ;;  %v8000_v20 = vpack.i.bf16 %v4660_v33, %v4695_v51 }
 0x629   : > { %7861 = vrot.lane.b32.xlu1 %v7860_v23, %s8230_s16  ;;  %v7970_v23 = vpack.i.bf16 %v4690_v11, %v10960_v52  ;;  %v11295_v11 = vld [vmem:[#allocation4 + $0x172] sm:$0xff] }
 0x62a   : > { %7866 = vrot.lane.b32.xlu0 %v7865_v60, %s8232_s8  ;;  %v4758_v60 = vld [vmem:[#allocation4 + $0x122] sm:$0xff] }
 0x62b   : > { %7073 = vmatprep.mubr.msk.f32.mxu1 %vm2426_vm11, %v4758_v60 }
 0x62c   : > { %7074 = vmatmul.mubr.msk.f32.gmra.mxu1 %vm2426_vm11, %v4759_v32 }
 0x62d   : > { %7871 = vrot.lane.b32.xlu1 %v7870_v61, %s8231_s17  ;;  %v7975_v61 = vpack.i.bf16 %v4658_v1, %v4693_v27  ;;  %7076 = vmatprep.mubr.msk.f32.mxu1 %vm2426_vm11, %v4760_v8 }
 0x62e   : > { %7876 = vrot.lane.b32.xlu0 %v7875_v47, %s8232_s8  ;;  %v4662_v47 = vld [vmem:[#allocation4 + $0x112] sm:$0xff] }
 0x62f   : > { %v7985_v52 = vpack.i.bf16 %v4662_v47, %v4661_v46 }
 0x631   : > { %7881 = vrot.lane.b32.xlu1 %v7880_v56, %s8231_s17  ;;  %v4694_v56 = vld [vmem:[#allocation4 + $0x120] sm:$0xff] }
 0x632   : > { %7886 = vrot.lane.b32.xlu0 %v7885_v39, %s8230_s16 }
 0x635   : > { %7891 = vrot.lane.b32.xlu1 %v7890_v30, %s8232_s8  ;;  %v7990_v30 = vpack.i.bf16 %v4659_v50, %v4694_v56  ;;  %v11312_v50 = vld [vmem:[#allocation4 + $0x150] sm:$0xff] }
 0x636   : > { %7896 = vrot.lane.b32.xlu0 %v7895_v3, %s8231_s17  ;;  %v7995_v3 = vpack.i.bf16 %v4692_v55, %v10964_v48  ;;  %v4481_v55 = vld [vmem:[#allocation4] sm:$0xff] }
 0x639   : > { %7901 = vrot.lane.b32.xlu1 %v7900_v19, %s8232_s8 }
 0x63a   : > { %7906 = vrot.lane.b32.xlu0 %v7905_v41, %s8231_s17  ;;  %v4761_v41 = vld [vmem:[#allocation4 + $0x142] sm:$0xff] }
 0x63b   : > { %7077 = vmatmul.mubr.msk.f32.gmra.mxu1 %vm2426_vm11, %v4761_v41 }
 0x63d   : > { %7911 = vrot.lane.b32.xlu1 %v7910_v44, %s8230_s16  ;;  %v11263_v44 = vld [vmem:[#allocation4 + $0x138] sm:$0xff] }
 0x63e   : > { %7916 = vrot.lane.b32.xlu0 %v7915_v34, %s8232_s8  ;;  %v11265_v34 = vld [vmem:[#allocation4 + $0x152] sm:$0xff] }
 0x63f   : > { %7079 = vmatprep.mubr.msk.f32.mxu1 %vm2426_vm11, %v11265_v34 }
 0x640   : > { %7080 = vmatmul.mubr.msk.f32.gmra.mxu1 %vm2426_vm11, %v11277_v26 }
 0x641   : > { %7921 = vrot.lane.b32.xlu1 %v7920_v45, %s8231_s17  ;;  %v8015_v45 = vpack.i.bf16 %v4661_v46, %v11263_v44  ;;  %7082 = vmatprep.mubr.msk.f32.mxu1 %vm2426_vm11, %v11283_v5 }
 0x642   : > { %7926 = vrot.lane.b32.xlu0 %v7925_v31, %s8232_s8  ;;  %v11281_v31 = vld [vmem:[#allocation4 + $0x140] sm:$0xff] }
 0x644   : > { %v11212_v29 = vpop.permute.xlu0 %7656  ;;  %7083 = vmatmul.mubr.msk.f32.gmra.mxu1 %vm2426_vm11, %v11295_v11 }
 0x645   : > { %7931 = vrot.lane.b32.xlu1 %v7930_v17, %s8231_s17  ;;  %v8020_v17 = vpack.i.bf16 %v4694_v56, %v10978_v24  ;;  %v7658_v24 = vunpack.i.l.bf16 %v11212_v29  ;;  %v11328_v56 = vld [vmem:[#allocation4 + $0x158] sm:$0xff] }
 0x646   : > { %7936 = vrot.lane.b32.xlu0 %v7935_v25, %s8230_s16  ;;  %v8025_v25 = vpack.i.bf16 %v4662_v47, %v11281_v31 }
 0x649   : > { %7941 = vrot.lane.b32.xlu1 %v7940_v16, %s8232_s8 }
 0x64a   : > { %7946 = vrot.lane.b32.xlu0 %v7945_v6, %s8231_s17  ;;  %v11299_v6 = vld [vmem:[#allocation4 + $0x13a] sm:$0xff] }
 0x64b   : > { %v11219_v10 = vpop.permute.xlu1 %7666  ;;  %v8035_v33 = vpack.i.bf16 %v11301_v14, %v11299_v6 }
 0x64c   : > { %v11222_v9 = vpop.permute.xlu0 %7661 }
 0x64d   : > { %7951 = vrot.lane.b32.xlu1 %v7950_v63, %s8232_s8  ;;  %v11303_v63 = vld [vmem:[#allocation4 + $0x182] sm:$0xff] }
 0x64e   : > { %7956 = vrot.lane.b32.xlu0 %v7955_v59, %s8231_s17  ;;  %7085 = vmatprep.mubr.msk.f32.mxu1 %vm2426_vm11, %v11303_v63  ;;  %v8030_v59 = vpack.i.bf16 %v4695_v51, %v10980_v13  ;;  %v4482_v51 = vld [vmem:[#allocation4 + $0x8] sm:$0xff] }
 0x64f   : > { %v11226_v38 = vpop.permute.xlu1 %7671 }
 0x650   : > { %v11228_v54 = vpop.permute.xlu0 %7676 }
 0x651   : > { %7961 = vrot.lane.b32.xlu1 %v7960_v62, %s8230_s16  ;;  %v11317_v62 = vld [vmem:[#allocation4 + $0x18a] sm:$0xff] }
 0x652   : > { %7966 = vrot.lane.b32.xlu0 %v7965_v35, %s8232_s8  ;;  %7086 = vmatmul.mubr.msk.f32.gmra.mxu1 %vm2426_vm11, %v11317_v62 }
 0x653   : > { %v11234_v15 = vpop.permute.xlu1 %7681 }
 0x654   : > { %v11237_v36 = vpop.permute.xlu0 %7686 }
 0x655   : > { %7971 = vrot.lane.b32.xlu1 %v7970_v23, %s8231_s17  ;;  %v7659_v23 = vunpack.i.h.bf16 %v11212_v29  ;;  %v8045_v29 = vpack.i.bf16 %v11263_v44, %v10982_v40 }
 0x656   : > { %7976 = vrot.lane.b32.xlu0 %v7975_v61, %s8232_s8  ;;  %v8040_v61 = vpack.i.bf16 %v11256_v0, %v11312_v50 }
 0x657   : > { %v11242_v39 = vpop.permute.xlu1 %7691  ;;  %v5539_v44 = vsel %vm2426_vm11, %v4482_v51, %v7659_v23 }
 0x658   : > { %v11244_v18 = vpop.permute.xlu0 %7696 }
 0x659   : > { %7981 = vrot.lane.b32.xlu1 %v7980_v53, %s8231_s17 }
 0x65a   : > { %7986 = vrot.lane.b32.xlu0 %v7985_v52, %s8230_s16  ;;  %v5538_v52 = vsel %vm2426_vm11, %v4481_v55, %v7658_v24  ;;  %v8055_v24 = vpack.i.bf16 %v11281_v31, %v10984_v37  ;;  %v11349_v55 = vld [vmem:[#allocation4 + $0x168] sm:$0xff]  ;;  %v8060_v37 = vpack.i.bf16 %v11277_v26, %v11265_v34 }
 0x65b   : > { %v11249_v19 = vpop.permute.xlu1 %7701  ;;  %v8065_v31 = vpack.i.bf16 %v11299_v6, %v11349_v55 }
 0x65c   : > { %v11251_v49 = vpop.permute.xlu0 %7706 }
 0x65d   : > { %7991 = vrot.lane.b32.xlu1 %v7990_v30, %s8232_s8 }
 0x65e   : > { %7996 = vrot.lane.b32.xlu0 %v7995_v3, %s8231_s17  ;;  %v4610_v3 = vld [vmem:[#allocation4 + $0x21] sm:$0xff] }
 0x65f   : > { %v11261_v48 = vpop.permute.xlu1 %7711 }
 0x660   : > { %v11268_v28 = vpop.permute.xlu0 %7716 }
 0x661   : > { %8001 = vrot.lane.b32.xlu1 %v8000_v20, %s8232_s8 }
 0x662   : > { %8006 = vrot.lane.b32.xlu0 %v8005_v22, %s8231_s17 }
 0x663   : > { %v11279_v4 = vpop.permute.xlu1 %7721 }
 0x664   : > { %v11287_v1 = vpop.permute.xlu0 %7726 }
 0x665   : > { %8011 = vrot.lane.b32.xlu1 %v8010_v57, %s8230_s16 }
 0x666   : > { %8016 = vrot.lane.b32.xlu0 %v8015_v45, %s8232_s8  ;;  %v8050_v45 = vpack.i.bf16 %v11258_v2, %v11328_v56 }
 0x667   : > { %v11297_v16 = vpop.permute.xlu1 %7731 }
 0x668   : > { %v7737_v7 = vpop.permute.xlu0 %7736 }
 0x669   : > { %v7738_v58 = vunpack.i.l.bf16 %v7737_v7  ;;  %8021 = vrot.lane.b32.xlu1 %v8020_v17, %s8231_s17  ;;  %v7739_v46 = vunpack.i.h.bf16 %v7737_v7 }
 0x66a   : > { %8026 = vrot.lane.b32.xlu0 %v8025_v25, %s8232_s8 }
 0x66b   : > { %v7742_v35 = vpop.permute.xlu1 %7741  ;;  %v5634_v27 = vsel %vm2426_vm11, %v10870_v43, %v7738_v58  ;;  %v5635_v40 = vsel %vm2426_vm11, %v4610_v3, %v7739_v46  ;;  %v7664_v46 = vunpack.i.h.bf16 %v11222_v9 }
 0x66c   : > { %v7744_v13 = vunpack.i.h.bf16 %v7742_v35  ;;  %v7747_v60 = vpop.permute.xlu0 %7746  ;;  %v7743_v32 = vunpack.i.l.bf16 %v7742_v35  ;;  %v4611_v35 = vld [vmem:[#allocation4 + $0x31] sm:$0xff] }
 0x66d   : > { %v7749_v47 = vunpack.i.h.bf16 %v7747_v60  ;;  %8031 = vrot.lane.b32.xlu1 %v8030_v59, %s8231_s17  ;;  %v7748_v53 = vunpack.i.l.bf16 %v7747_v60 }
 0x66e   : > { %8036 = vrot.lane.b32.xlu0 %v8035_v33, %s8230_s16  ;;  %v5666_v43 = vsel %vm3548_vm1, %v5634_v27, %v7743_v32  ;;  %v5570_v30 = vsel %vm3548_vm1, %v5538_v52, %v7744_v13  ;;  %v7663_v27 = vunpack.i.l.bf16 %v11222_v9  ;;  %v11362_v52 = vld [vmem:[#allocation4 + $0x170] sm:$0xff] }
 0x66f   : > { %v7752_v20 = vpop.permute.xlu1 %7751  ;;  %v5698_v8 = vsel %vm3581_vm3, %v5666_v43, %v7748_v53  ;;  %v5602_v41 = vsel %vm3581_vm3, %v5570_v30, %v7749_v47  ;;  %v8070_v53 = vpack.i.bf16 %v11312_v50, %v11000_v21 }
 0x670   : > { %v7754_v22 = vunpack.i.h.bf16 %v7752_v20  ;;  %v7753_v0 = vunpack.i.l.bf16 %v7752_v20  ;;  %v7757_v57 = vpop.permute.xlu0 %7756  ;;  %5926 = vmatprep.mubr.f32.mxu0 %v5698_v8  ;;  %v5540_v51 = vsel %vm2426_vm11, %v11021_v42, %v7663_v27  ;;  %v4733_v20 = vld [vmem:[#allocation4 + $0x171] sm:$0xff] }
 0x671   : > { %v7759_v17 = vunpack.i.h.bf16 %v7757_v57  ;;  %v7758_v25 = vunpack.i.l.bf16 %v7757_v57  ;;  %8041 = vrot.lane.b32.xlu1 %v8040_v61, %s8232_s8  ;;  %5927 = vmatmul.mubr.f32.vlgmr.msra.gmra.mxu0 %v5602_v41  ;;  %v8080_v57 = vpack.i.bf16 %v11328_v56, %v4733_v20  ;;  %v11382_v56 = vld [vmem:[#allocation4 + $0x180] sm:$0xff]  ;;  %v4486_v20 = vld [vmem:[#allocation4 + $0x38] sm:$0xff] }
 0x672   : > { %8046 = vrot.lane.b32.xlu0 %v8045_v29, %s8231_s17  ;;  %v5667_v7 = vsel %vm3548_vm1, %v5635_v40, %v7753_v0  ;;  %v5571_v58 = vsel %vm3548_vm1, %v5539_v44, %v7754_v22  ;;  %v4612_v22 = vld [vmem:[#allocation4 + $0x39] sm:$0xff]  ;;  %v8075_v0 = vpack.i.bf16 %v11301_v14, %v11362_v52  ;;  %v5541_v44 = vsel %vm2426_vm11, %v11044_v12, %v7664_v46 }
 0x673   : > { %v7762_v59 = vpop.permute.xlu1 %7761  ;;  %v5699_v2 = vsel %vm3581_vm3, %v5667_v7, %v7758_v25  ;;  %v5603_v33 = vsel %vm3581_vm3, %v5571_v58, %v7759_v17  ;;  %v4613_v7 = vld [vmem:[#allocation4 + $0x49] sm:$0xff]  ;;  %v8085_v12 = vpack.i.bf16 %v11295_v11, %v11283_v5 }
 0x674   : > { %v7763_v23 = vunpack.i.l.bf16 %v7762_v59  ;;  %v7767_v13 = vpop.permute.xlu0 %7766  ;;  %5931 = vmatprep.mubr.f32.mxu0 %v5699_v2  ;;  %v7764_v43 = vunpack.i.h.bf16 %v7762_v59 }
 0x675   : > { %v7769_v60 = vunpack.i.h.bf16 %v7767_v13  ;;  %v7768_v32 = vunpack.i.l.bf16 %v7767_v13  ;;  %8051 = vrot.lane.b32.xlu1 %v8050_v45, %s8232_s8  ;;  %5932 = vmatmul.mubr.f32.gmra.mxu0 %v5603_v33  ;;  %v4734_v13 = vld [vmem:[#allocation4 + $0x181] sm:$0xff] }
 0x676   : > { %8056 = vrot.lane.b32.xlu0 %v8055_v24, %s8231_s17  ;;  %v5636_v61 = vsel %vm2426_vm11, %v4611_v35, %v7763_v23  ;;  %v5637_v40 = vsel %vm2426_vm11, %v4612_v22, %v7764_v43  ;;  %v7668_v24 = vunpack.i.l.bf16 %v11219_v10  ;;  %v4485_v35 = vld [vmem:[#allocation4 + $0x30] sm:$0xff] }
 0x677   : > { %v7772_v47 = vpop.permute.xlu1 %7771  ;;  %v5668_v9 = vsel %vm3548_vm1, %v5636_v61, %v7768_v32  ;;  %v5572_v41 = vsel %vm3548_vm1, %v5540_v51, %v7769_v60  ;;  %v7669_v60 = vunpack.i.h.bf16 %v11219_v10  ;;  %v8090_v61 = vpack.i.bf16 %v11265_v34, %v11382_v56  ;;  %v4614_v51 = vld [vmem:[#allocation4 + $0x51] sm:$0xff] }
 0x678   : > { %v7774_v29 = vunpack.i.h.bf16 %v7772_v47  ;;  %v7773_v30 = vunpack.i.l.bf16 %v7772_v47  ;;  %v7777_v3 = vpop.permute.xlu0 %7776  ;;  %v5542_v43 = vsel %vm2426_vm11, %v4485_v35, %v7668_v24 }
 0x679   : > { %v7779_v8 = vunpack.i.h.bf16 %v7777_v3  ;;  %v7778_v6 = vunpack.i.l.bf16 %v7777_v3  ;;  %8061 = vrot.lane.b32.xlu1 %v8060_v37, %s8230_s16 }
 0x67a   : > { %8066 = vrot.lane.b32.xlu0 %v8065_v31, %s8232_s8  ;;  %v5700_v21 = vsel %vm3581_vm3, %v5668_v9, %v7773_v30  ;;  %v5604_v50 = vsel %vm3581_vm3, %v5572_v41, %v7774_v29  ;;  %v11395_v29 = vld [vmem:[#allocation4 + $0x188] sm:$0xff]  ;;  %v8095_v30 = vpack.i.bf16 %v11349_v55, %v4734_v13 }
 0x67b   : > { %v7782_v42 = vpop.permute.xlu1 %7781  ;;  %5936 = vmatprep.mubr.f32.mxu0 %v5700_v21  ;;  %v5669_v14 = vsel %vm3548_vm1, %v5637_v40, %v7778_v6  ;;  %v5573_v59 = vsel %vm3548_vm1, %v5541_v44, %v7779_v8  ;;  %v4735_v9 = vld [vmem:[#allocation4 + $0x189] sm:$0xff] }
 0x67c   : > { %v7784_v45 = vunpack.i.h.bf16 %v7782_v42  ;;  %v7783_v17 = vunpack.i.l.bf16 %v7782_v42  ;;  %v7787_v25 = vpop.permute.xlu0 %7786  ;;  %5937 = vmatmul.mubr.f32.gmra.mxu0 %v5604_v50  ;;  %v8100_v50 = vpack.i.bf16 %v11277_v26, %v11395_v29  ;;  %v8105_v40 = vpack.i.bf16 %v11362_v52, %v4735_v9 }
 0x67d   : > { %v7788_v58 = vunpack.i.l.bf16 %v7787_v25  ;;  %8071 = vrot.lane.b32.xlu1 %v8070_v53, %s8231_s17  ;;  %v7789_v46 = vunpack.i.h.bf16 %v7787_v25 }
 0x67e   : > { %8076 = vrot.lane.b32.xlu0 %v8075_v0, %s8232_s8  ;;  %v5701_v2 = vsel %vm3581_vm3, %v5669_v14, %v7783_v17  ;;  %v5605_v33 = vsel %vm3581_vm3, %v5573_v59, %v7784_v45  ;;  %v4768_v45 = vld [vmem:[#allocation4 + $0x19a] sm:$0xff]  ;;  %v4769_v17 = vld [vmem:[#allocation4 + $0x1a2] sm:$0xff]  ;;  %v7673_v59 = vunpack.i.l.bf16 %v11226_v38 }
 0x67f   : > { %v7792_v27 = vpop.permute.xlu1 %7791  ;;  %5941 = vmatprep.mubr.f32.mxu0 %v5701_v2  ;;  %v5638_v23 = vsel %vm2426_vm11, %v4613_v7, %v7788_v58  ;;  %v5639_v55 = vsel %vm2426_vm11, %v4614_v51, %v7789_v46  ;;  %7088 = vmatprep.mubr.msk.f32.mxu1 %vm2426_vm11, %v4768_v45  ;;  %v4704_v58 = vld [vmem:[#allocation4 + $0x198] sm:$0xff]  ;;  %v4615_v14 = vld [vmem:[#allocation4 + $0x61] sm:$0xff]  ;;  %v4488_v51 = vld [vmem:[#allocation4 + $0x50] sm:$0xff] }
 0x680   : > { %v7794_v32 = vunpack.i.h.bf16 %v7792_v27  ;;  %v7793_v37 = vunpack.i.l.bf16 %v7792_v27  ;;  %v7797_v31 = vpop.permute.xlu0 %7796  ;;  %5942 = vmatmul.mubr.f32.gmra.mxu0 %v5605_v33  ;;  %7089 = vmatmul.mubr.msk.f32.gmra.mxu1 %vm2426_vm11, %v4769_v17  ;;  %v8110_v27 = vpack.i.bf16 %v11317_v62, %v11303_v63  ;;  %v8115_v13 = vpack.i.bf16 %v11283_v5, %v4704_v58  ;;  %v4737_v63 = vld [vmem:[#allocation4 + $0x1a1] sm:$0xff] }
 0x681   : > { %v7799_v47 = vunpack.i.h.bf16 %v7797_v31  ;;  %v7798_v53 = vunpack.i.l.bf16 %v7797_v31  ;;  %8081 = vrot.lane.b32.xlu1 %v8080_v57, %s8231_s17  ;;  %v5543_v57 = vsel %vm2426_vm11, %v4486_v20, %v7669_v60  ;;  %v4489_v17 = vld [vmem:[#allocation4 + $0x60] sm:$0xff] }
 0x682   : > { %8086 = vrot.lane.b32.xlu0 %v8085_v12, %s8230_s16  ;;  %v5670_v10 = vsel %vm3548_vm1, %v5638_v23, %v7793_v37  ;;  %v5574_v3 = vsel %vm3548_vm1, %v5542_v43, %v7794_v32  ;;  %v4736_v12 = vld [vmem:[#allocation4 + $0x199] sm:$0xff]  ;;  %v4487_v23 = vld [vmem:[#allocation4 + $0x48] sm:$0xff]  ;;  %v7674_v32 = vunpack.i.h.bf16 %v11226_v38 }
 0x683   : > { %v7802_v34 = vpop.permute.xlu1 %7801  ;;  %v5702_v8 = vsel %vm3581_vm3, %v5670_v10, %v7798_v53  ;;  %v5606_v6 = vsel %vm3581_vm3, %v5574_v3, %v7799_v47  ;;  %v8120_v31 = vpack.i.bf16 %v11382_v56, %v4736_v12  ;;  %v5544_v10 = vsel %vm2426_vm11, %v4487_v23, %v7673_v59  ;;  %v4616_v38 = vld [vmem:[#allocation4 + $0x69] sm:$0xff] }
 0x684   : > { %v7804_v41 = vunpack.i.h.bf16 %v7802_v34  ;;  %v7803_v22 = vunpack.i.l.bf16 %v7802_v34  ;;  %v7807_v21 = vpop.permute.xlu0 %7806  ;;  %5946 = vmatprep.mubr.f32.mxu0 %v5702_v8 }
 0x685   : > { %v7809_v0 = vunpack.i.h.bf16 %v7807_v21  ;;  %v7808_v42 = vunpack.i.l.bf16 %v7807_v21  ;;  %8091 = vrot.lane.b32.xlu1 %v8090_v61, %s8232_s8  ;;  %5947 = vmatmul.mubr.f32.gmra.mxu0 %v5606_v6  ;;  %v4705_v61 = vld [vmem:[#allocation4 + $0x1a0] sm:$0xff]  ;;  %v8130_v6 = vpack.i.bf16 %v11395_v29, %v4737_v63 }
 0x686   : > { %8096 = vrot.lane.b32.xlu0 %v8095_v30, %s8231_s17  ;;  %v5671_v25 = vsel %vm3548_vm1, %v5639_v55, %v7803_v22  ;;  %v5575_v44 = vsel %vm3548_vm1, %v5543_v57, %v7804_v41  ;;  %v8125_v34 = vpack.i.bf16 %v11295_v11, %v4705_v61 }
 0x687   : > { %v7812_v26 = vpop.permute.xlu1 %7811  ;;  %v5703_v7 = vsel %vm3581_vm3, %v5671_v25, %v7808_v42  ;;  %v5607_v24 = vsel %vm3581_vm3, %v5575_v44, %v7809_v0  ;;  %v4617_v0 = vld [vmem:[#allocation4 + $0x79] sm:$0xff]  ;;  %v7678_v42 = vunpack.i.l.bf16 %v11228_v54  ;;  %v7679_v44 = vunpack.i.h.bf16 %v11228_v54 }
 0x688   : > { %v7813_v2 = vunpack.i.l.bf16 %v7812_v26  ;;  %v7817_v33 = vpop.permute.xlu0 %7816  ;;  %5951 = vmatprep.mubr.f32.mxu0 %v5703_v7  ;;  %v7814_v46 = vunpack.i.h.bf16 %v7812_v26 }
 0x689   : > { %v7819_v52 = vunpack.i.h.bf16 %v7817_v33  ;;  %v7818_v35 = vunpack.i.l.bf16 %v7817_v33  ;;  %8101 = vrot.lane.b32.xlu1 %v8100_v50, %s8232_s8  ;;  %5952 = vmatmul.mubr.f32.gmra.mxu0 %v5607_v24  ;;  %v5545_v50 = vsel %vm2426_vm11, %v4488_v51, %v7674_v32 }
 0x68a   : > { %8106 = vrot.lane.b32.xlu0 %v8105_v40, %s8231_s17  ;;  %v5640_v60 = vsel %vm2426_vm11, %v4615_v14, %v7813_v2  ;;  %v5641_v21 = vsel %vm2426_vm11, %v4616_v38, %v7814_v46  ;;  %v5546_v2 = vsel %vm2426_vm11, %v4489_v17, %v7678_v42 }
 0x68b   : > { %v7822_v37 = vpop.permute.xlu1 %7821  ;;  %v5672_v5 = vsel %vm3548_vm1, %v5640_v60, %v7818_v35  ;;  %v5576_v3 = vsel %vm3548_vm1, %v5544_v10, %v7819_v52  ;;  %v4618_v52 = vld [vmem:[#allocation4 + $0x81] sm:$0xff] }
 0x68c   : > { %v7824_v47 = vunpack.i.h.bf16 %v7822_v37  ;;  %v7823_v53 = vunpack.i.l.bf16 %v7822_v37  ;;  %v7827_v43 = vpop.permute.xlu0 %7826  ;;  %v4490_v35 = vld [vmem:[#allocation4 + $0x68] sm:$0xff] }
 0x68d   : > { %v7829_v62 = vunpack.i.h.bf16 %v7827_v43  ;;  %v7828_v30 = vunpack.i.l.bf16 %v7827_v43  ;;  %8111 = vrot.lane.b32.xlu1 %v8110_v27, %s8230_s16  ;;  %v5547_v46 = vsel %vm2426_vm11, %v4490_v35, %v7679_v44  ;;  %s6817_s16 = sshll.u32 %s8288_s22, 8  ;;  %s11692_s22 = scalar_lea.sflag [#allocation6], %s229_s11 }
 0x68e   : > { %8116 = vrot.lane.b32.xlu0 %v8115_v13, %s8232_s8  ;;  %v5704_v56 = vsel %vm3581_vm3, %v5672_v5, %v7823_v53  ;;  %v5608_v20 = vsel %vm3581_vm3, %v5576_v3, %v7824_v47  ;;  %s11681_s12 = scalar_lea.hbm %s11738_s5, %s6817_s16 }
 0x68f   : > { %v7832_v8 = vpop.permute.xlu1 %7831  ;;  %5956 = vmatprep.mubr.f32.mxu0 %v5704_v56  ;;  %v5673_v11 = vsel %vm3548_vm1, %v5641_v21, %v7828_v30  ;;  %v5577_v57 = vsel %vm3548_vm1, %v5545_v50, %v7829_v62  ;;  %v4619_v62 = vld [vmem:[#allocation4 + $0x91] sm:$0xff]  ;;  %v7683_v30 = vunpack.i.l.bf16 %v11234_v15 }
 0x690   : > { %v7834_v9 = vunpack.i.h.bf16 %v7832_v8  ;;  %v7833_v41 = vunpack.i.l.bf16 %v7832_v8  ;;  %v7837_v22 = vpop.permute.xlu0 %7836  ;;  %5957 = vmatmul.mubr.f32.gmra.mxu0 %v5608_v20  ;;  %v4491_v56 = vld [vmem:[#allocation4 + $0x78] sm:$0xff] }
 0x691   : > { %v7838_v55 = vunpack.i.l.bf16 %v7837_v22  ;;  %8121 = vrot.lane.b32.xlu1 %v8120_v31, %s8231_s17  ;;  %v7839_v58 = vunpack.i.h.bf16 %v7837_v22  ;;  %v5548_v21 = vsel %vm2426_vm11, %v4491_v56, %v7683_v30 }
 0x692   : > { %8126 = vrot.lane.b32.xlu0 %v8125_v34, %s8232_s8  ;;  %v5705_v29 = vsel %vm3581_vm3, %v5673_v11, %v7833_v41  ;;  %v5609_v45 = vsel %vm3581_vm3, %v5577_v57, %v7834_v9  ;;  %v7684_v34 = vunpack.i.h.bf16 %v11234_v15  ;;  %v4620_v11 = vld [vmem:[#allocation4 + $0x99] sm:$0xff] }
 0x693   : > { %v7842_v25 = vpop.permute.xlu1 %7841  ;;  %5961 = vmatprep.mubr.f32.mxu0 %v5705_v29  ;;  %v5642_v40 = vsel %vm2426_vm11, %v4617_v0, %v7838_v55  ;;  %v5643_v61 = vsel %vm2426_vm11, %v4618_v52, %v7839_v58  ;;  %v4492_v57 = vld [vmem:[#allocation4 + $0x80] sm:$0xff] }
 0x694   : > { %v7844_v26 = vunpack.i.h.bf16 %v7842_v25  ;;  %v7843_v7 = vunpack.i.l.bf16 %v7842_v25  ;;  %v7847_v24 = vpop.permute.xlu0 %7846  ;;  %5962 = vmatmul.mubr.f32.gmra.mxu0 %v5609_v45 }
 0x695   : > { %v7849_v14 = vunpack.i.h.bf16 %v7847_v24  ;;  %v7848_v59 = vunpack.i.l.bf16 %v7847_v24  ;;  %8131 = vrot.lane.b32.xlu1 %v8130_v6, %s8231_s17  ;;  %v7688_v24 = vunpack.i.l.bf16 %v11237_v36  ;;  %s6627_s17 = sshll.u32 %s8443_s23, 4  ;;  %s11685_s17 = int_to_ptr.vmem [resolvable:$true] %s6627_s17 }
 0x696   : > { %v5674_v33 = vsel %vm3548_vm1, %v5642_v40, %v7843_v7  ;;  %v5578_v12 = vsel %vm3548_vm1, %v5546_v2, %v7844_v26  ;;  %v5549_v26 = vsel %vm2426_vm11, %v4492_v57, %v7684_v34  ;;  %v4621_v7 = vld [vmem:[#allocation4 + $0xa9] sm:$0xff]  ;;  %s8152_s13 = scalar_lea.vmem %s11685_s17, 256  ;;  %p8159_p2 = scmp.lt.s32.totalorder %s11685_s17, %s8157_s15 }
 0x697   : > { %v7852_v27 = vpop.permute.xlu1 %7851  ;;  %v5706_v54 = vsel %vm3581_vm3, %v5674_v33, %v7848_v59  ;;  %v5610_v23 = vsel %vm3581_vm3, %v5578_v12, %v7849_v14  ;;  %v4493_v12 = vld [vmem:[#allocation4 + $0x90] sm:$0xff]  ;;  %p8153_p13 = scmp.ne.s32.totalorder %s11685_s17, %s8152_s13  ;;  %p8160_p3 = scmp.lt.s32.totalorder %s8158_s25, %s8152_s13 }
 0x698   : > { %v7854_v13 = vunpack.i.h.bf16 %v7852_v27  ;;  %v7853_v60 = vunpack.i.l.bf16 %v7852_v27  ;;  %v7857_v32 = vpop.permute.xlu0 %7856  ;;  %5966 = vmatprep.mubr.f32.mxu0 %v5706_v54  ;;  %v7689_v27 = vunpack.i.h.bf16 %v11237_v36 }
 0x699   : > { %v7859_v37 = vunpack.i.h.bf16 %v7857_v32  ;;  %v7858_v31 = vunpack.i.l.bf16 %v7857_v32  ;;  %5967 = vmatmul.mubr.f32.gmra.mxu0 %v5610_v23  ;;  %p8154_p0 = pnand %p8153_p13, %p8305_p5  ;;  %p8161_p4 = por %p8160_p3, %p8159_p2 }
 0x69a   : > { %v5675_v47 = vsel %vm3548_vm1, %v5643_v61, %v7853_v60  ;;  %v5579_v53 = vsel %vm3548_vm1, %v5547_v46, %v7854_v13 }
 0x69b   : > { %v7862_v43 = vpop.permute.xlu1 %7861  ;;  %v5707_v10 = vsel %vm3581_vm3, %v5675_v47, %v7858_v31  ;;  %v5611_v63 = vsel %vm3581_vm3, %v5579_v53, %v7859_v37  ;;  %v5550_v31 = vsel %vm2426_vm11, %v4493_v12, %v7688_v24  ;;  %v4622_v47 = vld [vmem:[#allocation4 + $0xb1] sm:$0xff]  ;;  %p8155_p1 = pneg %p8154_p0 }
 0x69c   : > { %v7863_v5 = vunpack.i.l.bf16 %v7862_v43  ;;  %v7867_v3 = vpop.permute.xlu0 %7866  ;;  %5971 = vmatprep.mubr.f32.mxu0 %v5707_v10  ;;  %v7864_v6 = vunpack.i.h.bf16 %v7862_v43  ;;  %v4494_v53 = vld [vmem:[#allocation4 + $0x98] sm:$0xff] }
 0x69d   : > { %v7869_v38 = vunpack.i.h.bf16 %v7867_v3  ;;  %v7868_v51 = vunpack.i.l.bf16 %v7867_v3  ;;  %5972 = vmatmul.mubr.f32.gmra.mxu0 %v5611_v63  ;;  %p8162_p7 = pnand %p8161_p4, %p8155_p1 }
 0x69e   : > { %v5644_v20 = vsel %vm2426_vm11, %v4619_v62, %v7863_v5  ;;  %v5645_v44 = vsel %vm2426_vm11, %v4620_v11, %v7864_v6  ;;  %v7694_v11 = vunpack.i.h.bf16 %v11242_v39 }
 0x69f   : > { %v7872_v8 = vpop.permute.xlu1 %7871  ;;  %v5676_v42 = vsel %vm3548_vm1, %v5644_v20, %v7868_v51  ;;  %v5580_v55 = vsel %vm3548_vm1, %v5548_v21, %v7869_v38  ;;  %v5551_v51 = vsel %vm2426_vm11, %v4494_v53, %v7689_v27  ;;  %v7699_v53 = vunpack.i.h.bf16 %v11244_v18 }
 0x6a0   : > { %v7874_v9 = vunpack.i.h.bf16 %v7872_v8  ;;  %v7873_v41 = vunpack.i.l.bf16 %v7872_v8  ;;  %v7877_v22 = vpop.permute.xlu0 %7876 }
 0x6a1   : > { %v7879_v50 = vunpack.i.h.bf16 %v7877_v22  ;;  %v7878_v0 = vunpack.i.l.bf16 %v7877_v22 }
 0x6a2   : > { %v5708_v29 = vsel %vm3581_vm3, %v5676_v42, %v7873_v41  ;;  %v5612_v45 = vsel %vm3581_vm3, %v5580_v55, %v7874_v9  ;;  %v4623_v9 = vld [vmem:[#allocation4 + $0xc1] sm:$0xff]  ;;  %v7693_v41 = vunpack.i.l.bf16 %v11242_v39 }
 0x6a3   : > { %v7882_v15 = vpop.permute.xlu1 %7881  ;;  %5976 = vmatprep.mubr.f32.mxu0 %v5708_v29  ;;  %v5677_v14 = vsel %vm3548_vm1, %v5645_v44, %v7878_v0  ;;  %v5581_v59 = vsel %vm3548_vm1, %v5549_v26, %v7879_v50  ;;  %v4495_v42 = vld [vmem:[#allocation4 + $0xa8] sm:$0xff]  ;;  %v8234_v29 = vmov 0  }
 0x6a4   : > { %v7884_v17 = vunpack.i.h.bf16 %v7882_v15  ;;  %v7883_v25 = vunpack.i.l.bf16 %v7882_v15  ;;  %v7887_v40 = vpop.permute.xlu0 %7886  ;;  %5977 = vmatmul.mubr.f32.gmra.mxu0 %v5612_v45  ;;  %8135 = vset.pattern.permute.xlu0 %v8234_v29 }
 0x6a5   : > { %v7888_v58 = vunpack.i.l.bf16 %v7887_v40  ;;  %v7889_v60 = vunpack.i.h.bf16 %v7887_v40  ;;  %8136 = vset.pattern.permute.xlu1 %v8234_v29  ;;  %v5552_v40 = vsel %vm2426_vm11, %v4495_v42, %v7693_v41  ;;  %v4627_v29 = vld [vmem:[#allocation4 + $0xf1] sm:$0xff] }
 0x6a6   : > { %v5709_v2 = vsel %vm3581_vm3, %v5677_v14, %v7883_v25  ;;  %v5613_v33 = vsel %vm3581_vm3, %v5581_v59, %v7884_v17  ;;  %v4496_v14 = vld [vmem:[#allocation4 + $0xb0] sm:$0xff] }
 0x6a7   : > { %v7892_v52 = vpop.permute.xlu1 %7891  ;;  %5981 = vmatprep.mubr.f32.mxu0 %v5709_v2  ;;  %v5646_v35 = vsel %vm2426_vm11, %v4621_v7, %v7888_v58  ;;  %v5647_v38 = vsel %vm2426_vm11, %v4622_v47, %v7889_v60  ;;  %v4624_v58 = vld [vmem:[#allocation4 + $0xc9] sm:$0xff]  ;;  %v5553_v27 = vsel %vm2426_vm11, %v4496_v14, %v7694_v11 }
 0x6a8   : > { %v7894_v54 = vunpack.i.h.bf16 %v7892_v52  ;;  %v7893_v23 = vunpack.i.l.bf16 %v7892_v52  ;;  %v7897_v13 = vpop.permute.xlu0 %7896  ;;  %5982 = vmatmul.mubr.f32.gmra.mxu0 %v5613_v33 }
 0x6a9   : > { %v7899_v32 = vunpack.i.h.bf16 %v7897_v13  ;;  %v7898_v37 = vunpack.i.l.bf16 %v7897_v13 }
 0x6aa   : > { %v5678_v61 = vsel %vm3548_vm1, %v5646_v35, %v7893_v23  ;;  %v5582_v46 = vsel %vm3548_vm1, %v5550_v31, %v7894_v54  ;;  %v4625_v54 = vld [vmem:[#allocation4 + $0xd9] sm:$0xff]  ;;  %v7698_v23 = vunpack.i.l.bf16 %v11244_v18 }
 0x6ab   : > { %v7902_v43 = vpop.permute.xlu1 %7901  ;;  %v5710_v10 = vsel %vm3581_vm3, %v5678_v61, %v7898_v37  ;;  %v5614_v36 = vsel %vm3581_vm3, %v5582_v46, %v7899_v32  ;;  %v4497_v61 = vld [vmem:[#allocation4 + $0xc0] sm:$0xff] }
 0x6ac   : > { %v7904_v63 = vunpack.i.h.bf16 %v7902_v43  ;;  %v7903_v62 = vunpack.i.l.bf16 %v7902_v43  ;;  %v7907_v30 = vpop.permute.xlu0 %7906  ;;  %5986 = vmatprep.mubr.f32.mxu0 %v5710_v10 }
 0x6ad   : > { %v7909_v5 = vunpack.i.h.bf16 %v7907_v30  ;;  %v7908_v3 = vunpack.i.l.bf16 %v7907_v30  ;;  %5987 = vmatmul.mubr.f32.gmra.mxu0 %v5614_v36 }
 0x6ae   : > { %v5679_v56 = vsel %vm3548_vm1, %v5647_v38, %v7903_v62  ;;  %v5583_v20 = vsel %vm3548_vm1, %v5551_v51, %v7904_v63  ;;  %v4626_v51 = vld [vmem:[#allocation4 + $0xe1] sm:$0xff] }
 0x6af   : > { %v7912_v34 = vpop.permute.xlu1 %7911  ;;  %v5711_v8 = vsel %vm3581_vm3, %v5679_v56, %v7908_v3  ;;  %v5615_v6 = vsel %vm3581_vm3, %v5583_v20, %v7909_v5  ;;  %v5554_v5 = vsel %vm2426_vm11, %v4497_v61, %v7698_v23  ;;  %v4498_v56 = vld [vmem:[#allocation4 + $0xc8] sm:$0xff] }
 0x6b0   : > { %v7913_v22 = vunpack.i.l.bf16 %v7912_v34  ;;  %v7917_v21 = vpop.permute.xlu0 %7916  ;;  %5991 = vmatprep.mubr.f32.mxu0 %v5711_v8  ;;  %v7914_v45 = vunpack.i.h.bf16 %v7912_v34 }
 0x6b1   : > { %v7919_v50 = vunpack.i.h.bf16 %v7917_v21  ;;  %v7918_v0 = vunpack.i.l.bf16 %v7917_v21  ;;  %5992 = vmatmul.mubr.f32.gmra.mxu0 %v5615_v6 }
 0x6b2   : > { %v5648_v55 = vsel %vm2426_vm11, %v4623_v9, %v7913_v22  ;;  %v5649_v35 = vsel %vm2426_vm11, %v4624_v58, %v7914_v45  ;;  %v7703_v45 = vunpack.i.l.bf16 %v11249_v19 }
 0x6b3   : > { %v7922_v57 = vpop.permute.xlu1 %7921  ;;  %v5680_v7 = vsel %vm3548_vm1, %v5648_v55, %v7918_v0  ;;  %v5584_v24 = vsel %vm3548_vm1, %v5552_v40, %v7919_v50  ;;  %v5555_v50 = vsel %vm2426_vm11, %v4498_v56, %v7699_v53 }
 0x6b4   : > { %v7924_v15 = vunpack.i.h.bf16 %v7922_v57  ;;  %v7923_v17 = vunpack.i.l.bf16 %v7922_v57  ;;  %v7927_v25 = vpop.permute.xlu0 %7926 }
 0x6b5   : > { %v7929_v44 = vunpack.i.h.bf16 %v7927_v25  ;;  %v7928_v26 = vunpack.i.l.bf16 %v7927_v25 }
 0x6b6   : > { %v5712_v39 = vsel %vm3581_vm3, %v5680_v7, %v7923_v17  ;;  %v5616_v59 = vsel %vm3581_vm3, %v5584_v24, %v7924_v15  ;;  %v7704_v7 = vunpack.i.h.bf16 %v11249_v19 }
 0x6b7   : > { %v7932_v2 = vpop.permute.xlu1 %7931  ;;  %5996 = vmatprep.mubr.f32.mxu0 %v5712_v39  ;;  %v5681_v60 = vsel %vm3548_vm1, %v5649_v35, %v7928_v26  ;;  %v5585_v32 = vsel %vm3548_vm1, %v5553_v27, %v7929_v44  ;;  %v4499_v44 = vld [vmem:[#allocation4 + $0xd8] sm:$0xff] }
 0x6b8   : > { %v7934_v33 = vunpack.i.h.bf16 %v7932_v2  ;;  %v7933_v12 = vunpack.i.l.bf16 %v7932_v2  ;;  %v7937_v52 = vpop.permute.xlu0 %7936  ;;  %5997 = vmatmul.mubr.f32.gmra.mxu0 %v5616_v59  ;;  %v5556_v2 = vsel %vm2426_vm11, %v4499_v44, %v7703_v45  ;;  %v4628_v27 = vld [vmem:[#allocation4 + $0xf9] sm:$0xff] }
 0x6b9   : > { %v7938_v13 = vunpack.i.l.bf16 %v7937_v52  ;;  %v7939_v63 = vunpack.i.h.bf16 %v7937_v52 }
 0x6ba   : > { %v5713_v37 = vsel %vm3581_vm3, %v5681_v60, %v7933_v12  ;;  %v5617_v31 = vsel %vm3581_vm3, %v5585_v32, %v7934_v33 }
 0x6bb   : > { %v7942_v46 = vpop.permute.xlu1 %7941  ;;  %6001 = vmatprep.mubr.f32.mxu0 %v5713_v37  ;;  %v5650_v47 = vsel %vm2426_vm11, %v4625_v54, %v7938_v13  ;;  %v5651_v21 = vsel %vm2426_vm11, %v4626_v51, %v7939_v63  ;;  %v4500_v54 = vld [vmem:[#allocation4 + $0xe0] sm:$0xff] }
 0x6bc   : > { %v7944_v43 = vunpack.i.h.bf16 %v7942_v46  ;;  %v7943_v10 = vunpack.i.l.bf16 %v7942_v46  ;;  %v7947_v36 = vpop.permute.xlu0 %7946  ;;  %6002 = vmatmul.mubr.f32.gmra.mxu0 %v5617_v31  ;;  %v5557_v61 = vsel %vm2426_vm11, %v4500_v54, %v7704_v7  ;;  %v4629_v46 = vld [vmem:[#allocation4 + $0x109] sm:$0xff]  ;;  %v7713_v7 = vunpack.i.l.bf16 %v11261_v48 }
 0x6bd   : > { %v7949_v62 = vunpack.i.h.bf16 %v7947_v36  ;;  %v7948_v30 = vunpack.i.l.bf16 %v7947_v36 }
 0x6be   : > { %v5682_v3 = vsel %vm3548_vm1, %v5650_v47, %v7943_v10  ;;  %v5586_v38 = vsel %vm3548_vm1, %v5554_v5, %v7944_v43  ;;  %v7708_v47 = vunpack.i.l.bf16 %v11251_v49 }
 0x6bf   : > { %v7952_v20 = vpop.permute.xlu1 %7951  ;;  %v5714_v34 = vsel %vm3581_vm3, %v5682_v3, %v7948_v30  ;;  %v5618_v18 = vsel %vm3581_vm3, %v5586_v38, %v7949_v62  ;;  %v4501_v62 = vld [vmem:[#allocation4 + $0xf0] sm:$0xff]  ;;  %v7709_v3 = vunpack.i.h.bf16 %v11251_v49 }
 0x6c0   : > { %v7954_v8 = vunpack.i.h.bf16 %v7952_v20  ;;  %v7953_v6 = vunpack.i.l.bf16 %v7952_v20  ;;  %v7957_v9 = vpop.permute.xlu0 %7956  ;;  %6006 = vmatprep.mubr.f32.mxu0 %v5714_v34 }
 0x6c1   : > { %v7959_v41 = vunpack.i.h.bf16 %v7957_v9  ;;  %v7958_v22 = vunpack.i.l.bf16 %v7957_v9  ;;  %6007 = vmatmul.mubr.f32.gmra.mxu0 %v5618_v18 }
 0x6c2   : > { %v5683_v0 = vsel %vm3548_vm1, %v5651_v21, %v7953_v6  ;;  %v5587_v42 = vsel %vm3548_vm1, %v5555_v50, %v7954_v8  ;;  %v5558_v8 = vsel %vm2426_vm11, %v4501_v62, %v7708_v47  ;;  %v7718_v62 = vunpack.i.l.bf16 %v11268_v28 }
 0x6c3   : > { %v7962_v55 = vpop.permute.xlu1 %7961  ;;  %v5715_v11 = vsel %vm3581_vm3, %v5683_v0, %v7958_v22  ;;  %v5619_v57 = vsel %vm3581_vm3, %v5587_v42, %v7959_v41  ;;  %v4630_v41 = vld [vmem:[#allocation4 + $0x111] sm:$0xff] }
 0x6c4   : > { %v7963_v15 = vunpack.i.l.bf16 %v7962_v55  ;;  %v7967_v17 = vpop.permute.xlu0 %7966  ;;  %6011 = vmatprep.mubr.f32.mxu0 %v5715_v11  ;;  %v7964_v58 = vunpack.i.h.bf16 %v7962_v55  ;;  %v4502_v22 = vld [vmem:[#allocation4 + $0xf8] sm:$0xff] }
 0x6c5   : > { %v7969_v25 = vunpack.i.h.bf16 %v7967_v17  ;;  %v7968_v40 = vunpack.i.l.bf16 %v7967_v17  ;;  %6012 = vmatmul.mubr.f32.gmra.mxu0 %v5619_v57  ;;  %v5559_v45 = vsel %vm2426_vm11, %v4502_v22, %v7709_v3 }
 0x6c6   : > { %v5652_v26 = vsel %vm2426_vm11, %v4627_v29, %v7963_v15  ;;  %v5653_v31 = vsel %vm2426_vm11, %v4628_v27, %v7964_v58 }
 0x6c7   : > { %v7972_v24 = vpop.permute.xlu1 %7971  ;;  %v5684_v52 = vsel %vm3548_vm1, %v5652_v26, %v7968_v40  ;;  %v5588_v35 = vsel %vm3548_vm1, %v5556_v2, %v7969_v25  ;;  %v4631_v26 = vld [vmem:[#allocation4 + $0x121] sm:$0xff] }
 0x6c8   : > { %v7974_v14 = vunpack.i.h.bf16 %v7972_v24  ;;  %v7973_v39 = vunpack.i.l.bf16 %v7972_v24  ;;  %v7977_v59 = vpop.permute.xlu0 %7976 }
 0x6c9   : > { %v7979_v33 = vunpack.i.h.bf16 %v7977_v59  ;;  %v7978_v12 = vunpack.i.l.bf16 %v7977_v59  ;;  %v4503_v59 = vld [vmem:[#allocation4 + $0x108] sm:$0xff] }
 0x6ca   : > { %v5716_v23 = vsel %vm3581_vm3, %v5684_v52, %v7973_v39  ;;  %v5620_v13 = vsel %vm3581_vm3, %v5588_v35, %v7974_v14 }
 0x6cb   : > { %v7982_v19 = vpop.permute.xlu1 %7981  ;;  %6016 = vmatprep.mubr.f32.mxu0 %v5716_v23  ;;  %v5685_v43 = vsel %vm3548_vm1, %v5653_v31, %v7978_v12  ;;  %v5589_v10 = vsel %vm3548_vm1, %v5557_v61, %v7979_v33  ;;  %v7714_v33 = vunpack.i.h.bf16 %v11261_v48  ;;  %v5560_v23 = vsel %vm2426_vm11, %v4503_v59, %v7713_v7  ;;  %v4504_v31 = vld [vmem:[#allocation4 + $0x110] sm:$0xff] }
 0x6cc   : > { %v7984_v60 = vunpack.i.h.bf16 %v7982_v19  ;;  %v7983_v32 = vunpack.i.l.bf16 %v7982_v19  ;;  %v7987_v37 = vpop.permute.xlu0 %7986  ;;  %6017 = vmatmul.mubr.f32.gmra.mxu0 %v5620_v13  ;;  %v7723_v59 = vunpack.i.l.bf16 %v11279_v4 }
 0x6cd   : > { %v7988_v53 = vunpack.i.l.bf16 %v7987_v37  ;;  %v7989_v20 = vunpack.i.h.bf16 %v7987_v37  ;;  %v4632_v37 = vld [vmem:[#allocation4 + $0x129] sm:$0xff] }
 0x6ce   : > { %v5717_v36 = vsel %vm3581_vm3, %v5685_v43, %v7983_v32  ;;  %v5621_v63 = vsel %vm3581_vm3, %v5589_v10, %v7984_v60 }
 0x6cf   : > { %v7992_v30 = vpop.permute.xlu1 %7991  ;;  %6021 = vmatprep.mubr.f32.mxu0 %v5717_v36  ;;  %v5654_v5 = vsel %vm2426_vm11, %v4629_v46, %v7988_v53  ;;  %v5655_v29 = vsel %vm2426_vm11, %v4630_v41, %v7989_v20  ;;  %v5561_v36 = vsel %vm2426_vm11, %v4504_v31, %v7714_v33 }
 0x6d0   : > { %v7994_v38 = vunpack.i.h.bf16 %v7992_v30  ;;  %v7993_v51 = vunpack.i.l.bf16 %v7992_v30  ;;  %v7997_v56 = vpop.permute.xlu0 %7996  ;;  %6022 = vmatmul.mubr.f32.gmra.mxu0 %v5621_v63  ;;  %v4633_v63 = vld [vmem:[#allocation4 + $0x139] sm:$0xff] }
 0x6d1   : > { %v7999_v34 = vunpack.i.h.bf16 %v7997_v56  ;;  %v7998_v18 = vunpack.i.l.bf16 %v7997_v56  ;;  %v4505_v56 = vld [vmem:[#allocation4 + $0x120] sm:$0xff] }
 0x6d2   : > { %v5686_v6 = vsel %vm3548_vm1, %v5654_v5, %v7993_v51  ;;  %v5590_v9 = vsel %vm3548_vm1, %v5558_v8, %v7994_v38 }
 0x6d3   : > { %v8002_v21 = vpop.permute.xlu1 %8001  ;;  %v5718_v50 = vsel %vm3581_vm3, %v5686_v6, %v7998_v18  ;;  %v5622_v49 = vsel %vm3581_vm3, %v5590_v9, %v7999_v34  ;;  %v7719_v18 = vunpack.i.h.bf16 %v11268_v28 }
 0x6d4   : > { %v8004_v0 = vunpack.i.h.bf16 %v8002_v21  ;;  %v8003_v42 = vunpack.i.l.bf16 %v8002_v21  ;;  %v8007_v55 = vpop.permute.xlu0 %8006  ;;  %6026 = vmatprep.mubr.f32.mxu0 %v5718_v50  ;;  %v5562_v50 = vsel %vm2426_vm11, %v4505_v56, %v7718_v62 }
 0x6d5   : > { %v8009_v11 = vunpack.i.h.bf16 %v8007_v55  ;;  %v8008_v57 = vunpack.i.l.bf16 %v8007_v55  ;;  %6027 = vmatmul.mubr.f32.gmra.mxu0 %v5622_v49  ;;  %v4506_v55 = vld [vmem:[#allocation4 + $0x128] sm:$0xff] }
 0x6d6   : > { %v5687_v15 = vsel %vm3548_vm1, %v5655_v29, %v8003_v42  ;;  %v5591_v17 = vsel %vm3548_vm1, %v5559_v45, %v8004_v0  ;;  %v4634_v42 = vld [vmem:[#allocation4 + $0x141] sm:$0xff] }
 0x6d7   : > { %v8012_v25 = vpop.permute.xlu1 %8011  ;;  %v5719_v40 = vsel %vm3581_vm3, %v5687_v15, %v8008_v57  ;;  %v5623_v44 = vsel %vm3581_vm3, %v5591_v17, %v8009_v11 }
 0x6d8   : > { %v8013_v24 = vunpack.i.l.bf16 %v8012_v25  ;;  %v8017_v58 = vpop.permute.xlu0 %8016  ;;  %6031 = vmatprep.mubr.f32.mxu0 %v5719_v40  ;;  %v8014_v52 = vunpack.i.h.bf16 %v8012_v25 }
 0x6d9   : > { %v8019_v14 = vunpack.i.h.bf16 %v8017_v58  ;;  %v8018_v39 = vunpack.i.l.bf16 %v8017_v58  ;;  %6032 = vmatmul.mubr.f32.gmra.mxu0 %v5623_v44  ;;  %v5563_v44 = vsel %vm2426_vm11, %v4506_v55, %v7719_v18 }
 0x6da   : > { %v5656_v2 = vsel %vm2426_vm11, %v4631_v26, %v8013_v24  ;;  %v5657_v10 = vsel %vm2426_vm11, %v4632_v37, %v8014_v52 }
 0x6db   : > { %v8022_v12 = vpop.permute.xlu1 %8021  ;;  %v5688_v60 = vsel %vm3548_vm1, %v5656_v2, %v8018_v39  ;;  %v5592_v32 = vsel %vm3548_vm1, %v5560_v23, %v8019_v14  ;;  %v4635_v39 = vld [vmem:[#allocation4 + $0x151] sm:$0xff] }
 0x6dc   : > { %v8024_v35 = vunpack.i.h.bf16 %v8022_v12  ;;  %v8023_v27 = vunpack.i.l.bf16 %v8022_v12  ;;  %v8027_v54 = vpop.permute.xlu0 %8026 }
 0x6dd   : > { %v8029_v13 = vunpack.i.h.bf16 %v8027_v54  ;;  %v8028_v19 = vunpack.i.l.bf16 %v8027_v54  ;;  %v7724_v54 = vunpack.i.h.bf16 %v11279_v4 }
 0x6de   : > { %v5720_v61 = vsel %vm3581_vm3, %v5688_v60, %v8023_v27  ;;  %v5624_v46 = vsel %vm3581_vm3, %v5592_v32, %v8024_v35  ;;  %v4507_v35 = vld [vmem:[#allocation4 + $0x138] sm:$0xff] }
 0x6df   : > { %v8032_v48 = vpop.permute.xlu1 %8031  ;;  %6036 = vmatprep.mubr.f32.mxu0 %v5720_v61  ;;  %v5689_v5 = vsel %vm3548_vm1, %v5657_v10, %v8028_v19  ;;  %v5593_v3 = vsel %vm3548_vm1, %v5561_v36, %v8029_v13  ;;  %v5564_v37 = vsel %vm2426_vm11, %v4507_v35, %v7723_v59 }
 0x6e0   : > { %v8034_v47 = vunpack.i.h.bf16 %v8032_v48  ;;  %v8033_v53 = vunpack.i.l.bf16 %v8032_v48  ;;  %v8037_v43 = vpop.permute.xlu0 %8036  ;;  %6037 = vmatmul.mubr.f32.gmra.mxu0 %v5624_v46 }
 0x6e1   : > { %v8038_v30 = vunpack.i.l.bf16 %v8037_v43  ;;  %v8039_v41 = vunpack.i.h.bf16 %v8037_v43 }
 0x6e2   : > { %v5721_v38 = vsel %vm3581_vm3, %v5689_v5, %v8033_v53  ;;  %v5625_v51 = vsel %vm3581_vm3, %v5593_v3, %v8034_v47  ;;  %v4636_v47 = vld [vmem:[#allocation4 + $0x159] sm:$0xff]  ;;  %v4637_v3 = vld [vmem:[#allocation4 + $0x169] sm:$0xff] }
 0x6e3   : > { %v8042_v20 = vpop.permute.xlu1 %8041  ;;  %6041 = vmatprep.mubr.f32.mxu0 %v5721_v38  ;;  %v5658_v34 = vsel %vm2426_vm11, %v4633_v63, %v8038_v30  ;;  %v5659_v40 = vsel %vm2426_vm11, %v4634_v42, %v8039_v41  ;;  %v4508_v53 = vld [vmem:[#allocation4 + $0x140] sm:$0xff]  ;;  %v7728_v38 = vunpack.i.l.bf16 %v11287_v1  ;;  %v7729_v41 = vunpack.i.h.bf16 %v11287_v1 }
 0x6e4   : > { %v8044_v8 = vunpack.i.h.bf16 %v8042_v20  ;;  %v8043_v6 = vunpack.i.l.bf16 %v8042_v20  ;;  %v8047_v9 = vpop.permute.xlu0 %8046  ;;  %6042 = vmatmul.mubr.f32.gmra.mxu0 %v5625_v51  ;;  %v5565_v5 = vsel %vm2426_vm11, %v4508_v53, %v7724_v54 }
 0x6e5   : > { %v8049_v22 = vunpack.i.h.bf16 %v8047_v9  ;;  %v8048_v21 = vunpack.i.l.bf16 %v8047_v9 }
 0x6e6   : > { %v5690_v49 = vsel %vm3548_vm1, %v5658_v34, %v8043_v6  ;;  %v5594_v0 = vsel %vm3548_vm1, %v5562_v50, %v8044_v8  ;;  %v4509_v8 = vld [vmem:[#allocation4 + $0x150] sm:$0xff] }
 0x6e7   : > { %v8052_v11 = vpop.permute.xlu1 %8051  ;;  %v5722_v57 = vsel %vm3581_vm3, %v5690_v49, %v8048_v21  ;;  %v5626_v28 = vsel %vm3581_vm3, %v5594_v0, %v8049_v22  ;;  %v5566_v55 = vsel %vm2426_vm11, %v4509_v8, %v7728_v38 }
 0x6e8   : > { %v8054_v29 = vunpack.i.h.bf16 %v8052_v11  ;;  %v8053_v45 = vunpack.i.l.bf16 %v8052_v11  ;;  %v8057_v15 = vpop.permute.xlu0 %8056  ;;  %6046 = vmatprep.mubr.f32.mxu0 %v5722_v57 }
 0x6e9   : > { %v8059_v17 = vunpack.i.h.bf16 %v8057_v15  ;;  %v8058_v25 = vunpack.i.l.bf16 %v8057_v15  ;;  %6047 = vmatmul.mubr.f32.gmra.mxu0 %v5626_v28  ;;  %v4638_v28 = vld [vmem:[#allocation4 + $0x171] sm:$0xff] }
 0x6ea   : > { %v5691_v26 = vsel %vm3548_vm1, %v5659_v40, %v8053_v45  ;;  %v5595_v7 = vsel %vm3548_vm1, %v5563_v44, %v8054_v29  ;;  %v4510_v29 = vld [vmem:[#allocation4 + $0x158] sm:$0xff] }
 0x6eb   : > { %v8062_v24 = vpop.permute.xlu1 %8061  ;;  %v5723_v58 = vsel %vm3581_vm3, %v5691_v26, %v8058_v25  ;;  %v5627_v14 = vsel %vm3581_vm3, %v5595_v7, %v8059_v17 }
 0x6ec   : > { %v8063_v2 = vunpack.i.l.bf16 %v8062_v24  ;;  %v8067_v33 = vpop.permute.xlu0 %8066  ;;  %6051 = vmatprep.mubr.f32.mxu0 %v5723_v58  ;;  %v8064_v13 = vunpack.i.h.bf16 %v8062_v24  ;;  %v5567_v24 = vsel %vm2426_vm11, %v4510_v29, %v7729_v41 }
 0x6ed   : > { %v8069_v12 = vunpack.i.h.bf16 %v8067_v33  ;;  %v8068_v52 = vunpack.i.l.bf16 %v8067_v33  ;;  %6052 = vmatmul.mubr.f32.gmra.mxu0 %v5627_v14  ;;  %v4639_v33 = vld [vmem:[#allocation4 + $0x181] sm:$0xff] }
 0x6ee   : > { %v5660_v27 = vsel %vm2426_vm11, %v4635_v39, %v8063_v2  ;;  %v5661_v30 = vsel %vm2426_vm11, %v4636_v47, %v8064_v13 }
 0x6ef   : > { %v8072_v23 = vpop.permute.xlu1 %8071  ;;  %v5692_v46 = vsel %vm3548_vm1, %v5660_v27, %v8068_v52  ;;  %v5596_v48 = vsel %vm3548_vm1, %v5564_v37, %v8069_v12  ;;  %v7733_v12 = vunpack.i.l.bf16 %v11297_v16 }
 0x6f0   : > { %v8074_v19 = vunpack.i.h.bf16 %v8072_v23  ;;  %v8073_v60 = vunpack.i.l.bf16 %v8072_v23  ;;  %v8077_v32 = vpop.permute.xlu0 %8076  ;;  %v4511_v23 = vld [vmem:[#allocation4 + $0x168] sm:$0xff] }
 0x6f1   : > { %v8079_v31 = vunpack.i.h.bf16 %v8077_v32  ;;  %v8078_v61 = vunpack.i.l.bf16 %v8077_v32 }
 0x6f2   : > { %v5724_v43 = vsel %vm3581_vm3, %v5692_v46, %v8073_v60  ;;  %v5628_v10 = vsel %vm3581_vm3, %v5596_v48, %v8074_v19  ;;  %v7734_v19 = vunpack.i.h.bf16 %v11297_v16  ;;  %v5568_v46 = vsel %vm2426_vm11, %v4511_v23, %v7733_v12 }
 0x6f3   : > { %v8082_v4 = vpop.permute.xlu1 %8081  ;;  %6056 = vmatprep.mubr.f32.mxu0 %v5724_v43  ;;  %v5693_v56 = vsel %vm3548_vm1, %v5661_v30, %v8078_v61  ;;  %v5597_v20 = vsel %vm3548_vm1, %v5565_v5, %v8079_v31 }
 0x6f4   : > { %v8084_v36 = vunpack.i.h.bf16 %v8082_v4  ;;  %v8083_v63 = vunpack.i.l.bf16 %v8082_v4  ;;  %v8087_v62 = vpop.permute.xlu0 %8086  ;;  %6057 = vmatmul.mubr.f32.gmra.mxu0 %v5628_v10  ;;  %v4640_v10 = vld [vmem:[#allocation4 + $0x189] sm:$0xff] }
 0x6f5   : > { %v8088_v51 = vunpack.i.l.bf16 %v8087_v62  ;;  %v8089_v49 = vunpack.i.h.bf16 %v8087_v62  ;;  %v4512_v4 = vld [vmem:[#allocation4 + $0x170] sm:$0xff] }
 0x6f6   : > { %v5725_v34 = vsel %vm3581_vm3, %v5693_v56, %v8083_v63  ;;  %v5629_v18 = vsel %vm3581_vm3, %v5597_v20, %v8084_v36 }
 0x6f7   : > { %v8092_v6 = vpop.permute.xlu1 %8091  ;;  %6061 = vmatprep.mubr.f32.mxu0 %v5725_v34  ;;  %v5662_v9 = vsel %vm2426_vm11, %v4637_v3, %v8088_v51  ;;  %v5663_v7 = vsel %vm2426_vm11, %v4638_v28, %v8089_v49  ;;  %v5569_v3 = vsel %vm2426_vm11, %v4512_v4, %v7734_v19  ;;  %v7045_v34 = vpop.f32.mrf.mxu1 }
 0x6f8   : > { %v8094_v22 = vunpack.i.h.bf16 %v8092_v6  ;;  %v8093_v21 = vunpack.i.l.bf16 %v8092_v6  ;;  %v8097_v50 = vpop.permute.xlu0 %8096  ;;  %6062 = vmatmul.mubr.f32.gmra.mxu0 %v5629_v18 }
 0x6f9   : > { %v8099_v0 = vunpack.i.h.bf16 %v8097_v50  ;;  %v8098_v42 = vunpack.i.l.bf16 %v8097_v50  ;;  %v6153_v18 = vpop.f32.mrf.mxu1 }
 0x6fa   : > { %v5694_v11 = vsel %vm3548_vm1, %v5662_v9, %v8093_v21  ;;  %v5598_v57 = vsel %vm3548_vm1, %v5566_v55, %v8094_v22 }
 0x6fb   : > { %v8102_v45 = vpop.permute.xlu1 %8101  ;;  %v5726_v15 = vsel %vm3581_vm3, %v5694_v11, %v8098_v42  ;;  %v5630_v1 = vsel %vm3581_vm3, %v5598_v57, %v8099_v0  ;;  %v7048_v21 = vpop.f32.mrf.mxu1 }
 0x6fc   : > { %v8104_v17 = vunpack.i.h.bf16 %v8102_v45  ;;  %v8103_v25 = vunpack.i.l.bf16 %v8102_v45  ;;  %v8107_v40 = vpop.permute.xlu0 %8106  ;;  %6066 = vmatprep.mubr.f32.mxu0 %v5726_v15 }
 0x6fd   : > { %v8109_v44 = vunpack.i.h.bf16 %v8107_v40  ;;  %v8108_v26 = vunpack.i.l.bf16 %v8107_v40  ;;  %6067 = vmatmul.mubr.f32.gmra.mxu0 %v5630_v1  ;;  %v6163_v49 = vpop.f32.mrf.mxu1 }
 0x6fe   : > { %v5695_v58 = vsel %vm3548_vm1, %v5663_v7, %v8103_v25  ;;  %v5599_v14 = vsel %vm3548_vm1, %v5567_v24, %v8104_v17 }
 0x6ff   : > { %v8112_v39 = vpop.permute.xlu1 %8111  ;;  %v5727_v59 = vsel %vm3581_vm3, %v5695_v58, %v8108_v26  ;;  %v5631_v2 = vsel %vm3581_vm3, %v5599_v14, %v8109_v44  ;;  %v7051_v11 = vpop.f32.mrf.mxu1 }
 0x700   : > { %v8113_v52 = vunpack.i.l.bf16 %v8112_v39  ;;  %v8117_v35 = vpop.permute.xlu0 %8116  ;;  %6071 = vmatprep.mubr.f32.mxu0 %v5727_v59  ;;  %v8114_v32 = vunpack.i.h.bf16 %v8112_v39 }
 0x701   : > { %v8119_v27 = vunpack.i.h.bf16 %v8117_v35  ;;  %v8118_v54 = vunpack.i.l.bf16 %v8117_v35  ;;  %6072 = vmatmul.mubr.f32.gmra.mxu0 %v5631_v2  ;;  %v6173_v45 = vpop.f32.mrf.mxu1 }
 0x702   : > { %v5664_v13 = vsel %vm2426_vm11, %v4639_v33, %v8113_v52  ;;  %v5665_v5 = vsel %vm2426_vm11, %v4640_v10, %v8114_v32  ;;  %vm6451_vm11 = vcmask 130112  }
 0x703   : > { %v8122_v60 = vpop.permute.xlu1 %8121  ;;  %v5696_v53 = vsel %vm3548_vm1, %v5664_v13, %v8118_v54  ;;  %v5600_v43 = vsel %vm3548_vm1, %v5568_v46, %v8119_v27  ;;  %v7054_v44 = vpop.f32.mrf.mxu1 }
 0x704   : > { %v8124_v37 = vunpack.i.h.bf16 %v8122_v60  ;;  %v8123_v31 = vunpack.i.l.bf16 %v8122_v60  ;;  %v8127_v61 = vpop.permute.xlu0 %8126 }
 0x705   : > { %v8129_v48 = vunpack.i.h.bf16 %v8127_v61  ;;  %v8128_v47 = vunpack.i.l.bf16 %v8127_v61  ;;  %v6183_v7 = vpop.f32.mrf.mxu1 }
 0x706   : > { %v5728_v36 = vsel %vm3581_vm3, %v5696_v53, %v8123_v31  ;;  %v5632_v63 = vsel %vm3581_vm3, %v5600_v43, %v8124_v37 }
 0x707   : > { %v8132_v16 = vpop.permute.xlu1 %8131  ;;  %6076 = vmatprep.mubr.f32.mxu0 %v5728_v36  ;;  %v5697_v38 = vsel %vm3548_vm1, %v5665_v5, %v8128_v47  ;;  %v5601_v51 = vsel %vm3548_vm1, %v5569_v3, %v8129_v48  ;;  %v7057_v39 = vpop.f32.mrf.mxu1  ;;  %vm6588_vm1 = vcmask 1041409  }
 0x708   : > { %v8134_v62 = vunpack.i.h.bf16 %v8132_v16  ;;  %v8133_v30 = vunpack.i.l.bf16 %v8132_v16  ;;  %6077 = vmatmul.mubr.f32.gmra.mxu0 %v5632_v63 }
 0x709   : > { %v6193_v12 = vpop.f32.mrf.mxu1 }
 0x70a   : > { %v5729_v56 = vsel %vm3581_vm3, %v5697_v38, %v8133_v30  ;;  %v5633_v20 = vsel %vm3581_vm3, %v5601_v51, %v8134_v62  ;;  %vm6590_vm3 = vcmask 1042434  }
 0x70b   : > { %6081 = vmatprep.mubr.f32.mxu0 %v5729_v56  ;;  %v7060_v13 = vpop.f32.mrf.mxu1 }
 0x70c   : > { %6082 = vmatmul.mubr.f32.gmra.mxu0 %v5633_v20 }
 0x70d   : > { %v6203_v60 = vpop.f32.mrf.mxu1 }
 0x70f   : > { %v7063_v61 = vpop.f32.mrf.mxu1 }
 0x711   : > { %v6213_v53 = vpop.f32.mrf.mxu1 }
 0x713   : > { %v7066_v16 = vpop.f32.mrf.mxu1 }
 0x715   : > { %v6223_v30 = vpop.f32.mrf.mxu1 }
 0x717   : > { %v7069_v51 = vpop.f32.mrf.mxu1 }
 0x731   : > { %v5928_v8 = vpop.f32.mrf.mxu0 }
 0x732   : > { %v6154_v6 = vadd.f32 %v6153_v18, %v5928_v8  ;;  %v6233_v18 = vpop.f32.mrf.mxu1 }
 0x733   : > { %v5930_v9 = vpop.f32.mrf.mxu0 }
 0x734   : > { %6345 = vperm.xlu0 %8135, %v6154_v6  }
 0x735   : > { %v5933_v41 = vpop.f32.mrf.mxu0 }
 0x736   : > { %v6159_v22 = vadd.f32 %v7045_v34, %v5933_v41 }
 0x737   : > { %v5935_v50 = vpop.f32.mrf.mxu0 }
 0x738   : > { %6348 = vperm.xlu1 %8136, %v6159_v22  }
 0x73c   : > { %v5938_v0 = vpop.f32.mrf.mxu0 }
 0x73d   : > { %v6164_v42 = vadd.f32 %v6163_v49, %v5938_v0 }
 0x73e   : > { %v5940_v55 = vpop.f32.mrf.mxu0 }
 0x73f   : > { %6351 = vperm.xlu1 %8136, %v6164_v42  }
 0x740   : > { %v5943_v57 = vpop.f32.mrf.mxu0 }
 0x741   : > { %v6169_v28 = vadd.f32 %v7048_v21, %v5943_v57  ;;  %v7072_v21 = vpop.f32.mrf.mxu1 }
 0x742   : > { %v5945_v29 = vpop.f32.mrf.mxu0 }
 0x743   : > { %6354 = vperm.xlu0 %8135, %v6169_v28   ;;  %v6243_v49 = vpop.f32.mrf.mxu1 }
 0x745   : > { %v5948_v15 = vpop.f32.mrf.mxu0 }
 0x746   : > { %v6174_v1 = vadd.f32 %v6173_v45, %v5948_v15 }
 0x747   : > { %v5950_v17 = vpop.f32.mrf.mxu0 }
 0x748   : > { %6357 = vperm.xlu1 %8136, %v6174_v1  }
 0x749   : > { %v5953_v25 = vpop.f32.mrf.mxu0 }
 0x74a   : > { %v6179_v40 = vadd.f32 %v7051_v11, %v5953_v25  ;;  %v7075_v11 = vpop.f32.mrf.mxu1 }
 0x74b   : > { %v5955_v26 = vpop.f32.mrf.mxu0 }
 0x74c   : > { %6360 = vperm.xlu0 %8135, %v6179_v40   ;;  %v6253_v45 = vpop.f32.mrf.mxu1 }
 0x750   : > { %v5958_v24 = vpop.f32.mrf.mxu0 }
 0x751   : > { %v6184_v58 = vadd.f32 %v6183_v7, %v5958_v24 }
 0x752   : > { %v5960_v14 = vpop.f32.mrf.mxu0 }
 0x753   : > { %6363 = vperm.xlu1 %8136, %v6184_v58  }
 0x754   : > { %v5963_v59 = vpop.f32.mrf.mxu0 }
 0x755   : > { %v6189_v2 = vadd.f32 %v7054_v44, %v5963_v59  ;;  %v7078_v44 = vpop.f32.mrf.mxu1 }
 0x756   : > { %v5965_v33 = vpop.f32.mrf.mxu0 }
 0x757   : > { %6366 = vperm.xlu0 %8135, %v6189_v2   ;;  %v6263_v7 = vpop.f32.mrf.mxu1 }
 0x759   : > { %v5968_v52 = vpop.f32.mrf.mxu0 }
 0x75a   : > { %v6194_v35 = vadd.f32 %v6193_v12, %v5968_v52 }
 0x75b   : > { %v5970_v27 = vpop.f32.mrf.mxu0 }
 0x75c   : > { %6369 = vperm.xlu1 %8136, %v6194_v35  }
 0x75d   : > { %v5973_v54 = vpop.f32.mrf.mxu0 }
 0x75e   : > { %v6199_v23 = vadd.f32 %v7057_v39, %v5973_v54  ;;  %v7081_v39 = vpop.f32.mrf.mxu1 }
 0x75f   : > { %v5975_v19 = vpop.f32.mrf.mxu0 }
 0x760   : > { %6372 = vperm.xlu0 %8135, %v6199_v23   ;;  %v6273_v12 = vpop.f32.mrf.mxu1 }
 0x764   : > { %v5978_v32 = vpop.f32.mrf.mxu0 }
 0x765   : > { %v6204_v37 = vadd.f32 %v6203_v60, %v5978_v32 }
 0x766   : > { %v5980_v31 = vpop.f32.mrf.mxu0 }
 0x767   : > { %6375 = vperm.xlu1 %8136, %v6204_v37  }
 0x768   : > { %v5983_v46 = vpop.f32.mrf.mxu0 }
 0x769   : > { %v6209_v48 = vadd.f32 %v7060_v13, %v5983_v46  ;;  %v7084_v13 = vpop.f32.mrf.mxu1 }
 0x76a   : > { %v5985_v47 = vpop.f32.mrf.mxu0 }
 0x76b   : > { %6378 = vperm.xlu0 %8135, %v6209_v48   ;;  %v6283_v60 = vpop.f32.mrf.mxu1 }
 0x76d   : > { %v5988_v43 = vpop.f32.mrf.mxu0 }
 0x76e   : > { %v6214_v10 = vadd.f32 %v6213_v53, %v5988_v43 }
 0x76f   : > { %v5990_v4 = vpop.f32.mrf.mxu0 }
 0x770   : > { %6381 = vperm.xlu1 %8136, %v6214_v10  }
 0x771   : > { %v5993_v36 = vpop.f32.mrf.mxu0 }
 0x772   : > { %v6219_v63 = vadd.f32 %v7063_v61, %v5993_v36  ;;  %v7087_v61 = vpop.f32.mrf.mxu1 }
 0x773   : > { %v5995_v62 = vpop.f32.mrf.mxu0 }
 0x774   : > { %6384 = vperm.xlu0 %8135, %v6219_v63   ;;  %v6293_v53 = vpop.f32.mrf.mxu1 }
 0x778   : > { %v5998_v5 = vpop.f32.mrf.mxu0 }
 0x779   : > { %v6224_v3 = vadd.f32 %v6223_v30, %v5998_v5 }
 0x77a   : > { %v6000_v38 = vpop.f32.mrf.mxu0 }
 0x77b   : > { %6387 = vperm.xlu1 %8136, %v6224_v3  }
 0x77c   : > { %v6003_v56 = vpop.f32.mrf.mxu0 }
 0x77d   : > { %v6229_v20 = vadd.f32 %v7066_v16, %v6003_v56  ;;  %v7090_v16 = vpop.f32.mrf.mxu1 }
 0x77e   : > { %v6005_v34 = vpop.f32.mrf.mxu0 }
 0x77f   : > { %6390 = vperm.xlu0 %8135, %v6229_v20   ;;  %v6303_v30 = vpop.f32.mrf.mxu1 }
 0x781   : > { %v6008_v8 = vpop.f32.mrf.mxu0 }
 0x782   : > { %v6234_v6 = vadd.f32 %v6233_v18, %v6008_v8 }
 0x783   : > { %v6010_v9 = vpop.f32.mrf.mxu0 }
 0x784   : > { %6393 = vperm.xlu1 %8136, %v6234_v6  }
 0x785   : > { %v6013_v41 = vpop.f32.mrf.mxu0 }
 0x786   : > { %v6239_v22 = vadd.f32 %v7069_v51, %v6013_v41 }
 0x787   : > { %v6015_v50 = vpop.f32.mrf.mxu0 }
 0x788   : > { %6396 = vperm.xlu0 %8135, %v6239_v22   ;;  %v6440_v22 = vlaneseq }
 0x78c   : > { %v6018_v0 = vpop.f32.mrf.mxu0 }
 0x78d   : > { %v6244_v42 = vadd.f32 %v6243_v49, %v6018_v0  ;;  %v6441_v49 = vand.u32 127, %v6440_v22 }
 0x78e   : > { %v6020_v55 = vpop.f32.mrf.mxu0 }
 0x78f   : > { %6399 = vperm.xlu1 %8136, %v6244_v42   ;;  %v6446_v0 = vadd.s32 4294967288, %v6441_v49 }
 0x790   : > { %v6023_v57 = vpop.f32.mrf.mxu0 }
 0x791   : > { %v6249_v28 = vadd.f32 %v7072_v21, %v6023_v57 }
 0x792   : > { %v6025_v29 = vpop.f32.mrf.mxu0 }
 0x793   : > { %6402 = vperm.xlu0 %8135, %v6249_v28  }
 0x795   : > { %v6028_v15 = vpop.f32.mrf.mxu0 }
 0x796   : > { %v6254_v1 = vadd.f32 %v6253_v45, %v6028_v15 }
 0x797   : > { %v6030_v17 = vpop.f32.mrf.mxu0 }
 0x798   : > { %6405 = vperm.xlu1 %8136, %v6254_v1  }
 0x799   : > { %v6033_v25 = vpop.f32.mrf.mxu0 }
 0x79a   : > { %v6259_v40 = vadd.f32 %v7075_v11, %v6033_v25  ;;  %v6443_v11 = vshrl.u32 %v6440_v22, 7 }
 0x79b   : > { %v6035_v26 = vpop.f32.mrf.mxu0 }
 0x79c   : > { %6408 = vperm.xlu0 %8135, %v6259_v40   ;;  %v11611_v57 = vsub.s32 %v6446_v0, %v6443_v11  ;;  %v11613_v45 = vsub.s32 %v6441_v49, %v6443_v11 }
 0x7a0   : > { %v6038_v24 = vpop.f32.mrf.mxu0 }
 0x7a1   : > { %v6264_v58 = vadd.f32 %v6263_v7, %v6038_v24 }
 0x7a2   : > { %v6040_v14 = vpop.f32.mrf.mxu0 }
 0x7a3   : > { %6411 = vperm.xlu1 %8136, %v6264_v58  }
 0x7a4   : > { %v6043_v59 = vpop.f32.mrf.mxu0 }
 0x7a5   : > { %v6269_v2 = vadd.f32 %v7078_v44, %v6043_v59 }
 0x7a6   : > { %v6045_v33 = vpop.f32.mrf.mxu0 }
 0x7a7   : > { %6414 = vperm.xlu0 %8135, %v6269_v2  }
 0x7a9   : > { %v6048_v52 = vpop.f32.mrf.mxu0 }
 0x7aa   : > { %v6274_v35 = vadd.f32 %v6273_v12, %v6048_v52 }
 0x7ab   : > { %v6050_v27 = vpop.f32.mrf.mxu0 }
 0x7ac   : > { %6417 = vperm.xlu1 %8136, %v6274_v35  }
 0x7ad   : > { %v6053_v54 = vpop.f32.mrf.mxu0 }
 0x7ae   : > { %v6279_v23 = vadd.f32 %v7081_v39, %v6053_v54 }
 0x7af   : > { %v6055_v19 = vpop.f32.mrf.mxu0  ;;  %v6346_v34 = vpop.permute.xlu0 %6345 }
 0x7b0   : > { %6420 = vperm.xlu0 %8135, %v6279_v23   ;;  %v6445_v58 = vrot.slane %v6346_v34, %v11613_v45 }
 0x7b3   : > { %v6349_v18 = vpop.permute.xlu1 %6348 }
 0x7b4   : > { %v6058_v32 = vpop.f32.mrf.mxu0  ;;  %v6450_v17 = vrot.slane %v6349_v18, %v11611_v57 }
 0x7b5   : > { %v6284_v37 = vadd.f32 %v6283_v60, %v6058_v32 }
 0x7b6   : > { %v6060_v31 = vpop.f32.mrf.mxu0  ;;  %v6452_v52 = vsel %vm6451_vm11, %v6450_v17, %v6445_v58 }
 0x7b7   : > { %6423 = vperm.xlu1 %8136, %v6284_v37  }
 0x7b8   : > { %v6063_v46 = vpop.f32.mrf.mxu0 }
 0x7b9   : > { %v6289_v48 = vadd.f32 %v7084_v13, %v6063_v46 }
 0x7ba   : > { %v6065_v47 = vpop.f32.mrf.mxu0  ;;  %v6352_v6 = vpop.permute.xlu1 %6351 }
 0x7bb   : > { %6426 = vperm.xlu0 %8135, %v6289_v48   ;;  %v6456_v25 = vrot.slane %v6352_v6, %v11613_v45 }
 0x7bd   : > { %v6068_v43 = vpop.f32.mrf.mxu0 }
 0x7be   : > { %v6294_v10 = vadd.f32 %v6293_v53, %v6068_v43  ;;  %v6355_v8 = vpop.permute.xlu0 %6354 }
 0x7bf   : > { %v6070_v4 = vpop.f32.mrf.mxu0  ;;  %v6460_v15 = vrot.slane %v6355_v8, %v11611_v57 }
 0x7c0   : > { %6429 = vperm.xlu1 %8136, %v6294_v10  }
 0x7c1   : > { %v6073_v36 = vpop.f32.mrf.mxu0  ;;  %v6461_v14 = vsel %vm6451_vm11, %v6460_v15, %v6456_v25 }
 0x7c2   : > { %v6299_v63 = vadd.f32 %v7087_v61, %v6073_v36  ;;  %v6589_v54 = vsel %vm6588_vm1, %v6461_v14, %v6452_v52 }
 0x7c3   : > { %v6075_v62 = vpop.f32.mrf.mxu0  ;;  %v6358_v41 = vpop.permute.xlu1 %6357 }
 0x7c4   : > { %6432 = vperm.xlu0 %8135, %v6299_v63   ;;  %v6465_v26 = vrot.slane %v6358_v41, %v11613_v45 }
 0x7c7   : > { %v6361_v9 = vpop.permute.xlu0 %6360 }
 0x7c8   : > { %v6078_v5 = vpop.f32.mrf.mxu0  ;;  %v6469_v1 = vrot.slane %v6361_v9, %v11611_v57 }
 0x7c9   : > { %v6304_v3 = vadd.f32 %v6303_v30, %v6078_v5 }
 0x7ca   : > { %v6080_v38 = vpop.f32.mrf.mxu0  ;;  %v6470_v2 = vsel %vm6451_vm11, %v6469_v1, %v6465_v26 }
 0x7cb   : > { %6435 = vperm.xlu1 %8136, %v6304_v3   ;;  %v6591_v60 = vsel %vm6590_vm3, %v6470_v2, %v6589_v54 }
 0x7cc   : > { %v6083_v51 = vpop.f32.mrf.mxu0 }
 0x7cd   : > { %v6309_v56 = vadd.f32 %v7090_v16, %v6083_v51 }
 0x7ce   : > { %v6085_v20 = vpop.f32.mrf.mxu0  ;;  %v6364_v50 = vpop.permute.xlu1 %6363 }
 0x7cf   : > { %6438 = vperm.xlu0 %8135, %v6309_v56   ;;  %v6474_v39 = vrot.slane %v6364_v50, %v11613_v45 }
 0x7d2   : > { %v6367_v21 = vpop.permute.xlu0 %6366 }
 0x7d3   : > { %v6478_v40 = vrot.slane %v6367_v21, %v11611_v57 }
 0x7d5   : > { %v6479_v35 = vsel %vm6451_vm11, %v6478_v40, %v6474_v39 }
 0x7d6   : > { %v6593_v37 = vsel %vm6592_vm7, %v6479_v35, %v6591_v60 }
 0x7d7   : > { %v6370_v55 = vpop.permute.xlu1 %6369 }
 0x7d8   : > { %v6483_v33 = vrot.slane %v6370_v55, %v11613_v45 }
 0x7db   : > { %v6373_v42 = vpop.permute.xlu0 %6372 }
 0x7dc   : > { %v6487_v7 = vrot.slane %v6373_v42, %v11611_v57 }
 0x7de   : > { %v6488_v23 = vsel %vm6451_vm11, %v6487_v7, %v6483_v33 }
 0x7df   : > { %v6595_v46 = vsel %vm6594_vm8, %v6488_v23, %v6593_v37 }
 0x7e2   : > { %v6376_v29 = vpop.permute.xlu1 %6375 }
 0x7e3   : > { %v6492_v27 = vrot.slane %v6376_v29, %v11613_v45 }
 0x7e6   : > { %v6379_v28 = vpop.permute.xlu0 %6378 }
 0x7e7   : > { %v6496_v59 = vrot.slane %v6379_v28, %v11611_v57 }
 0x7e9   : > { %v6497_v32 = vsel %vm6451_vm11, %v6496_v59, %v6492_v27 }
 0x7ea   : > { %v6597_v53 = vsel %vm6596_vm9, %v6497_v32, %v6595_v46 }
 0x7eb   : > { %v6382_v24 = vpop.permute.xlu1 %6381 }
 0x7ec   : > { %v6501_v13 = vrot.slane %v6382_v24, %v11613_v45 }
 0x7ef   : > { %v6385_v44 = vpop.permute.xlu0 %6384 }
 0x7f0   : > { %v6505_v12 = vrot.slane %v6385_v44, %v11611_v57 }
 0x7f2   : > { %v6506_v31 = vsel %vm6451_vm11, %v6505_v12, %v6501_v13 }
 0x7f3   : > { %v6599_v43 = vsel %vm6598_vm12, %v6506_v31, %v6597_v53 }
 0x7f6   : > { %v6388_v19 = vpop.permute.xlu1 %6387 }
 0x7f7   : > { %v6510_v48 = vrot.slane %v6388_v19, %v11613_v45 }
 0x7fa   : > { %v6391_v61 = vpop.permute.xlu0 %6390 }
 0x7fb   : > { %v6514_v47 = vrot.slane %v6391_v61, %v11611_v57 }
 0x7fd   : > { %v6515_v10 = vsel %vm6451_vm11, %v6514_v47, %v6510_v48 }
 0x7fe   : > { %v6601_v4 = vsel %vm6600_vm13, %v6515_v10, %v6599_v43 }
 0x7ff   : > { %6611 = vst.msk [vmem:[%s8443_s23] sm:$0xff] %vm1906_vm10, %v6601_v4  ;;  %v6394_v63 = vpop.permute.xlu1 %6393 }
 0x800   : > { %v6519_v0 = vrot.slane %v6394_v63, %v11613_v45 }
 0x803   : > { %v6397_v36 = vpop.permute.xlu0 %6396 }
 0x804   : > { %v6523_v6 = vrot.slane %v6397_v36, %v11611_v57 }
 0x806   : > { %v6524_v1 = vsel %vm6451_vm11, %v6523_v6, %v6519_v0 }
 0x80a   : > { %v6400_v62 = vpop.permute.xlu1 %6399 }
 0x80b   : > { %v6528_v9 = vrot.slane %v6400_v62, %v11613_v45 }
 0x80e   : > { %v6403_v16 = vpop.permute.xlu0 %6402 }
 0x80f   : > { %v6532_v18 = vrot.slane %v6403_v16, %v11611_v57 }
 0x811   : > { %v6533_v42 = vsel %vm6451_vm11, %v6532_v18, %v6528_v9 }
 0x812   : > { %v6602_v40 = vsel %vm6588_vm1, %v6533_v42, %v6524_v1 }
 0x813   : > { %v6406_v5 = vpop.permute.xlu1 %6405 }
 0x814   : > { %v6537_v21 = vrot.slane %v6406_v5, %v11613_v45 }
 0x817   : > { %v6409_v30 = vpop.permute.xlu0 %6408 }
 0x818   : > { %v6541_v8 = vrot.slane %v6409_v30, %v11611_v57 }
 0x81a   : > { %v6542_v28 = vsel %vm6451_vm11, %v6541_v8, %v6537_v21 }
 0x81b   : > { %v6603_v24 = vsel %vm6590_vm3, %v6542_v28, %v6602_v40 }
 0x81e   : > { %v6412_v38 = vpop.permute.xlu1 %6411 }
 0x81f   : > { %v6546_v55 = vrot.slane %v6412_v38, %v11613_v45 }
 0x822   : > { %v6415_v3 = vpop.permute.xlu0 %6414 }
 0x823   : > { %v6550_v41 = vrot.slane %v6415_v3, %v11611_v57 }
 0x825   : > { %v6551_v17 = vsel %vm6451_vm11, %v6550_v41, %v6546_v55 }
 0x826   : > { %v6604_v14 = vsel %vm6592_vm7, %v6551_v17, %v6603_v24 }
 0x827   : > { %v6418_v56 = vpop.permute.xlu1 %6417 }
 0x828   : > { %v6555_v29 = vrot.slane %v6418_v56, %v11613_v45 }
 0x82b   : > { %v6421_v51 = vpop.permute.xlu0 %6420 }
 0x82c   : > { %v6559_v50 = vrot.slane %v6421_v51, %v11611_v57 }
 0x82e   : > { %v6560_v44 = vsel %vm6451_vm11, %v6559_v50, %v6555_v29 }
 0x82f   : > { %v6605_v2 = vsel %vm6594_vm8, %v6560_v44, %v6604_v14 }
 0x832   : > { %v6424_v34 = vpop.permute.xlu1 %6423 }
 0x833   : > { %v6564_v25 = vrot.slane %v6424_v34, %v11613_v45 }
 0x836   : > { %v6427_v20 = vpop.permute.xlu0 %6426 }
 0x837   : > { %v6568_v11 = vrot.slane %v6427_v20, %v11611_v57 }
 0x839   : > { %v6569_v58 = vsel %vm6451_vm11, %v6568_v11, %v6564_v25 }
 0x83a   : > { %v6606_v52 = vsel %vm6596_vm9, %v6569_v58, %v6605_v2 }
 0x83b   : > { %v6430_v49 = vpop.permute.xlu1 %6429 }
 0x83c   : > { %v6573_v26 = vrot.slane %v6430_v49, %v11613_v45 }
 0x83f   : > { %v6433_v22 = vpop.permute.xlu0 %6432 }
 0x840   : > { %v6577_v15 = vrot.slane %v6433_v22, %v11611_v57 }
 0x842   : > { %v6578_v39 = vsel %vm6451_vm11, %v6577_v15, %v6573_v26 }
 0x843   : > { %v6607_v35 = vsel %vm6598_vm12, %v6578_v39, %v6606_v52 }
 0x846   : > { %v6436_v7 = vpop.permute.xlu1 %6435 }
 0x847   : > { %v6582_v33 = vrot.slane %v6436_v7, %v11613_v45 }
 0x84a   : > { %v6439_v59 = vpop.permute.xlu0 %6438 }
 0x84b   : > { %v6586_v12 = vrot.slane %v6439_v59, %v11611_v57 }
 0x84d   : > { %v6587_v27 = vsel %vm6451_vm11, %v6586_v12, %v6582_v33 }
 0x84e   : > { %v6608_v45 = vsel %vm6600_vm13, %v6587_v27, %v6607_v35 }
 0x84f   : > { %6612 = vst.msk [vmem:[%s8443_s23 + $0x8] sm:$0xff] %vm1906_vm10, %v6608_v45 }
 0x850   : > { %8165 = shalt.err (!%p8162_p7)
}
 0x851   : > { %s8166_s11 = scalar_lea.hbm %s11681_s12, 256  ;;  %s8170_s30 = scalar_lea.hbm %s11738_s5, 512 }
 0x852   : > { %p8167_p8 = scmp.ne.s32.totalorder %s11681_s12, %s8166_s11  ;;  %p8171_p10 = scmp.lt.s32.totalorder %s11681_s12, %s11738_s5 }
 0x853   : > { %p8172_p11 = scmp.lt.s32.totalorder %s8170_s30, %s8166_s11 }
 0x854   : > { %p8168_p12 = pnand %p8167_p8, %p8305_p5 }
 0x855   : > { %p8173_p13 = por %p8172_p11, %p8171_p10 }
 0x856   : > { %p8169_p9 = pneg %p8168_p12 }
 0x858   : > { %p8174_p0 = pnand %p8173_p13, %p8169_p9 }
 0x85a   : > { %8177 = shalt.err (!%p8174_p0)
}
 0x85b   : > { %s8236_s16 = smov 128  }
 0x85c   : > { %7095 = dma.vmem_to_hbm [thread:$0]  (%p8305_p5), %s11685_s17, 256, %s11681_s12, %s11692_s22, %s8236_s16, %s8236_s16, %s8223_s6  }
 0x85d PF: > { %p7107_p1 = scmp.ge.s32.totalorder %s8216_s21, 2  ;;  %s6642_s8 = sand.u32 1, %s8204_s18  }
 0x85e   : > { %s6643_s10 = scalar_lea.sflag [#allocation6], %s6642_s8 }
 0x85f   : > { %p7102_p2 = pnand %p7107_p1, %p8309_p6 }
 0x861   : > { %p7103_p3 = pneg %p7102_p2 }
 0x863   : > { %8199 = dma.done.wait (%p7103_p3), %s6643_s10, 256  }
 0x864   : > { %8201 = vsyncadd (%p7103_p3), %s6643_s10, 4294967040  ;;  %p16_p4 = scmp.ge.s32.totalorder %s8292_s24, 4   ;;  %s11891_s18 = smov %s8208_s19 }
 0x865   : > { %s11892_s19 = smov %s8212_s20  ;;  %s11893_s20 = smov %s8303_s27 }
 0x866   : > { %s11894_s21 = smov %s8292_s24  ;;  %18 = sbr.rel (!%p16_p4) target bundleno = 4 (0x4), region = 98 }
 0x86b   :  { %6648 = vsyncpa [#allocation6], 1 }
 0x86c   :  { %6650 = vsyncpa [#allocation6 + $0x1], 1 }
 0x86d   :  { %6651 = vsyncpa [#allocation7], 1 }
 0x86e   :  { %6653 = vsyncpa [#allocation7 + $0x1], 1 }

</bundles_post_ra>
